<compile_context>
chip_gen: v6e
topology: v6e:2x2x1
jax: 0.10.0
libtpu: 0.0.40
codegen_flags: <defaults>
</compile_context>

<pallas_src>
import functools

import jax
import jax.numpy as jnp
from jax.experimental import pallas as pl
from jax.experimental.pallas import tpu as pltpu

BN_EPS = 1e-5        # torch.nn.BatchNorm1d default
NORM_EPS = 1e-12     # torch.nn.functional.normalize default


# ---------------------------------------------------------------------------
# Kernel
# ---------------------------------------------------------------------------
def _vae_kernel(n_enc_hidden, dims_out, x_ref, alpha_ref, bias_ref, *refs):
    """Fused MLP stack (BN already folded into the linear weights).

    Args (refs):
      x_ref     : [tile, G]            f32 activations (batch tile)
      alpha_ref : [n_hidden]           f32 PReLU scalars (SMEM)
      bias_ref  : [n_layers, max_out]  f32 stacked (BN-folded) biases (VMEM)
      refs[:-1] : per-layer weight matrices Wt[in, out] (bf16, VMEM)
      refs[-1]  : [tile, G] output
    """
    w_refs = refs[:-1]
    out_ref = refs[-1]
    n_layers = len(w_refs)

    h = x_ref[...].astype(jnp.float32)
    hidden_idx = 0
    for l in range(n_layers):
        d = dims_out[l]
        b = bias_ref[l:l + 1, :d]                        # (1, d), broadcasts over rows
        # Native bf16 MXU feed (no f32 upcast of the weights); f32 accumulate.
        w = w_refs[l][...].astype(jnp.bfloat16)          # no-op for bf16 storage
        h = jnp.dot(h.astype(jnp.bfloat16), w,
                    preferred_element_type=jnp.float32) + b

        if l == n_enc_hidden:
            # encoder final linear -> F.normalize(p=2, dim=1)
            # x / max(||x||, eps) == x * rsqrt(max(sum x^2, eps^2))
            ssq = jnp.sum(h * h, axis=1, keepdims=True)
            h = h * jax.lax.rsqrt(jnp.maximum(ssq, NORM_EPS * NORM_EPS))
        elif l < n_layers - 1:
            # hidden layer: (folded BN) + PReLU, scalar alpha from SMEM
            a = alpha_ref[hidden_idx]
            h = jnp.where(h > 0, h, a * h)
            hidden_idx += 1
        # last layer (decoder final): plain linear, nothing else

    out_ref[...] = h.astype(out_ref.dtype)


# ---------------------------------------------------------------------------
# Wrapper
# ---------------------------------------------------------------------------
def vae_forward(genes, w_list, bias_stack, alpha_stack, n_enc_hidden, *,
                batch_tile=256, single_buffer_consts=True):
    N, G = genes.shape
    bt = min(batch_tile, N)
    assert N % bt == 0, "batch must be a multiple of batch_tile"
    grid = (N // bt,)
    dims_out = tuple(int(w.shape[1]) for w in w_list)

    def const_spec(shape):
        # Constant-index inputs: DMA'd once, so request single buffering.
        index_map = lambda i, _s=shape: tuple(0 for _ in _s)
        if single_buffer_consts:
            return pl.BlockSpec(shape, index_map, pipeline_mode=pl.Buffered(1))
        return pl.BlockSpec(shape, index_map)

    in_specs = [
        pl.BlockSpec((bt, G), lambda i: (i, 0)),                   # activations, tiled on batch
        pl.BlockSpec(memory_space=pltpu.MemorySpace.SMEM),         # PReLU scalars -> SMEM
        const_spec(bias_stack.shape),                              # stacked biases, resident
    ]
    in_specs += [const_spec(w.shape) for w in w_list]              # weights, resident

    out_spec = pl.BlockSpec((bt, G), lambda i: (i, 0))

    kernel = functools.partial(_vae_kernel, n_enc_hidden, dims_out)
    return pl.pallas_call(
        kernel,
        out_shape=jax.ShapeDtypeStruct((N, G), jnp.float32),
        grid_spec=pltpu.PrefetchScalarGridSpec(
            num_scalar_prefetch=0,
            grid=grid,
            in_specs=in_specs,
            out_specs=out_spec,
        ),
        compiler_params=pltpu.CompilerParams(
            dimension_semantics=("parallel",)),
    )(genes, alpha_stack, bias_stack, *w_list)


# ---------------------------------------------------------------------------
# Deterministic synthetic parameters (shapes from VAE.__init__) and folding
# ---------------------------------------------------------------------------
def build_raw_params(key, num_genes, latent_dim, hidden_dim):
    """Raw (PyTorch-style, eval-mode) parameters for encoder + decoder."""
    enc_dims = [num_genes] + list(hidden_dim) + [latent_dim]
    dec_dims = [latent_dim] + list(reversed(hidden_dim)) + [num_genes]
    layers = []

    def linear(key, din, dout):
        k1, k2 = jax.random.split(key)
        Wt = (0.05 * jax.random.normal(k1, (din, dout))).astype(jnp.float32)  # [in,out] = torch W.T
        b = (0.05 * jax.random.normal(k2, (dout,))).astype(jnp.float32)
        return Wt, b

    def add_stack(key, dims, alpha0):
        for i in range(len(dims) - 2):
            key, kl, k1, k2, k3, k4 = jax.random.split(key, 6)
            Wt, b = linear(kl, dims[i], dims[i + 1])
            d = dims[i + 1]
            gamma = (1.0 + 0.1 * jax.random.normal(k1, (d,))).astype(jnp.float32)
            beta = (0.1 * jax.random.normal(k2, (d,))).astype(jnp.float32)
            rmean = (0.1 * jax.random.normal(k3, (d,))).astype(jnp.float32)
            rvar = (1.0 + 0.1 * jnp.abs(jax.random.normal(k4, (d,)))).astype(jnp.float32)
            alpha = float(alpha0 + 0.03 * i)  # PReLU default is 0.25; vary per layer for testing
            layers.append(dict(kind="hidden", Wt=Wt, b=b, gamma=gamma, beta=beta,
                               rmean=rmean, rvar=rvar, alpha=alpha))
        key, kl = jax.random.split(key)
        Wt, b = linear(kl, dims[-2], dims[-1])
        layers.append(dict(kind="linear", Wt=Wt, b=b))
        return key

    key = add_stack(key, enc_dims, 0.25)   # encoder
    key = add_stack(key, dec_dims, 0.20)   # decoder
    return layers


def fold_and_pack(layers, weight_dtype=jnp.bfloat16):
    """Fold eval-mode BN into the linear, pack biases/alphas into single arrays."""
    w_list, biases, alphas, dims_out = [], [], [], []
    for lyr in layers:
        Wt, b = lyr["Wt"], lyr["b"]
        if lyr["kind"] == "hidden":
            scale = lyr["gamma"] * jax.lax.rsqrt(lyr["rvar"] + BN_EPS)        # [out]
            Wt = Wt * scale[None, :]
            b = (b - lyr["rmean"]) * scale + lyr["beta"]
            alphas.append(lyr["alpha"])
        w_list.append(Wt.astype(weight_dtype))
        biases.append(b.astype(jnp.float32))
        dims_out.append(int(Wt.shape[1]))

    max_out = max(dims_out)
    bias_stack = jnp.zeros((len(layers), max_out), jnp.float32)
    for l, b in enumerate(biases):
        bias_stack = bias_stack.at[l, : b.shape[0]].set(b)
    alpha_stack = jnp.asarray(alphas, jnp.float32)
    return w_list, bias_stack, alpha_stack


# ---------------------------------------------------------------------------
# Pure-JAX references
# ---------------------------------------------------------------------------
def reference_folded(x, w_list, bias_stack, alpha_stack, n_enc_hidden):
    """Same math the kernel does (BN folded, bf16 dot inputs), pure JAX."""
    h = x.astype(jnp.float32)
    hi = 0
    n_layers = len(w_list)
    for l in range(n_layers):
        d = int(w_list[l].shape[1])
        h = jnp.dot(h.astype(jnp.bfloat16), w_list[l].astype(jnp.bfloat16),
                    preferred_element_type=jnp.float32) + bias_stack[l, :d][None, :]
        if l == n_enc_hidden:
            nrm = jnp.sqrt(jnp.sum(h * h, axis=1, keepdims=True))
            h = h / jnp.maximum(nrm, NORM_EPS)
        elif l < n_layers - 1:
            h = jnp.where(h > 0, h, alpha_stack[hi] * h)
            hi += 1
    return h


def reference_raw(x, layers, n_enc_hidden):
    """Original eval-mode parameterization: Linear -> BN(running stats) -> PReLU."""
    h = x.astype(jnp.float32)
    for l, lyr in enumerate(layers):
        h = h @ lyr["Wt"] + lyr["b"][None, :]
        if lyr["kind"] == "hidden":
            inv = lyr["gamma"] / jnp.sqrt(lyr["rvar"] + BN_EPS)
            h = (h - lyr["rmean"]) * inv + lyr["beta"]
            h = jnp.where(h > 0, h, lyr["alpha"] * h)
        if l == n_enc_hidden:
            nrm = jnp.sqrt(jnp.sum(h * h, axis=1, keepdims=True))
            h = h / jnp.maximum(nrm, NORM_EPS)
    return h


# ---------------------------------------------------------------------------
if __name__ == "__main__":
    # Small, TPU-friendly shapes consistent with the module:
    N = 512           # batch (cells) -> 2 parallel grid steps of 256 rows
    NUM_GENES = 256   # num_genes
    LATENT = 64       # latent_dim
    HIDDEN = [128, 128, 128]

    key = jax.random.PRNGKey(0)
    k_x, k_p = jax.random.split(key)
    genes = jax.random.normal(k_x, (N, NUM_GENES), jnp.float32)

    layers = build_raw_params(k_p, NUM_GENES, LATENT, HIDDEN)
    n_enc_hidden = len(HIDDEN)

    # Fold BN into linears; weights stored in bf16, biases/activations in f32.
    w_list, bias_stack, alpha_stack = fold_and_pack(layers, weight_dtype=jnp.bfloat16)

    def run(single_buffer_consts):
        return jax.block_until_ready(
            vae_forward(genes, w_list, bias_stack, alpha_stack, n_enc_hidden,
                        batch_tile=256, single_buffer_consts=single_buffer_consts))

    try:
        out = run(True)
    except Exception:
        # Fallback if this jax build rejects Buffered(1) on the grid pipeline.
        out = run(False)
    assert out.shape == (N, NUM_GENES)

    # 1) Kernel vs pure-JAX reference computing the exact same folded math
    #    (same bf16 dot inputs) -- validates the Pallas kernel itself.
    ref_f = reference_folded(genes, w_list, bias_stack, alpha_stack, n_enc_hidden)
    assert jnp.allclose(out, ref_f, atol=1e-3, rtol=1e-3), "mismatch vs folded reference"

    # 2) Kernel vs the original eval-mode parameterization (unfused BN, f32
    #    weights/activations); residual error comes only from bf16 quantization
    #    of the weights and of the per-layer matmul activations.
    ref_r = reference_raw(genes, layers, n_enc_hidden)
    assert jnp.allclose(out, ref_r, atol=1e-2, rtol=5e-2), "mismatch vs eval-mode reference"

    print("KERNEL_OK")
</pallas_src>

<mosaic_0001>
module attributes {stable_mosaic.version = 11 : i64} {
  func.func @_vae_kernel(%arg0: i32, %arg1: memref<256x256xf32, #tpu.memory_space<vmem>>, %arg2: memref<6xf32, #tpu.memory_space<smem>>, %arg3: memref<8x256xf32, #tpu.memory_space<vmem>>, %arg4: memref<256x128xbf16, #tpu.memory_space<vmem>>, %arg5: memref<128x128xbf16, #tpu.memory_space<vmem>>, %arg6: memref<128x128xbf16, #tpu.memory_space<vmem>>, %arg7: memref<128x64xbf16, #tpu.memory_space<vmem>>, %arg8: memref<64x128xbf16, #tpu.memory_space<vmem>>, %arg9: memref<128x128xbf16, #tpu.memory_space<vmem>>, %arg10: memref<128x128xbf16, #tpu.memory_space<vmem>>, %arg11: memref<128x256xbf16, #tpu.memory_space<vmem>>, %arg12: memref<256x256xf32, #tpu.memory_space<vmem>>) attributes {dimension_semantics = [#tpu.dimension_semantics<parallel>], iteration_bounds = array<i64: 2>, scalar_prefetch = 0 : i64, scratch_operands = 0 : i64, tpu.core_type = #tpu.core_type<tc>, window_params = [{transform_indices = @transform_0, window_bounds = array<i64: 256, 256>}, {transform_indices = @transform_1, window_bounds = array<i64: 6>}, {pipeline_mode = #tpu.pipeline_mode<synchronous>, transform_indices = @transform_2, window_bounds = array<i64: 8, 256>}, {pipeline_mode = #tpu.pipeline_mode<synchronous>, transform_indices = @transform_3, window_bounds = array<i64: 256, 128>}, {pipeline_mode = #tpu.pipeline_mode<synchronous>, transform_indices = @transform_4, window_bounds = array<i64: 128, 128>}, {pipeline_mode = #tpu.pipeline_mode<synchronous>, transform_indices = @transform_5, window_bounds = array<i64: 128, 128>}, {pipeline_mode = #tpu.pipeline_mode<synchronous>, transform_indices = @transform_6, window_bounds = array<i64: 128, 64>}, {pipeline_mode = #tpu.pipeline_mode<synchronous>, transform_indices = @transform_7, window_bounds = array<i64: 64, 128>}, {pipeline_mode = #tpu.pipeline_mode<synchronous>, transform_indices = @transform_8, window_bounds = array<i64: 128, 128>}, {pipeline_mode = #tpu.pipeline_mode<synchronous>, transform_indices = @transform_9, window_bounds = array<i64: 128, 128>}, {pipeline_mode = #tpu.pipeline_mode<synchronous>, transform_indices = @transform_10, window_bounds = array<i64: 128, 256>}, {transform_indices = @transform_11, window_bounds = array<i64: 256, 256>}]} {
    %c0 = arith.constant 0 : index
    %c0_0 = arith.constant 0 : index
    %0 = vector.load %arg1[%c0, %c0_0] : memref<256x256xf32, #tpu.memory_space<vmem>>, vector<256x256xf32>
    %c0_1 = arith.constant 0 : index
    %c0_2 = arith.constant 0 : index
    %1 = vector.load %arg3[%c0_1, %c0_2] : memref<8x256xf32, #tpu.memory_space<vmem>>, vector<1x128xf32>
    %c0_3 = arith.constant 0 : index
    %c0_4 = arith.constant 0 : index
    %2 = vector.load %arg4[%c0_3, %c0_4] : memref<256x128xbf16, #tpu.memory_space<vmem>>, vector<256x128xbf16>
    %3 = arith.truncf %0 : vector<256x256xf32> to vector<256x256xbf16>
    %cst = arith.constant dense<0.000000e+00> : vector<256x128xf32>
    %4 = tpu.matmul %3, %2, %cst {dimension_numbers = #tpu.dot_dimension_numbers<[1], [0], [0], [1], [0, 0, 1, 1], [], []>} : vector<256x256xbf16>, vector<256x128xbf16>, vector<256x128xf32> -> vector<256x128xf32>
    %5 = vector.broadcast %1 : vector<1x128xf32> to vector<256x128xf32>
    %6 = arith.addf %4, %5 : vector<256x128xf32>
    %c0_5 = arith.constant 0 : index
    %7 = memref.load %arg2[%c0_5] : memref<6xf32, #tpu.memory_space<smem>>
    %cst_6 = arith.constant 0.000000e+00 : f32
    %8 = vector.broadcast %cst_6 : f32 to vector<256x128xf32>
    %9 = arith.cmpf ogt, %6, %8 : vector<256x128xf32>
    %10 = vector.broadcast %7 : f32 to vector<256x128xf32>
    %11 = arith.mulf %10, %6 : vector<256x128xf32>
    %12 = arith.select %9, %6, %11 : vector<256x128xi1>, vector<256x128xf32>
    %c1 = arith.constant 1 : index
    %c0_7 = arith.constant 0 : index
    %13 = vector.load %arg3[%c1, %c0_7] : memref<8x256xf32, #tpu.memory_space<vmem>>, vector<1x128xf32>
    %c0_8 = arith.constant 0 : index
    %c0_9 = arith.constant 0 : index
    %14 = vector.load %arg5[%c0_8, %c0_9] : memref<128x128xbf16, #tpu.memory_space<vmem>>, vector<128x128xbf16>
    %15 = arith.truncf %12 : vector<256x128xf32> to vector<256x128xbf16>
    %cst_10 = arith.constant dense<0.000000e+00> : vector<256x128xf32>
    %16 = tpu.matmul %15, %14, %cst_10 {dimension_numbers = #tpu.dot_dimension_numbers<[1], [0], [0], [1], [0, 0, 1, 1], [], []>} : vector<256x128xbf16>, vector<128x128xbf16>, vector<256x128xf32> -> vector<256x128xf32>
    %17 = vector.broadcast %13 : vector<1x128xf32> to vector<256x128xf32>
    %18 = arith.addf %16, %17 : vector<256x128xf32>
    %c1_11 = arith.constant 1 : index
    %19 = memref.load %arg2[%c1_11] : memref<6xf32, #tpu.memory_space<smem>>
    %cst_12 = arith.constant 0.000000e+00 : f32
    %20 = vector.broadcast %cst_12 : f32 to vector<256x128xf32>
    %21 = arith.cmpf ogt, %18, %20 : vector<256x128xf32>
    %22 = vector.broadcast %19 : f32 to vector<256x128xf32>
    %23 = arith.mulf %22, %18 : vector<256x128xf32>
    %24 = arith.select %21, %18, %23 : vector<256x128xi1>, vector<256x128xf32>
    %c2 = arith.constant 2 : index
    %c0_13 = arith.constant 0 : index
    %25 = vector.load %arg3[%c2, %c0_13] : memref<8x256xf32, #tpu.memory_space<vmem>>, vector<1x128xf32>
    %c0_14 = arith.constant 0 : index
    %c0_15 = arith.constant 0 : index
    %26 = vector.load %arg6[%c0_14, %c0_15] : memref<128x128xbf16, #tpu.memory_space<vmem>>, vector<128x128xbf16>
    %27 = arith.truncf %24 : vector<256x128xf32> to vector<256x128xbf16>
    %cst_16 = arith.constant dense<0.000000e+00> : vector<256x128xf32>
    %28 = tpu.matmul %27, %26, %cst_16 {dimension_numbers = #tpu.dot_dimension_numbers<[1], [0], [0], [1], [0, 0, 1, 1], [], []>} : vector<256x128xbf16>, vector<128x128xbf16>, vector<256x128xf32> -> vector<256x128xf32>
    %29 = vector.broadcast %25 : vector<1x128xf32> to vector<256x128xf32>
    %30 = arith.addf %28, %29 : vector<256x128xf32>
    %c2_17 = arith.constant 2 : index
    %31 = memref.load %arg2[%c2_17] : memref<6xf32, #tpu.memory_space<smem>>
    %cst_18 = arith.constant 0.000000e+00 : f32
    %32 = vector.broadcast %cst_18 : f32 to vector<256x128xf32>
    %33 = arith.cmpf ogt, %30, %32 : vector<256x128xf32>
    %34 = vector.broadcast %31 : f32 to vector<256x128xf32>
    %35 = arith.mulf %34, %30 : vector<256x128xf32>
    %36 = arith.select %33, %30, %35 : vector<256x128xi1>, vector<256x128xf32>
    %c3 = arith.constant 3 : index
    %c0_19 = arith.constant 0 : index
    %37 = vector.load %arg3[%c3, %c0_19] : memref<8x256xf32, #tpu.memory_space<vmem>>, vector<1x64xf32>
    %c0_20 = arith.constant 0 : index
    %c0_21 = arith.constant 0 : index
    %38 = vector.load %arg7[%c0_20, %c0_21] : memref<128x64xbf16, #tpu.memory_space<vmem>>, vector<128x64xbf16>
    %39 = arith.truncf %36 : vector<256x128xf32> to vector<256x128xbf16>
    %cst_22 = arith.constant dense<0.000000e+00> : vector<256x64xf32>
    %40 = tpu.matmul %39, %38, %cst_22 {dimension_numbers = #tpu.dot_dimension_numbers<[1], [0], [0], [1], [0, 0, 1, 1], [], []>} : vector<256x128xbf16>, vector<128x64xbf16>, vector<256x64xf32> -> vector<256x64xf32>
    %41 = vector.broadcast %37 : vector<1x64xf32> to vector<256x64xf32>
    %42 = arith.addf %40, %41 : vector<256x64xf32>
    %43 = arith.mulf %42, %42 : vector<256x64xf32>
    %cst_23 = arith.constant dense<0.000000e+00> : vector<256xf32>
    %44 = vector.multi_reduction <add>, %43, %cst_23 [1] : vector<256x64xf32> to vector<256xf32>
    %45 = vector.shape_cast %44 : vector<256xf32> to vector<256x1xf32>
    %cst_24 = arith.constant 1.000000e-24 : f32
    %46 = vector.broadcast %cst_24 : f32 to vector<256x1xf32>
    %47 = arith.maximumf %45, %46 : vector<256x1xf32>
    %48 = math.rsqrt %47 : vector<256x1xf32>
    %49 = vector.broadcast %48 : vector<256x1xf32> to vector<256x64xf32>
    %50 = arith.mulf %42, %49 : vector<256x64xf32>
    %c4 = arith.constant 4 : index
    %c0_25 = arith.constant 0 : index
    %51 = vector.load %arg3[%c4, %c0_25] : memref<8x256xf32, #tpu.memory_space<vmem>>, vector<1x128xf32>
    %c0_26 = arith.constant 0 : index
    %c0_27 = arith.constant 0 : index
    %52 = vector.load %arg8[%c0_26, %c0_27] : memref<64x128xbf16, #tpu.memory_space<vmem>>, vector<64x128xbf16>
    %53 = arith.truncf %50 : vector<256x64xf32> to vector<256x64xbf16>
    %cst_28 = arith.constant dense<0.000000e+00> : vector<256x128xf32>
    %54 = tpu.matmul %53, %52, %cst_28 {dimension_numbers = #tpu.dot_dimension_numbers<[1], [0], [0], [1], [0, 0, 1, 1], [], []>} : vector<256x64xbf16>, vector<64x128xbf16>, vector<256x128xf32> -> vector<256x128xf32>
    %55 = vector.broadcast %51 : vector<1x128xf32> to vector<256x128xf32>
    %56 = arith.addf %54, %55 : vector<256x128xf32>
    %c3_29 = arith.constant 3 : index
    %57 = memref.load %arg2[%c3_29] : memref<6xf32, #tpu.memory_space<smem>>
    %cst_30 = arith.constant 0.000000e+00 : f32
    %58 = vector.broadcast %cst_30 : f32 to vector<256x128xf32>
    %59 = arith.cmpf ogt, %56, %58 : vector<256x128xf32>
    %60 = vector.broadcast %57 : f32 to vector<256x128xf32>
    %61 = arith.mulf %60, %56 : vector<256x128xf32>
    %62 = arith.select %59, %56, %61 : vector<256x128xi1>, vector<256x128xf32>
    %c5 = arith.constant 5 : index
    %c0_31 = arith.constant 0 : index
    %63 = vector.load %arg3[%c5, %c0_31] : memref<8x256xf32, #tpu.memory_space<vmem>>, vector<1x128xf32>
    %c0_32 = arith.constant 0 : index
    %c0_33 = arith.constant 0 : index
    %64 = vector.load %arg9[%c0_32, %c0_33] : memref<128x128xbf16, #tpu.memory_space<vmem>>, vector<128x128xbf16>
    %65 = arith.truncf %62 : vector<256x128xf32> to vector<256x128xbf16>
    %cst_34 = arith.constant dense<0.000000e+00> : vector<256x128xf32>
    %66 = tpu.matmul %65, %64, %cst_34 {dimension_numbers = #tpu.dot_dimension_numbers<[1], [0], [0], [1], [0, 0, 1, 1], [], []>} : vector<256x128xbf16>, vector<128x128xbf16>, vector<256x128xf32> -> vector<256x128xf32>
    %67 = vector.broadcast %63 : vector<1x128xf32> to vector<256x128xf32>
    %68 = arith.addf %66, %67 : vector<256x128xf32>
    %c4_35 = arith.constant 4 : index
    %69 = memref.load %arg2[%c4_35] : memref<6xf32, #tpu.memory_space<smem>>
    %cst_36 = arith.constant 0.000000e+00 : f32
    %70 = vector.broadcast %cst_36 : f32 to vector<256x128xf32>
    %71 = arith.cmpf ogt, %68, %70 : vector<256x128xf32>
    %72 = vector.broadcast %69 : f32 to vector<256x128xf32>
    %73 = arith.mulf %72, %68 : vector<256x128xf32>
    %74 = arith.select %71, %68, %73 : vector<256x128xi1>, vector<256x128xf32>
    %c6 = arith.constant 6 : index
    %c0_37 = arith.constant 0 : index
    %75 = vector.load %arg3[%c6, %c0_37] : memref<8x256xf32, #tpu.memory_space<vmem>>, vector<1x128xf32>
    %c0_38 = arith.constant 0 : index
    %c0_39 = arith.constant 0 : index
    %76 = vector.load %arg10[%c0_38, %c0_39] : memref<128x128xbf16, #tpu.memory_space<vmem>>, vector<128x128xbf16>
    %77 = arith.truncf %74 : vector<256x128xf32> to vector<256x128xbf16>
    %cst_40 = arith.constant dense<0.000000e+00> : vector<256x128xf32>
    %78 = tpu.matmul %77, %76, %cst_40 {dimension_numbers = #tpu.dot_dimension_numbers<[1], [0], [0], [1], [0, 0, 1, 1], [], []>} : vector<256x128xbf16>, vector<128x128xbf16>, vector<256x128xf32> -> vector<256x128xf32>
    %79 = vector.broadcast %75 : vector<1x128xf32> to vector<256x128xf32>
    %80 = arith.addf %78, %79 : vector<256x128xf32>
    %c5_41 = arith.constant 5 : index
    %81 = memref.load %arg2[%c5_41] : memref<6xf32, #tpu.memory_space<smem>>
    %cst_42 = arith.constant 0.000000e+00 : f32
    %82 = vector.broadcast %cst_42 : f32 to vector<256x128xf32>
    %83 = arith.cmpf ogt, %80, %82 : vector<256x128xf32>
    %84 = vector.broadcast %81 : f32 to vector<256x128xf32>
    %85 = arith.mulf %84, %80 : vector<256x128xf32>
    %86 = arith.select %83, %80, %85 : vector<256x128xi1>, vector<256x128xf32>
    %c7 = arith.constant 7 : index
    %c0_43 = arith.constant 0 : index
    %87 = vector.load %arg3[%c7, %c0_43] : memref<8x256xf32, #tpu.memory_space<vmem>>, vector<1x256xf32>
    %c0_44 = arith.constant 0 : index
    %c0_45 = arith.constant 0 : index
    %88 = vector.load %arg11[%c0_44, %c0_45] : memref<128x256xbf16, #tpu.memory_space<vmem>>, vector<128x256xbf16>
    %89 = arith.truncf %86 : vector<256x128xf32> to vector<256x128xbf16>
    %cst_46 = arith.constant dense<0.000000e+00> : vector<256x256xf32>
    %90 = tpu.matmul %89, %88, %cst_46 {dimension_numbers = #tpu.dot_dimension_numbers<[1], [0], [0], [1], [0, 0, 1, 1], [], []>} : vector<256x128xbf16>, vector<128x256xbf16>, vector<256x256xf32> -> vector<256x256xf32>
    %91 = vector.broadcast %87 : vector<1x256xf32> to vector<256x256xf32>
    %92 = arith.addf %90, %91 : vector<256x256xf32>
    %c0_47 = arith.constant 0 : index
    %c0_48 = arith.constant 0 : index
    %93 = vector.load %arg12[%c0_47, %c0_48] : memref<256x256xf32, #tpu.memory_space<vmem>>, vector<256x256xf32>
    tpu.vector_store %arg12[%c0_47, %c0_48], %92 {strides = array<i32>} : memref<256x256xf32, #tpu.memory_space<vmem>>, vector<256x256xf32>,
    return
  }
  func.func @transform_0(%arg0: i32) -> (i32, i32) {
    %c0_i32 = arith.constant 0 : i32
    %c0_i32_0 = arith.constant 0 : i32
    return %arg0, %c0_i32 : i32, i32
  }
  func.func @transform_1(%arg0: i32) -> i32 {
    %c0_i32 = arith.constant 0 : i32
    %c0_i32_0 = arith.constant 0 : i32
    return %c0_i32 : i32
  }
  func.func @transform_2(%arg0: i32) -> (i32, i32) {
    %c0_i32 = arith.constant 0 : i32
    %c0_i32_0 = arith.constant 0 : i32
    %c0_i32_1 = arith.constant 0 : i32
    return %c0_i32, %c0_i32_0 : i32, i32
  }
  func.func @transform_3(%arg0: i32) -> (i32, i32) {
    %c0_i32 = arith.constant 0 : i32
    %c0_i32_0 = arith.constant 0 : i32
    %c0_i32_1 = arith.constant 0 : i32
    return %c0_i32, %c0_i32_0 : i32, i32
  }
  func.func @transform_4(%arg0: i32) -> (i32, i32) {
    %c0_i32 = arith.constant 0 : i32
    %c0_i32_0 = arith.constant 0 : i32
    %c0_i32_1 = arith.constant 0 : i32
    return %c0_i32, %c0_i32_0 : i32, i32
  }
  func.func @transform_5(%arg0: i32) -> (i32, i32) {
    %c0_i32 = arith.constant 0 : i32
    %c0_i32_0 = arith.constant 0 : i32
    %c0_i32_1 = arith.constant 0 : i32
    return %c0_i32, %c0_i32_0 : i32, i32
  }
  func.func @transform_6(%arg0: i32) -> (i32, i32) {
    %c0_i32 = arith.constant 0 : i32
    %c0_i32_0 = arith.constant 0 : i32
    %c0_i32_1 = arith.constant 0 : i32
    return %c0_i32, %c0_i32_0 : i32, i32
  }
  func.func @transform_7(%arg0: i32) -> (i32, i32) {
    %c0_i32 = arith.constant 0 : i32
    %c0_i32_0 = arith.constant 0 : i32
    %c0_i32_1 = arith.constant 0 : i32
    return %c0_i32, %c0_i32_0 : i32, i32
  }
  func.func @transform_8(%arg0: i32) -> (i32, i32) {
    %c0_i32 = arith.constant 0 : i32
    %c0_i32_0 = arith.constant 0 : i32
    %c0_i32_1 = arith.constant 0 : i32
    return %c0_i32, %c0_i32_0 : i32, i32
  }
  func.func @transform_9(%arg0: i32) -> (i32, i32) {
    %c0_i32 = arith.constant 0 : i32
    %c0_i32_0 = arith.constant 0 : i32
    %c0_i32_1 = arith.constant 0 : i32
    return %c0_i32, %c0_i32_0 : i32, i32
  }
  func.func @transform_10(%arg0: i32) -> (i32, i32) {
    %c0_i32 = arith.constant 0 : i32
    %c0_i32_0 = arith.constant 0 : i32
    %c0_i32_1 = arith.constant 0 : i32
    return %c0_i32, %c0_i32_0 : i32, i32
  }
  func.func @transform_11(%arg0: i32) -> (i32, i32) {
    %c0_i32 = arith.constant 0 : i32
    %c0_i32_0 = arith.constant 0 : i32
    return %arg0, %c0_i32 : i32, i32
  }
}

module attributes {stable_mosaic.version = 11 : i64} {
  func.func @_vae_kernel(%arg0: i32, %arg1: memref<256x256xf32, #tpu.memory_space<vmem>>, %arg2: memref<6xf32, #tpu.memory_space<smem>>, %arg3: memref<8x256xf32, #tpu.memory_space<vmem>>, %arg4: memref<256x128xbf16, #tpu.memory_space<vmem>>, %arg5: memref<128x128xbf16, #tpu.memory_space<vmem>>, %arg6: memref<128x128xbf16, #tpu.memory_space<vmem>>, %arg7: memref<128x64xbf16, #tpu.memory_space<vmem>>, %arg8: memref<64x128xbf16, #tpu.memory_space<vmem>>, %arg9: memref<128x128xbf16, #tpu.memory_space<vmem>>, %arg10: memref<128x128xbf16, #tpu.memory_space<vmem>>, %arg11: memref<128x256xbf16, #tpu.memory_space<vmem>>, %arg12: memref<256x256xf32, #tpu.memory_space<vmem>>) attributes {dimension_semantics = [#tpu.dimension_semantics<parallel>], iteration_bounds = array<i64: 2>, scalar_prefetch = 0 : i64, scratch_operands = 0 : i64, tpu.core_type = #tpu.core_type<tc>, window_params = [{transform_indices = @transform_0, window_bounds = array<i64: 256, 256>}, {transform_indices = @transform_1, window_bounds = array<i64: 6>}, {pipeline_mode = #tpu.pipeline_mode<synchronous>, transform_indices = @transform_2, window_bounds = array<i64: 8, 256>}, {pipeline_mode = #tpu.pipeline_mode<synchronous>, transform_indices = @transform_3, window_bounds = array<i64: 256, 128>}, {pipeline_mode = #tpu.pipeline_mode<synchronous>, transform_indices = @transform_4, window_bounds = array<i64: 128, 128>}, {pipeline_mode = #tpu.pipeline_mode<synchronous>, transform_indices = @transform_5, window_bounds = array<i64: 128, 128>}, {pipeline_mode = #tpu.pipeline_mode<synchronous>, transform_indices = @transform_6, window_bounds = array<i64: 128, 64>}, {pipeline_mode = #tpu.pipeline_mode<synchronous>, transform_indices = @transform_7, window_bounds = array<i64: 64, 128>}, {pipeline_mode = #tpu.pipeline_mode<synchronous>, transform_indices = @transform_8, window_bounds = array<i64: 128, 128>}, {pipeline_mode = #tpu.pipeline_mode<synchronous>, transform_indices = @transform_9, window_bounds = array<i64: 128, 128>}, {pipeline_mode = #tpu.pipeline_mode<synchronous>, transform_indices = @transform_10, window_bounds = array<i64: 128, 256>}, {transform_indices = @transform_11, window_bounds = array<i64: 256, 256>}]} {
    %c0 = arith.constant 0 : index
    %c0_0 = arith.constant 0 : index
    %0 = vector.load %arg1[%c0, %c0_0] : memref<256x256xf32, #tpu.memory_space<vmem>>, vector<256x256xf32>
    %c0_1 = arith.constant 0 : index
    %c0_2 = arith.constant 0 : index
    %1 = vector.load %arg3[%c0_1, %c0_2] : memref<8x256xf32, #tpu.memory_space<vmem>>, vector<1x128xf32>
    %c0_3 = arith.constant 0 : index
    %c0_4 = arith.constant 0 : index
    %2 = vector.load %arg4[%c0_3, %c0_4] : memref<256x128xbf16, #tpu.memory_space<vmem>>, vector<256x128xbf16>
    %3 = arith.truncf %0 : vector<256x256xf32> to vector<256x256xbf16>
    %cst = arith.constant dense<0.000000e+00> : vector<256x128xf32>
    %4 = tpu.matmul %3, %2, %cst {dimension_numbers = #tpu.dot_dimension_numbers<[1], [0], [0], [1], [0, 0, 1, 1], [], []>} : vector<256x256xbf16>, vector<256x128xbf16>, vector<256x128xf32> -> vector<256x128xf32>
    %5 = vector.broadcast %1 : vector<1x128xf32> to vector<256x128xf32>
    %6 = arith.addf %4, %5 : vector<256x128xf32>
    %c0_5 = arith.constant 0 : index
    %7 = memref.load %arg2[%c0_5] : memref<6xf32, #tpu.memory_space<smem>>
    %cst_6 = arith.constant 0.000000e+00 : f32
    %8 = vector.broadcast %cst_6 : f32 to vector<256x128xf32>
    %9 = arith.cmpf ogt, %6, %8 : vector<256x128xf32>
    %10 = vector.broadcast %7 : f32 to vector<256x128xf32>
    %11 = arith.mulf %10, %6 : vector<256x128xf32>
    %12 = arith.select %9, %6, %11 : vector<256x128xi1>, vector<256x128xf32>
    %c1 = arith.constant 1 : index
    %c0_7 = arith.constant 0 : index
    %13 = vector.load %arg3[%c1, %c0_7] : memref<8x256xf32, #tpu.memory_space<vmem>>, vector<1x128xf32>
    %c0_8 = arith.constant 0 : index
    %c0_9 = arith.constant 0 : index
    %14 = vector.load %arg5[%c0_8, %c0_9] : memref<128x128xbf16, #tpu.memory_space<vmem>>, vector<128x128xbf16>
    %15 = arith.truncf %12 : vector<256x128xf32> to vector<256x128xbf16>
    %cst_10 = arith.constant dense<0.000000e+00> : vector<256x128xf32>
    %16 = tpu.matmul %15, %14, %cst_10 {dimension_numbers = #tpu.dot_dimension_numbers<[1], [0], [0], [1], [0, 0, 1, 1], [], []>} : vector<256x128xbf16>, vector<128x128xbf16>, vector<256x128xf32> -> vector<256x128xf32>
    %17 = vector.broadcast %13 : vector<1x128xf32> to vector<256x128xf32>
    %18 = arith.addf %16, %17 : vector<256x128xf32>
    %c1_11 = arith.constant 1 : index
    %19 = memref.load %arg2[%c1_11] : memref<6xf32, #tpu.memory_space<smem>>
    %cst_12 = arith.constant 0.000000e+00 : f32
    %20 = vector.broadcast %cst_12 : f32 to vector<256x128xf32>
    %21 = arith.cmpf ogt, %18, %20 : vector<256x128xf32>
    %22 = vector.broadcast %19 : f32 to vector<256x128xf32>
    %23 = arith.mulf %22, %18 : vector<256x128xf32>
    %24 = arith.select %21, %18, %23 : vector<256x128xi1>, vector<256x128xf32>
    %c2 = arith.constant 2 : index
    %c0_13 = arith.constant 0 : index
    %25 = vector.load %arg3[%c2, %c0_13] : memref<8x256xf32, #tpu.memory_space<vmem>>, vector<1x128xf32>
    %c0_14 = arith.constant 0 : index
    %c0_15 = arith.constant 0 : index
    %26 = vector.load %arg6[%c0_14, %c0_15] : memref<128x128xbf16, #tpu.memory_space<vmem>>, vector<128x128xbf16>
    %27 = arith.truncf %24 : vector<256x128xf32> to vector<256x128xbf16>
    %cst_16 = arith.constant dense<0.000000e+00> : vector<256x128xf32>
    %28 = tpu.matmul %27, %26, %cst_16 {dimension_numbers = #tpu.dot_dimension_numbers<[1], [0], [0], [1], [0, 0, 1, 1], [], []>} : vector<256x128xbf16>, vector<128x128xbf16>, vector<256x128xf32> -> vector<256x128xf32>
    %29 = vector.broadcast %25 : vector<1x128xf32> to vector<256x128xf32>
    %30 = arith.addf %28, %29 : vector<256x128xf32>
    %c2_17 = arith.constant 2 : index
    %31 = memref.load %arg2[%c2_17] : memref<6xf32, #tpu.memory_space<smem>>
    %cst_18 = arith.constant 0.000000e+00 : f32
    %32 = vector.broadcast %cst_18 : f32 to vector<256x128xf32>
    %33 = arith.cmpf ogt, %30, %32 : vector<256x128xf32>
    %34 = vector.broadcast %31 : f32 to vector<256x128xf32>
    %35 = arith.mulf %34, %30 : vector<256x128xf32>
    %36 = arith.select %33, %30, %35 : vector<256x128xi1>, vector<256x128xf32>
    %c3 = arith.constant 3 : index
    %c0_19 = arith.constant 0 : index
    %37 = vector.load %arg3[%c3, %c0_19] : memref<8x256xf32, #tpu.memory_space<vmem>>, vector<1x64xf32>
    %c0_20 = arith.constant 0 : index
    %c0_21 = arith.constant 0 : index
    %38 = vector.load %arg7[%c0_20, %c0_21] : memref<128x64xbf16, #tpu.memory_space<vmem>>, vector<128x64xbf16>
    %39 = arith.truncf %36 : vector<256x128xf32> to vector<256x128xbf16>
    %cst_22 = arith.constant dense<0.000000e+00> : vector<256x64xf32>
    %40 = tpu.matmul %39, %38, %cst_22 {dimension_numbers = #tpu.dot_dimension_numbers<[1], [0], [0], [1], [0, 0, 1, 1], [], []>} : vector<256x128xbf16>, vector<128x64xbf16>, vector<256x64xf32> -> vector<256x64xf32>
    %41 = vector.broadcast %37 : vector<1x64xf32> to vector<256x64xf32>
    %42 = arith.addf %40, %41 : vector<256x64xf32>
    %43 = arith.mulf %42, %42 : vector<256x64xf32>
    %cst_23 = arith.constant dense<0.000000e+00> : vector<256xf32>
    %44 = vector.multi_reduction <add>, %43, %cst_23 [1] : vector<256x64xf32> to vector<256xf32>
    %45 = vector.shape_cast %44 : vector<256xf32> to vector<256x1xf32>
    %cst_24 = arith.constant 1.000000e-24 : f32
    %46 = vector.broadcast %cst_24 : f32 to vector<256x1xf32>
    %47 = arith.maximumf %45, %46 : vector<256x1xf32>
    %48 = math.rsqrt %47 : vector<256x1xf32>
    %49 = vector.broadcast %48 : vector<256x1xf32> to vector<256x64xf32>
    %50 = arith.mulf %42, %49 : vector<256x64xf32>
    %c4 = arith.constant 4 : index
    %c0_25 = arith.constant 0 : index
    %51 = vector.load %arg3[%c4, %c0_25] : memref<8x256xf32, #tpu.memory_space<vmem>>, vector<1x128xf32>
    %c0_26 = arith.constant 0 : index
    %c0_27 = arith.constant 0 : index
    %52 = vector.load %arg8[%c0_26, %c0_27] : memref<64x128xbf16, #tpu.memory_space<vmem>>, vector<64x128xbf16>
    %53 = arith.truncf %50 : vector<256x64xf32> to vector<256x64xbf16>
    %cst_28 = arith.constant dense<0.000000e+00> : vector<256x128xf32>
    %54 = tpu.matmul %53, %52, %cst_28 {dimension_numbers = #tpu.dot_dimension_numbers<[1], [0], [0], [1], [0, 0, 1, 1], [], []>} : vector<256x64xbf16>, vector<64x128xbf16>, vector<256x128xf32> -> vector<256x128xf32>
    %55 = vector.broadcast %51 : vector<1x128xf32> to vector<256x128xf32>
    %56 = arith.addf %54, %55 : vector<256x128xf32>
    %c3_29 = arith.constant 3 : index
    %57 = memref.load %arg2[%c3_29] : memref<6xf32, #tpu.memory_space<smem>>
    %cst_30 = arith.constant 0.000000e+00 : f32
    %58 = vector.broadcast %cst_30 : f32 to vector<256x128xf32>
    %59 = arith.cmpf ogt, %56, %58 : vector<256x128xf32>
    %60 = vector.broadcast %57 : f32 to vector<256x128xf32>
    %61 = arith.mulf %60, %56 : vector<256x128xf32>
    %62 = arith.select %59, %56, %61 : vector<256x128xi1>, vector<256x128xf32>
    %c5 = arith.constant 5 : index
    %c0_31 = arith.constant 0 : index
    %63 = vector.load %arg3[%c5, %c0_31] : memref<8x256xf32, #tpu.memory_space<vmem>>, vector<1x128xf32>
    %c0_32 = arith.constant 0 : index
    %c0_33 = arith.constant 0 : index
    %64 = vector.load %arg9[%c0_32, %c0_33] : memref<128x128xbf16, #tpu.memory_space<vmem>>, vector<128x128xbf16>
    %65 = arith.truncf %62 : vector<256x128xf32> to vector<256x128xbf16>
    %cst_34 = arith.constant dense<0.000000e+00> : vector<256x128xf32>
    %66 = tpu.matmul %65, %64, %cst_34 {dimension_numbers = #tpu.dot_dimension_numbers<[1], [0], [0], [1], [0, 0, 1, 1], [], []>} : vector<256x128xbf16>, vector<128x128xbf16>, vector<256x128xf32> -> vector<256x128xf32>
    %67 = vector.broadcast %63 : vector<1x128xf32> to vector<256x128xf32>
    %68 = arith.addf %66, %67 : vector<256x128xf32>
    %c4_35 = arith.constant 4 : index
    %69 = memref.load %arg2[%c4_35] : memref<6xf32, #tpu.memory_space<smem>>
    %cst_36 = arith.constant 0.000000e+00 : f32
    %70 = vector.broadcast %cst_36 : f32 to vector<256x128xf32>
    %71 = arith.cmpf ogt, %68, %70 : vector<256x128xf32>
    %72 = vector.broadcast %69 : f32 to vector<256x128xf32>
    %73 = arith.mulf %72, %68 : vector<256x128xf32>
    %74 = arith.select %71, %68, %73 : vector<256x128xi1>, vector<256x128xf32>
    %c6 = arith.constant 6 : index
    %c0_37 = arith.constant 0 : index
    %75 = vector.load %arg3[%c6, %c0_37] : memref<8x256xf32, #tpu.memory_space<vmem>>, vector<1x128xf32>
    %c0_38 = arith.constant 0 : index
    %c0_39 = arith.constant 0 : index
    %76 = vector.load %arg10[%c0_38, %c0_39] : memref<128x128xbf16, #tpu.memory_space<vmem>>, vector<128x128xbf16>
    %77 = arith.truncf %74 : vector<256x128xf32> to vector<256x128xbf16>
    %cst_40 = arith.constant dense<0.000000e+00> : vector<256x128xf32>
    %78 = tpu.matmul %77, %76, %cst_40 {dimension_numbers = #tpu.dot_dimension_numbers<[1], [0], [0], [1], [0, 0, 1, 1], [], []>} : vector<256x128xbf16>, vector<128x128xbf16>, vector<256x128xf32> -> vector<256x128xf32>
    %79 = vector.broadcast %75 : vector<1x128xf32> to vector<256x128xf32>
    %80 = arith.addf %78, %79 : vector<256x128xf32>
    %c5_41 = arith.constant 5 : index
    %81 = memref.load %arg2[%c5_41] : memref<6xf32, #tpu.memory_space<smem>>
    %cst_42 = arith.constant 0.000000e+00 : f32
    %82 = vector.broadcast %cst_42 : f32 to vector<256x128xf32>
    %83 = arith.cmpf ogt, %80, %82 : vector<256x128xf32>
    %84 = vector.broadcast %81 : f32 to vector<256x128xf32>
    %85 = arith.mulf %84, %80 : vector<256x128xf32>
    %86 = arith.select %83, %80, %85 : vector<256x128xi1>, vector<256x128xf32>
    %c7 = arith.constant 7 : index
    %c0_43 = arith.constant 0 : index
    %87 = vector.load %arg3[%c7, %c0_43] : memref<8x256xf32, #tpu.memory_space<vmem>>, vector<1x256xf32>
    %c0_44 = arith.constant 0 : index
    %c0_45 = arith.constant 0 : index
    %88 = vector.load %arg11[%c0_44, %c0_45] : memref<128x256xbf16, #tpu.memory_space<vmem>>, vector<128x256xbf16>
    %89 = arith.truncf %86 : vector<256x128xf32> to vector<256x128xbf16>
    %cst_46 = arith.constant dense<0.000000e+00> : vector<256x256xf32>
    %90 = tpu.matmul %89, %88, %cst_46 {dimension_numbers = #tpu.dot_dimension_numbers<[1], [0], [0], [1], [0, 0, 1, 1], [], []>} : vector<256x128xbf16>, vector<128x256xbf16>, vector<256x256xf32> -> vector<256x256xf32>
    %91 = vector.broadcast %87 : vector<1x256xf32> to vector<256x256xf32>
    %92 = arith.addf %90, %91 : vector<256x256xf32>
    %c0_47 = arith.constant 0 : index
    %c0_48 = arith.constant 0 : index
    %93 = vector.load %arg12[%c0_47, %c0_48] : memref<256x256xf32, #tpu.memory_space<vmem>>, vector<256x256xf32>
    tpu.vector_store %arg12[%c0_47, %c0_48], %92 {strides = array<i32>} : memref<256x256xf32, #tpu.memory_space<vmem>>, vector<256x256xf32>,
    return
  }
  func.func @transform_0(%arg0: i32) -> (i32, i32) {
    %c0_i32 = arith.constant 0 : i32
    %c0_i32_0 = arith.constant 0 : i32
    return %arg0, %c0_i32 : i32, i32
  }
  func.func @transform_1(%arg0: i32) -> i32 {
    %c0_i32 = arith.constant 0 : i32
    %c0_i32_0 = arith.constant 0 : i32
    return %c0_i32 : i32
  }
  func.func @transform_2(%arg0: i32) -> (i32, i32) {
    %c0_i32 = arith.constant 0 : i32
    %c0_i32_0 = arith.constant 0 : i32
    %c0_i32_1 = arith.constant 0 : i32
    return %c0_i32, %c0_i32_0 : i32, i32
  }
  func.func @transform_3(%arg0: i32) -> (i32, i32) {
    %c0_i32 = arith.constant 0 : i32
    %c0_i32_0 = arith.constant 0 : i32
    %c0_i32_1 = arith.constant 0 : i32
    return %c0_i32, %c0_i32_0 : i32, i32
  }
  func.func @transform_4(%arg0: i32) -> (i32, i32) {
    %c0_i32 = arith.constant 0 : i32
    %c0_i32_0 = arith.constant 0 : i32
    %c0_i32_1 = arith.constant 0 : i32
    return %c0_i32, %c0_i32_0 : i32, i32
  }
  func.func @transform_5(%arg0: i32) -> (i32, i32) {
    %c0_i32 = arith.constant 0 : i32
    %c0_i32_0 = arith.constant 0 : i32
    %c0_i32_1 = arith.constant 0 : i32
    return %c0_i32, %c0_i32_0 : i32, i32
  }
  func.func @transform_6(%arg0: i32) -> (i32, i32) {
    %c0_i32 = arith.constant 0 : i32
    %c0_i32_0 = arith.constant 0 : i32
    %c0_i32_1 = arith.constant 0 : i32
    return %c0_i32, %c0_i32_0 : i32, i32
  }
  func.func @transform_7(%arg0: i32) -> (i32, i32) {
    %c0_i32 = arith.constant 0 : i32
    %c0_i32_0 = arith.constant 0 : i32
    %c0_i32_1 = arith.constant 0 : i32
    return %c0_i32, %c0_i32_0 : i32, i32
  }
  func.func @transform_8(%arg0: i32) -> (i32, i32) {
    %c0_i32 = arith.constant 0 : i32
    %c0_i32_0 = arith.constant 0 : i32
    %c0_i32_1 = arith.constant 0 : i32
    return %c0_i32, %c0_i32_0 : i32, i32
  }
  func.func @transform_9(%arg0: i32) -> (i32, i32) {
    %c0_i32 = arith.constant 0 : i32
    %c0_i32_0 = arith.constant 0 : i32
    %c0_i32_1 = arith.constant 0 : i32
    return %c0_i32, %c0_i32_0 : i32, i32
  }
  func.func @transform_10(%arg0: i32) -> (i32, i32) {
    %c0_i32 = arith.constant 0 : i32
    %c0_i32_0 = arith.constant 0 : i32
    %c0_i32_1 = arith.constant 0 : i32
    return %c0_i32, %c0_i32_0 : i32, i32
  }
  func.func @transform_11(%arg0: i32) -> (i32, i32) {
    %c0_i32 = arith.constant 0 : i32
    %c0_i32_0 = arith.constant 0 : i32
    return %arg0, %c0_i32 : i32, i32
  }
}

</mosaic_0001>

<bundles_post_ra>
// kernel: tpu_custom_call.1
= control target key start
LH: loop header
LB: loop body
LE: loop exit
PB: predicated region body
PF: predicated region fallthrough
CT: control target
= control target key end

     0   :  { %s6284_s0 = inlined_call_operand.hbm [shape: f32[512,256], index: 0, kind: input, shape index: {}]   ;;  %s6285_s1 = inlined_call_operand.vmem [shape: f32[6], index: 1, kind: input, shape index: {}]   ;;  %s6286_s2 = inlined_call_operand.hbm [shape: f32[8,256], index: 2, kind: input, shape index: {}]   ;;  %s6287_s3 = inlined_call_operand.hbm [shape: bf16[256,128], index: 3, kind: input, shape index: {}]   ;;  %s6288_s4 = inlined_call_operand.vmem [shape: bf16[128,128], index: 4, kind: input, shape index: {}]   ;;  %s6289_s5 = inlined_call_operand.hbm [shape: bf16[128,128], index: 5, kind: input, shape index: {}]   ;;  %s6290_s6 = inlined_call_operand.vmem [shape: bf16[128,64], index: 6, kind: input, shape index: {}]   ;;  %s6291_s7 = inlined_call_operand.vmem [shape: bf16[64,128], index: 7, kind: input, shape index: {}]   ;;  %s6292_s8 = inlined_call_operand.hbm [shape: bf16[128,128], index: 8, kind: input, shape index: {}]   ;;  %s6293_s9 = inlined_call_operand.hbm [shape: bf16[128,128], index: 9, kind: input, shape index: {}]   ;;  %s6294_s10 = inlined_call_operand.hbm [shape: bf16[128,256], index: 10, kind: input, shape index: {}]   ;;  %s6295_s11 = inlined_call_operand.hbm [shape: f32[512,256], index: 11, kind: output, shape index: {}]  }
   0x1   :  { %6300 = sst [smem:[#allocation23_spill]] %s6285_s1 }
   0x2   :  { %6301 = sst [smem:[#allocation24_spill]] %s6286_s2 }
   0x3   :  { %6302 = sst [smem:[#allocation25_spill]] %s6287_s3 }
   0x4   :  { %6303 = sst [smem:[#allocation26_spill]] %s6289_s5 }
   0x5   :  { %6304 = sst [smem:[#allocation27_spill]] %s6292_s8 }
   0x6   :  { %16 = vsyncpa [#allocation3], 0 }
   0x7   :  { %18 = vsyncpa [#allocation3 + $0x1], 0 }
   0x8   :  { %19 = vsyncpa [#allocation5], 0 }
   0x9   :  { %20 = vsyncpa [#allocation8], 0 }
   0xa   :  { %21 = vsyncpa [#allocation11], 0 }
   0xb   :  { %22 = vsyncpa [#allocation14], 0 }
   0xc   :  { %23 = vsyncpa [#allocation4], 0 }
   0xd   :  { %25 = vsyncpa [#allocation4 + $0x1], 0  ;;  %s5026_s17 = smov 0   ;;  %s5028_s18 = smov 0  }
   0xe   :  { %s5030_s19 = smov 0   ;;  %s5032_s20 = smov 0  }
   0xf LB: > { %s4948_s21 = smov [#allocation7]   ;;  %s5047_s23 = sadd.s32 4294967295, %s4946_s20   ;;  %s4946_s20 = sphi %s5032_s20, %s6333_s20   ;;  %s4942_s19 = sphi %s5030_s19, %s6332_s19   ;;  %s4938_s18 = sphi %s5028_s18, %s6331_s18   ;;  %s4934_s17 = sphi %s5026_s17, %s6330_s17  }
  0x10   : > { %s322_s22 = sshll.u32 %s4948_s21, 4  ;;  %p3715_p0 = scmp.ge.s32.totalorder %s4946_s20, 1  ;;  %s323_s22 = int_to_ptr.vmem [resolvable:$true] %s322_s22 }
  0x11   : > { %p6296_p1 = scmp.eq.s32.totalorder %s5047_s23, 0  ;;  %p298_p2 = scmp.lt.s32.totalorder %s4946_s20, 3 }
  0x12   : > { %s4949_s25 = smov [#allocation10]   ;;  %s4950_s28 = smov [#allocation13]  }
  0x13   : > { %p5052_p3 = pnand %p3715_p0, %p298_p2  ;;  %s348_s26 = sshll.u32 %s4949_s25, 4  ;;  %s5065_s26 = int_to_ptr.vmem [resolvable:$true] %s348_s26 }
  0x14   : > { %s380_s29 = sshll.u32 %s4950_s28, 4  ;;  %s6307_s1 = sld [smem:[#allocation23_spill]]  ;;  %s5070_s29 = int_to_ptr.vmem [resolvable:$true] %s380_s29 }
  0x15   : > { %s6305_s24 = scalar_select %p5052_p3, 1, 0 }
  0x16   : > { %p4425_p5 = pneg %p5052_p3  ;;  %s4678_s15 = scalar_lea.vmem %s323_s22, 256 }
  0x17   : > { %p4679_p8 = scmp.ne.s32.totalorder %s323_s22, %s4678_s15  ;;  %p4686_p11 = scmp.lt.s32.totalorder %s323_s22, %s323_s22 }
  0x18   : > { %p5061_p6 = pnand %p4425_p5, %p6296_p1  ;;  %p4687_p12 = scmp.lt.s32.totalorder %s4678_s15, %s4678_s15 }
  0x1a   : > { %s311_s13 = sshll.u32 %s6307_s1, 4  ;;  %p5074_p7 = pneg %p5061_p6  ;;  %s312_s13 = int_to_ptr.vmem [resolvable:$true] %s311_s13 }
  0x1b   : > { %p4688_p13 = por %p4687_p12, %p4686_p11 }
  0x1c   : > { %p4681_p9 = pnand %p4679_p8, %p5074_p7 }
  0x1e   : > { %p4682_p10 = pneg %p4681_p9 }
  0x20   : > { %p4689_p0 = pnand %p4688_p13, %p4682_p10 }
  0x22   : > { %4692 = shalt.err (!%p4689_p0)
}
  0x23   : > { %s6309_s2 = sld [smem:[#allocation24_spill]]  ;;  %s4704_s25 = scalar_lea.vmem %s5065_s26, 1024 }
  0x24   : > { %p4705_p2 = scmp.ne.s32.totalorder %s5065_s26, %s4704_s25  ;;  %p4712_p9 = scmp.lt.s32.totalorder %s5065_s26, %s5065_s26 }
  0x25   : > { %p4713_p11 = scmp.lt.s32.totalorder %s4704_s25, %s4704_s25 }
  0x26   : > { %p4707_p5 = pnand %p4705_p2, %p5074_p7 }
  0x27   : > { %p4714_p10 = por %p4713_p11, %p4712_p9 }
  0x28   : > { %p4708_p8 = pneg %p4707_p5 }
  0x29   : > { %4431 = dma.hbm_to_vmem [thread:$0]  (!%p5061_p6), %s6309_s2, 256, %s323_s22, [#allocation8]  }
  0x2a   : > { %p4715_p12 = pnand %p4714_p10, %p4708_p8 }
  0x2c   : > { %4718 = shalt.err (!%p4715_p12)
}
  0x2d   : > { %s4951_s28 = smov 64   ;;  %s4952_s30 = smov 4  }
  0x2e   : > { %s6310_s5 = sld [smem:[#allocation26_spill]]  ;;  %s4730_s15 = scalar_lea.vmem %s5070_s29, 1024 }
  0x2f   : > { %p4731_p13 = scmp.ne.s32.totalorder %s5070_s29, %s4730_s15  ;;  %p4738_p5 = scmp.lt.s32.totalorder %s5070_s29, %s5070_s29 }
  0x30   : > { %p4739_p8 = scmp.lt.s32.totalorder %s4730_s15, %s4730_s15 }
  0x31   : > { %p4733_p0 = pnand %p4731_p13, %p5074_p7 }
  0x32   : > { %p4740_p9 = por %p4739_p8, %p4738_p5 }
  0x33   : > { %p4734_p2 = pneg %p4733_p0 }
  0x34   : > { %4437 = dma.hbm_to_vmem [thread:$0]  (!%p5061_p6), %s6310_s5, 1024, %s5065_s26, [#allocation11], %s4951_s28, %s4951_s28, %s4952_s30  }
  0x35   : > { %p4741_p11 = pnand %p4740_p9, %p4734_p2 }
  0x37   : > { %4744 = shalt.err (!%p4741_p11)
}
  0x38   : > { %4443 = dma.hbm_to_vmem [thread:$0]  (!%p5061_p6), %s6293_s9, 1024, %s5070_s29, [#allocation14], %s4951_s28, %s4951_s28, %s4952_s30  }
  0x39   : > { %s4745_s22 = scalar_lea.vmem %s312_s13, 16  ;;  %p4753_p0 = scmp.lt.s32.totalorder %s312_s13, %s312_s13 }
  0x3a   : > { %p4746_p10 = scmp.ne.s32.totalorder %s312_s13, %s4745_s22  ;;  %p4754_p2 = scmp.lt.s32.totalorder %s4745_s22, %s4745_s22 }
  0x3c   : > { %p4748_p12 = pnand %p4746_p10, %p5074_p7  ;;  %p4755_p5 = por %p4754_p2, %p4753_p0 }
  0x3e   : > { %p4749_p13 = pneg %p4748_p12 }
  0x40   : > { %p4756_p8 = pnand %p4755_p5, %p4749_p13 }
  0x42   : > { %4759 = shalt.err (!%p4756_p8)
}
  0x43   : > { %s4953_s12 = smov [#allocation6]   ;;  %s4954_s29 = smov [#allocation9]  }
  0x44   : > { %4428 = dma.vmem_to_smem (!%p5061_p6), %s312_s13, 16, %s4953_s12, [#allocation5]  }
  0x45   : > { %s332_s15 = sshll.u32 %s4954_s29, 4  ;;  %s4955_s16 = smov [#allocation12]   ;;  %s333_s15 = int_to_ptr.vmem [resolvable:$true] %s332_s15 }
  0x46   : > { %s367_s21 = sshll.u32 %s4955_s16, 4  ;;  %s4771_s26 = scalar_lea.vmem %s333_s15, 2048  ;;  %s368_s21 = int_to_ptr.vmem [resolvable:$true] %s367_s21 }
  0x47   : > { %p4772_p9 = scmp.ne.s32.totalorder %s333_s15, %s4771_s26  ;;  %p4779_p12 = scmp.lt.s32.totalorder %s333_s15, %s333_s15 }
  0x48   : > { %p4780_p0 = scmp.lt.s32.totalorder %s4771_s26, %s4771_s26 }
  0x49   : > { %p4774_p11 = pnand %p4772_p9, %p5074_p7 }
  0x4a   : > { %p4781_p13 = por %p4780_p0, %p4779_p12 }
  0x4b   : > { %p4775_p10 = pneg %p4774_p11 }
  0x4d   : > { %p4782_p2 = pnand %p4781_p13, %p4775_p10 }
  0x4f   : > { %4785 = shalt.err (!%p4782_p2)
}
  0x50   : > { %s6311_s3 = sld [smem:[#allocation25_spill]]  ;;  %s4797_s22 = scalar_lea.vmem %s368_s21, 1024 }
  0x51   : > { %p4798_p5 = scmp.ne.s32.totalorder %s368_s21, %s4797_s22  ;;  %p4805_p11 = scmp.lt.s32.totalorder %s368_s21, %s368_s21 }
  0x52   : > { %p4806_p4 = scmp.lt.s32.totalorder %s4797_s22, %s4797_s22 }
  0x53   : > { %p4800_p8 = pnand %p4798_p5, %p5074_p7 }
  0x54   : > { %p4807_p12 = por %p4806_p4, %p4805_p11 }
  0x55   : > { %p4801_p9 = pneg %p4800_p8 }
  0x56   : > { %4434 = dma.hbm_to_vmem [thread:$0]  (!%p5061_p6), %s6311_s3, 2048, %s333_s15, [#allocation8], %s4951_s28, %s4951_s28, %s4952_s30  }
  0x57   : > { %p4808_p10 = pnand %p4807_p12, %p4801_p9 }
  0x59   : > { %4811 = shalt.err (!%p4808_p10)
}
  0x5a   : > { %s6312_s8 = sld [smem:[#allocation27_spill]]  ;;  %s4956_s15 = smov [#allocation15]  }
  0x5b   : > { %s393_s16 = sshll.u32 %s4956_s15, 4  ;;  %s394_s16 = int_to_ptr.vmem [resolvable:$true] %s393_s16 }
  0x5c   : > { %s4823_s26 = scalar_lea.vmem %s394_s16, 2048  ;;  %p4831_p2 = scmp.lt.s32.totalorder %s394_s16, %s394_s16 }
  0x5d   : > { %p4824_p0 = scmp.ne.s32.totalorder %s394_s16, %s4823_s26  ;;  %p4832_p5 = scmp.lt.s32.totalorder %s4823_s26, %s4823_s26 }
  0x5f   : > { %p4826_p13 = pnand %p4824_p0, %p5074_p7  ;;  %p4833_p8 = por %p4832_p5, %p4831_p2 }
  0x60   : > { %4440 = dma.hbm_to_vmem [thread:$0]  (!%p5061_p6), %s6312_s8, 1024, %s368_s21, [#allocation11], %s4951_s28, %s4951_s28, %s4952_s30  }
  0x61   : > { %p4827_p4 = pneg %p4826_p13 }
  0x63   : > { %p4834_p9 = pnand %p4833_p8, %p4827_p4 }
  0x65   : > { %4837 = shalt.err (!%p4834_p9)
}
  0x66   : > { %s4957_s13 = smov 128   ;;  %s4958_s14 = smov 8  }
  0x67   : > { %4446 = dma.hbm_to_vmem [thread:$0]  (!%p5061_p6), %s6294_s10, 2048, %s394_s16, [#allocation14], %s4957_s13, %s4957_s13, %s4958_s14  }
  0x68   : > { %s3714_s21 = sadd.s32 4294967294, %s4946_s20   ;;  %s5152_s25 = sadd.s32 1, %s4946_s20  }
  0x69   : > { %s38_s22 = sadd.s32 1, %s4942_s19  ;;  %s35_s12 = ssub.s32 %s4946_s20, %s5152_s25 }
  0x6a   : > { %p45_p7 = scmp.ne.s32.totalorder %s4942_s19, %s4938_s18  ;;  %p36_p11 = scmp.eq.s32.totalorder %s35_s12, 0 }
  0x6b   : > { %p46_p12 = scmp.eq.s32.totalorder %s4946_s20, 0  ;;  %p51_p10 = scmp.ne.s32.totalorder %s4938_s18, %s4934_s17 }
  0x6c   : > { %p285_p0 = scmp.eq.s32.totalorder %s5047_s23, 1  ;;  %p291_p2 = scmp.eq.s32.totalorder %s3714_s21, 1 }
  0x6d   : > { %s5164_s29 = scalar_select %p36_p11, %s4942_s19, %s38_s22  }
  0x6e   : > { %p47_p13 = por %p46_p12, %p45_p7  ;;  %p5168_p4 = por %p6296_p1, %p51_p10 }
  0x6f   : > { %p5172_p6 = por %p285_p0, %p45_p7  ;;  %p4462_p5 = scmp.lt.s32.totalorder %s4946_s20, 2 }
  0x70   : > { %s6313_s27 = scalar_select %p5168_p4, 1, 0 }
  0x71   : > { %s6314_s15 = scalar_select %p5172_p6, 1, 0 }
  0x72   : > { %s407_s16 = sand.u32 1, %s4942_s19   ;;  %p5178_p8 = por %p291_p2, %p51_p10 }
  0x73   : > { %s3724_s13 = sshll.u32 %s407_s16, 9  ;;  %s3842_s14 = sshll.u32 %s4946_s20, 13 }
  0x74   : > { %s6315_s26 = scalar_select %p5178_p8, 1, 0 }
  0x75   : > { %s5186_s22 = scalar_lea.hbm %s6284_s0, %s3842_s14  ;;  %s411_s12 = scalar_lea.vmem [#allocation2], %s3724_s13 }
  0x76   : > { %s419_s1 = sshll.u32 %s411_s12, 4  ;;  %p5188_p9 = pnand %p4462_p5, %p47_p13  ;;  %s5192_s1 = int_to_ptr.vmem [resolvable:$true] %s419_s1 }
  0x77   : > { %s5194_s2 = scalar_lea.sflag [#allocation3], %s407_s16  ;;  %s4838_s3 = scalar_lea.hbm %s5186_s22, 8192 }
  0x78   : > { %p4839_p7 = scmp.ne.s32.totalorder %s5186_s22, %s4838_s3  ;;  %p4840_p11 = pneg %p5188_p9 }
  0x79   : > { %s4843_s13 = scalar_lea.hbm %s6284_s0, 16384  ;;  %p4844_p0 = scmp.lt.s32.totalorder %s5186_s22, %s6284_s0 }
  0x7a   : > { %p4841_p12 = pnand %p4840_p11, %p4839_p7  ;;  %p4845_p13 = scmp.lt.s32.totalorder %s4843_s13, %s4838_s3 }
  0x7c   : > { %p4842_p10 = pneg %p4841_p12  ;;  %p4846_p2 = por %p4845_p13, %p4844_p0 }
  0x7e   : > { %p4847_p5 = pnand %p4846_p2, %p4842_p10 }
  0x80   : > { %4850 = shalt.err (!%p4847_p5)
}
  0x81   : > { %s4851_s16 = scalar_lea.vmem %s5192_s1, 8192  ;;  %s4959_s5 = smov [#allocation2]  }
  0x82   : > { %p4852_p1 = scmp.ne.s32.totalorder %s5192_s1, %s4851_s16  ;;  %s4856_s8 = sshll.u32 %s4959_s5, 4  ;;  %s4857_s8 = int_to_ptr.vmem [resolvable:$false] %s4856_s8 }
  0x83   : > { %s4858_s14 = scalar_lea.vmem %s4857_s8, 16384  ;;  %p4859_p12 = scmp.lt.s32.totalorder %s5192_s1, %s4857_s8 }
  0x84   : > { %p4854_p8 = pnand %p4852_p1, %p4840_p11  ;;  %p4860_p6 = scmp.lt.s32.totalorder %s4858_s14, %s4851_s16 }
  0x86   : > { %p4855_p7 = pneg %p4854_p8  ;;  %p4861_p4 = por %p4860_p6, %p4859_p12 }
  0x88   : > { %p4862_p3 = pnand %p4861_p4, %p4855_p7 }
  0x8a   : > { %4865 = shalt.err (!%p4862_p3)
}
  0x8b   : > { %s4960_s3 = smov 256   ;;  %s4961_s28 = smov 16  }
  0x8c   : > { %4450 = dma.hbm_to_vmem [thread:$0]  (!%p5188_p9), %s5186_s22, 8192, %s5192_s1, %s5194_s2, %s4960_s3, %s4960_s3, %s4961_s28  }
  0x8d   : > { %p6317_p1 = scmp.ne.s32.totalorder %s6305_s24, 0 }
  0x8e   : > { %s5218_s5 = sand.u32 (!%p6317_p1), 1, %s4938_s18   ;;  %p6318_p3 = scmp.ne.s32.totalorder (!%p6317_p1), %s6313_s27, 0 }
  0x8f   : > { %431 = sbr.rel (%p6317_p1) target bundleno = 2148 (0x864), region = 64  ;;  %s3729_s8 = sshll.u32 (!%p6317_p1), %s5218_s5, 9 }
  0x90   : > { %s434_s13 = scalar_lea.sflag (!%p6317_p1), [#allocation3], %s5218_s5  ;;  %s5224_s30 = scalar_lea.vmem (!%p6317_p1), [#allocation2], %s3729_s8 }
  0x94   : > { %4909 = dma.done.wait (%p6318_p3), %s434_s13, 8192  }
  0x95   : > { %4911 = vsyncadd (%p6318_p3), %s434_s13, 4294959104  ;;  %p6319_p4 = scmp.eq.s32.totalorder %s5047_s23, 0 }
  0x97   : > { %4913 = dma.done.wait (%p6319_p4), [#allocation5], 16   ;;  %p6320_p6 = pmov %p6319_p4 }
  0x98   : > { %p6321_p8 = pmov %p6319_p4 }
  0x99   : > { %4915 = vsyncadd (%p6320_p6), [#allocation5], 4294967280 }
  0x9a   : > { %4917 = dma.done.wait (%p6321_p8), [#allocation8], 2304   ;;  %p6322_p9 = pmov %p6319_p4 }
  0x9b   : > { %p6323_p11 = pmov %p6319_p4 }
  0x9c   : > { %4919 = vsyncadd (%p6322_p9), [#allocation8], 4294964992 }
  0x9d   : > { %4921 = dma.done.wait (%p6323_p11), [#allocation11], 2048   ;;  %p6324_p10 = pmov %p6319_p4 }
  0x9e   : > { %p6325_p0 = pmov %p6319_p4 }
  0x9f   : > { %4923 = vsyncadd (%p6324_p10), [#allocation11], 4294965248 }
  0xa0   : > { %4925 = dma.done.wait (%p6325_p0), [#allocation14], 3072   ;;  %p6326_p13 = pmov %p6325_p0 }
  0xa2   : > { %4927 = vsyncadd (%p6326_p13), [#allocation14], 4294964224 }
  0xa3   : > { %470 = sfence }
  0xa4   : > { %v4519_v0 = vld [vmem:[#allocation9 + $0x78] sm:$0xff]   ;;  %v4521_v2 = vld [vmem:[#allocation9 + $0x70] sm:$0xff]   ;;  %v4523_v4 = vld [vmem:[#allocation9 + $0x68] sm:$0xff]   ;;  %s3771_s14 = sld [smem:[#allocation6 + $0x2]]  ;;  %s6105_s16 = scalar_lea.vmem [#allocation16], %s3729_s8 }
  0xa5   : > { %v4520_v1 = vld [vmem:[#allocation9 + $0x38] sm:$0xff]   ;;  %3845 = vmatprep.subr.bf16.mxu0 %v4519_v0  ;;  %4377 = vmatprep.subr.bf16.mxu1 %v4519_v0  ;;  %v4522_v3 = vld [vmem:[#allocation9 + $0x30] sm:$0xff]   ;;  %v4524_v5 = vld [vmem:[#allocation9 + $0x28] sm:$0xff]   ;;  %s3800_s22 = sld [smem:[#allocation6 + $0x3]]  ;;  %s3844_s8 = sshll.u32 %s5047_s23, 13 }
  0xa6   : > { %3846 = vmatpush3.bf16.msra.mxu0 %v4520_v1  ;;  %4385 = vmatpush3.bf16.msra.mxu1 %v4520_v1  ;;  %v4525_v6 = vld [vmem:[#allocation9 + $0x60] sm:$0xff]   ;;  %v4527_v8 = vld [vmem:[#allocation9 + $0x58] sm:$0xff]   ;;  %v4529_v10 = vld [vmem:[#allocation9 + $0x50] sm:$0xff]   ;;  %s3809_s21 = sld [smem:[#allocation6 + $0x4]]  ;;  %s6236_s13 = scalar_lea.hbm %s6295_s11, %s3844_s8 }
  0xa7   : > { %3847 = vmatprep.subr.bf16.mxu0 %v4521_v2  ;;  %4378 = vmatprep.subr.bf16.mxu1 %v4521_v2  ;;  %v4526_v7 = vld [vmem:[#allocation9 + $0x20] sm:$0xff]   ;;  %v4528_v9 = vld [vmem:[#allocation9 + $0x18] sm:$0xff]   ;;  %v511_v12 = vld [vmem:[%s5224_s30 + $0x18] sm:$0xff]  ;;  %s3818_s12 = sld [smem:[#allocation6 + $0x5]]  ;;  %s3558_s23 = scalar_lea.sflag [#allocation4], %s5218_s5 }
  0xa8   : > { %v509_v11 = vld [vmem:[%s5224_s30 + $0x8] sm:$0xff]  ;;  %v4530_v14 = vld [vmem:[#allocation9 + $0x10] sm:$0xff]   ;;  %v4531_v15 = vld [vmem:[#allocation9 + $0x48] sm:$0xff]   ;;  %p6327_p5 = scmp.ne.s32.totalorder %s6314_s15, 0  ;;  %s4963_s2 = smov [#allocation16]  }
  0xa9   : > { %v606_v13 = vpack.c.bf16 %v511_v12, %v509_v11  ;;  %v541_v16 = vld [vmem:[%s5224_s30 + $0x108] sm:$0xff]  ;;  %v543_v17 = vld [vmem:[%s5224_s30 + $0x118] sm:$0xff]  ;;  %v4533_v20 = vld [vmem:[#allocation9 + $0x40] sm:$0xff]   ;;  %s4870_s24 = sshll.u32 %s4963_s2, 4  ;;  %s4871_s24 = int_to_ptr.vmem [resolvable:$false] %s4870_s24 }
  0xaa   : > { %3848 = vmatpush3.bf16.msra.mxu0 %v4522_v3  ;;  %4386 = vmatpush3.bf16.msra.mxu1 %v4522_v3  ;;  %v4532_v18 = vld [vmem:[#allocation9 + $0x8] sm:$0xff]   ;;  %v622_v19 = vpack.c.bf16 %v543_v17, %v541_v16  ;;  %v4534_v21 = vld [vmem:[#allocation9] sm:$0xff]   ;;  %v508_v22 = vld [vmem:[%s5224_s30] sm:$0xff]  ;;  %s4872_s27 = scalar_lea.vmem %s4871_s24, 16384 }
  0xab   : > { %3849 = vmatprep.subr.bf16.mxu0 %v4523_v4  ;;  %4379 = vmatprep.subr.bf16.mxu1 %v4523_v4  ;;  %v510_v23 = vld [vmem:[%s5224_s30 + $0x10] sm:$0xff]  ;;  %v513_v24 = vld [vmem:[%s5224_s30 + $0x28] sm:$0xff]  ;;  %v515_v25 = vld [vmem:[%s5224_s30 + $0x38] sm:$0xff] }
  0xac   : > { %765 = vmatprep.mubr.bf16.mxu0 %v606_v13  ;;  %829 = vmatprep.mubr.bf16.mxu1 %v622_v19  ;;  %v540_v26 = vld [vmem:[%s5224_s30 + $0x100] sm:$0xff]  ;;  %v542_v27 = vld [vmem:[%s5224_s30 + $0x110] sm:$0xff]  ;;  %v545_v28 = vld [vmem:[%s5224_s30 + $0x128] sm:$0xff]  ;;  %v605_v30 = vpack.c.bf16 %v510_v23, %v508_v22  ;;  %v608_v31 = vpack.c.bf16 %v515_v25, %v513_v24 }
  0xad   : > { %v547_v29 = vld [vmem:[%s5224_s30 + $0x138] sm:$0xff]  ;;  %v621_v32 = vpack.c.bf16 %v542_v27, %v540_v26  ;;  %v512_v34 = vld [vmem:[%s5224_s30 + $0x20] sm:$0xff]  ;;  %v514_v35 = vld [vmem:[%s5224_s30 + $0x30] sm:$0xff] }
  0xae   : > { %3850 = vmatpush3.bf16.msra.mxu0 %v4524_v5  ;;  %4387 = vmatpush3.bf16.msra.mxu1 %v4524_v5  ;;  %v624_v33 = vpack.c.bf16 %v547_v29, %v545_v28  ;;  %v517_v36 = vld [vmem:[%s5224_s30 + $0x48] sm:$0xff]  ;;  %v519_v37 = vld [vmem:[%s5224_s30 + $0x58] sm:$0xff]  ;;  %v544_v38 = vld [vmem:[%s5224_s30 + $0x120] sm:$0xff]  ;;  %v607_v42 = vpack.c.bf16 %v514_v35, %v512_v34 }
  0xaf   : > { %3851 = vmatprep.subr.bf16.mxu0 %v4525_v6  ;;  %4380 = vmatprep.subr.bf16.mxu1 %v4525_v6  ;;  %v546_v39 = vld [vmem:[%s5224_s30 + $0x130] sm:$0xff]  ;;  %v549_v40 = vld [vmem:[%s5224_s30 + $0x148] sm:$0xff]  ;;  %v551_v41 = vld [vmem:[%s5224_s30 + $0x158] sm:$0xff]  ;;  %v610_v44 = vpack.c.bf16 %v519_v37, %v517_v36 }
  0xb0   : > { %v4535_v43 = vld [vmem:[%s6288_s4 + $0x38] sm:$0xff]   ;;  %v623_v45 = vpack.c.bf16 %v546_v39, %v544_v38  ;;  %v4536_v46 = vld [vmem:[%s6288_s4 + $0x30] sm:$0xff]   ;;  %v626_v47 = vpack.c.bf16 %v551_v41, %v549_v40  ;;  %v516_v48 = vld [vmem:[%s5224_s30 + $0x40] sm:$0xff] }
  0xb1   : > { %v518_v49 = vld [vmem:[%s5224_s30 + $0x50] sm:$0xff]  ;;  %v521_v50 = vld [vmem:[%s5224_s30 + $0x68] sm:$0xff]  ;;  %v523_v51 = vld [vmem:[%s5224_s30 + $0x78] sm:$0xff] }
  0xb2   : > { %3852 = vmatpush3.bf16.msra.mxu0 %v4526_v7  ;;  %4388 = vmatpush3.bf16.msra.mxu1 %v4526_v7  ;;  %v548_v52 = vld [vmem:[%s5224_s30 + $0x140] sm:$0xff]  ;;  %v550_v53 = vld [vmem:[%s5224_s30 + $0x150] sm:$0xff]  ;;  %v4537_v54 = vld [vmem:[%s6288_s4 + $0x28] sm:$0xff]   ;;  %v609_v58 = vpack.c.bf16 %v518_v49, %v516_v48  ;;  %v612_v59 = vpack.c.bf16 %v523_v51, %v521_v50 }
  0xb3   : > { %3853 = vmatprep.subr.bf16.mxu0 %v4527_v8  ;;  %4381 = vmatprep.subr.bf16.mxu1 %v4527_v8  ;;  %v553_v55 = vld [vmem:[%s5224_s30 + $0x168] sm:$0xff]  ;;  %v555_v56 = vld [vmem:[%s5224_s30 + $0x178] sm:$0xff]  ;;  %v4538_v57 = vld [vmem:[%s6288_s4 + $0x20] sm:$0xff]   ;;  %v625_v60 = vpack.c.bf16 %v550_v53, %v548_v52 }
  0xb4   : > { %v628_v61 = vpack.c.bf16 %v555_v56, %v553_v55  ;;  %v4539_v62 = vld [vmem:[%s6288_s4 + $0x18] sm:$0xff]   ;;  %v520_v63 = vld [vmem:[%s5224_s30 + $0x60] sm:$0xff]  ;;  %v522_v0 = vld [vmem:[%s5224_s30 + $0x70] sm:$0xff] }
  0xb5   : > { %v525_v1 = vld [vmem:[%s5224_s30 + $0x88] sm:$0xff]  ;;  %v527_v2 = vld [vmem:[%s5224_s30 + $0x98] sm:$0xff]  ;;  %v552_v3 = vld [vmem:[%s5224_s30 + $0x160] sm:$0xff]  ;;  %v611_v7 = vpack.c.bf16 %v522_v0, %v520_v63 }
  0xb6   : > { %3854 = vmatpush3.bf16.msra.mxu0 %v4528_v9  ;;  %4389 = vmatpush3.bf16.msra.mxu1 %v4528_v9  ;;  %v554_v4 = vld [vmem:[%s5224_s30 + $0x170] sm:$0xff]  ;;  %v557_v5 = vld [vmem:[%s5224_s30 + $0x188] sm:$0xff]  ;;  %v559_v6 = vld [vmem:[%s5224_s30 + $0x198] sm:$0xff]  ;;  %v614_v8 = vpack.c.bf16 %v527_v2, %v525_v1 }
  0xb7   : > { %3855 = vmatprep.subr.bf16.mxu0 %v4529_v10  ;;  %4382 = vmatprep.subr.bf16.mxu1 %v4529_v10  ;;  %v627_v9 = vpack.c.bf16 %v554_v4, %v552_v3  ;;  %v630_v10 = vpack.c.bf16 %v559_v6, %v557_v5  ;;  %v524_v11 = vld [vmem:[%s5224_s30 + $0x80] sm:$0xff]  ;;  %v526_v12 = vld [vmem:[%s5224_s30 + $0x90] sm:$0xff]  ;;  %v529_v13 = vld [vmem:[%s5224_s30 + $0xa8] sm:$0xff] }
  0xb8   : > { %v558_v16 = vld [vmem:[%s5224_s30 + $0x190] sm:$0xff]  ;;  %v561_v17 = vld [vmem:[%s5224_s30 + $0x1a8] sm:$0xff]  ;;  %v613_v19 = vpack.c.bf16 %v526_v12, %v524_v11  ;;  %v528_v23 = vld [vmem:[%s5224_s30 + $0xa0] sm:$0xff] }
  0xb9   : > { %v530_v24 = vld [vmem:[%s5224_s30 + $0xb0] sm:$0xff]  ;;  %v533_v25 = vld [vmem:[%s5224_s30 + $0xc8] sm:$0xff]  ;;  %v535_v26 = vld [vmem:[%s5224_s30 + $0xd8] sm:$0xff] }
  0xba   : > { %3856 = vmatpush3.bf16.msra.mxu0 %v4530_v14  ;;  %4390 = vmatpush3.bf16.msra.mxu1 %v4530_v14  ;;  %v531_v14 = vld [vmem:[%s5224_s30 + $0xb8] sm:$0xff]  ;;  %v560_v27 = vld [vmem:[%s5224_s30 + $0x1a0] sm:$0xff]  ;;  %v562_v28 = vld [vmem:[%s5224_s30 + $0x1b0] sm:$0xff] }
  0xbb   : > { %3857 = vmatprep.subr.bf16.mxu0 %v4531_v15  ;;  %4383 = vmatprep.subr.bf16.mxu1 %v4531_v15  ;;  %v556_v15 = vld [vmem:[%s5224_s30 + $0x180] sm:$0xff]  ;;  %v565_v29 = vld [vmem:[%s5224_s30 + $0x1c8] sm:$0xff]  ;;  %v534_v36 = vld [vmem:[%s5224_s30 + $0xd0] sm:$0xff] }
  0xbc   : > { %v532_v35 = vld [vmem:[%s5224_s30 + $0xc0] sm:$0xff]  ;;  %v537_v37 = vld [vmem:[%s5224_s30 + $0xe8] sm:$0xff]  ;;  %v539_v38 = vld [vmem:[%s5224_s30 + $0xf8] sm:$0xff] }
  0xbd   : > { %v564_v39 = vld [vmem:[%s5224_s30 + $0x1c0] sm:$0xff]  ;;  %v566_v40 = vld [vmem:[%s5224_s30 + $0x1d0] sm:$0xff]  ;;  %v569_v41 = vld [vmem:[%s5224_s30 + $0x1e8] sm:$0xff] }
  0xbe   : > { %3858 = vmatpush3.bf16.msra.mxu0 %v4532_v18  ;;  %4391 = vmatpush3.bf16.msra.mxu1 %v4532_v18  ;;  %v563_v18 = vld [vmem:[%s5224_s30 + $0x1b8] sm:$0xff]  ;;  %v538_v48 = vld [vmem:[%s5224_s30 + $0xf0] sm:$0xff]  ;;  %v568_v49 = vld [vmem:[%s5224_s30 + $0x1e0] sm:$0xff] }
  0xbf   : > { %3859 = vmatprep.subr.bf16.mxu0 %v4533_v20  ;;  %4384 = vmatprep.subr.bf16.mxu1 %v4533_v20  ;;  %v616_v20 = vpack.c.bf16 %v531_v14, %v529_v13  ;;  %v632_v22 = vpack.c.bf16 %v563_v18, %v561_v17  ;;  %v570_v50 = vld [vmem:[%s5224_s30 + $0x1f0] sm:$0xff]  ;;  %v4542_v55 = vld [vmem:[%s6288_s4] sm:$0xff]   ;;  %v5334_v56 = vld [vmem:[#allocation10 + $0x38] sm:$0xff]  }
  0xc0   : > { %v635_v52 = vpack.c.bf16 %v570_v50, %v568_v49  ;;  %v4540_v53 = vld [vmem:[%s6288_s4 + $0x10] sm:$0xff]  }
  0xc2   : > { %3860 = vmatpush3.bf16.msra.mxu0 %v4534_v21  ;;  %4392 = vmatpush3.bf16.msra.mxu1 %v4534_v21  ;;  %v629_v21 = vpack.c.bf16 %v558_v16, %v556_v15 }
  0xc3   : > { %4097 = vmatprep.subr.bf16.mxu1 %v4535_v43 }
  0xc5   : > { %766 = vmatmul.mubr.bf16.vlgmr.msra.gmra.mxu0 %v605_v30  ;;  %830 = vmatmul.mubr.bf16.vlgmr.msra.gmra.mxu1 %v621_v32  ;;  %v567_v30 = vld [vmem:[%s5224_s30 + $0x1d8] sm:$0xff]  ;;  %v618_v32 = vpack.c.bf16 %v535_v26, %v533_v25 }
  0xc6   : > { %773 = vmatprep.mubr.bf16.mxu0 %v608_v31  ;;  %837 = vmatprep.mubr.bf16.mxu1 %v624_v33  ;;  %v615_v31 = vpack.c.bf16 %v530_v24, %v528_v23  ;;  %v631_v33 = vpack.c.bf16 %v562_v28, %v560_v27  ;;  %v634_v34 = vpack.c.bf16 %v567_v30, %v565_v29 }
  0xc7   : > { %4098 = vmatpush3.bf16.msra.mxu1 %v4535_v43  ;;  %v617_v43 = vpack.c.bf16 %v534_v36, %v532_v35 }
  0xc8   : > { %4099 = vmatprep.subr.bf16.mxu1 %v4536_v46 }
  0xcb   : > { %4100 = vmatpush3.bf16.msra.mxu1 %v4536_v46 }
  0xcc   : > { %4101 = vmatprep.subr.bf16.mxu1 %v4537_v54 }
  0xcd   : > { %774 = vmatmul.mubr.bf16.gmra.mxu0 %v607_v42  ;;  %838 = vmatmul.mubr.bf16.gmra.mxu1 %v623_v45  ;;  %v571_v42 = vld [vmem:[%s5224_s30 + $0x1f8] sm:$0xff]  ;;  %v633_v45 = vpack.c.bf16 %v566_v40, %v564_v39 }
  0xce   : > { %781 = vmatprep.mubr.bf16.mxu0 %v610_v44  ;;  %845 = vmatprep.mubr.bf16.mxu1 %v626_v47  ;;  %v620_v44 = vpack.c.bf16 %v539_v38, %v537_v37  ;;  %v636_v46 = vpack.c.bf16 %v571_v42, %v569_v41  ;;  %v536_v47 = vld [vmem:[%s5224_s30 + $0xe0] sm:$0xff]  ;;  %s894_s30 = sld [smem:[#allocation6]] }
  0xcf   : > { %4102 = vmatpush3.bf16.msra.mxu1 %v4537_v54  ;;  %v619_v51 = vpack.c.bf16 %v538_v48, %v536_v47  ;;  %v4541_v54 = vld [vmem:[%s6288_s4 + $0x8] sm:$0xff]   ;;  %v4544_v48 = vld [vmem:[#allocation10 + $0x30] sm:$0xff]  }
  0xd0   : > { %4103 = vmatprep.subr.bf16.mxu1 %v4538_v57 }
  0xd3   : > { %4104 = vmatpush3.bf16.msra.mxu1 %v4538_v57 }
  0xd4   : > { %4105 = vmatprep.subr.bf16.mxu1 %v4539_v62  ;;  %v5346_v2 = vstv %s894_s30  ;;  %s3762_s30 = sld [smem:[#allocation6 + $0x1]] }
  0xd5   : > { %782 = vmatmul.mubr.bf16.gmra.mxu0 %v609_v58  ;;  %846 = vmatmul.mubr.bf16.gmra.mxu1 %v625_v60 }
  0xd6   : > { %789 = vmatprep.mubr.bf16.mxu0 %v612_v59  ;;  %853 = vmatprep.mubr.bf16.mxu1 %v628_v61  ;;  %v5339_v59 = vld [vmem:[#allocation7] ss:$0 sm:$0xff] }
  0xd7   : > { %4106 = vmatpush3.bf16.msra.mxu1 %v4539_v62 }
  0xd8   : > { %4107 = vmatprep.subr.bf16.mxu1 %v4540_v53 }
  0xdb   : > { %4108 = vmatpush3.bf16.msra.mxu1 %v4540_v53 }
  0xdc   : > { %4109 = vmatprep.subr.bf16.mxu1 %v4541_v54 }
  0xdd   : > { %790 = vmatmul.mubr.bf16.gmra.mxu0 %v611_v7  ;;  %854 = vmatmul.mubr.bf16.gmra.mxu1 %v627_v9 }
  0xde   : > { %797 = vmatprep.mubr.bf16.mxu0 %v614_v8  ;;  %861 = vmatprep.mubr.bf16.mxu1 %v630_v10 }
  0xdf   : > { %4110 = vmatpush3.bf16.msra.mxu1 %v4541_v54 }
  0xe0   : > { %4111 = vmatprep.subr.bf16.mxu1 %v4542_v55 }
  0xe3   : > { %4112 = vmatpush3.bf16.msra.mxu1 %v4542_v55 }
  0xe4   : > { %4145 = vmatprep.subr.bf16.mxu1 %v5334_v56 }
  0xe5   : > { %798 = vmatmul.mubr.bf16.gmra.mxu0 %v613_v19  ;;  %862 = vmatmul.mubr.bf16.gmra.mxu1 %v629_v21 }
  0xe6   : > { %805 = vmatprep.mubr.bf16.mxu0 %v616_v20  ;;  %869 = vmatprep.mubr.bf16.mxu1 %v632_v22 }
  0xed   : > { %806 = vmatmul.mubr.bf16.gmra.mxu0 %v615_v31  ;;  %870 = vmatmul.mubr.bf16.gmra.mxu1 %v631_v33 }
  0xee   : > { %813 = vmatprep.mubr.bf16.mxu0 %v618_v32  ;;  %877 = vmatprep.mubr.bf16.mxu1 %v634_v34 }
  0xf5   : > { %814 = vmatmul.mubr.bf16.gmra.mxu0 %v617_v43  ;;  %878 = vmatmul.mubr.bf16.gmra.mxu1 %v633_v45 }
  0xf6   : > { %821 = vmatprep.mubr.bf16.mxu0 %v620_v44  ;;  %885 = vmatprep.mubr.bf16.mxu1 %v636_v46 }
  0xfd   : > { %822 = vmatmul.mubr.bf16.gmra.mxu0 %v619_v51  ;;  %886 = vmatmul.mubr.bf16.gmra.mxu1 %v635_v52 }
 0x185   : > { %v3861_v57 = vpop.f32.mrf.mxu0  ;;  %v5337_v58 = vpop.f32.mrf.mxu1 }
 0x187   : > { %v3862_v60 = vpop.f32.mrf.mxu0  ;;  %v5341_v62 = vpop.f32.mrf.mxu1 }
 0x188   : > { %v3863_v61 = vadd.f32 %v3862_v60, %v3861_v57 }
 0x189   : > { %v3864_v63 = vpop.f32.mrf.mxu0  ;;  %v5344_v1 = vpop.f32.mrf.mxu1 }
 0x18a   : > { %v768_v0 = vadd.f32 %v3863_v61, %v5339_v59 }
 0x18b   : > { %v3865_v3 = vpop.f32.mrf.mxu0  ;;  %v5348_v5 = vpop.f32.mrf.mxu1 }
 0x18c   : > { %v3866_v4 = vadd.f32 %v3865_v3, %v3864_v63  ;;  %v928_v7 = vmul.f32 %v5346_v2, %v768_v0  ;;  %vm895_vm0 = vcmp.gt.f32.partialorder %v768_v0, 0.0  ;;  %v4545_v3 = vld [vmem:[#allocation10 + $0x28] sm:$0xff]  }
 0x18d   : > { %v3867_v6 = vpop.f32.mrf.mxu0  ;;  %v3915_v9 = vpop.f32.mrf.mxu1 }
 0x18e   : > { %v771_v8 = vadd.f32 %v3866_v4, %v5339_v59  ;;  %v960_v17 = vsel %vm895_vm0, %v768_v0, %v928_v7 }
 0x18f   : > { %v3868_v10 = vpop.f32.mrf.mxu0  ;;  %v3916_v13 = vpop.f32.mrf.mxu1 }
 0x190   : > { %v929_v11 = vmul.f32 %v5346_v2, %v771_v8  ;;  %v3869_v12 = vadd.f32 %v3868_v10, %v3867_v6  ;;  %vm896_vm1 = vcmp.gt.f32.partialorder %v771_v8, 0.0  ;;  %v3917_v15 = vadd.f32 %v3916_v13, %v3915_v9 }
 0x191   : > { %v3870_v14 = vpop.f32.mrf.mxu0  ;;  %v3918_v19 = vpop.f32.mrf.mxu1 }
 0x192   : > { %v776_v16 = vadd.f32 %v3869_v12, %v5339_v59  ;;  %v961_v18 = vsel %vm896_vm1, %v771_v8, %v929_v11  ;;  %v840_v22 = vadd.f32 %v3917_v15, %v5339_v59 }
 0x193   : > { %v3871_v20 = vpop.f32.mrf.mxu0  ;;  %v1009_v21 = vpack.c.bf16 %v961_v18, %v960_v17  ;;  %v3919_v24 = vpop.f32.mrf.mxu1  ;;  %v4546_v18 = vld [vmem:[#allocation10 + $0x20] sm:$0xff]  }
 0x194   : > { %v3872_v23 = vadd.f32 %v3871_v20, %v3870_v14  ;;  %vm913_vm2 = vcmp.gt.f32.partialorder %v840_v22, 0.0  ;;  %v946_v26 = vmul.f32 %v5346_v2, %v840_v22  ;;  %v3920_v27 = vadd.f32 %v3919_v24, %v3918_v19 }
 0x195   : > { %v3873_v25 = vpop.f32.mrf.mxu0  ;;  %4113 = vmatprep.mubr.bf16.mxu1 %v1009_v21  ;;  %v930_v28 = vmul.f32 %v5346_v2, %v776_v16  ;;  %v3921_v30 = vpop.f32.mrf.mxu1  ;;  %vm897_vm3 = vcmp.gt.f32.partialorder %v776_v16, 0.0 }
 0x196   : > { %v779_v29 = vadd.f32 %v3872_v23, %v5339_v59  ;;  %v843_v32 = vadd.f32 %v3920_v27, %v5339_v59  ;;  %v5359_v33 = vsel %vm913_vm2, %v840_v22, %v946_v26 }
 0x197   : > { %v3874_v31 = vpop.f32.mrf.mxu0  ;;  %v3922_v36 = vpop.f32.mrf.mxu1  ;;  %v962_v40 = vsel %vm897_vm3, %v776_v16, %v930_v28 }
 0x198   : > { %vm898_vm4 = vcmp.gt.f32.partialorder %v779_v29, 0.0  ;;  %v931_v34 = vmul.f32 %v5346_v2, %v779_v29  ;;  %v3875_v35 = vadd.f32 %v3874_v31, %v3873_v25  ;;  %v947_v38 = vmul.f32 %v5346_v2, %v843_v32  ;;  %v4547_v31 = vld [vmem:[#allocation10 + $0x18] sm:$0xff]  }
 0x199   : > { %v3876_v37 = vpop.f32.mrf.mxu0  ;;  %v3923_v39 = vadd.f32 %v3922_v36, %v3921_v30  ;;  %vm914_vm5 = vcmp.gt.f32.partialorder %v843_v32, 0.0  ;;  %v3924_v43 = vpop.f32.mrf.mxu1 }
 0x19a   : > { %v963_v41 = vsel %vm898_vm4, %v779_v29, %v931_v34  ;;  %v784_v42 = vadd.f32 %v3875_v35, %v5339_v59  ;;  %v5365_v47 = vsel %vm914_vm5, %v843_v32, %v947_v38 }
 0x19b   : > { %v1010_v44 = vpack.c.bf16 %v963_v41, %v962_v40  ;;  %v3877_v45 = vpop.f32.mrf.mxu0  ;;  %v848_v46 = vadd.f32 %v3923_v39, %v5339_v59  ;;  %v3925_v50 = vpop.f32.mrf.mxu1  ;;  %v1018_v51 = vpack.c.bf16 %v5365_v47, %v5359_v33  ;;  %v4551_v33 = vld [vmem:[%s6290_s6 + $0x38] sm:$0xff]   ;;  %v4552_v47 = vld [vmem:[%s6290_s6 + $0x30] sm:$0xff]  }
 0x19c   : > { %v3878_v49 = vadd.f32 %v3877_v45, %v3876_v37  ;;  %v3926_v54 = vadd.f32 %v3925_v50, %v3924_v43  ;;  %v932_v55 = vmul.f32 %v5346_v2, %v784_v42  ;;  %vm899_vm7 = vcmp.gt.f32.partialorder %v784_v42, 0.0  ;;  %4193 = vmatprep.subr.bf16.mxu0 %v4551_v33 }
 0x19d   : > { %v3879_v52 = vpop.f32.mrf.mxu0  ;;  %4114 = vmatmul.mubr.bf16.vlgmr.msra.gmra.mxu1 %v1010_v44  ;;  %vm915_vm6 = vcmp.gt.f32.partialorder %v848_v46, 0.0  ;;  %v948_v53 = vmul.f32 %v5346_v2, %v848_v46  ;;  %v3927_v60 = vpop.f32.mrf.mxu1  ;;  %4194 = vmatpush3.bf16.msra.mxu0 %v4551_v33 }
 0x19e   : > { %v787_v57 = vadd.f32 %v3878_v49, %v5339_v59  ;;  %4146 = vmatpush3.bf16.msra.mxu1 %v5334_v56  ;;  %v851_v63 = vadd.f32 %v3926_v54, %v5339_v59  ;;  %v964_v11 = vsel %vm899_vm7, %v784_v42, %v932_v55  ;;  %4195 = vmatprep.subr.bf16.mxu0 %v4552_v47 }
 0x19f   : > { %v3880_v61 = vpop.f32.mrf.mxu0  ;;  %v5374_v0 = vsel %vm915_vm6, %v848_v46, %v948_v53  ;;  %4147 = vmatprep.subr.bf16.mxu1 %v4544_v48  ;;  %v3928_v7 = vpop.f32.mrf.mxu1 }
 0x1a0   : > { %v933_v4 = vmul.f32 %v5346_v2, %v787_v57  ;;  %v3881_v6 = vadd.f32 %v3880_v61, %v3879_v52  ;;  %vm900_vm8 = vcmp.gt.f32.partialorder %v787_v57, 0.0  ;;  %v949_v9 = vmul.f32 %v5346_v2, %v851_v63 }
 0x1a1   : > { %v3882_v8 = vpop.f32.mrf.mxu0  ;;  %v3929_v10 = vadd.f32 %v3928_v7, %v3927_v60  ;;  %vm916_vm9 = vcmp.gt.f32.partialorder %v851_v63, 0.0  ;;  %v3930_v13 = vpop.f32.mrf.mxu1  ;;  %4196 = vmatpush3.bf16.msra.mxu0 %v4552_v47 }
 0x1a2   : > { %v792_v56 = vadd.f32 %v3881_v6, %v5339_v59  ;;  %v965_v12 = vsel %vm900_vm8, %v787_v57, %v933_v4  ;;  %4148 = vmatpush3.bf16.msra.mxu1 %v4544_v48  ;;  %v5380_v17 = vsel %vm916_vm9, %v851_v63, %v949_v9  ;;  %v4548_v48 = vld [vmem:[#allocation10 + $0x10] sm:$0xff]  }
 0x1a3   : > { %v3883_v14 = vpop.f32.mrf.mxu0  ;;  %v1011_v15 = vpack.c.bf16 %v965_v12, %v964_v11  ;;  %v856_v16 = vadd.f32 %v3929_v10, %v5339_v59  ;;  %4149 = vmatprep.subr.bf16.mxu1 %v4545_v3  ;;  %v3931_v20 = vpop.f32.mrf.mxu1  ;;  %v1019_v21 = vpack.c.bf16 %v5380_v17, %v5374_v0  ;;  %v4554_v0 = vld [vmem:[%s6290_s6 + $0x20] sm:$0xff]   ;;  %v4555_v17 = vld [vmem:[%s6290_s6 + $0x18] sm:$0xff]  }
 0x1a4   : > { %v3884_v19 = vadd.f32 %v3883_v14, %v3882_v8  ;;  %v3932_v24 = vadd.f32 %v3931_v20, %v3930_v13  ;;  %v934_v25 = vmul.f32 %v5346_v2, %v792_v56  ;;  %vm901_vm11 = vcmp.gt.f32.partialorder %v792_v56, 0.0 }
 0x1a5   : > { %v3885_v22 = vpop.f32.mrf.mxu0  ;;  %4117 = vmatprep.mubr.bf16.mxu1 %v1011_v15  ;;  %vm917_vm10 = vcmp.gt.f32.partialorder %v856_v16, 0.0  ;;  %v950_v23 = vmul.f32 %v5346_v2, %v856_v16  ;;  %v3933_v27 = vpop.f32.mrf.mxu1 }
 0x1a6   : > { %v795_v26 = vadd.f32 %v3884_v19, %v5339_v59  ;;  %4150 = vmatpush3.bf16.msra.mxu1 %v4545_v3  ;;  %v859_v29 = vadd.f32 %v3932_v24, %v5339_v59  ;;  %v966_v40 = vsel %vm901_vm11, %v792_v56, %v934_v25 }
 0x1a7   : > { %v3886_v28 = vpop.f32.mrf.mxu0  ;;  %v5388_v30 = vsel %vm917_vm10, %v856_v16, %v950_v23  ;;  %4151 = vmatprep.subr.bf16.mxu1 %v4546_v18  ;;  %v3934_v35 = vpop.f32.mrf.mxu1 }
 0x1a8   : > { %v935_v32 = vmul.f32 %v5346_v2, %v795_v26  ;;  %v3887_v34 = vadd.f32 %v3886_v28, %v3885_v22  ;;  %vm902_vm12 = vcmp.gt.f32.partialorder %v795_v26, 0.0  ;;  %v951_v37 = vmul.f32 %v5346_v2, %v859_v29 }
 0x1a9   : > { %v3888_v36 = vpop.f32.mrf.mxu0  ;;  %v3935_v38 = vadd.f32 %v3934_v35, %v3933_v27  ;;  %vm918_vm13 = vcmp.gt.f32.partialorder %v859_v29, 0.0  ;;  %v3936_v42 = vpop.f32.mrf.mxu1 }
 0x1aa   : > { %v800_v39 = vadd.f32 %v3887_v34, %v5339_v59  ;;  %v967_v41 = vsel %vm902_vm12, %v795_v26, %v935_v32  ;;  %4152 = vmatpush3.bf16.msra.mxu1 %v4546_v18  ;;  %v5394_v46 = vsel %vm918_vm13, %v859_v29, %v951_v37 }
 0x1ab   : > { %v3889_v43 = vpop.f32.mrf.mxu0  ;;  %v1012_v44 = vpack.c.bf16 %v967_v41, %v966_v40  ;;  %v864_v45 = vadd.f32 %v3935_v38, %v5339_v59  ;;  %4153 = vmatprep.subr.bf16.mxu1 %v4547_v31  ;;  %v3937_v50 = vpop.f32.mrf.mxu1  ;;  %v1020_v52 = vpack.c.bf16 %v5394_v46, %v5388_v30  ;;  %v3911_v38 = vadd.f32 %v5341_v62, %v5337_v58  ;;  %v5482_v46 = vld [vmem:[#allocation7 + $0x1] ss:$0 sm:$0xff] }
 0x1ac   : > { %v3890_v49 = vadd.f32 %v3889_v43, %v3888_v36  ;;  %v3938_v55 = vadd.f32 %v3937_v50, %v3936_v42  ;;  %v936_v57 = vmul.f32 %v5346_v2, %v800_v39  ;;  %vm903_vm15 = vcmp.gt.f32.partialorder %v800_v39, 0.0 }
 0x1ad   : > { %v3891_v53 = vpop.f32.mrf.mxu0  ;;  %4118 = vmatmul.mubr.bf16.gmra.mxu1 %v1012_v44  ;;  %vm919_vm14 = vcmp.gt.f32.partialorder %v864_v45, 0.0  ;;  %v952_v54 = vmul.f32 %v5346_v2, %v864_v45  ;;  %v3939_v61 = vpop.f32.mrf.mxu1 }
 0x1ae   : > { %v803_v60 = vadd.f32 %v3890_v49, %v5339_v59  ;;  %4154 = vmatpush3.bf16.msra.mxu1 %v4547_v31  ;;  %v867_v3 = vadd.f32 %v3938_v55, %v5339_v59  ;;  %v968_v12 = vsel %vm903_vm15, %v800_v39, %v936_v57  ;;  %v832_v57 = vadd.f32 %v3911_v38, %v5339_v59 }
 0x1af   : > { %v3892_v63 = vpop.f32.mrf.mxu0  ;;  %v5402_v4 = vsel %vm919_vm14, %v864_v45, %v952_v54  ;;  %4155 = vmatprep.subr.bf16.mxu1 %v4548_v48  ;;  %v3940_v8 = vpop.f32.mrf.mxu1 }
 0x1b0   : > { %v937_v6 = vmul.f32 %v5346_v2, %v803_v60  ;;  %v3893_v7 = vadd.f32 %v3892_v63, %v3891_v53  ;;  %vm904_vm0 = vcmp.gt.f32.partialorder %v803_v60, 0.0  ;;  %v953_v10 = vmul.f32 %v5346_v2, %v867_v3 }
 0x1b1   : > { %v3894_v9 = vpop.f32.mrf.mxu0  ;;  %v3941_v56 = vadd.f32 %v3940_v8, %v3939_v61  ;;  %vm920_vm1 = vcmp.gt.f32.partialorder %v867_v3, 0.0  ;;  %v3942_v14 = vpop.f32.mrf.mxu1  ;;  %vm911_vm9 = vcmp.gt.f32.partialorder %v832_v57, 0.0 }
 0x1b2   : > { %v808_v11 = vadd.f32 %v3893_v7, %v5339_v59  ;;  %v969_v13 = vsel %vm904_vm0, %v803_v60, %v937_v6  ;;  %4156 = vmatpush3.bf16.msra.mxu1 %v4548_v48  ;;  %v5408_v19 = vsel %vm920_vm1, %v867_v3, %v953_v10  ;;  %v3914_v48 = vadd.f32 %v5348_v5, %v5344_v1 }
 0x1b3   : > { %v3895_v15 = vpop.f32.mrf.mxu0  ;;  %v1013_v16 = vpack.c.bf16 %v969_v13, %v968_v12  ;;  %v872_v18 = vadd.f32 %v3941_v56, %v5339_v59  ;;  %v3943_v22 = vpop.f32.mrf.mxu1  ;;  %v1021_v23 = vpack.c.bf16 %v5408_v19, %v5402_v4 }
 0x1b4   : > { %v3896_v20 = vadd.f32 %v3895_v15, %v3894_v9  ;;  %v3944_v26 = vadd.f32 %v3943_v22, %v3942_v14  ;;  %v938_v27 = vmul.f32 %v5346_v2, %v808_v11  ;;  %vm905_vm3 = vcmp.gt.f32.partialorder %v808_v11, 0.0 }
 0x1b5   : > { %v3897_v24 = vpop.f32.mrf.mxu0  ;;  %4121 = vmatprep.mubr.bf16.mxu1 %v1013_v16  ;;  %vm921_vm2 = vcmp.gt.f32.partialorder %v872_v18, 0.0  ;;  %v954_v25 = vmul.f32 %v5346_v2, %v872_v18  ;;  %v3945_v29 = vpop.f32.mrf.mxu1  ;;  %v835_v6 = vadd.f32 %v3914_v48, %v5339_v59  ;;  %v944_v15 = vmul.f32 %v5346_v2, %v832_v57 }
 0x1b6   : > { %v811_v28 = vadd.f32 %v3896_v20, %v5339_v59  ;;  %v875_v32 = vadd.f32 %v3944_v26, %v5339_v59  ;;  %v970_v43 = vsel %vm905_vm3, %v808_v11, %v938_v27 }
 0x1b7   : > { %v3898_v31 = vpop.f32.mrf.mxu0  ;;  %v5416_v34 = vsel %vm921_vm2, %v872_v18, %v954_v25  ;;  %v3946_v37 = vpop.f32.mrf.mxu1  ;;  %vm912_vm11 = vcmp.gt.f32.partialorder %v835_v6, 0.0 }
 0x1b8   : > { %v939_v35 = vmul.f32 %v5346_v2, %v811_v28  ;;  %v3899_v36 = vadd.f32 %v3898_v31, %v3897_v24  ;;  %vm906_vm4 = vcmp.gt.f32.partialorder %v811_v28, 0.0  ;;  %v955_v40 = vmul.f32 %v5346_v2, %v875_v32 }
 0x1b9   : > { %v3900_v39 = vpop.f32.mrf.mxu0  ;;  %v3947_v41 = vadd.f32 %v3946_v37, %v3945_v29  ;;  %vm922_vm5 = vcmp.gt.f32.partialorder %v875_v32, 0.0  ;;  %v3948_v45 = vpop.f32.mrf.mxu1  ;;  %v945_v24 = vmul.f32 %v5346_v2, %v835_v6 }
 0x1ba   : > { %v816_v42 = vadd.f32 %v3899_v36, %v5339_v59  ;;  %v971_v44 = vsel %vm906_vm4, %v811_v28, %v939_v35  ;;  %v5426_v54 = vsel %vm922_vm5, %v875_v32, %v955_v40 }
 0x1bb   : > { %v3901_v49 = vpop.f32.mrf.mxu0  ;;  %v1014_v50 = vpack.c.bf16 %v971_v44, %v970_v43  ;;  %v880_v53 = vadd.f32 %v3947_v41, %v5339_v59  ;;  %v3949_v62 = vpop.f32.mrf.mxu1  ;;  %v1022_v55 = vpack.c.bf16 %v5426_v54, %v5416_v34  ;;  %v977_v40 = vsel %vm912_vm11, %v835_v6, %v945_v24 }
 0x1bc   : > { %v3902_v58 = vadd.f32 %v3901_v49, %v3900_v39  ;;  %v3950_v63 = vadd.f32 %v3949_v62, %v3948_v45  ;;  %v940_v1 = vmul.f32 %v5346_v2, %v816_v42  ;;  %vm907_vm7 = vcmp.gt.f32.partialorder %v816_v42, 0.0 }
 0x1bd   : > { %v3903_v60 = vpop.f32.mrf.mxu0  ;;  %4122 = vmatmul.mubr.bf16.gmra.mxu1 %v1014_v50  ;;  %vm923_vm6 = vcmp.gt.f32.partialorder %v880_v53, 0.0  ;;  %v956_v61 = vmul.f32 %v5346_v2, %v880_v53  ;;  %v3951_v3 = vpop.f32.mrf.mxu1  ;;  %v976_v39 = vsel %vm911_vm9, %v832_v57, %v944_v15  ;;  %v5486_v34 = vstv %s3762_s30 }
 0x1be   : > { %v819_v5 = vadd.f32 %v3902_v58, %v5339_v59  ;;  %v883_v8 = vadd.f32 %v3950_v63, %v5339_v59  ;;  %v972_v18 = vsel %vm907_vm7, %v816_v42, %v940_v1  ;;  %v1017_v49 = vpack.c.bf16 %v977_v40, %v976_v39 }
 0x1bf   : > { %v3904_v7 = vpop.f32.mrf.mxu0  ;;  %v988_v9 = vsel %vm923_vm6, %v880_v53, %v956_v61  ;;  %v3952_v11 = vpop.f32.mrf.mxu1 }
 0x1c0   : > { %v941_v10 = vmul.f32 %v5346_v2, %v819_v5  ;;  %v3905_v56 = vadd.f32 %v3904_v7, %v3903_v60  ;;  %vm908_vm8 = vcmp.gt.f32.partialorder %v819_v5, 0.0  ;;  %v957_v13 = vmul.f32 %v5346_v2, %v883_v8 }
 0x1c1   : > { %v3906_v12 = vpop.f32.mrf.mxu0  ;;  %v3953_v14 = vadd.f32 %v3952_v11, %v3951_v3  ;;  %vm924_vm10 = vcmp.gt.f32.partialorder %v883_v8, 0.0  ;;  %v3954_v22 = vpop.f32.mrf.mxu1 }
 0x1c2   : > { %v824_v16 = vadd.f32 %v3905_v56, %v5339_v59  ;;  %v973_v20 = vsel %vm908_vm8, %v819_v5, %v941_v10  ;;  %v989_v28 = vsel %vm924_vm10, %v883_v8, %v957_v13 }
 0x1c3   : > { %v3907_v25 = vpop.f32.mrf.mxu0  ;;  %v1015_v26 = vpack.c.bf16 %v973_v20, %v972_v18  ;;  %v888_v27 = vadd.f32 %v3953_v14, %v5339_v59  ;;  %v3955_v31 = vpop.f32.mrf.mxu1  ;;  %v1023_v32 = vpack.c.bf16 %v989_v28, %v988_v9 }
 0x1c4   : > { %v3908_v29 = vadd.f32 %v3907_v25, %v3906_v12  ;;  %v3956_v36 = vadd.f32 %v3955_v31, %v3954_v22  ;;  %v942_v37 = vmul.f32 %v5346_v2, %v824_v16  ;;  %vm909_vm13 = vcmp.gt.f32.partialorder %v824_v16, 0.0 }
 0x1c5   : > { %4125 = vmatprep.mubr.bf16.mxu1 %v1015_v26  ;;  %vm925_vm12 = vcmp.gt.f32.partialorder %v888_v27, 0.0  ;;  %v958_v35 = vmul.f32 %v5346_v2, %v888_v27 }
 0x1c6   : > { %v827_v38 = vadd.f32 %v3908_v29, %v5339_v59  ;;  %v891_v41 = vadd.f32 %v3956_v36, %v5339_v59  ;;  %v974_v45 = vsel %vm909_vm13, %v824_v16, %v942_v37  ;;  %v4549_v59 = vld [vmem:[#allocation10 + $0x8] sm:$0xff]  }
 0x1c7   : > { %v990_v42 = vsel %vm925_vm12, %v888_v27, %v958_v35  ;;  %4157 = vmatprep.subr.bf16.mxu1 %v4549_v59 }
 0x1c8   : > { %v943_v43 = vmul.f32 %v5346_v2, %v827_v38  ;;  %vm910_vm14 = vcmp.gt.f32.partialorder %v827_v38, 0.0  ;;  %v959_v44 = vmul.f32 %v5346_v2, %v891_v41  ;;  %vm926_vm15 = vcmp.gt.f32.partialorder %v891_v41, 0.0  ;;  %4158 = vmatpush3.bf16.msra.mxu1 %v4549_v59  ;;  %v4550_v2 = vld [vmem:[#allocation10] sm:$0xff]  }
 0x1c9   : > { %4159 = vmatprep.subr.bf16.mxu1 %v4550_v2 }
 0x1ca   : > { %v975_v48 = vsel %vm910_vm14, %v827_v38, %v943_v43  ;;  %v991_v53 = vsel %vm926_vm15, %v891_v41, %v959_v44 }
 0x1cb   : > { %v1016_v50 = vpack.c.bf16 %v975_v48, %v974_v45  ;;  %v1024_v58 = vpack.c.bf16 %v991_v53, %v990_v42 }
 0x1cc   : > { %4160 = vmatpush3.bf16.msra.mxu1 %v4550_v2 }
 0x1cd   : > { %4126 = vmatmul.mubr.bf16.gmra.mxu1 %v1016_v50 }
 0x1ce   : > { %4129 = vmatprep.mubr.bf16.mxu1 %v1017_v49 }
 0x1d5   : > { %4130 = vmatmul.mubr.bf16.gmra.mxu1 %v1018_v51  ;;  %v4553_v51 = vld [vmem:[%s6290_s6 + $0x28] sm:$0xff]  }
 0x1d6   : > { %4133 = vmatprep.mubr.bf16.mxu1 %v1019_v21  ;;  %4197 = vmatprep.subr.bf16.mxu0 %v4553_v51  ;;  %v4556_v21 = vld [vmem:[%s6290_s6 + $0x10] sm:$0xff]  }
 0x1d7   : > { %4198 = vmatpush3.bf16.msra.mxu0 %v4553_v51 }
 0x1d8   : > { %4199 = vmatprep.subr.bf16.mxu0 %v4554_v0 }
 0x1db   : > { %4200 = vmatpush3.bf16.msra.mxu0 %v4554_v0 }
 0x1dc   : > { %4201 = vmatprep.subr.bf16.mxu0 %v4555_v17 }
 0x1dd   : > { %4134 = vmatmul.mubr.bf16.gmra.mxu1 %v1020_v52 }
 0x1de   : > { %4137 = vmatprep.mubr.bf16.mxu1 %v1021_v23 }
 0x1df   : > { %4202 = vmatpush3.bf16.msra.mxu0 %v4555_v17 }
 0x1e0   : > { %4203 = vmatprep.subr.bf16.mxu0 %v4556_v21 }
 0x1e3   : > { %4204 = vmatpush3.bf16.msra.mxu0 %v4556_v21 }
 0x1e5   : > { %4138 = vmatmul.mubr.bf16.gmra.mxu1 %v1022_v55 }
 0x1e6   : > { %4141 = vmatprep.mubr.bf16.mxu1 %v1023_v32 }
 0x1ed   : > { %4142 = vmatmul.mubr.bf16.gmra.mxu1 %v1024_v58 }
 0x25d   : > { %v4115_v30 = vpop.f32.mrf.mxu1 }
 0x25e   : > { %v1116_v19 = vadd.f32 %v4115_v30, %v5482_v46 }
 0x25f   : > { %v1107_v52 = vpop.f32.mrf.mxu1 }
 0x260   : > { %v1108_v4 = vadd.f32 %v1107_v52, %v5482_v46  ;;  %v1270_v61 = vmul.f32 %v5486_v34, %v1116_v19  ;;  %vm1237_vm2 = vcmp.gt.f32.partialorder %v1116_v19, 0.0 }
 0x261   : > { %v4116_v23 = vpop.f32.mrf.mxu1 }
 0x262   : > { %v1119_v54 = vadd.f32 %v4116_v23, %v5482_v46  ;;  %v1268_v55 = vmul.f32 %v5486_v34, %v1108_v4  ;;  %vm1235_vm1 = vcmp.gt.f32.partialorder %v1108_v4, 0.0  ;;  %v1302_v6 = vsel %vm1237_vm2, %v1116_v19, %v1270_v61 }
 0x263   : > { %v1110_v62 = vpop.f32.mrf.mxu1 }
 0x264   : > { %vm1238_vm0 = vcmp.gt.f32.partialorder %v1119_v54, 0.0  ;;  %v1271_v57 = vmul.f32 %v5486_v34, %v1119_v54  ;;  %v1111_v60 = vadd.f32 %v1110_v62, %v5482_v46  ;;  %v1300_v5 = vsel %vm1235_vm1, %v1108_v4, %v1268_v55 }
 0x266   : > { %vm1236_vm3 = vcmp.gt.f32.partialorder %v1111_v60, 0.0  ;;  %v1269_v63 = vmul.f32 %v5486_v34, %v1111_v60  ;;  %v1303_v1 = vsel %vm1238_vm0, %v1119_v54, %v1271_v57 }
 0x267   : > { %v1350_v8 = vpack.c.bf16 %v1303_v1, %v1302_v6 }
 0x268   : > { %v1301_v3 = vsel %vm1236_vm3, %v1111_v60, %v1269_v63 }
 0x269   : > { %v1349_v7 = vpack.c.bf16 %v1301_v3, %v1300_v5 }
 0x26b   : > { %4161 = vmatprep.mubr.bf16.mxu1 %v1349_v7 }
 0x26c   : > { %4162 = vmatmul.mubr.bf16.vlgmr.msra.gmra.mxu1 %v1350_v8 }
 0x26d   : > { %v4119_v9 = vpop.f32.mrf.mxu1 }
 0x26e   : > { %v1132_v11 = vadd.f32 %v4119_v9, %v5482_v46 }
 0x26f   : > { %v1123_v10 = vpop.f32.mrf.mxu1 }
 0x270   : > { %v1124_v56 = vadd.f32 %v1123_v10, %v5482_v46  ;;  %v1274_v20 = vmul.f32 %v5486_v34, %v1132_v11  ;;  %vm1241_vm6 = vcmp.gt.f32.partialorder %v1132_v11, 0.0 }
 0x271   : > { %v4120_v12 = vpop.f32.mrf.mxu1 }
 0x272   : > { %v1135_v13 = vadd.f32 %v4120_v12, %v5482_v46  ;;  %v1272_v15 = vmul.f32 %v5486_v34, %v1124_v56  ;;  %vm1239_vm5 = vcmp.gt.f32.partialorder %v1124_v56, 0.0  ;;  %v1306_v28 = vsel %vm1241_vm6, %v1132_v11, %v1274_v20 }
 0x273   : > { %v1126_v14 = vpop.f32.mrf.mxu1 }
 0x274   : > { %vm1242_vm4 = vcmp.gt.f32.partialorder %v1135_v13, 0.0  ;;  %v1275_v16 = vmul.f32 %v5486_v34, %v1135_v13  ;;  %v1127_v18 = vadd.f32 %v1126_v14, %v5482_v46  ;;  %v1304_v25 = vsel %vm1239_vm5, %v1124_v56, %v1272_v15 }
 0x276   : > { %vm1240_vm7 = vcmp.gt.f32.partialorder %v1127_v18, 0.0  ;;  %v1273_v22 = vmul.f32 %v5486_v34, %v1127_v18  ;;  %v1307_v24 = vsel %vm1242_vm4, %v1135_v13, %v1275_v16 }
 0x277   : > { %v1352_v29 = vpack.c.bf16 %v1307_v24, %v1306_v28 }
 0x278   : > { %v1305_v26 = vsel %vm1240_vm7, %v1127_v18, %v1273_v22 }
 0x279   : > { %v1351_v27 = vpack.c.bf16 %v1305_v26, %v1304_v25 }
 0x27b   : > { %4165 = vmatprep.mubr.bf16.mxu1 %v1351_v27 }
 0x27c   : > { %4166 = vmatmul.mubr.bf16.gmra.mxu1 %v1352_v29 }
 0x27d   : > { %v4123_v31 = vpop.f32.mrf.mxu1 }
 0x27e   : > { %v1148_v36 = vadd.f32 %v4123_v31, %v5482_v46 }
 0x27f   : > { %v1139_v32 = vpop.f32.mrf.mxu1 }
 0x280   : > { %v1140_v35 = vadd.f32 %v1139_v32, %v5482_v46  ;;  %v1278_v43 = vmul.f32 %v5486_v34, %v1148_v36  ;;  %vm1245_vm10 = vcmp.gt.f32.partialorder %v1148_v36, 0.0 }
 0x281   : > { %v4124_v37 = vpop.f32.mrf.mxu1 }
 0x282   : > { %v1151_v38 = vadd.f32 %v4124_v37, %v5482_v46  ;;  %v1276_v40 = vmul.f32 %v5486_v34, %v1140_v35  ;;  %vm1243_vm9 = vcmp.gt.f32.partialorder %v1140_v35, 0.0  ;;  %v1310_v53 = vsel %vm1245_vm10, %v1148_v36, %v1278_v43 }
 0x283   : > { %v1142_v39 = vpop.f32.mrf.mxu1 }
 0x284   : > { %vm1246_vm8 = vcmp.gt.f32.partialorder %v1151_v38, 0.0  ;;  %v1279_v41 = vmul.f32 %v5486_v34, %v1151_v38  ;;  %v1143_v42 = vadd.f32 %v1142_v39, %v5482_v46  ;;  %v1308_v48 = vsel %vm1243_vm9, %v1140_v35, %v1276_v40 }
 0x286   : > { %vm1244_vm11 = vcmp.gt.f32.partialorder %v1143_v42, 0.0  ;;  %v1277_v44 = vmul.f32 %v5486_v34, %v1143_v42  ;;  %v1311_v45 = vsel %vm1246_vm8, %v1151_v38, %v1279_v41 }
 0x287   : > { %v1354_v58 = vpack.c.bf16 %v1311_v45, %v1310_v53 }
 0x288   : > { %v1309_v49 = vsel %vm1244_vm11, %v1143_v42, %v1277_v44 }
 0x289   : > { %v1353_v50 = vpack.c.bf16 %v1309_v49, %v1308_v48 }
 0x28b   : > { %4169 = vmatprep.mubr.bf16.mxu1 %v1353_v50 }
 0x28c   : > { %4170 = vmatmul.mubr.bf16.gmra.mxu1 %v1354_v58 }
 0x28d   : > { %v4127_v59 = vpop.f32.mrf.mxu1 }
 0x28e   : > { %v1164_v47 = vadd.f32 %v4127_v59, %v5482_v46 }
 0x28f   : > { %v1155_v2 = vpop.f32.mrf.mxu1 }
 0x290   : > { %v1156_v33 = vadd.f32 %v1155_v2, %v5482_v46  ;;  %v1282_v4 = vmul.f32 %v5486_v34, %v1164_v47  ;;  %vm1249_vm14 = vcmp.gt.f32.partialorder %v1164_v47, 0.0 }
 0x291   : > { %v4128_v51 = vpop.f32.mrf.mxu1 }
 0x292   : > { %v1167_v0 = vadd.f32 %v4128_v51, %v5482_v46  ;;  %v1280_v21 = vmul.f32 %v5486_v34, %v1156_v33  ;;  %vm1247_vm13 = vcmp.gt.f32.partialorder %v1156_v33, 0.0  ;;  %v1314_v5 = vsel %vm1249_vm14, %v1164_v47, %v1282_v4 }
 0x293   : > { %v1158_v17 = vpop.f32.mrf.mxu1 }
 0x294   : > { %vm1250_vm12 = vcmp.gt.f32.partialorder %v1167_v0, 0.0  ;;  %v1283_v30 = vmul.f32 %v5486_v34, %v1167_v0  ;;  %v1159_v52 = vadd.f32 %v1158_v17, %v5482_v46  ;;  %v1312_v60 = vsel %vm1247_vm13, %v1156_v33, %v1280_v21 }
 0x295   : > { %v4131_v19 = vpop.f32.mrf.mxu1 }
 0x296   : > { %vm1248_vm15 = vcmp.gt.f32.partialorder %v1159_v52, 0.0  ;;  %v1281_v23 = vmul.f32 %v5486_v34, %v1159_v52  ;;  %v1180_v54 = vadd.f32 %v4131_v19, %v5482_v46  ;;  %v1315_v55 = vsel %vm1250_vm12, %v1167_v0, %v1283_v30 }
 0x297   : > { %v1171_v62 = vpop.f32.mrf.mxu1  ;;  %v1356_v6 = vpack.c.bf16 %v1315_v55, %v1314_v5 }
 0x298   : > { %v1172_v57 = vadd.f32 %v1171_v62, %v5482_v46  ;;  %v1313_v61 = vsel %vm1248_vm15, %v1159_v52, %v1281_v23  ;;  %v1286_v7 = vmul.f32 %v5486_v34, %v1180_v54  ;;  %vm1253_vm1 = vcmp.gt.f32.partialorder %v1180_v54, 0.0 }
 0x299   : > { %v4132_v63 = vpop.f32.mrf.mxu1  ;;  %v1355_v1 = vpack.c.bf16 %v1313_v61, %v1312_v60 }
 0x29a   : > { %v1183_v3 = vadd.f32 %v4132_v63, %v5482_v46  ;;  %v1284_v9 = vmul.f32 %v5486_v34, %v1172_v57  ;;  %vm1251_vm2 = vcmp.gt.f32.partialorder %v1172_v57, 0.0  ;;  %v1318_v22 = vsel %vm1253_vm1, %v1180_v54, %v1286_v7 }
 0x29b   : > { %v1174_v8 = vpop.f32.mrf.mxu1  ;;  %4173 = vmatprep.mubr.bf16.mxu1 %v1355_v1 }
 0x29c   : > { %vm1254_vm0 = vcmp.gt.f32.partialorder %v1183_v3, 0.0  ;;  %v1287_v10 = vmul.f32 %v5486_v34, %v1183_v3  ;;  %v1175_v56 = vadd.f32 %v1174_v8, %v5482_v46  ;;  %4174 = vmatmul.mubr.bf16.gmra.mxu1 %v1356_v6  ;;  %v1316_v18 = vsel %vm1251_vm2, %v1172_v57, %v1284_v9  ;;  %v4557_v57 = vld [vmem:[%s6290_s6 + $0x8] sm:$0xff]   ;;  %v4558_v6 = vld [vmem:[%s6290_s6] sm:$0xff]  }
 0x29d   : > { %v4135_v11 = vpop.f32.mrf.mxu1  ;;  %4205 = vmatprep.subr.bf16.mxu0 %v4557_v57 }
 0x29e   : > { %vm1252_vm3 = vcmp.gt.f32.partialorder %v1175_v56, 0.0  ;;  %v1285_v12 = vmul.f32 %v5486_v34, %v1175_v56  ;;  %v1196_v13 = vadd.f32 %v4135_v11, %v5482_v46  ;;  %v1319_v14 = vsel %vm1254_vm0, %v1183_v3, %v1287_v10  ;;  %4206 = vmatpush3.bf16.msra.mxu0 %v4557_v57 }
 0x29f   : > { %v1187_v15 = vpop.f32.mrf.mxu1  ;;  %v1358_v27 = vpack.c.bf16 %v1319_v14, %v1318_v22  ;;  %4207 = vmatprep.subr.bf16.mxu0 %v4558_v6 }
 0x2a0   : > { %v1188_v16 = vadd.f32 %v1187_v15, %v5482_v46  ;;  %v1317_v20 = vsel %vm1252_vm3, %v1175_v56, %v1285_v12  ;;  %v1290_v24 = vmul.f32 %v5486_v34, %v1196_v13  ;;  %vm1257_vm4 = vcmp.gt.f32.partialorder %v1196_v13, 0.0  ;;  %v5556_v12 = vld [vmem:[#allocation7 + $0x2] ss:$0 sm:$0xff] }
 0x2a1   : > { %v4136_v25 = vpop.f32.mrf.mxu1  ;;  %v1357_v26 = vpack.c.bf16 %v1317_v20, %v1316_v18 }
 0x2a2   : > { %vm1255_vm5 = vcmp.gt.f32.partialorder %v1188_v16, 0.0  ;;  %v1288_v28 = vmul.f32 %v5486_v34, %v1188_v16  ;;  %v1199_v29 = vadd.f32 %v4136_v25, %v5482_v46  ;;  %v1322_v38 = vsel %vm1257_vm4, %v1196_v13, %v1290_v24  ;;  %4208 = vmatpush3.bf16.msra.mxu0 %v4558_v6 }
 0x2a3   : > { %v1190_v31 = vpop.f32.mrf.mxu1  ;;  %4177 = vmatprep.mubr.bf16.mxu1 %v1357_v26 }
 0x2a4   : > { %vm1258_vm6 = vcmp.gt.f32.partialorder %v1199_v29, 0.0  ;;  %v1291_v32 = vmul.f32 %v5486_v34, %v1199_v29  ;;  %v1191_v35 = vadd.f32 %v1190_v31, %v5482_v46  ;;  %4178 = vmatmul.mubr.bf16.gmra.mxu1 %v1358_v27  ;;  %v1320_v37 = vsel %vm1255_vm5, %v1188_v16, %v1288_v28 }
 0x2a5   : > { %v4139_v36 = vpop.f32.mrf.mxu1 }
 0x2a6   : > { %vm1256_vm7 = vcmp.gt.f32.partialorder %v1191_v35, 0.0  ;;  %v1289_v39 = vmul.f32 %v5486_v34, %v1191_v35  ;;  %v1212_v40 = vadd.f32 %v4139_v36, %v5482_v46  ;;  %v1323_v41 = vsel %vm1258_vm6, %v1199_v29, %v1291_v32 }
 0x2a7   : > { %v1203_v42 = vpop.f32.mrf.mxu1  ;;  %v1360_v45 = vpack.c.bf16 %v1323_v41, %v1322_v38 }
 0x2a8   : > { %v1204_v43 = vadd.f32 %v1203_v42, %v5482_v46  ;;  %v1321_v44 = vsel %vm1256_vm7, %v1191_v35, %v1289_v39  ;;  %v1294_v48 = vmul.f32 %v5486_v34, %v1212_v40  ;;  %vm1261_vm8 = vcmp.gt.f32.partialorder %v1212_v40, 0.0 }
 0x2a9   : > { %v4140_v49 = vpop.f32.mrf.mxu1  ;;  %v1359_v50 = vpack.c.bf16 %v1321_v44, %v1320_v37 }
 0x2aa   : > { %vm1259_vm9 = vcmp.gt.f32.partialorder %v1204_v43, 0.0  ;;  %v1292_v53 = vmul.f32 %v5486_v34, %v1204_v43  ;;  %v1215_v58 = vadd.f32 %v4140_v49, %v5482_v46  ;;  %v1326_v0 = vsel %vm1261_vm8, %v1212_v40, %v1294_v48 }
 0x2ab   : > { %v1206_v59 = vpop.f32.mrf.mxu1  ;;  %4181 = vmatprep.mubr.bf16.mxu1 %v1359_v50 }
 0x2ac   : > { %vm1262_vm10 = vcmp.gt.f32.partialorder %v1215_v58, 0.0  ;;  %v1295_v2 = vmul.f32 %v5486_v34, %v1215_v58  ;;  %v1207_v33 = vadd.f32 %v1206_v59, %v5482_v46  ;;  %4182 = vmatmul.mubr.bf16.gmra.mxu1 %v1360_v45  ;;  %v1324_v51 = vsel %vm1259_vm9, %v1204_v43, %v1292_v53 }
 0x2ad   : > { %v4143_v47 = vpop.f32.mrf.mxu1 }
 0x2ae   : > { %vm1260_vm11 = vcmp.gt.f32.partialorder %v1207_v33, 0.0  ;;  %v1293_v17 = vmul.f32 %v5486_v34, %v1207_v33  ;;  %v1228_v21 = vadd.f32 %v4143_v47, %v5482_v46  ;;  %v1327_v30 = vsel %vm1262_vm10, %v1215_v58, %v1295_v2 }
 0x2af   : > { %v1219_v52 = vpop.f32.mrf.mxu1  ;;  %v1362_v23 = vpack.c.bf16 %v1327_v30, %v1326_v0 }
 0x2b0   : > { %v1220_v4 = vadd.f32 %v1219_v52, %v5482_v46  ;;  %v1325_v19 = vsel %vm1260_vm11, %v1207_v33, %v1293_v17  ;;  %v1298_v54 = vmul.f32 %v5486_v34, %v1228_v21  ;;  %vm1265_vm12 = vcmp.gt.f32.partialorder %v1228_v21, 0.0 }
 0x2b1   : > { %v4144_v62 = vpop.f32.mrf.mxu1  ;;  %v1361_v55 = vpack.c.bf16 %v1325_v19, %v1324_v51 }
 0x2b2   : > { %v1296_v60 = vmul.f32 %v5486_v34, %v1220_v4  ;;  %v1231_v61 = vadd.f32 %v4144_v62, %v5482_v46  ;;  %vm1263_vm13 = vcmp.gt.f32.partialorder %v1220_v4, 0.0  ;;  %v1330_v3 = vsel %vm1265_vm12, %v1228_v21, %v1298_v54 }
 0x2b3   : > { %v1222_v63 = vpop.f32.mrf.mxu1  ;;  %4185 = vmatprep.mubr.bf16.mxu1 %v1361_v55 }
 0x2b4   : > { %vm1266_vm14 = vcmp.gt.f32.partialorder %v1231_v61, 0.0  ;;  %v1299_v1 = vmul.f32 %v5486_v34, %v1231_v61  ;;  %v1223_v5 = vadd.f32 %v1222_v63, %v5482_v46  ;;  %4186 = vmatmul.mubr.bf16.gmra.mxu1 %v1362_v23  ;;  %v1328_v8 = vsel %vm1263_vm13, %v1220_v4, %v1296_v60 }
 0x2b6   : > { %vm1264_vm15 = vcmp.gt.f32.partialorder %v1223_v5, 0.0  ;;  %v1297_v7 = vmul.f32 %v5486_v34, %v1223_v5  ;;  %v1331_v9 = vsel %vm1266_vm14, %v1231_v61, %v1299_v1  ;;  %v5560_v34 = vstv %s3771_s14  ;;  %s3572_s14 = sshll.u32 %s6105_s16, 4  ;;  %s6238_s14 = int_to_ptr.vmem [resolvable:$true] %s3572_s14 }
 0x2b7   : > { %v1364_v56 = vpack.c.bf16 %v1331_v9, %v1330_v3  ;;  %s4866_s1 = scalar_lea.vmem %s6238_s14, 8192  ;;  %p4873_p1 = scmp.lt.s32.totalorder %s6238_s14, %s4871_s24 }
 0x2b8   : > { %v1329_v10 = vsel %vm1264_vm15, %v1223_v5, %v1297_v7  ;;  %p4867_p2 = scmp.ne.s32.totalorder %s6238_s14, %s4866_s1  ;;  %p4874_p3 = scmp.lt.s32.totalorder %s4872_s27, %s4866_s1 }
 0x2b9   : > { %v1363_v11 = vpack.c.bf16 %v1329_v10, %v1328_v8 }
 0x2ba   : > { %p4868_p7 = pnand %p4867_p2, %p6327_p5  ;;  %p4875_p4 = por %p4874_p3, %p4873_p1 }
 0x2bb   : > { %4189 = vmatprep.mubr.bf16.mxu1 %v1363_v11 }
 0x2bc   : > { %4190 = vmatmul.mubr.bf16.gmra.mxu1 %v1364_v56  ;;  %p4869_p12 = pneg %p4868_p7 }
 0x2be   : > { %p4876_p6 = pnand %p4875_p4, %p4869_p12 }
 0x32c   : > { %v4163_v46 = vpop.f32.mrf.mxu1 }
 0x32d   : > { %v1456_v15 = vadd.f32 %v4163_v46, %v5556_v12 }
 0x32e   : > { %v1447_v13 = vpop.f32.mrf.mxu1 }
 0x32f   : > { %v1448_v14 = vadd.f32 %v1447_v13, %v5556_v12  ;;  %v1610_v26 = vmul.f32 %v5560_v34, %v1456_v15  ;;  %vm1577_vm2 = vcmp.gt.f32.partialorder %v1456_v15, 0.0 }
 0x330   : > { %v4164_v16 = vpop.f32.mrf.mxu1 }
 0x331   : > { %v1459_v18 = vadd.f32 %v4164_v16, %v5556_v12  ;;  %v1608_v22 = vmul.f32 %v5560_v34, %v1448_v14  ;;  %vm1575_vm1 = vcmp.gt.f32.partialorder %v1448_v14, 0.0  ;;  %v1642_v32 = vsel %vm1577_vm2, %v1456_v15, %v1610_v26 }
 0x332   : > { %v1450_v20 = vpop.f32.mrf.mxu1 }
 0x333   : > { %vm1578_vm0 = vcmp.gt.f32.partialorder %v1459_v18, 0.0  ;;  %v1611_v24 = vmul.f32 %v5560_v34, %v1459_v18  ;;  %v1451_v25 = vadd.f32 %v1450_v20, %v5556_v12  ;;  %v1640_v29 = vsel %vm1575_vm1, %v1448_v14, %v1608_v22 }
 0x335   : > { %vm1576_vm3 = vcmp.gt.f32.partialorder %v1451_v25, 0.0  ;;  %v1609_v27 = vmul.f32 %v5560_v34, %v1451_v25  ;;  %v1643_v28 = vsel %vm1578_vm0, %v1459_v18, %v1611_v24 }
 0x336   : > { %v1690_v36 = vpack.c.bf16 %v1643_v28, %v1642_v32 }
 0x337   : > { %v1641_v31 = vsel %vm1576_vm3, %v1451_v25, %v1609_v27 }
 0x338   : > { %v1689_v35 = vpack.c.bf16 %v1641_v31, %v1640_v29 }
 0x33a   : > { %4209 = vmatprep.mubr.bf16.mxu0 %v1689_v35 }
 0x33b   : > { %4210 = vmatmul.mubr.bf16.vlgmr.msra.gmra.mxu0 %v1690_v36 }
 0x33c   : > { %v4167_v37 = vpop.f32.mrf.mxu1 }
 0x33d   : > { %v1472_v40 = vadd.f32 %v4167_v37, %v5556_v12 }
 0x33e   : > { %v1463_v38 = vpop.f32.mrf.mxu1 }
 0x33f   : > { %v1464_v39 = vadd.f32 %v1463_v38, %v5556_v12  ;;  %v1614_v49 = vmul.f32 %v5560_v34, %v1472_v40  ;;  %vm1581_vm6 = vcmp.gt.f32.partialorder %v1472_v40, 0.0 }
 0x340   : > { %v4168_v41 = vpop.f32.mrf.mxu1 }
 0x341   : > { %v1475_v42 = vadd.f32 %v4168_v41, %v5556_v12  ;;  %v1612_v44 = vmul.f32 %v5560_v34, %v1464_v39  ;;  %vm1579_vm5 = vcmp.gt.f32.partialorder %v1464_v39, 0.0  ;;  %v1646_v33 = vsel %vm1581_vm6, %v1472_v40, %v1614_v49 }
 0x342   : > { %v1466_v43 = vpop.f32.mrf.mxu1 }
 0x343   : > { %vm1582_vm4 = vcmp.gt.f32.partialorder %v1475_v42, 0.0  ;;  %v1615_v45 = vmul.f32 %v5560_v34, %v1475_v42  ;;  %v1467_v48 = vadd.f32 %v1466_v43, %v5556_v12  ;;  %v1644_v58 = vsel %vm1579_vm5, %v1464_v39, %v1612_v44 }
 0x345   : > { %vm1580_vm7 = vcmp.gt.f32.partialorder %v1467_v48, 0.0  ;;  %v1613_v50 = vmul.f32 %v5560_v34, %v1467_v48  ;;  %v1647_v53 = vsel %vm1582_vm4, %v1475_v42, %v1615_v45 }
 0x346   : > { %v1692_v47 = vpack.c.bf16 %v1647_v53, %v1646_v33 }
 0x347   : > { %v1645_v59 = vsel %vm1580_vm7, %v1467_v48, %v1613_v50 }
 0x348   : > { %v1691_v2 = vpack.c.bf16 %v1645_v59, %v1644_v58 }
 0x34a   : > { %4213 = vmatprep.mubr.bf16.mxu0 %v1691_v2 }
 0x34b   : > { %4214 = vmatmul.mubr.bf16.gmra.mxu0 %v1692_v47 }
 0x34c   : > { %v4171_v51 = vpop.f32.mrf.mxu1 }
 0x34d   : > { %v1488_v21 = vadd.f32 %v4171_v51, %v5556_v12 }
 0x34e   : > { %v1479_v0 = vpop.f32.mrf.mxu1 }
 0x34f   : > { %v1480_v17 = vadd.f32 %v1479_v0, %v5556_v12  ;;  %v1618_v62 = vmul.f32 %v5560_v34, %v1488_v21  ;;  %vm1585_vm10 = vcmp.gt.f32.partialorder %v1488_v21, 0.0 }
 0x350   : > { %v4172_v30 = vpop.f32.mrf.mxu1 }
 0x351   : > { %v1491_v52 = vadd.f32 %v4172_v30, %v5556_v12  ;;  %v1616_v19 = vmul.f32 %v5560_v34, %v1480_v17  ;;  %vm1583_vm9 = vcmp.gt.f32.partialorder %v1480_v17, 0.0  ;;  %v1650_v1 = vsel %vm1585_vm10, %v1488_v21, %v1618_v62 }
 0x352   : > { %v1482_v4 = vpop.f32.mrf.mxu1 }
 0x353   : > { %vm1586_vm8 = vcmp.gt.f32.partialorder %v1491_v52, 0.0  ;;  %v1619_v23 = vmul.f32 %v5560_v34, %v1491_v52  ;;  %v1483_v54 = vadd.f32 %v1482_v4, %v5556_v12  ;;  %v1648_v60 = vsel %vm1583_vm9, %v1480_v17, %v1616_v19 }
 0x355   : > { %vm1584_vm11 = vcmp.gt.f32.partialorder %v1483_v54, 0.0  ;;  %v1617_v55 = vmul.f32 %v5560_v34, %v1483_v54  ;;  %v1651_v57 = vsel %vm1586_vm8, %v1491_v52, %v1619_v23 }
 0x356   : > { %v1694_v5 = vpack.c.bf16 %v1651_v57, %v1650_v1 }
 0x357   : > { %v1649_v61 = vsel %vm1584_vm11, %v1483_v54, %v1617_v55 }
 0x358   : > { %v1693_v63 = vpack.c.bf16 %v1649_v61, %v1648_v60 }
 0x35a   : > { %4217 = vmatprep.mubr.bf16.mxu0 %v1693_v63 }
 0x35b   : > { %4218 = vmatmul.mubr.bf16.gmra.mxu0 %v1694_v5 }
 0x35c   : > { %v4175_v3 = vpop.f32.mrf.mxu1 }
 0x35d   : > { %v1504_v8 = vadd.f32 %v4175_v3, %v5556_v12 }
 0x35e   : > { %v1495_v6 = vpop.f32.mrf.mxu1 }
 0x35f   : > { %v1496_v7 = vadd.f32 %v1495_v6, %v5556_v12  ;;  %v1622_v14 = vmul.f32 %v5560_v34, %v1504_v8  ;;  %vm1589_vm14 = vcmp.gt.f32.partialorder %v1504_v8, 0.0 }
 0x360   : > { %v4176_v9 = vpop.f32.mrf.mxu1 }
 0x361   : > { %v1507_v10 = vadd.f32 %v4176_v9, %v5556_v12  ;;  %v1620_v11 = vmul.f32 %v5560_v34, %v1496_v7  ;;  %vm1587_vm13 = vcmp.gt.f32.partialorder %v1496_v7, 0.0  ;;  %v1654_v29 = vsel %vm1589_vm14, %v1504_v8, %v1622_v14 }
 0x362   : > { %v1498_v56 = vpop.f32.mrf.mxu1 }
 0x363   : > { %vm1590_vm12 = vcmp.gt.f32.partialorder %v1507_v10, 0.0  ;;  %v1623_v46 = vmul.f32 %v5560_v34, %v1507_v10  ;;  %v1499_v13 = vadd.f32 %v1498_v56, %v5556_v12  ;;  %v1652_v24 = vsel %vm1587_vm13, %v1496_v7, %v1620_v11 }
 0x364   : > { %v4179_v15 = vpop.f32.mrf.mxu1 }
 0x365   : > { %vm1588_vm15 = vcmp.gt.f32.partialorder %v1499_v13, 0.0  ;;  %v1621_v16 = vmul.f32 %v5560_v34, %v1499_v13  ;;  %v1655_v20 = vsel %vm1590_vm12, %v1507_v10, %v1623_v46  ;;  %v1520_v26 = vadd.f32 %v4179_v15, %v5556_v12 }
 0x366   : > { %v1511_v18 = vpop.f32.mrf.mxu1  ;;  %v1696_v32 = vpack.c.bf16 %v1655_v20, %v1654_v29 }
 0x367   : > { %v1512_v22 = vadd.f32 %v1511_v18, %v5556_v12  ;;  %v1653_v25 = vsel %vm1588_vm15, %v1499_v13, %v1621_v16  ;;  %v1626_v39 = vmul.f32 %v5560_v34, %v1520_v26  ;;  %vm1593_vm2 = vcmp.gt.f32.partialorder %v1520_v26, 0.0 }
 0x368   : > { %v4180_v27 = vpop.f32.mrf.mxu1  ;;  %v1695_v28 = vpack.c.bf16 %v1653_v25, %v1652_v24 }
 0x369   : > { %v1523_v31 = vadd.f32 %v4180_v27, %v5556_v12  ;;  %v1624_v36 = vmul.f32 %v5560_v34, %v1512_v22  ;;  %vm1591_vm1 = vcmp.gt.f32.partialorder %v1512_v22, 0.0  ;;  %v1658_v58 = vsel %vm1593_vm2, %v1520_v26, %v1626_v39  ;;  %v4559_v39 = vld [vmem:[%s6291_s7 + $0x18] sm:$0xff]  }
 0x36a   : > { %v1514_v35 = vpop.f32.mrf.mxu1  ;;  %4221 = vmatprep.mubr.bf16.mxu0 %v1695_v28  ;;  %4241 = vmatprep.subr.bf16.mxu1 %v4559_v39 }
 0x36b   : > { %vm1594_vm0 = vcmp.gt.f32.partialorder %v1523_v31, 0.0  ;;  %v1627_v37 = vmul.f32 %v5560_v34, %v1523_v31  ;;  %v1515_v38 = vadd.f32 %v1514_v35, %v5556_v12  ;;  %4222 = vmatmul.mubr.bf16.gmra.mxu0 %v1696_v32  ;;  %v1656_v45 = vsel %vm1591_vm1, %v1512_v22, %v1624_v36  ;;  %4242 = vmatpush3.bf16.msra.mxu1 %v4559_v39 }
 0x36c   : > { %v4183_v40 = vpop.f32.mrf.mxu1 }
 0x36d   : > { %vm1592_vm3 = vcmp.gt.f32.partialorder %v1515_v38, 0.0  ;;  %v1625_v41 = vmul.f32 %v5560_v34, %v1515_v38  ;;  %v1659_v43 = vsel %vm1594_vm0, %v1523_v31, %v1627_v37  ;;  %v1536_v49 = vadd.f32 %v4183_v40, %v5556_v12  ;;  %v5633_v40 = vld [vmem:[#allocation7 + $0x3] ss:$0 sm:$0xff] }
 0x36e   : > { %v1527_v42 = vpop.f32.mrf.mxu1  ;;  %v1698_v2 = vpack.c.bf16 %v1659_v43, %v1658_v58  ;;  %vm1946_vm0 = vcmask 523264  }
 0x36f   : > { %v1528_v44 = vadd.f32 %v1527_v42, %v5556_v12  ;;  %v1657_v48 = vsel %vm1592_vm3, %v1515_v38, %v1625_v41  ;;  %v1630_v17 = vmul.f32 %v5560_v34, %v1536_v49  ;;  %vm1597_vm6 = vcmp.gt.f32.partialorder %v1536_v49, 0.0 }
 0x370   : > { %v4184_v50 = vpop.f32.mrf.mxu1  ;;  %v1697_v53 = vpack.c.bf16 %v1657_v48, %v1656_v45 }
 0x371   : > { %v1539_v59 = vadd.f32 %v4184_v50, %v5556_v12  ;;  %v1628_v47 = vmul.f32 %v5560_v34, %v1528_v44  ;;  %vm1595_vm5 = vcmp.gt.f32.partialorder %v1528_v44, 0.0  ;;  %v1662_v60 = vsel %vm1597_vm6, %v1536_v49, %v1630_v17 }
 0x372   : > { %v1530_v33 = vpop.f32.mrf.mxu1  ;;  %4225 = vmatprep.mubr.bf16.mxu0 %v1697_v53 }
 0x373   : > { %vm1598_vm4 = vcmp.gt.f32.partialorder %v1539_v59, 0.0  ;;  %v1631_v51 = vmul.f32 %v5560_v34, %v1539_v59  ;;  %v1531_v0 = vadd.f32 %v1530_v33, %v5556_v12  ;;  %4226 = vmatmul.mubr.bf16.gmra.mxu0 %v1698_v2  ;;  %v1660_v54 = vsel %vm1595_vm5, %v1528_v44, %v1628_v47 }
 0x374   : > { %v4187_v21 = vpop.f32.mrf.mxu1 }
 0x375   : > { %vm1596_vm7 = vcmp.gt.f32.partialorder %v1531_v0, 0.0  ;;  %v1629_v30 = vmul.f32 %v5560_v34, %v1531_v0  ;;  %v1552_v52 = vadd.f32 %v4187_v21, %v5556_v12  ;;  %v1663_v19 = vsel %vm1598_vm4, %v1539_v59, %v1631_v51 }
 0x376   : > { %v1543_v4 = vpop.f32.mrf.mxu1  ;;  %v1700_v1 = vpack.c.bf16 %v1663_v19, %v1662_v60 }
 0x377   : > { %v1544_v23 = vadd.f32 %v1543_v4, %v5556_v12  ;;  %v1661_v62 = vsel %vm1596_vm7, %v1531_v0, %v1629_v30  ;;  %v1634_v5 = vmul.f32 %v5560_v34, %v1552_v52  ;;  %vm1601_vm9 = vcmp.gt.f32.partialorder %v1552_v52, 0.0 }
 0x378   : > { %v4188_v55 = vpop.f32.mrf.mxu1  ;;  %v1699_v57 = vpack.c.bf16 %v1661_v62, %v1660_v54 }
 0x379   : > { %v1632_v61 = vmul.f32 %v5560_v34, %v1544_v23  ;;  %v1555_v63 = vadd.f32 %v4188_v55, %v5556_v12  ;;  %vm1599_vm8 = vcmp.gt.f32.partialorder %v1544_v23, 0.0  ;;  %v1666_v46 = vsel %vm1601_vm9, %v1552_v52, %v1634_v5 }
 0x37a   : > { %v1546_v3 = vpop.f32.mrf.mxu1  ;;  %4229 = vmatprep.mubr.bf16.mxu0 %v1699_v57 }
 0x37b   : > { %vm1602_vm10 = vcmp.gt.f32.partialorder %v1555_v63, 0.0  ;;  %v1635_v6 = vmul.f32 %v5560_v34, %v1555_v63  ;;  %v1547_v7 = vadd.f32 %v1546_v3, %v5556_v12  ;;  %4230 = vmatmul.mubr.bf16.gmra.mxu0 %v1700_v1  ;;  %v1664_v56 = vsel %vm1599_vm8, %v1544_v23, %v1632_v61 }
 0x37c   : > { %v4191_v8 = vpop.f32.mrf.mxu1 }
 0x37d   : > { %vm1600_vm11 = vcmp.gt.f32.partialorder %v1547_v7, 0.0  ;;  %v1633_v9 = vmul.f32 %v5560_v34, %v1547_v7  ;;  %v1568_v10 = vadd.f32 %v4191_v8, %v5556_v12  ;;  %v1667_v13 = vsel %vm1602_vm10, %v1555_v63, %v1635_v6 }
 0x37e   : > { %v1559_v11 = vpop.f32.mrf.mxu1  ;;  %v1702_v25 = vpack.c.bf16 %v1667_v13, %v1666_v46 }
 0x37f   : > { %v1560_v14 = vadd.f32 %v1559_v11, %v5556_v12  ;;  %v1665_v15 = vsel %vm1600_vm11, %v1547_v7, %v1633_v9  ;;  %v1638_v16 = vmul.f32 %v5560_v34, %v1568_v10  ;;  %vm1605_vm12 = vcmp.gt.f32.partialorder %v1568_v10, 0.0 }
 0x380   : > { %v4192_v18 = vpop.f32.mrf.mxu1  ;;  %v1701_v20 = vpack.c.bf16 %v1665_v15, %v1664_v56  ;;  %v4562_v56 = vld [vmem:[%s6291_s7] sm:$0xff]  }
 0x381   : > { %v1636_v22 = vmul.f32 %v5560_v34, %v1560_v14  ;;  %v1571_v24 = vadd.f32 %v4192_v18, %v5556_v12  ;;  %vm1603_vm13 = vcmp.gt.f32.partialorder %v1560_v14, 0.0  ;;  %v1670_v29 = vsel %vm1605_vm12, %v1568_v10, %v1638_v16 }
 0x382   : > { %v1562_v26 = vpop.f32.mrf.mxu1  ;;  %4233 = vmatprep.mubr.bf16.mxu0 %v1701_v20 }
 0x383   : > { %vm1606_vm14 = vcmp.gt.f32.partialorder %v1571_v24, 0.0  ;;  %v1639_v27 = vmul.f32 %v5560_v34, %v1571_v24  ;;  %v1563_v28 = vadd.f32 %v1562_v26, %v5556_v12  ;;  %4234 = vmatmul.mubr.bf16.gmra.mxu0 %v1702_v25  ;;  %v1668_v32 = vsel %vm1603_vm13, %v1560_v14, %v1636_v22  ;;  %v4560_v12 = vld [vmem:[%s6291_s7 + $0x10] sm:$0xff]  }
 0x384   : > { %4243 = vmatprep.subr.bf16.mxu1 %v4560_v12 }
 0x385   : > { %vm1604_vm15 = vcmp.gt.f32.partialorder %v1563_v28, 0.0  ;;  %v1637_v31 = vmul.f32 %v5560_v34, %v1563_v28  ;;  %v1671_v35 = vsel %vm1606_vm14, %v1571_v24, %v1639_v27  ;;  %v4561_v34 = vld [vmem:[%s6291_s7 + $0x8] sm:$0xff]   ;;  %4244 = vmatpush3.bf16.msra.mxu1 %v4560_v12 }
 0x386   : > { %v1704_v37 = vpack.c.bf16 %v1671_v35, %v1670_v29  ;;  %4245 = vmatprep.subr.bf16.mxu1 %v4561_v34 }
 0x387   : > { %v1669_v36 = vsel %vm1604_vm15, %v1563_v28, %v1637_v31 }
 0x388   : > { %v1703_v38 = vpack.c.bf16 %v1669_v36, %v1668_v32 }
 0x389   : > { %4246 = vmatpush3.bf16.msra.mxu1 %v4561_v34 }
 0x38a   : > { %4237 = vmatprep.mubr.bf16.mxu0 %v1703_v38  ;;  %4247 = vmatprep.subr.bf16.mxu1 %v4562_v56 }
 0x38b   : > { %4238 = vmatmul.mubr.bf16.gmra.mxu0 %v1704_v37 }
 0x38d   : > { %4248 = vmatpush3.bf16.msra.mxu1 %v4562_v56 }
 0x3fb   : > { %v4211_v41 = vpop.f32.mrf.mxu0 }
 0x3fc   : > { %v5636_v42 = vadd.f32 %v4211_v41, %v5633_v40 }
 0x3fd   : > { %v1787_v43 = vpop.f32.mrf.mxu0 }
 0x3fe   : > { %v5639_v44 = vadd.f32 %v1787_v43, %v5633_v40  ;;  %v1916_v45 = vmul.f32 %v5636_v42, %v5636_v42 }
 0x3ff   : > { %v4212_v48 = vpop.f32.mrf.mxu0 }
 0x400   : > { %v5644_v49 = vadd.f32 %v4212_v48, %v5633_v40  ;;  %v1953_v50 = vsel %vm1946_vm0, %v1916_v45, 0.0  ;;  %v1914_v53 = vmul.f32 %v5639_v44, %v5639_v44 }
 0x401   : > { %1954 = vadd.xlane.f32.xlu1 %v1953_v50  ;;  %v1790_v58 = vpop.f32.mrf.mxu0 }
 0x402   : > { %v5650_v59 = vadd.f32 %v1790_v58, %v5633_v40  ;;  %v1947_v2 = vsel %vm1946_vm0, %v1914_v53, 0.0  ;;  %v1917_v33 = vmul.f32 %v5644_v49, %v5644_v49 }
 0x403   : > { %1948 = vadd.xlane.f32.xlu0 %v1947_v2 }
 0x404   : > { %v1956_v47 = vsel %vm1946_vm0, %v1917_v33, 0.0  ;;  %v1915_v51 = vmul.f32 %v5650_v59, %v5650_v59 }
 0x405   : > { %1957 = vadd.xlane.f32.xlu1 %v1956_v47 }
 0x406   : > { %v1950_v0 = vsel %vm1946_vm0, %v1915_v51, 0.0 }
 0x407   : > { %1951 = vadd.xlane.f32.xlu0 %v1950_v0 }
 0x40b   : > { %v4215_v17 = vpop.f32.mrf.mxu0 }
 0x40c   : > { %v5660_v30 = vadd.f32 %v4215_v17, %v5633_v40 }
 0x40d   : > { %v1803_v21 = vpop.f32.mrf.mxu0 }
 0x40e   : > { %v5663_v52 = vadd.f32 %v1803_v21, %v5633_v40  ;;  %v1920_v57 = vmul.f32 %v5660_v30, %v5660_v30 }
 0x40f   : > { %v4216_v4 = vpop.f32.mrf.mxu0 }
 0x410   : > { %v1918_v19 = vmul.f32 %v5663_v52, %v5663_v52  ;;  %v5668_v54 = vadd.f32 %v4216_v4, %v5633_v40  ;;  %v1965_v63 = vsel %vm1946_vm0, %v1920_v57, 0.0 }
 0x411   : > { %v1806_v23 = vpop.f32.mrf.mxu0 }
 0x412   : > { %v5671_v62 = vadd.f32 %v1806_v23, %v5633_v40  ;;  %v1959_v55 = vsel %vm1946_vm0, %v1918_v19, 0.0  ;;  %v1921_v1 = vmul.f32 %v5668_v54, %v5668_v54 }
 0x413   : > { %1960 = vadd.xlane.f32.xlu0 %v1959_v55 }
 0x414   : > { %v1919_v60 = vmul.f32 %v5671_v62, %v5671_v62  ;;  %v1968_v5 = vsel %vm1946_vm0, %v1921_v1, 0.0 }
 0x416   : > { %v1962_v61 = vsel %vm1946_vm0, %v1919_v60, 0.0 }
 0x417   : > { %1963 = vadd.xlane.f32.xlu1 %v1962_v61  ;;  %1966 = vadd.xlane.f32.xlu0 %v1965_v63 }
 0x41b   : > { %v4219_v3 = vpop.f32.mrf.mxu0  ;;  %1969 = vadd.xlane.f32.xlu1 %v1968_v5 }
 0x41c   : > { %v5684_v7 = vadd.f32 %v4219_v3, %v5633_v40 }
 0x41d   : > { %v1819_v6 = vpop.f32.mrf.mxu0 }
 0x41e   : > { %v5687_v8 = vadd.f32 %v1819_v6, %v5633_v40  ;;  %v1924_v15 = vmul.f32 %v5684_v7, %v5684_v7 }
 0x41f   : > { %v4220_v9 = vpop.f32.mrf.mxu0 }
 0x420   : > { %v1922_v10 = vmul.f32 %v5687_v8, %v5687_v8  ;;  %v5695_v46 = vadd.f32 %v4220_v9, %v5633_v40  ;;  %v1977_v20 = vsel %vm1946_vm0, %v1924_v15, 0.0 }
 0x421   : > { %v1822_v11 = vpop.f32.mrf.mxu0 }
 0x422   : > { %v5698_v13 = vadd.f32 %v1822_v11, %v5633_v40  ;;  %v1971_v14 = vsel %vm1946_vm0, %v1922_v10, 0.0  ;;  %v1925_v22 = vmul.f32 %v5695_v46, %v5695_v46 }
 0x423   : > { %1972 = vadd.xlane.f32.xlu0 %v1971_v14 }
 0x424   : > { %v1923_v16 = vmul.f32 %v5698_v13, %v5698_v13  ;;  %v1980_v24 = vsel %vm1946_vm0, %v1925_v22, 0.0 }
 0x426   : > { %v1974_v18 = vsel %vm1946_vm0, %v1923_v16, 0.0 }
 0x427   : > { %1975 = vadd.xlane.f32.xlu1 %v1974_v18  ;;  %1978 = vadd.xlane.f32.xlu0 %v1977_v20 }
 0x42b   : > { %v4223_v25 = vpop.f32.mrf.mxu0  ;;  %1981 = vadd.xlane.f32.xlu1 %v1980_v24 }
 0x42c   : > { %v5711_v27 = vadd.f32 %v4223_v25, %v5633_v40 }
 0x42d   : > { %v1835_v26 = vpop.f32.mrf.mxu0 }
 0x42e   : > { %v5714_v28 = vadd.f32 %v1835_v26, %v5633_v40  ;;  %v1928_v38 = vmul.f32 %v5711_v27, %v5711_v27 }
 0x42f   : > { %v4224_v29 = vpop.f32.mrf.mxu0 }
 0x430   : > { %v1926_v31 = vmul.f32 %v5714_v28, %v5714_v28  ;;  %v5719_v35 = vadd.f32 %v4224_v29, %v5633_v40  ;;  %v1989_v48 = vsel %vm1946_vm0, %v1928_v38, 0.0 }
 0x431   : > { %v1838_v32 = vpop.f32.mrf.mxu0 }
 0x432   : > { %v5722_v36 = vadd.f32 %v1838_v32, %v5633_v40  ;;  %v1983_v37 = vsel %vm1946_vm0, %v1926_v31, 0.0  ;;  %v1929_v50 = vmul.f32 %v5719_v35, %v5719_v35 }
 0x433   : > { %v4227_v39 = vpop.f32.mrf.mxu0  ;;  %1984 = vadd.xlane.f32.xlu0 %v1983_v37 }
 0x434   : > { %v1927_v12 = vmul.f32 %v5722_v36, %v5722_v36  ;;  %v5730_v34 = vadd.f32 %v4227_v39, %v5633_v40  ;;  %v1992_v0 = vsel %vm1946_vm0, %v1929_v50, 0.0 }
 0x435   : > { %v1851_v41 = vpop.f32.mrf.mxu0 }
 0x436   : > { %v5733_v43 = vadd.f32 %v1851_v41, %v5633_v40  ;;  %v1986_v45 = vsel %vm1946_vm0, %v1927_v12, 0.0  ;;  %v1932_v33 = vmul.f32 %v5730_v34, %v5730_v34 }
 0x437   : > { %v4228_v53 = vpop.f32.mrf.mxu0  ;;  %1987 = vadd.xlane.f32.xlu1 %v1986_v45  ;;  %1990 = vadd.xlane.f32.xlu0 %v1989_v48 }
 0x438   : > { %v1930_v58 = vmul.f32 %v5733_v43, %v5733_v43  ;;  %v5744_v47 = vadd.f32 %v4228_v53, %v5633_v40  ;;  %v2001_v23 = vsel %vm1946_vm0, %v1932_v33, 0.0 }
 0x439   : > { %v1854_v2 = vpop.f32.mrf.mxu0 }
 0x43a   : > { %v5747_v51 = vadd.f32 %v1854_v2, %v5633_v40  ;;  %v1995_v17 = vsel %vm1946_vm0, %v1930_v58, 0.0  ;;  %v1933_v61 = vmul.f32 %v5744_v47, %v5744_v47 }
 0x43b   : > { %v4231_v21 = vpop.f32.mrf.mxu0  ;;  %1993 = vadd.xlane.f32.xlu1 %v1992_v0  ;;  %1996 = vadd.xlane.f32.xlu0 %v1995_v17 }
 0x43c   : > { %v1931_v4 = vmul.f32 %v5747_v51, %v5747_v51  ;;  %v5755_v55 = vadd.f32 %v4231_v21, %v5633_v40  ;;  %v2004_v9 = vsel %vm1946_vm0, %v1933_v61, 0.0 }
 0x43d   : > { %v1867_v19 = vpop.f32.mrf.mxu0 }
 0x43e   : > { %v5758_v57 = vadd.f32 %v1867_v19, %v5633_v40  ;;  %v1998_v60 = vsel %vm1946_vm0, %v1931_v4, 0.0  ;;  %v1936_v56 = vmul.f32 %v5755_v55, %v5755_v55 }
 0x43f   : > { %v4232_v63 = vpop.f32.mrf.mxu0  ;;  %1999 = vadd.xlane.f32.xlu1 %v1998_v60  ;;  %2002 = vadd.xlane.f32.xlu0 %v2001_v23 }
 0x440   : > { %v1934_v1 = vmul.f32 %v5758_v57, %v5758_v57  ;;  %v5766_v5 = vadd.f32 %v4232_v63, %v5633_v40  ;;  %v2013_v24 = vsel %vm1946_vm0, %v1936_v56, 0.0  ;;  %v4565_v56 = vld [vmem:[#allocation12 + $0x28] sm:$0xff]  }
 0x441   : > { %v1870_v3 = vpop.f32.mrf.mxu0 }
 0x442   : > { %v5769_v6 = vadd.f32 %v1870_v3, %v5633_v40  ;;  %v2007_v10 = vsel %vm1946_vm0, %v1934_v1, 0.0  ;;  %v1937_v16 = vmul.f32 %v5766_v5, %v5766_v5 }
 0x443   : > { %v4235_v11 = vpop.f32.mrf.mxu0  ;;  %2005 = vadd.xlane.f32.xlu1 %v2004_v9  ;;  %2008 = vadd.xlane.f32.xlu0 %v2007_v10  ;;  %v4563_v9 = vld [vmem:[#allocation12 + $0x38] sm:$0xff]   ;;  %v4564_v10 = vld [vmem:[#allocation12 + $0x30] sm:$0xff]  }
 0x444   : > { %v1935_v14 = vmul.f32 %v5769_v6, %v5769_v6  ;;  %v5780_v18 = vadd.f32 %v4235_v11, %v5633_v40  ;;  %v2016_v31 = vsel %vm1946_vm0, %v1937_v16, 0.0  ;;  %4281 = vmatprep.subr.bf16.mxu0 %v4563_v9  ;;  %v4566_v11 = vld [vmem:[#allocation12 + $0x20] sm:$0xff]  }
 0x445   : > { %v1883_v15 = vpop.f32.mrf.mxu0  ;;  %4282 = vmatpush3.bf16.msra.mxu0 %v4563_v9 }
 0x446   : > { %v5783_v20 = vadd.f32 %v1883_v15, %v5633_v40  ;;  %v2010_v22 = vsel %vm1946_vm0, %v1935_v14, 0.0  ;;  %v1940_v39 = vmul.f32 %v5780_v18, %v5780_v18  ;;  %4283 = vmatprep.subr.bf16.mxu0 %v4564_v10  ;;  %v4567_v14 = vld [vmem:[#allocation12 + $0x18] sm:$0xff]   ;;  %v4568_v15 = vld [vmem:[#allocation12 + $0x10] sm:$0xff]  }
 0x447   : > { %v4236_v25 = vpop.f32.mrf.mxu0  ;;  %2011 = vadd.xlane.f32.xlu1 %v2010_v22  ;;  %2014 = vadd.xlane.f32.xlu0 %v2013_v24 }
 0x448   : > { %v1938_v26 = vmul.f32 %v5783_v20, %v5783_v20  ;;  %v5791_v32 = vadd.f32 %v4236_v25, %v5633_v40  ;;  %v2025_v58 = vsel %vm1946_vm0, %v1940_v39, 0.0 }
 0x449   : > { %v1886_v29 = vpop.f32.mrf.mxu0  ;;  %4284 = vmatpush3.bf16.msra.mxu0 %v4564_v10 }
 0x44a   : > { %v5794_v37 = vadd.f32 %v1886_v29, %v5633_v40  ;;  %v2019_v38 = vsel %vm1946_vm0, %v1938_v26, 0.0  ;;  %v1941_v2 = vmul.f32 %v5791_v32, %v5791_v32  ;;  %4285 = vmatprep.subr.bf16.mxu0 %v4565_v56 }
 0x44b   : > { %v4239_v12 = vpop.f32.mrf.mxu0  ;;  %2017 = vadd.xlane.f32.xlu1 %v2016_v31  ;;  %2020 = vadd.xlane.f32.xlu0 %v2019_v38 }
 0x44c   : > { %v5800_v41 = vadd.f32 %v4239_v12, %v5633_v40  ;;  %v1939_v45 = vmul.f32 %v5794_v37, %v5794_v37  ;;  %v2028_v23 = vsel %vm1946_vm0, %v1941_v2, 0.0 }
 0x44d   : > { %v1899_v48 = vpop.f32.mrf.mxu0  ;;  %4286 = vmatpush3.bf16.msra.mxu0 %v4565_v56 }
 0x44e   : > { %v5805_v50 = vadd.f32 %v1899_v48, %v5633_v40  ;;  %v2022_v53 = vsel %vm1946_vm0, %v1939_v45, 0.0  ;;  %v1944_v17 = vmul.f32 %v5800_v41, %v5800_v41  ;;  %4287 = vmatprep.subr.bf16.mxu0 %v4566_v11 }
 0x44f   : > { %v4240_v33 = vpop.f32.mrf.mxu0  ;;  %2023 = vadd.xlane.f32.xlu1 %v2022_v53  ;;  %2026 = vadd.xlane.f32.xlu0 %v2025_v58 }
 0x450   : > { %v1942_v0 = vmul.f32 %v5805_v50, %v5805_v50  ;;  %v5816_v4 = vadd.f32 %v4240_v33, %v5633_v40  ;;  %v2037_v63 = vsel %vm1946_vm0, %v1944_v17, 0.0 }
 0x451   : > { %v1902_v21 = vpop.f32.mrf.mxu0  ;;  %4288 = vmatpush3.bf16.msra.mxu0 %v4566_v11 }
 0x452   : > { %v5819_v19 = vadd.f32 %v1902_v21, %v5633_v40  ;;  %v2031_v60 = vsel %vm1946_vm0, %v1942_v0, 0.0  ;;  %v1945_v3 = vmul.f32 %v5816_v4, %v5816_v4  ;;  %4289 = vmatprep.subr.bf16.mxu0 %v4567_v14 }
 0x453   : > { %2029 = vadd.xlane.f32.xlu1 %v2028_v23  ;;  %2032 = vadd.xlane.f32.xlu0 %v2031_v60 }
 0x454   : > { %v1943_v61 = vmul.f32 %v5819_v19, %v5819_v19  ;;  %v2040_v40 = vsel %vm1946_vm0, %v1945_v3, 0.0 }
 0x455   : > { %4290 = vmatpush3.bf16.msra.mxu0 %v4567_v14 }
 0x456   : > { %v2034_v1 = vsel %vm1946_vm0, %v1943_v61, 0.0  ;;  %4291 = vmatprep.subr.bf16.mxu0 %v4568_v15 }
 0x457   : > { %2035 = vadd.xlane.f32.xlu1 %v2034_v1  ;;  %2038 = vadd.xlane.f32.xlu0 %v2037_v63 }
 0x459   : > { %4292 = vmatpush3.bf16.msra.mxu0 %v4568_v15 }
 0x45b   : > { %2041 = vadd.xlane.f32.xlu1 %v2040_v40 }
 0x48a   : > { %v1955_v16 = vpop.xlane.xlu1 %1954 }
 0x48b   : > { %v2045_v25 = vmax.f32 %v1955_v16, 1e-24 }
 0x48c   : > { %v1949_v22 = vpop.xlane.xlu0 %1948 }
 0x48d   : > { %v2043_v24 = vmax.f32 %v1949_v22, 1e-24 }
 0x48e   : > { %v1958_v26 = vpop.xlane.xlu1 %1957 }
 0x48f   : > { %v2046_v29 = vmax.f32 %v1958_v26, 1e-24  ;;  %4603 = vrsqrt.f32 %v2043_v24 }
 0x490   : > { %v1952_v31 = vpop.xlane.xlu0 %1951 }
 0x491   : > { %4605 = vrsqrt.f32 %v2046_v29  ;;  %v2044_v38 = vmax.f32 %v1952_v31, 1e-24 }
 0x492   : > { %4607 = vrsqrt.f32 %v2045_v25 }
 0x493   : > { %4609 = vrsqrt.f32 %v2044_v38 }
 0x49c   : > { %v1961_v39 = vpop.xlane.xlu0 %1960  ;;  %v4604_v12 = vpop.eup %4603 }
 0x49d   : > { %v2047_v45 = vmax.f32 %v1961_v39, 1e-24  ;;  %v2107_v17 = vmul.f32 %v4604_v12, %v5639_v44 }
 0x49e   : > { %v4606_v48 = vpop.eup %4605 }
 0x49f   : > { %v4608_v53 = vpop.eup %4607  ;;  %v2110_v2 = vmul.f32 %v4606_v48, %v5644_v49  ;;  %4611 = vrsqrt.f32 %v2047_v45 }
 0x4a0   : > { %v4610_v58 = vpop.eup %4609  ;;  %v1964_v33 = vpop.xlane.xlu1 %1963  ;;  %v2109_v61 = vmul.f32 %v4608_v53, %v5636_v42 }
 0x4a1   : > { %v1967_v0 = vpop.xlane.xlu0 %1966  ;;  %v2048_v21 = vmax.f32 %v1964_v33, 1e-24  ;;  %v2108_v60 = vmul.f32 %v4610_v58, %v5650_v59 }
 0x4a2   : > { %v2049_v23 = vmax.f32 %v1967_v0, 1e-24  ;;  %v2149_v1 = vpack.c.bf16 %v2110_v2, %v2109_v61 }
 0x4a3   : > { %4613 = vrsqrt.f32 %v2048_v21  ;;  %v2148_v63 = vpack.c.bf16 %v2108_v60, %v2107_v17 }
 0x4a4   : > { %v1970_v3 = vpop.xlane.xlu1 %1969  ;;  %4615 = vrsqrt.f32 %v2049_v23 }
 0x4a5   : > { %v2050_v40 = vmax.f32 %v1970_v3, 1e-24  ;;  %4249 = vmatprep.mubr.msk.bf16.mxu1 %vm1946_vm0, %v2148_v63 }
 0x4a6   : > { %4250 = vmatmul.mubr.msk.bf16.vlgmr.msra.gmra.mxu1 %vm1946_vm0, %v2149_v1 }
 0x4a7   : > { %4617 = vrsqrt.f32 %v2050_v40 }
 0x4ac   : > { %v1973_v49 = vpop.xlane.xlu0 %1972  ;;  %v4612_v9 = vpop.eup %4611 }
 0x4ad   : > { %v2051_v44 = vmax.f32 %v1973_v49, 1e-24  ;;  %v2111_v14 = vmul.f32 %v4612_v9, %v5663_v52 }
 0x4af   : > { %4619 = vrsqrt.f32 %v2051_v44 }
 0x4b0   : > { %v4614_v10 = vpop.eup %4613  ;;  %v1976_v56 = vpop.xlane.xlu1 %1975 }
 0x4b1   : > { %v1979_v59 = vpop.xlane.xlu0 %1978  ;;  %v2052_v11 = vmax.f32 %v1976_v56, 1e-24  ;;  %v2112_v15 = vmul.f32 %v4614_v10, %v5671_v62  ;;  %v4616_v16 = vpop.eup %4615 }
 0x4b2   : > { %v2053_v42 = vmax.f32 %v1979_v59, 1e-24  ;;  %v2113_v29 = vmul.f32 %v4616_v16, %v5660_v30 }
 0x4b3   : > { %4621 = vrsqrt.f32 %v2052_v11  ;;  %v2150_v22 = vpack.c.bf16 %v2112_v15, %v2111_v14 }
 0x4b4   : > { %v4618_v24 = vpop.eup %4617  ;;  %v1982_v25 = vpop.xlane.xlu1 %1981  ;;  %4623 = vrsqrt.f32 %v2053_v42 }
 0x4b5   : > { %v2054_v26 = vmax.f32 %v1982_v25, 1e-24  ;;  %4253 = vmatprep.mubr.msk.bf16.mxu1 %vm1946_vm0, %v2150_v22  ;;  %v2114_v31 = vmul.f32 %v4618_v24, %v5668_v54 }
 0x4b7   : > { %4625 = vrsqrt.f32 %v2054_v26  ;;  %v2151_v38 = vpack.c.bf16 %v2114_v31, %v2113_v29 }
 0x4b9   : > { %4254 = vmatmul.mubr.msk.bf16.gmra.mxu1 %vm1946_vm0, %v2151_v38 }
 0x4bc   : > { %v1985_v52 = vpop.xlane.xlu0 %1984  ;;  %v4620_v39 = vpop.eup %4619 }
 0x4bd   : > { %v2055_v62 = vmax.f32 %v1985_v52, 1e-24  ;;  %v2115_v53 = vmul.f32 %v4620_v39, %v5687_v8 }
 0x4bf   : > { %4627 = vrsqrt.f32 %v2055_v62 }
 0x4c0   : > { %v4622_v12 = vpop.eup %4621  ;;  %v1988_v45 = vpop.xlane.xlu1 %1987 }
 0x4c1   : > { %v1991_v48 = vpop.xlane.xlu0 %1990  ;;  %v2056_v58 = vmax.f32 %v1988_v45, 1e-24  ;;  %v2116_v33 = vmul.f32 %v4622_v12, %v5698_v13  ;;  %v4624_v30 = vpop.eup %4623 }
 0x4c2   : > { %v2057_v2 = vmax.f32 %v1991_v48, 1e-24  ;;  %v2117_v61 = vmul.f32 %v4624_v30, %v5684_v7 }
 0x4c3   : > { %4629 = vrsqrt.f32 %v2056_v58  ;;  %v2152_v54 = vpack.c.bf16 %v2116_v33, %v2115_v53 }
 0x4c4   : > { %v4626_v0 = vpop.eup %4625  ;;  %4631 = vrsqrt.f32 %v2057_v2  ;;  %v1994_v17 = vpop.xlane.xlu1 %1993 }
 0x4c5   : > { %v1997_v21 = vpop.xlane.xlu0 %1996  ;;  %v2058_v23 = vmax.f32 %v1994_v17, 1e-24  ;;  %4257 = vmatprep.mubr.msk.bf16.mxu1 %vm1946_vm0, %v2152_v54  ;;  %v2118_v8 = vmul.f32 %v4626_v0, %v5695_v46 }
 0x4c6   : > { %v2059_v60 = vmax.f32 %v1997_v21, 1e-24 }
 0x4c7   : > { %4633 = vrsqrt.f32 %v2058_v23  ;;  %v2153_v63 = vpack.c.bf16 %v2118_v8, %v2117_v61 }
 0x4c8   : > { %4635 = vrsqrt.f32 %v2059_v60  ;;  %v2000_v1 = vpop.xlane.xlu1 %1999 }
 0x4c9   : > { %v2003_v13 = vpop.xlane.xlu0 %2002  ;;  %v2060_v3 = vmax.f32 %v2000_v1, 1e-24  ;;  %4258 = vmatmul.mubr.msk.bf16.gmra.mxu1 %vm1946_vm0, %v2153_v63 }
 0x4ca   : > { %v2061_v40 = vmax.f32 %v2003_v13, 1e-24 }
 0x4cb   : > { %4637 = vrsqrt.f32 %v2060_v3 }
 0x4cc   : > { %4639 = vrsqrt.f32 %v2061_v40  ;;  %v2006_v49 = vpop.xlane.xlu1 %2005  ;;  %v4628_v56 = vpop.eup %4627 }
 0x4cd   : > { %v2009_v44 = vpop.xlane.xlu0 %2008  ;;  %v2062_v9 = vmax.f32 %v2006_v49, 1e-24  ;;  %v2119_v15 = vmul.f32 %v4628_v56, %v5714_v28 }
 0x4ce   : > { %v2063_v10 = vmax.f32 %v2009_v44, 1e-24 }
 0x4cf   : > { %4641 = vrsqrt.f32 %v2062_v9 }
 0x4d0   : > { %v4630_v7 = vpop.eup %4629  ;;  %4643 = vrsqrt.f32 %v2063_v10  ;;  %v2012_v46 = vpop.xlane.xlu1 %2011 }
 0x4d1   : > { %v2015_v59 = vpop.xlane.xlu0 %2014  ;;  %v4632_v11 = vpop.eup %4631  ;;  %v2064_v42 = vmax.f32 %v2012_v46, 1e-24  ;;  %v2120_v16 = vmul.f32 %v4630_v7, %v5722_v36 }
 0x4d2   : > { %v2065_v14 = vmax.f32 %v2015_v59, 1e-24  ;;  %v2121_v29 = vmul.f32 %v4632_v11, %v5711_v27  ;;  %v4569_v11 = vld [vmem:[#allocation12 + $0x8] sm:$0xff]  }
 0x4d3   : > { %4645 = vrsqrt.f32 %v2064_v42  ;;  %v2154_v22 = vpack.c.bf16 %v2120_v16, %v2119_v15  ;;  %4293 = vmatprep.subr.bf16.mxu0 %v4569_v11 }
 0x4d4   : > { %v4634_v24 = vpop.eup %4633  ;;  %v2018_v25 = vpop.xlane.xlu1 %2017  ;;  %4647 = vrsqrt.f32 %v2065_v14  ;;  %4294 = vmatpush3.bf16.msra.mxu0 %v4569_v11 }
 0x4d5   : > { %v2021_v26 = vpop.xlane.xlu0 %2020  ;;  %v4636_v31 = vpop.eup %4635  ;;  %v2066_v38 = vmax.f32 %v2018_v25, 1e-24  ;;  %4261 = vmatprep.mubr.msk.bf16.mxu1 %vm1946_vm0, %v2154_v22  ;;  %v2122_v39 = vmul.f32 %v4634_v24, %v5719_v35  ;;  %v4570_v22 = vld [vmem:[#allocation12] sm:$0xff]  }
 0x4d6   : > { %v2067_v52 = vmax.f32 %v2021_v26, 1e-24  ;;  %v2123_v45 = vmul.f32 %v4636_v31, %v5733_v43  ;;  %4295 = vmatprep.subr.bf16.mxu0 %v4570_v22  ;;  %v4571_v31 = vld [vmem:[#allocation13 + $0x38] sm:$0xff]  }
 0x4d7   : > { %4649 = vrsqrt.f32 %v2066_v38  ;;  %v2155_v62 = vpack.c.bf16 %v2122_v39, %v2121_v29  ;;  %v4572_v38 = vld [vmem:[#allocation13 + $0x30] sm:$0xff]   ;;  %4329 = vmatprep.subr.bf16.mxu1 %v4571_v31 }
 0x4d8   : > { %v4638_v28 = vpop.eup %4637  ;;  %v2024_v12 = vpop.xlane.xlu1 %2023  ;;  %4651 = vrsqrt.f32 %v2067_v52  ;;  %4296 = vmatpush3.bf16.msra.mxu0 %v4570_v22  ;;  %4330 = vmatpush3.bf16.msra.mxu1 %v4571_v31  ;;  %v4575_v52 = vld [vmem:[#allocation13 + $0x18] sm:$0xff]   ;;  %v5878_v39 = vld [vmem:[#allocation7 + $0x4] ss:$0 sm:$0xff] }
 0x4d9   : > { %v2027_v36 = vpop.xlane.xlu0 %2026  ;;  %v4640_v48 = vpop.eup %4639  ;;  %v2068_v53 = vmax.f32 %v2024_v12, 1e-24  ;;  %4262 = vmatmul.mubr.msk.bf16.gmra.mxu1 %vm1946_vm0, %v2155_v62  ;;  %v2124_v27 = vmul.f32 %v4638_v28, %v5747_v51  ;;  %4331 = vmatprep.subr.bf16.mxu1 %v4572_v38 }
 0x4da   : > { %v2069_v58 = vmax.f32 %v2027_v36, 1e-24  ;;  %v2125_v54 = vmul.f32 %v4640_v48, %v5730_v34 }
 0x4db   : > { %4653 = vrsqrt.f32 %v2068_v53  ;;  %v2156_v2 = vpack.c.bf16 %v2124_v27, %v2123_v45  ;;  %v5882_v45 = vstv %s3800_s22 }
 0x4dc   : > { %v4642_v33 = vpop.eup %4641  ;;  %v2030_v30 = vpop.xlane.xlu1 %2029  ;;  %4655 = vrsqrt.f32 %v2069_v58  ;;  %4332 = vmatpush3.bf16.msra.mxu1 %v4572_v38 }
 0x4dd   : > { %v2033_v35 = vpop.xlane.xlu0 %2032  ;;  %v4644_v0 = vpop.eup %4643  ;;  %v2070_v17 = vmax.f32 %v2030_v30, 1e-24  ;;  %4265 = vmatprep.mubr.msk.bf16.mxu1 %vm1946_vm0, %v2156_v2  ;;  %v2126_v43 = vmul.f32 %v4642_v33, %v5744_v47 }
 0x4de   : > { %v2071_v21 = vmax.f32 %v2033_v35, 1e-24  ;;  %v2127_v8 = vmul.f32 %v4644_v0, %v5758_v57 }
 0x4df   : > { %4657 = vrsqrt.f32 %v2070_v17  ;;  %v2157_v23 = vpack.c.bf16 %v2126_v43, %v2125_v54 }
 0x4e0   : > { %v4646_v60 = vpop.eup %4645  ;;  %v2036_v61 = vpop.xlane.xlu1 %2035  ;;  %4659 = vrsqrt.f32 %v2071_v21 }
 0x4e1   : > { %v2039_v51 = vpop.xlane.xlu0 %2038  ;;  %v2072_v63 = vmax.f32 %v2036_v61, 1e-24  ;;  %4266 = vmatmul.mubr.msk.bf16.gmra.mxu1 %vm1946_vm0, %v2157_v23  ;;  %v2128_v34 = vmul.f32 %v4646_v60, %v5769_v6  ;;  %v4648_v13 = vpop.eup %4647 }
 0x4e2   : > { %v2073_v1 = vmax.f32 %v2039_v51, 1e-24  ;;  %v2129_v44 = vmul.f32 %v4648_v13, %v5755_v55 }
 0x4e3   : > { %4661 = vrsqrt.f32 %v2072_v63  ;;  %v2158_v3 = vpack.c.bf16 %v2128_v34, %v2127_v8 }
 0x4e4   : > { %v4650_v40 = vpop.eup %4649  ;;  %v2042_v49 = vpop.xlane.xlu1 %2041  ;;  %4663 = vrsqrt.f32 %v2073_v1 }
 0x4e5   : > { %v2074_v47 = vmax.f32 %v2042_v49, 1e-24  ;;  %4269 = vmatprep.mubr.msk.bf16.mxu1 %vm1946_vm0, %v2158_v3  ;;  %v2130_v57 = vmul.f32 %v4650_v40, %v5766_v5  ;;  %v4652_v9 = vpop.eup %4651 }
 0x4e6   : > { %v2131_v6 = vmul.f32 %v4652_v9, %v5783_v20 }
 0x4e7   : > { %4665 = vrsqrt.f32 %v2074_v47  ;;  %v2159_v10 = vpack.c.bf16 %v2130_v57, %v2129_v44 }
 0x4e8   : > { %v4654_v56 = vpop.eup %4653 }
 0x4e9   : > { %4270 = vmatmul.mubr.msk.bf16.gmra.mxu1 %vm1946_vm0, %v2159_v10  ;;  %v2132_v7 = vmul.f32 %v4654_v56, %v5794_v37  ;;  %v4656_v46 = vpop.eup %4655 }
 0x4ea   : > { %v2133_v55 = vmul.f32 %v4656_v46, %v5780_v18 }
 0x4eb   : > { %v2160_v59 = vpack.c.bf16 %v2132_v7, %v2131_v6 }
 0x4ec   : > { %v4658_v42 = vpop.eup %4657 }
 0x4ed   : > { %4273 = vmatprep.mubr.msk.bf16.mxu1 %vm1946_vm0, %v2160_v59  ;;  %v2134_v5 = vmul.f32 %v4658_v42, %v5791_v32  ;;  %v4660_v14 = vpop.eup %4659 }
 0x4ee   : > { %v2135_v20 = vmul.f32 %v4660_v14, %v5805_v50  ;;  %v4573_v50 = vld [vmem:[#allocation13 + $0x28] sm:$0xff]  }
 0x4ef   : > { %v2161_v15 = vpack.c.bf16 %v2134_v5, %v2133_v55  ;;  %4333 = vmatprep.subr.bf16.mxu1 %v4573_v50 }
 0x4f0   : > { %v4662_v16 = vpop.eup %4661  ;;  %4334 = vmatpush3.bf16.msra.mxu1 %v4573_v50 }
 0x4f1   : > { %4274 = vmatmul.mubr.msk.bf16.gmra.mxu1 %vm1946_vm0, %v2161_v15  ;;  %v2136_v37 = vmul.f32 %v4662_v16, %v5819_v19  ;;  %v4664_v24 = vpop.eup %4663  ;;  %v4574_v19 = vld [vmem:[#allocation13 + $0x20] sm:$0xff]  }
 0x4f2   : > { %v2137_v18 = vmul.f32 %v4664_v24, %v5800_v41  ;;  %4335 = vmatprep.subr.bf16.mxu1 %v4574_v19  ;;  %v4576_v41 = vld [vmem:[#allocation13 + $0x10] sm:$0xff]  }
 0x4f3   : > { %v2162_v25 = vpack.c.bf16 %v2136_v37, %v2135_v20 }
 0x4f4   : > { %v4666_v26 = vpop.eup %4665  ;;  %4336 = vmatpush3.bf16.msra.mxu1 %v4574_v19 }
 0x4f5   : > { %4277 = vmatprep.mubr.msk.bf16.mxu1 %vm1946_vm0, %v2162_v25  ;;  %v2138_v32 = vmul.f32 %v4666_v26, %v5816_v4  ;;  %4337 = vmatprep.subr.bf16.mxu1 %v4575_v52 }
 0x4f7   : > { %v2163_v29 = vpack.c.bf16 %v2138_v32, %v2137_v18 }
 0x4f8   : > { %4338 = vmatpush3.bf16.msra.mxu1 %v4575_v52 }
 0x4f9   : > { %4278 = vmatmul.mubr.msk.bf16.gmra.mxu1 %vm1946_vm0, %v2163_v29  ;;  %4339 = vmatprep.subr.bf16.mxu1 %v4576_v41 }
 0x4fc   : > { %4340 = vmatpush3.bf16.msra.mxu1 %v4576_v41 }
 0x566   : > { %v4251_v4 = vpop.f32.mrf.mxu1 }
 0x567   : > { %v2279_v12 = vadd.f32 %v4251_v4, %v5878_v39 }
 0x568   : > { %v2270_v62 = vpop.f32.mrf.mxu1 }
 0x569   : > { %v2271_v28 = vadd.f32 %v2270_v62, %v5878_v39  ;;  %v2433_v33 = vmul.f32 %v5882_v45, %v2279_v12  ;;  %vm2400_vm3 = vcmp.gt.f32.partialorder %v2279_v12, 0.0 }
 0x56a   : > { %v4252_v36 = vpop.f32.mrf.mxu1 }
 0x56b   : > { %v2282_v48 = vadd.f32 %v4252_v36, %v5878_v39  ;;  %v2431_v58 = vmul.f32 %v5882_v45, %v2271_v28  ;;  %vm2398_vm2 = vcmp.gt.f32.partialorder %v2271_v28, 0.0  ;;  %v2465_v17 = vsel %vm2400_vm3, %v2279_v12, %v2433_v33 }
 0x56c   : > { %v2273_v53 = vpop.f32.mrf.mxu1 }
 0x56d   : > { %vm2401_vm1 = vcmp.gt.f32.partialorder %v2282_v48, 0.0  ;;  %v2434_v27 = vmul.f32 %v5882_v45, %v2282_v48  ;;  %v2274_v2 = vadd.f32 %v2273_v53, %v5878_v39  ;;  %v2463_v54 = vsel %vm2398_vm2, %v2271_v28, %v2431_v58 }
 0x56f   : > { %vm2399_vm4 = vcmp.gt.f32.partialorder %v2274_v2, 0.0  ;;  %v2432_v30 = vmul.f32 %v5882_v45, %v2274_v2  ;;  %v2466_v35 = vsel %vm2401_vm1, %v2282_v48, %v2434_v27 }
 0x570   : > { %v2513_v43 = vpack.c.bf16 %v2466_v35, %v2465_v17 }
 0x571   : > { %v2464_v0 = vsel %vm2399_vm4, %v2274_v2, %v2432_v30 }
 0x572   : > { %v2512_v21 = vpack.c.bf16 %v2464_v0, %v2463_v54 }
 0x574   : > { %4297 = vmatprep.mubr.bf16.mxu0 %v2512_v21 }
 0x575   : > { %4298 = vmatmul.mubr.bf16.vlgmr.msra.gmra.mxu0 %v2513_v43 }
 0x579   : > { %v4255_v23 = vpop.f32.mrf.mxu1 }
 0x57a   : > { %v2295_v51 = vadd.f32 %v4255_v23, %v5878_v39 }
 0x57b   : > { %v2286_v60 = vpop.f32.mrf.mxu1 }
 0x57c   : > { %v2287_v61 = vadd.f32 %v2286_v60, %v5878_v39  ;;  %v2437_v40 = vmul.f32 %v5882_v45, %v2295_v51  ;;  %vm2404_vm7 = vcmp.gt.f32.partialorder %v2295_v51, 0.0 }
 0x57d   : > { %v4256_v8 = vpop.f32.mrf.mxu1 }
 0x57e   : > { %v2298_v63 = vadd.f32 %v4256_v8, %v5878_v39  ;;  %v2435_v34 = vmul.f32 %v5882_v45, %v2287_v61  ;;  %vm2402_vm6 = vcmp.gt.f32.partialorder %v2287_v61, 0.0  ;;  %v2469_v10 = vsel %vm2404_vm7, %v2295_v51, %v2437_v40 }
 0x57f   : > { %v2289_v1 = vpop.f32.mrf.mxu1 }
 0x580   : > { %vm2405_vm5 = vcmp.gt.f32.partialorder %v2298_v63, 0.0  ;;  %v2438_v13 = vmul.f32 %v5882_v45, %v2298_v63  ;;  %v2290_v3 = vadd.f32 %v2289_v1, %v5878_v39  ;;  %v2467_v44 = vsel %vm2402_vm6, %v2287_v61, %v2435_v34 }
 0x582   : > { %vm2403_vm8 = vcmp.gt.f32.partialorder %v2290_v3, 0.0  ;;  %v2436_v49 = vmul.f32 %v5882_v45, %v2290_v3  ;;  %v2470_v47 = vsel %vm2405_vm5, %v2298_v63, %v2438_v13 }
 0x583   : > { %v2515_v56 = vpack.c.bf16 %v2470_v47, %v2469_v10 }
 0x584   : > { %v2468_v57 = vsel %vm2403_vm8, %v2290_v3, %v2436_v49 }
 0x585   : > { %v2514_v9 = vpack.c.bf16 %v2468_v57, %v2467_v44 }
 0x587   : > { %4301 = vmatprep.mubr.bf16.mxu0 %v2514_v9 }
 0x588   : > { %4302 = vmatmul.mubr.bf16.gmra.mxu0 %v2515_v56 }
 0x589   : > { %v4259_v6 = vpop.f32.mrf.mxu1 }
 0x58a   : > { %v2311_v59 = vadd.f32 %v4259_v6, %v5878_v39 }
 0x58b   : > { %v2302_v7 = vpop.f32.mrf.mxu1 }
 0x58c   : > { %v2303_v46 = vadd.f32 %v2302_v7, %v5878_v39  ;;  %v2441_v16 = vmul.f32 %v5882_v45, %v2311_v59  ;;  %vm2408_vm11 = vcmp.gt.f32.partialorder %v2311_v59, 0.0 }
 0x58d   : > { %v4260_v11 = vpop.f32.mrf.mxu1 }
 0x58e   : > { %v2314_v42 = vadd.f32 %v4260_v11, %v5878_v39  ;;  %v2439_v5 = vmul.f32 %v5882_v45, %v2303_v46  ;;  %vm2406_vm10 = vcmp.gt.f32.partialorder %v2303_v46, 0.0  ;;  %v2473_v26 = vsel %vm2408_vm11, %v2311_v59, %v2441_v16 }
 0x58f   : > { %v2305_v55 = vpop.f32.mrf.mxu1 }
 0x590   : > { %vm2409_vm9 = vcmp.gt.f32.partialorder %v2314_v42, 0.0  ;;  %v2442_v14 = vmul.f32 %v5882_v45, %v2314_v42  ;;  %v2306_v15 = vadd.f32 %v2305_v55, %v5878_v39  ;;  %v2471_v37 = vsel %vm2406_vm10, %v2303_v46, %v2439_v5 }
 0x592   : > { %vm2407_vm12 = vcmp.gt.f32.partialorder %v2306_v15, 0.0  ;;  %v2440_v22 = vmul.f32 %v5882_v45, %v2306_v15  ;;  %v2474_v20 = vsel %vm2409_vm9, %v2314_v42, %v2442_v14 }
 0x593   : > { %v2517_v18 = vpack.c.bf16 %v2474_v20, %v2473_v26 }
 0x594   : > { %v2472_v24 = vsel %vm2407_vm12, %v2306_v15, %v2440_v22 }
 0x595   : > { %v2516_v25 = vpack.c.bf16 %v2472_v24, %v2471_v37 }
 0x597   : > { %4305 = vmatprep.mubr.bf16.mxu0 %v2516_v25 }
 0x598   : > { %4306 = vmatmul.mubr.bf16.gmra.mxu0 %v2517_v18 }
 0x599   : > { %v4263_v32 = vpop.f32.mrf.mxu1 }
 0x59a   : > { %v2327_v38 = vadd.f32 %v4263_v32, %v5878_v39 }
 0x59b   : > { %v2318_v29 = vpop.f32.mrf.mxu1 }
 0x59c   : > { %v2319_v31 = vadd.f32 %v2318_v29, %v5878_v39  ;;  %v2445_v28 = vmul.f32 %v5882_v45, %v2327_v38  ;;  %vm2412_vm15 = vcmp.gt.f32.partialorder %v2327_v38, 0.0 }
 0x59d   : > { %v4264_v50 = vpop.f32.mrf.mxu1 }
 0x59e   : > { %v2330_v19 = vadd.f32 %v4264_v50, %v5878_v39  ;;  %v2443_v41 = vmul.f32 %v5882_v45, %v2319_v31  ;;  %vm2410_vm14 = vcmp.gt.f32.partialorder %v2319_v31, 0.0  ;;  %v2477_v54 = vsel %vm2412_vm15, %v2327_v38, %v2445_v28 }
 0x59f   : > { %v2321_v52 = vpop.f32.mrf.mxu1 }
 0x5a0   : > { %vm2413_vm13 = vcmp.gt.f32.partialorder %v2330_v19, 0.0  ;;  %v2446_v4 = vmul.f32 %v5882_v45, %v2330_v19  ;;  %v2322_v62 = vadd.f32 %v2321_v52, %v5878_v39  ;;  %v2475_v27 = vsel %vm2410_vm14, %v2319_v31, %v2443_v41 }
 0x5a1   : > { %v4267_v12 = vpop.f32.mrf.mxu1 }
 0x5a2   : > { %vm2411_vm0 = vcmp.gt.f32.partialorder %v2322_v62, 0.0  ;;  %v2444_v36 = vmul.f32 %v5882_v45, %v2322_v62  ;;  %v2478_v53 = vsel %vm2413_vm13, %v2330_v19, %v2446_v4  ;;  %v2343_v33 = vadd.f32 %v4267_v12, %v5878_v39  ;;  %v4577_v19 = vld [vmem:[#allocation13 + $0x8] sm:$0xff]  }
 0x5a3   : > { %v2334_v48 = vpop.f32.mrf.mxu1  ;;  %v2519_v17 = vpack.c.bf16 %v2478_v53, %v2477_v54  ;;  %4341 = vmatprep.subr.bf16.mxu1 %v4577_v19 }
 0x5a4   : > { %v2335_v58 = vadd.f32 %v2334_v48, %v5878_v39  ;;  %v2476_v2 = vsel %vm2411_vm0, %v2322_v62, %v2444_v36  ;;  %v2449_v61 = vmul.f32 %v5882_v45, %v2343_v33  ;;  %vm2416_vm3 = vcmp.gt.f32.partialorder %v2343_v33, 0.0  ;;  %4342 = vmatpush3.bf16.msra.mxu1 %v4577_v19 }
 0x5a5   : > { %v4268_v30 = vpop.f32.mrf.mxu1  ;;  %v2518_v35 = vpack.c.bf16 %v2476_v2, %v2475_v27 }
 0x5a6   : > { %v2346_v0 = vadd.f32 %v4268_v30, %v5878_v39  ;;  %v2447_v43 = vmul.f32 %v5882_v45, %v2335_v58  ;;  %vm2414_vm2 = vcmp.gt.f32.partialorder %v2335_v58, 0.0  ;;  %v2481_v44 = vsel %vm2416_vm3, %v2343_v33, %v2449_v61  ;;  %v4578_v33 = vld [vmem:[#allocation13] sm:$0xff]  }
 0x5a7   : > { %v2337_v21 = vpop.f32.mrf.mxu1  ;;  %4309 = vmatprep.mubr.bf16.mxu0 %v2518_v35  ;;  %4343 = vmatprep.subr.bf16.mxu1 %v4578_v33 }
 0x5a8   : > { %vm2417_vm1 = vcmp.gt.f32.partialorder %v2346_v0, 0.0  ;;  %v2450_v23 = vmul.f32 %v5882_v45, %v2346_v0  ;;  %v2338_v60 = vadd.f32 %v2337_v21, %v5878_v39  ;;  %4310 = vmatmul.mubr.bf16.gmra.mxu0 %v2519_v17  ;;  %v2479_v13 = vsel %vm2414_vm2, %v2335_v58, %v2447_v43  ;;  %4344 = vmatpush3.bf16.msra.mxu1 %v4578_v33 }
 0x5a9   : > { %v4271_v51 = vpop.f32.mrf.mxu1 }
 0x5aa   : > { %vm2415_vm4 = vcmp.gt.f32.partialorder %v2338_v60, 0.0  ;;  %v2448_v8 = vmul.f32 %v5882_v45, %v2338_v60  ;;  %v2482_v1 = vsel %vm2417_vm1, %v2346_v0, %v2450_v23  ;;  %v2359_v40 = vadd.f32 %v4271_v51, %v5878_v39 }
 0x5ab   : > { %v2350_v63 = vpop.f32.mrf.mxu1  ;;  %v2521_v9 = vpack.c.bf16 %v2482_v1, %v2481_v44  ;;  %v4582_v1 = vld [vmem:[#allocation15 + $0x60] ss:$8 sps:$4 sm:$0xff]  }
 0x5ac   : > { %v2351_v34 = vadd.f32 %v2350_v63, %v5878_v39  ;;  %v2480_v3 = vsel %vm2415_vm4, %v2338_v60, %v2448_v8  ;;  %v2453_v46 = vmul.f32 %v5882_v45, %v2359_v40  ;;  %vm2420_vm7 = vcmp.gt.f32.partialorder %v2359_v40, 0.0  ;;  %v4579_v8 = vld [vmem:[#allocation15 + $0x70] ss:$8 sps:$4 sm:$0xff]   ;;  %v4584_v63 = vld [vmem:[#allocation15 + $0x64] ss:$8 sps:$4 sm:$0xff]  }
 0x5ad   : > { %v4272_v49 = vpop.f32.mrf.mxu1  ;;  %v2520_v47 = vpack.c.bf16 %v2480_v3, %v2479_v13  ;;  %v4585_v13 = vld [vmem:[#allocation15 + $0x50] ss:$8 sps:$4 sm:$0xff]   ;;  %v4588_v3 = vld [vmem:[#allocation15 + $0x40] ss:$8 sps:$4 sm:$0xff]  }
 0x5ae   : > { %v2362_v57 = vadd.f32 %v4272_v49, %v5878_v39  ;;  %v2451_v56 = vmul.f32 %v5882_v45, %v2351_v34  ;;  %vm2418_vm6 = vcmp.gt.f32.partialorder %v2351_v34, 0.0  ;;  %v2485_v37 = vsel %vm2420_vm7, %v2359_v40, %v2453_v46  ;;  %v4593_v40 = vld [vmem:[#allocation15 + $0x34] ss:$8 sps:$4 sm:$0xff]   ;;  %v4591_v49 = vld [vmem:[#allocation15 + $0x30] ss:$8 sps:$4 sm:$0xff]  }
 0x5af   : > { %v2353_v10 = vpop.f32.mrf.mxu1  ;;  %4313 = vmatprep.mubr.bf16.mxu0 %v2520_v47  ;;  %v4596_v47 = vld [vmem:[#allocation15 + $0x24] ss:$8 sps:$4 sm:$0xff]   ;;  %v4594_v44 = vld [vmem:[#allocation15 + $0x20] ss:$8 sps:$4 sm:$0xff]   ;;  %v5950_v46 = vstv %s3809_s21 }
 0x5b0   : > { %vm2421_vm5 = vcmp.gt.f32.partialorder %v2362_v57, 0.0  ;;  %v2454_v6 = vmul.f32 %v5882_v45, %v2362_v57  ;;  %v2354_v7 = vadd.f32 %v2353_v10, %v5878_v39  ;;  %4314 = vmatmul.mubr.bf16.gmra.mxu0 %v2521_v9  ;;  %v2483_v14 = vsel %vm2418_vm6, %v2351_v34, %v2451_v56  ;;  %v4587_v34 = vld [vmem:[#allocation15 + $0x54] ss:$8 sps:$4 sm:$0xff]  }
 0x5b1   : > { %v4275_v59 = vpop.f32.mrf.mxu1  ;;  %v5946_v9 = vld [vmem:[#allocation7 + $0x5] ss:$0 sm:$0xff] }
 0x5b2   : > { %vm2419_vm8 = vcmp.gt.f32.partialorder %v2354_v7, 0.0  ;;  %v2452_v11 = vmul.f32 %v5882_v45, %v2354_v7  ;;  %v2486_v55 = vsel %vm2421_vm5, %v2362_v57, %v2454_v6  ;;  %v2375_v16 = vadd.f32 %v4275_v59, %v5878_v39 }
 0x5b3   : > { %v2366_v42 = vpop.f32.mrf.mxu1  ;;  %v2523_v25 = vpack.c.bf16 %v2486_v55, %v2485_v37 }
 0x5b4   : > { %v2367_v5 = vadd.f32 %v2366_v42, %v5878_v39  ;;  %v2484_v15 = vsel %vm2419_vm8, %v2354_v7, %v2452_v11  ;;  %v2457_v31 = vmul.f32 %v5882_v45, %v2375_v16  ;;  %vm2424_vm11 = vcmp.gt.f32.partialorder %v2375_v16, 0.0 }
 0x5b5   : > { %v4276_v22 = vpop.f32.mrf.mxu1  ;;  %v2522_v20 = vpack.c.bf16 %v2484_v15, %v2483_v14 }
 0x5b6   : > { %v2378_v24 = vadd.f32 %v4276_v22, %v5878_v39  ;;  %v2455_v18 = vmul.f32 %v5882_v45, %v2367_v5  ;;  %vm2422_vm10 = vcmp.gt.f32.partialorder %v2367_v5, 0.0  ;;  %v2489_v53 = vsel %vm2424_vm11, %v2375_v16, %v2457_v31 }
 0x5b7   : > { %v2369_v26 = vpop.f32.mrf.mxu1  ;;  %4317 = vmatprep.mubr.bf16.mxu0 %v2522_v20 }
 0x5b8   : > { %vm2425_vm9 = vcmp.gt.f32.partialorder %v2378_v24, 0.0  ;;  %v2458_v32 = vmul.f32 %v5882_v45, %v2378_v24  ;;  %v2370_v29 = vadd.f32 %v2369_v26, %v5878_v39  ;;  %4318 = vmatmul.mubr.bf16.gmra.mxu0 %v2523_v25  ;;  %v2487_v62 = vsel %vm2422_vm10, %v2367_v5, %v2455_v18 }
 0x5b9   : > { %v4279_v38 = vpop.f32.mrf.mxu1 }
 0x5ba   : > { %vm2423_vm12 = vcmp.gt.f32.partialorder %v2370_v29, 0.0  ;;  %v2456_v50 = vmul.f32 %v5882_v45, %v2370_v29  ;;  %v2490_v41 = vsel %vm2425_vm9, %v2378_v24, %v2458_v32  ;;  %v2391_v12 = vadd.f32 %v4279_v38, %v5878_v39 }
 0x5bb   : > { %v2382_v52 = vpop.f32.mrf.mxu1  ;;  %v2525_v27 = vpack.c.bf16 %v2490_v41, %v2489_v53 }
 0x5bc   : > { %v2383_v4 = vadd.f32 %v2382_v52, %v5878_v39  ;;  %v2488_v28 = vsel %vm2423_vm12, %v2370_v29, %v2456_v50  ;;  %v2461_v0 = vmul.f32 %v5882_v45, %v2391_v12  ;;  %vm2428_vm15 = vcmp.gt.f32.partialorder %v2391_v12, 0.0 }
 0x5bd   : > { %v4280_v36 = vpop.f32.mrf.mxu1  ;;  %v2524_v48 = vpack.c.bf16 %v2488_v28, %v2487_v62 }
 0x5be   : > { %v2394_v58 = vadd.f32 %v4280_v36, %v5878_v39  ;;  %v2459_v30 = vmul.f32 %v5882_v45, %v2383_v4  ;;  %vm2426_vm14 = vcmp.gt.f32.partialorder %v2383_v4, 0.0  ;;  %v2493_v61 = vsel %vm2428_vm15, %v2391_v12, %v2461_v0 }
 0x5bf   : > { %v2385_v2 = vpop.f32.mrf.mxu1  ;;  %4321 = vmatprep.mubr.bf16.mxu0 %v2524_v48 }
 0x5c0   : > { %vm2429_vm13 = vcmp.gt.f32.partialorder %v2394_v58, 0.0  ;;  %v2462_v35 = vmul.f32 %v5882_v45, %v2394_v58  ;;  %v2386_v54 = vadd.f32 %v2385_v2, %v5878_v39  ;;  %4322 = vmatmul.mubr.bf16.gmra.mxu0 %v2525_v27  ;;  %v2491_v43 = vsel %vm2426_vm14, %v2383_v4, %v2459_v30  ;;  %v4581_v39 = vld [vmem:[#allocation15 + $0x74] ss:$8 sps:$4 sm:$0xff]  }
 0x5c1   : > { %3300 = vmatprep.subr.bf16.mxu0 %v4581_v39 }
 0x5c2   : > { %vm2427_vm0 = vcmp.gt.f32.partialorder %v2386_v54, 0.0  ;;  %v2460_v17 = vmul.f32 %v5882_v45, %v2386_v54  ;;  %v2494_v21 = vsel %vm2429_vm13, %v2394_v58, %v2462_v35  ;;  %3301 = vmatpush1.bf16.msra.mxu0 %v4579_v8  ;;  %v4590_v45 = vld [vmem:[#allocation15 + $0x44] ss:$8 sps:$4 sm:$0xff]  }
 0x5c3   : > { %v2527_v51 = vpack.c.bf16 %v2494_v21, %v2493_v61  ;;  %3302 = vmatprep.subr.bf16.mxu0 %v4584_v63 }
 0x5c4   : > { %v2492_v23 = vsel %vm2427_vm0, %v2386_v54, %v2460_v17 }
 0x5c5   : > { %v2526_v60 = vpack.c.bf16 %v2492_v23, %v2491_v43 }
 0x5c6   : > { %3303 = vmatpush1.bf16.msra.mxu0 %v4582_v1 }
 0x5c7   : > { %4325 = vmatprep.mubr.bf16.mxu0 %v2526_v60  ;;  %3304 = vmatprep.subr.bf16.mxu0 %v4587_v34 }
 0x5c8   : > { %4326 = vmatmul.mubr.bf16.gmra.mxu0 %v2527_v51 }
 0x5ca   : > { %3305 = vmatpush1.bf16.msra.mxu0 %v4585_v13 }
 0x5cb   : > { %3306 = vmatprep.subr.bf16.mxu0 %v4590_v45 }
 0x5ce   : > { %3307 = vmatpush1.bf16.msra.mxu0 %v4588_v3 }
 0x5cf   : > { %3308 = vmatprep.subr.bf16.mxu0 %v4593_v40 }
 0x5d2   : > { %3309 = vmatpush1.bf16.msra.mxu0 %v4591_v49 }
 0x5d3   : > { %3310 = vmatprep.subr.bf16.mxu0 %v4596_v47 }
 0x5d6   : > { %3311 = vmatpush1.bf16.msra.mxu0 %v4594_v44 }
 0x635   : > { %v4299_v57 = vpop.f32.mrf.mxu0 }
 0x636   : > { %v2619_v6 = vadd.f32 %v4299_v57, %v5946_v9 }
 0x637   : > { %v2610_v10 = vpop.f32.mrf.mxu0 }
 0x638   : > { %v2611_v56 = vadd.f32 %v2610_v10, %v5946_v9  ;;  %v2773_v14 = vmul.f32 %v5950_v46, %v2619_v6  ;;  %vm2740_vm3 = vcmp.gt.f32.partialorder %v2619_v6, 0.0 }
 0x639   : > { %v4300_v7 = vpop.f32.mrf.mxu0 }
 0x63a   : > { %v2622_v59 = vadd.f32 %v4300_v7, %v5946_v9  ;;  %v2771_v42 = vmul.f32 %v5950_v46, %v2611_v56  ;;  %vm2738_vm2 = vcmp.gt.f32.partialorder %v2611_v56, 0.0  ;;  %v2805_v37 = vsel %vm2740_vm3, %v2619_v6, %v2773_v14 }
 0x63b   : > { %v2613_v11 = vpop.f32.mrf.mxu0 }
 0x63c   : > { %vm2741_vm1 = vcmp.gt.f32.partialorder %v2622_v59, 0.0  ;;  %v2774_v55 = vmul.f32 %v5950_v46, %v2622_v59  ;;  %v2614_v5 = vadd.f32 %v2613_v11, %v5946_v9  ;;  %v2803_v22 = vsel %vm2738_vm2, %v2611_v56, %v2771_v42 }
 0x63e   : > { %vm2739_vm4 = vcmp.gt.f32.partialorder %v2614_v5, 0.0  ;;  %v2772_v15 = vmul.f32 %v5950_v46, %v2614_v5  ;;  %v2806_v16 = vsel %vm2741_vm1, %v2622_v59, %v2774_v55 }
 0x63f   : > { %v2853_v25 = vpack.c.bf16 %v2806_v16, %v2805_v37 }
 0x640   : > { %v2804_v20 = vsel %vm2739_vm4, %v2614_v5, %v2772_v15 }
 0x641   : > { %v2852_v24 = vpack.c.bf16 %v2804_v20, %v2803_v22 }
 0x643   : > { %4345 = vmatprep.mubr.bf16.mxu1 %v2852_v24 }
 0x644   : > { %4346 = vmatmul.mubr.bf16.vlgmr.msra.gmra.mxu1 %v2853_v25 }
 0x648   : > { %v4303_v26 = vpop.f32.mrf.mxu0 }
 0x649   : > { %v2635_v29 = vadd.f32 %v4303_v26, %v5946_v9 }
 0x64a   : > { %v2626_v18 = vpop.f32.mrf.mxu0 }
 0x64b   : > { %v2627_v32 = vadd.f32 %v2626_v18, %v5946_v9  ;;  %v2777_v4 = vmul.f32 %v5950_v46, %v2635_v29  ;;  %vm2744_vm7 = vcmp.gt.f32.partialorder %v2635_v29, 0.0 }
 0x64c   : > { %v4304_v31 = vpop.f32.mrf.mxu0 }
 0x64d   : > { %v2638_v38 = vadd.f32 %v4304_v31, %v5946_v9  ;;  %v2775_v19 = vmul.f32 %v5950_v46, %v2627_v32  ;;  %vm2742_vm6 = vcmp.gt.f32.partialorder %v2627_v32, 0.0  ;;  %v2809_v48 = vsel %vm2744_vm7, %v2635_v29, %v2777_v4 }
 0x64e   : > { %v2629_v50 = vpop.f32.mrf.mxu0 }
 0x64f   : > { %vm2745_vm5 = vcmp.gt.f32.partialorder %v2638_v38, 0.0  ;;  %v2778_v52 = vmul.f32 %v5950_v46, %v2638_v38  ;;  %v2630_v41 = vadd.f32 %v2629_v50, %v5946_v9  ;;  %v2807_v12 = vsel %vm2742_vm6, %v2627_v32, %v2775_v19 }
 0x651   : > { %vm2743_vm8 = vcmp.gt.f32.partialorder %v2630_v41, 0.0  ;;  %v2776_v62 = vmul.f32 %v5950_v46, %v2630_v41  ;;  %v2810_v28 = vsel %vm2745_vm5, %v2638_v38, %v2778_v52 }
 0x652   : > { %v2855_v58 = vpack.c.bf16 %v2810_v28, %v2809_v48 }
 0x653   : > { %v2808_v36 = vsel %vm2743_vm8, %v2630_v41, %v2776_v62 }
 0x654   : > { %v2854_v53 = vpack.c.bf16 %v2808_v36, %v2807_v12 }
 0x656   : > { %4349 = vmatprep.mubr.bf16.mxu1 %v2854_v53 }
 0x657   : > { %4350 = vmatmul.mubr.bf16.gmra.mxu1 %v2855_v58 }
 0x658   : > { %v4307_v27 = vpop.f32.mrf.mxu0 }
 0x659   : > { %v2651_v30 = vadd.f32 %v4307_v27, %v5946_v9 }
 0x65a   : > { %v2642_v2 = vpop.f32.mrf.mxu0 }
 0x65b   : > { %v2643_v33 = vadd.f32 %v2642_v2, %v5946_v9  ;;  %v2781_v23 = vmul.f32 %v5950_v46, %v2651_v30  ;;  %vm2748_vm11 = vcmp.gt.f32.partialorder %v2651_v30, 0.0 }
 0x65c   : > { %v4308_v35 = vpop.f32.mrf.mxu0 }
 0x65d   : > { %v2654_v54 = vadd.f32 %v4308_v35, %v5946_v9  ;;  %v2779_v17 = vmul.f32 %v5950_v46, %v2643_v33  ;;  %vm2746_vm10 = vcmp.gt.f32.partialorder %v2643_v33, 0.0  ;;  %v2813_v39 = vsel %vm2748_vm11, %v2651_v30, %v2781_v23 }
 0x65e   : > { %v2645_v0 = vpop.f32.mrf.mxu0 }
 0x65f   : > { %vm2749_vm9 = vcmp.gt.f32.partialorder %v2654_v54, 0.0  ;;  %v2782_v21 = vmul.f32 %v5950_v46, %v2654_v54  ;;  %v2646_v43 = vadd.f32 %v2645_v0, %v5946_v9  ;;  %v2811_v51 = vsel %vm2746_vm10, %v2643_v33, %v2779_v17 }
 0x661   : > { %vm2747_vm12 = vcmp.gt.f32.partialorder %v2646_v43, 0.0  ;;  %v2780_v60 = vmul.f32 %v5950_v46, %v2646_v43  ;;  %v2814_v61 = vsel %vm2749_vm9, %v2654_v54, %v2782_v21 }
 0x662   : > { %v2857_v1 = vpack.c.bf16 %v2814_v61, %v2813_v39 }
 0x663   : > { %v2812_v8 = vsel %vm2747_vm12, %v2646_v43, %v2780_v60 }
 0x664   : > { %v2856_v63 = vpack.c.bf16 %v2812_v8, %v2811_v51 }
 0x666   : > { %4353 = vmatprep.mubr.bf16.mxu1 %v2856_v63 }
 0x667   : > { %4354 = vmatmul.mubr.bf16.gmra.mxu1 %v2857_v1 }
 0x668   : > { %v4311_v34 = vpop.f32.mrf.mxu0 }
 0x669   : > { %v2667_v3 = vadd.f32 %v4311_v34, %v5946_v9 }
 0x66a   : > { %v2658_v13 = vpop.f32.mrf.mxu0 }
 0x66b   : > { %v2659_v45 = vadd.f32 %v2658_v13, %v5946_v9  ;;  %v2785_v56 = vmul.f32 %v5950_v46, %v2667_v3  ;;  %vm2752_vm15 = vcmp.gt.f32.partialorder %v2667_v3, 0.0 }
 0x66c   : > { %v4312_v40 = vpop.f32.mrf.mxu0 }
 0x66d   : > { %v2670_v49 = vadd.f32 %v4312_v40, %v5946_v9  ;;  %v2783_v44 = vmul.f32 %v5950_v46, %v2659_v45  ;;  %vm2750_vm14 = vcmp.gt.f32.partialorder %v2659_v45, 0.0  ;;  %v2817_v14 = vsel %vm2752_vm15, %v2667_v3, %v2785_v56  ;;  %v4599_v3 = vld [vmem:[#allocation15 + $0x14] ss:$8 sps:$4 sm:$0xff]  }
 0x66e   : > { %v2661_v47 = vpop.f32.mrf.mxu0  ;;  %3312 = vmatprep.subr.bf16.mxu0 %v4599_v3 }
 0x66f   : > { %vm2753_vm13 = vcmp.gt.f32.partialorder %v2670_v49, 0.0  ;;  %v2786_v57 = vmul.f32 %v5950_v46, %v2670_v49  ;;  %v2662_v10 = vadd.f32 %v2661_v47, %v5946_v9  ;;  %v2815_v55 = vsel %vm2750_vm14, %v2659_v45, %v2783_v44  ;;  %v4597_v45 = vld [vmem:[#allocation15 + $0x10] ss:$8 sps:$4 sm:$0xff]  }
 0x670   : > { %v4315_v6 = vpop.f32.mrf.mxu0  ;;  %3313 = vmatpush1.bf16.msra.mxu0 %v4597_v45 }
 0x671   : > { %vm2751_vm0 = vcmp.gt.f32.partialorder %v2662_v10, 0.0  ;;  %v2784_v7 = vmul.f32 %v5950_v46, %v2662_v10  ;;  %v2818_v59 = vsel %vm2753_vm13, %v2670_v49, %v2786_v57  ;;  %v2683_v15 = vadd.f32 %v4315_v6, %v5946_v9 }
 0x672   : > { %v2674_v11 = vpop.f32.mrf.mxu0  ;;  %v2859_v20 = vpack.c.bf16 %v2818_v59, %v2817_v14  ;;  %v4602_v14 = vld [vmem:[#allocation15 + $0x4] ss:$8 sps:$4 sm:$0xff]  }
 0x673   : > { %v2675_v42 = vadd.f32 %v2674_v11, %v5946_v9  ;;  %v2816_v5 = vsel %vm2751_vm0, %v2662_v10, %v2784_v7  ;;  %v2789_v32 = vmul.f32 %v5950_v46, %v2683_v15  ;;  %vm2756_vm3 = vcmp.gt.f32.partialorder %v2683_v15, 0.0  ;;  %3314 = vmatprep.subr.bf16.mxu0 %v4602_v14 }
 0x674   : > { %v4316_v16 = vpop.f32.mrf.mxu0  ;;  %v2858_v22 = vpack.c.bf16 %v2816_v5, %v2815_v55 }
 0x675   : > { %v2686_v37 = vadd.f32 %v4316_v16, %v5946_v9  ;;  %v2787_v25 = vmul.f32 %v5950_v46, %v2675_v42  ;;  %vm2754_vm2 = vcmp.gt.f32.partialorder %v2675_v42, 0.0  ;;  %v2821_v4 = vsel %vm2756_vm3, %v2683_v15, %v2789_v32  ;;  %v4600_v16 = vld [vmem:[#allocation15] ss:$8 sps:$4 sm:$0xff]  }
 0x676   : > { %v2677_v24 = vpop.f32.mrf.mxu0  ;;  %4357 = vmatprep.mubr.bf16.mxu1 %v2858_v22  ;;  %3315 = vmatpush1.bf16.msra.mxu0 %v4600_v16 }
 0x677   : > { %vm2757_vm1 = vcmp.gt.f32.partialorder %v2686_v37, 0.0  ;;  %v2790_v26 = vmul.f32 %v5950_v46, %v2686_v37  ;;  %v2678_v18 = vadd.f32 %v2677_v24, %v5946_v9  ;;  %4358 = vmatmul.mubr.bf16.gmra.mxu1 %v2859_v20  ;;  %v2819_v52 = vsel %vm2754_vm2, %v2675_v42, %v2787_v25 }
 0x678   : > { %v4319_v29 = vpop.f32.mrf.mxu0 }
 0x679   : > { %vm2755_vm4 = vcmp.gt.f32.partialorder %v2678_v18, 0.0  ;;  %v2788_v31 = vmul.f32 %v5950_v46, %v2678_v18  ;;  %v2822_v38 = vsel %vm2757_vm1, %v2686_v37, %v2790_v26  ;;  %v2699_v62 = vadd.f32 %v4319_v29, %v5946_v9 }
 0x67a   : > { %v2690_v50 = vpop.f32.mrf.mxu0  ;;  %v2861_v36 = vpack.c.bf16 %v2822_v38, %v2821_v4  ;;  %v4962_v26 = vmov 0  }
 0x67b   : > { %v2691_v19 = vadd.f32 %v2690_v50, %v5946_v9  ;;  %v2820_v41 = vsel %vm2755_vm4, %v2678_v18, %v2788_v31  ;;  %v2793_v33 = vmul.f32 %v5950_v46, %v2699_v62  ;;  %vm2760_vm7 = vcmp.gt.f32.partialorder %v2699_v62, 0.0  ;;  %3332 = vmatprep.mubr.bf16.mxu0 %v4962_v26 }
 0x67c   : > { %v4320_v28 = vpop.f32.mrf.mxu0  ;;  %v2860_v12 = vpack.c.bf16 %v2820_v41, %v2819_v52 }
 0x67d   : > { %v2702_v48 = vadd.f32 %v4320_v28, %v5946_v9  ;;  %v2791_v58 = vmul.f32 %v5950_v46, %v2691_v19  ;;  %vm2758_vm6 = vcmp.gt.f32.partialorder %v2691_v19, 0.0  ;;  %v2825_v23 = vsel %vm2760_vm7, %v2699_v62, %v2793_v33 }
 0x67e   : > { %v2693_v53 = vpop.f32.mrf.mxu0  ;;  %4361 = vmatprep.mubr.bf16.mxu1 %v2860_v12 }
 0x67f   : > { %vm2761_vm5 = vcmp.gt.f32.partialorder %v2702_v48, 0.0  ;;  %v2794_v27 = vmul.f32 %v5950_v46, %v2702_v48  ;;  %v2694_v2 = vadd.f32 %v2693_v53, %v5946_v9  ;;  %4362 = vmatmul.mubr.bf16.gmra.mxu1 %v2861_v36  ;;  %v2823_v21 = vsel %vm2758_vm6, %v2691_v19, %v2791_v58  ;;  %v6015_v19 = vld [vmem:[#allocation7 + $0x6] ss:$0 sm:$0xff] }
 0x680   : > { %v4323_v30 = vpop.f32.mrf.mxu0 }
 0x681   : > { %vm2759_vm8 = vcmp.gt.f32.partialorder %v2694_v2, 0.0  ;;  %v2792_v35 = vmul.f32 %v5950_v46, %v2694_v2  ;;  %v2826_v54 = vsel %vm2761_vm5, %v2702_v48, %v2794_v27  ;;  %v2715_v60 = vadd.f32 %v4323_v30, %v5946_v9 }
 0x682   : > { %v2706_v0 = vpop.f32.mrf.mxu0  ;;  %v2863_v8 = vpack.c.bf16 %v2826_v54, %v2825_v23 }
 0x683   : > { %v2707_v17 = vadd.f32 %v2706_v0, %v5946_v9  ;;  %v2824_v43 = vsel %vm2759_vm8, %v2694_v2, %v2792_v35  ;;  %v2797_v40 = vmul.f32 %v5950_v46, %v2715_v60  ;;  %vm2764_vm11 = vcmp.gt.f32.partialorder %v2715_v60, 0.0 }
 0x684   : > { %v4324_v61 = vpop.f32.mrf.mxu0  ;;  %v2862_v51 = vpack.c.bf16 %v2824_v43, %v2823_v21 }
 0x685   : > { %v2718_v39 = vadd.f32 %v4324_v61, %v5946_v9  ;;  %v2795_v1 = vmul.f32 %v5950_v46, %v2707_v17  ;;  %vm2762_vm10 = vcmp.gt.f32.partialorder %v2707_v17, 0.0  ;;  %v2829_v7 = vsel %vm2764_vm11, %v2715_v60, %v2797_v40 }
 0x686   : > { %v2709_v63 = vpop.f32.mrf.mxu0  ;;  %4365 = vmatprep.mubr.bf16.mxu1 %v2862_v51 }
 0x687   : > { %vm2765_vm9 = vcmp.gt.f32.partialorder %v2718_v39, 0.0  ;;  %v2798_v34 = vmul.f32 %v5950_v46, %v2718_v39  ;;  %v2710_v13 = vadd.f32 %v2709_v63, %v5946_v9  ;;  %4366 = vmatmul.mubr.bf16.gmra.mxu1 %v2863_v8  ;;  %v2827_v56 = vsel %vm2762_vm10, %v2707_v17, %v2795_v1 }
 0x688   : > { %v4327_v49 = vpop.f32.mrf.mxu0 }
 0x689   : > { %vm2763_vm12 = vcmp.gt.f32.partialorder %v2710_v13, 0.0  ;;  %v2796_v47 = vmul.f32 %v5950_v46, %v2710_v13  ;;  %v2830_v44 = vsel %vm2765_vm9, %v2718_v39, %v2798_v34  ;;  %v2731_v59 = vadd.f32 %v4327_v49, %v5946_v9 }
 0x68a   : > { %v2722_v57 = vpop.f32.mrf.mxu0  ;;  %v2865_v55 = vpack.c.bf16 %v2830_v44, %v2829_v7 }
 0x68b   : > { %v2723_v10 = vadd.f32 %v2722_v57, %v5946_v9  ;;  %v2828_v6 = vsel %vm2763_vm12, %v2710_v13, %v2796_v47  ;;  %v2801_v24 = vmul.f32 %v5950_v46, %v2731_v59  ;;  %vm2768_vm15 = vcmp.gt.f32.partialorder %v2731_v59, 0.0 }
 0x68c   : > { %v4328_v11 = vpop.f32.mrf.mxu0  ;;  %v2864_v42 = vpack.c.bf16 %v2828_v6, %v2827_v56 }
 0x68d   : > { %v2734_v5 = vadd.f32 %v4328_v11, %v5946_v9  ;;  %v2799_v22 = vmul.f32 %v5950_v46, %v2723_v10  ;;  %vm2766_vm14 = vcmp.gt.f32.partialorder %v2723_v10, 0.0  ;;  %v2833_v31 = vsel %vm2768_vm15, %v2731_v59, %v2801_v24 }
 0x68e   : > { %v2725_v15 = vpop.f32.mrf.mxu0  ;;  %4369 = vmatprep.mubr.bf16.mxu1 %v2864_v42 }
 0x68f   : > { %vm2769_vm13 = vcmp.gt.f32.partialorder %v2734_v5, 0.0  ;;  %v2802_v20 = vmul.f32 %v5950_v46, %v2734_v5  ;;  %v2726_v37 = vadd.f32 %v2725_v15, %v5946_v9  ;;  %4370 = vmatmul.mubr.bf16.gmra.mxu1 %v2865_v55  ;;  %v2831_v32 = vsel %vm2766_vm14, %v2723_v10, %v2799_v22 }
 0x691   : > { %vm2767_vm0 = vcmp.gt.f32.partialorder %v2726_v37, 0.0  ;;  %v2800_v25 = vmul.f32 %v5950_v46, %v2726_v37  ;;  %v2834_v18 = vsel %vm2769_vm13, %v2734_v5, %v2802_v20  ;;  %v6018_v46 = vstv %s3818_s12 }
 0x692   : > { %v2867_v50 = vpack.c.bf16 %v2834_v18, %v2833_v31 }
 0x693   : > { %v2832_v29 = vsel %vm2767_vm0, %v2726_v37, %v2800_v25 }
 0x694   : > { %v2866_v38 = vpack.c.bf16 %v2832_v29, %v2831_v32 }
 0x696   : > { %4373 = vmatprep.mubr.bf16.mxu1 %v2866_v38 }
 0x697   : > { %4374 = vmatmul.mubr.bf16.gmra.mxu1 %v2867_v50 }
 0x704   : > { %v4347_v9 = vpop.f32.mrf.mxu1 }
 0x705   : > { %v2959_v53 = vadd.f32 %v4347_v9, %v6015_v19 }
 0x706   : > { %v2950_v52 = vpop.f32.mrf.mxu1 }
 0x707   : > { %v2951_v41 = vadd.f32 %v2950_v52, %v6015_v19  ;;  %v3113_v30 = vmul.f32 %v6018_v46, %v2959_v53  ;;  %vm3080_vm4 = vcmp.gt.f32.partialorder %v2959_v53, 0.0 }
 0x708   : > { %v4348_v4 = vpop.f32.mrf.mxu1 }
 0x709   : > { %v3111_v28 = vmul.f32 %v6018_v46, %v2951_v41  ;;  %vm3078_vm1 = vcmp.gt.f32.partialorder %v2951_v41, 0.0  ;;  %v2962_v36 = vadd.f32 %v4348_v4, %v6015_v19  ;;  %v3145_v0 = vsel %vm3080_vm4, %v2959_v53, %v3113_v30 }
 0x70a   : > { %v2953_v62 = vpop.f32.mrf.mxu1 }
 0x70b   : > { %v2954_v12 = vadd.f32 %v2953_v62, %v6015_v19  ;;  %v3143_v58 = vsel %vm3078_vm1, %v2951_v41, %v3111_v28  ;;  %v3114_v33 = vmul.f32 %v6018_v46, %v2962_v36  ;;  %vm3081_vm3 = vcmp.gt.f32.partialorder %v2962_v36, 0.0 }
 0x70d   : > { %vm3079_vm2 = vcmp.gt.f32.partialorder %v2954_v12, 0.0  ;;  %v3112_v48 = vmul.f32 %v6018_v46, %v2954_v12  ;;  %v3146_v35 = vsel %vm3081_vm3, %v2962_v36, %v3114_v33 }
 0x70e   : > { %v3194_v17 = vpack.c.bf16 %v3146_v35, %v3145_v0 }
 0x70f   : > { %v3144_v27 = vsel %vm3079_vm2, %v2954_v12, %v3112_v48 }
 0x710   : > { %v3193_v2 = vpack.c.bf16 %v3144_v27, %v3143_v58 }
 0x712   : > { %3333 = vmatmul.mubr.bf16.vlgmr.msra.gmra.mxu0 %v3193_v2 }
 0x713   : > { %3342 = vmatprep.mubr.bf16.mxu0 %v4962_v26 }
 0x717   : > { %v4351_v54 = vpop.f32.mrf.mxu1 }
 0x718   : > { %v2975_v63 = vadd.f32 %v4351_v54, %v6015_v19 }
 0x719   : > { %v2966_v21 = vpop.f32.mrf.mxu1 }
 0x71a   : > { %v2967_v43 = vadd.f32 %v2966_v21, %v6015_v19  ;;  %3343 = vmatmul.mubr.bf16.gmra.mxu0 %v3194_v17  ;;  %v3117_v3 = vmul.f32 %v6018_v46, %v2975_v63  ;;  %vm3084_vm8 = vcmp.gt.f32.partialorder %v2975_v63, 0.0 }
 0x71b   : > { %v4352_v23 = vpop.f32.mrf.mxu1  ;;  %3352 = vmatprep.mubr.bf16.mxu0 %v4962_v26 }
 0x71c   : > { %v3115_v61 = vmul.f32 %v6018_v46, %v2967_v43  ;;  %vm3082_vm5 = vcmp.gt.f32.partialorder %v2967_v43, 0.0  ;;  %v2978_v8 = vadd.f32 %v4352_v23, %v6015_v19  ;;  %v3149_v57 = vsel %vm3084_vm8, %v2975_v63, %v3117_v3 }
 0x71d   : > { %v2969_v60 = vpop.f32.mrf.mxu1 }
 0x71e   : > { %v2970_v51 = vadd.f32 %v2969_v60, %v6015_v19  ;;  %v3147_v1 = vsel %vm3082_vm5, %v2967_v43, %v3115_v61  ;;  %v3118_v45 = vmul.f32 %v6018_v46, %v2978_v8  ;;  %vm3085_vm7 = vcmp.gt.f32.partialorder %v2978_v8, 0.0 }
 0x720   : > { %vm3083_vm6 = vcmp.gt.f32.partialorder %v2970_v51, 0.0  ;;  %v3116_v39 = vmul.f32 %v6018_v46, %v2970_v51  ;;  %v3150_v49 = vsel %vm3085_vm7, %v2978_v8, %v3118_v45 }
 0x721   : > { %v3196_v56 = vpack.c.bf16 %v3150_v49, %v3149_v57 }
 0x722   : > { %v3148_v34 = vsel %vm3083_vm6, %v2970_v51, %v3116_v39 }
 0x723   : > { %v3195_v13 = vpack.c.bf16 %v3148_v34, %v3147_v1 }
 0x725   : > { %3353 = vmatmul.mubr.bf16.gmra.mxu0 %v3195_v13 }
 0x726   : > { %3362 = vmatprep.mubr.bf16.mxu0 %v4962_v26 }
 0x727   : > { %v4355_v40 = vpop.f32.mrf.mxu1 }
 0x728   : > { %v2991_v55 = vadd.f32 %v4355_v40, %v6015_v19 }
 0x729   : > { %v2982_v47 = vpop.f32.mrf.mxu1 }
 0x72a   : > { %v2983_v44 = vadd.f32 %v2982_v47, %v6015_v19  ;;  %v3121_v22 = vmul.f32 %v6018_v46, %v2991_v55  ;;  %vm3088_vm12 = vcmp.gt.f32.partialorder %v2991_v55, 0.0 }
 0x72b   : > { %v4356_v10 = vpop.f32.mrf.mxu1 }
 0x72c   : > { %v3119_v7 = vmul.f32 %v6018_v46, %v2983_v44  ;;  %vm3086_vm9 = vcmp.gt.f32.partialorder %v2983_v44, 0.0  ;;  %v2994_v11 = vadd.f32 %v4356_v10, %v6015_v19  ;;  %v3153_v25 = vsel %vm3088_vm12, %v2991_v55, %v3121_v22 }
 0x72d   : > { %v2985_v6 = vpop.f32.mrf.mxu1  ;;  %3363 = vmatmul.mubr.bf16.gmra.mxu0 %v3196_v56 }
 0x72e   : > { %v2986_v59 = vadd.f32 %v2985_v6, %v6015_v19  ;;  %3372 = vmatprep.mubr.bf16.mxu0 %v4962_v26  ;;  %v3151_v5 = vsel %vm3086_vm9, %v2983_v44, %v3119_v7  ;;  %v3122_v16 = vmul.f32 %v6018_v46, %v2994_v11  ;;  %vm3089_vm11 = vcmp.gt.f32.partialorder %v2994_v11, 0.0 }
 0x730   : > { %vm3087_vm10 = vcmp.gt.f32.partialorder %v2986_v59, 0.0  ;;  %v3120_v42 = vmul.f32 %v6018_v46, %v2986_v59  ;;  %v3154_v37 = vsel %vm3089_vm11, %v2994_v11, %v3122_v16 }
 0x731   : > { %v3198_v32 = vpack.c.bf16 %v3154_v37, %v3153_v25 }
 0x732   : > { %v3152_v14 = vsel %vm3087_vm10, %v2986_v59, %v3120_v42 }
 0x733   : > { %v3197_v15 = vpack.c.bf16 %v3152_v14, %v3151_v5 }
 0x735   : > { %3373 = vmatmul.mubr.bf16.gmra.mxu0 %v3197_v15 }
 0x736   : > { %3382 = vmatprep.mubr.bf16.mxu0 %v4962_v26 }
 0x737   : > { %v4359_v20 = vpop.f32.mrf.mxu1 }
 0x738   : > { %v3007_v62 = vadd.f32 %v4359_v20, %v6015_v19 }
 0x739   : > { %v2998_v24 = vpop.f32.mrf.mxu1 }
 0x73a   : > { %v2999_v18 = vadd.f32 %v2998_v24, %v6015_v19  ;;  %v3125_v27 = vmul.f32 %v6018_v46, %v3007_v62  ;;  %vm3092_vm0 = vcmp.gt.f32.partialorder %v3007_v62, 0.0 }
 0x73b   : > { %v4360_v29 = vpop.f32.mrf.mxu1 }
 0x73c   : > { %v3123_v38 = vmul.f32 %v6018_v46, %v2999_v18  ;;  %vm3090_vm13 = vcmp.gt.f32.partialorder %v2999_v18, 0.0  ;;  %v3010_v52 = vadd.f32 %v4360_v29, %v6015_v19  ;;  %v3157_v35 = vsel %vm3092_vm0, %v3007_v62, %v3125_v27 }
 0x73d   : > { %v3001_v31 = vpop.f32.mrf.mxu1  ;;  %3383 = vmatmul.mubr.bf16.gmra.mxu0 %v3198_v32 }
 0x73e   : > { %v3002_v50 = vadd.f32 %v3001_v31, %v6015_v19  ;;  %3392 = vmatprep.mubr.bf16.mxu0 %v4962_v26  ;;  %v3155_v28 = vsel %vm3090_vm13, %v2999_v18, %v3123_v38  ;;  %v3126_v53 = vmul.f32 %v6018_v46, %v3010_v52  ;;  %vm3093_vm15 = vcmp.gt.f32.partialorder %v3010_v52, 0.0 }
 0x73f   : > { %v4363_v9 = vpop.f32.mrf.mxu1 }
 0x740   : > { %vm3091_vm14 = vcmp.gt.f32.partialorder %v3002_v50, 0.0  ;;  %v3124_v41 = vmul.f32 %v6018_v46, %v3002_v50  ;;  %v3158_v2 = vsel %vm3093_vm15, %v3010_v52, %v3126_v53  ;;  %v3023_v51 = vadd.f32 %v4363_v9, %v6015_v19 }
 0x741   : > { %v3014_v4 = vpop.f32.mrf.mxu1  ;;  %v3200_v0 = vpack.c.bf16 %v3158_v2, %v3157_v35 }
 0x742   : > { %v3156_v12 = vsel %vm3091_vm14, %v3002_v50, %v3124_v41  ;;  %v3015_v54 = vadd.f32 %v3014_v4, %v6015_v19  ;;  %v3129_v34 = vmul.f32 %v6018_v46, %v3023_v51  ;;  %vm3096_vm4 = vcmp.gt.f32.partialorder %v3023_v51, 0.0 }
 0x743   : > { %v3199_v36 = vpack.c.bf16 %v3156_v12, %v3155_v28  ;;  %v4364_v48 = vpop.f32.mrf.mxu1 }
 0x744   : > { %v3127_v43 = vmul.f32 %v6018_v46, %v3015_v54  ;;  %vm3094_vm2 = vcmp.gt.f32.partialorder %v3015_v54, 0.0  ;;  %v3026_v23 = vadd.f32 %v4364_v48, %v6015_v19  ;;  %v3161_v40 = vsel %vm3096_vm4, %v3023_v51, %v3129_v34 }
 0x745   : > { %v3017_v58 = vpop.f32.mrf.mxu1  ;;  %3393 = vmatmul.mubr.bf16.gmra.mxu0 %v3199_v36 }
 0x746   : > { %3402 = vmatprep.mubr.bf16.mxu0 %v4962_v26  ;;  %v3018_v33 = vadd.f32 %v3017_v58, %v6015_v19  ;;  %v3159_v8 = vsel %vm3094_vm2, %v3015_v54, %v3127_v43  ;;  %v3130_v63 = vmul.f32 %v6018_v46, %v3026_v23  ;;  %vm3097_vm3 = vcmp.gt.f32.partialorder %v3026_v23, 0.0 }
 0x747   : > { %v4367_v30 = vpop.f32.mrf.mxu1 }
 0x748   : > { %v3128_v17 = vmul.f32 %v6018_v46, %v3018_v33  ;;  %vm3095_vm1 = vcmp.gt.f32.partialorder %v3018_v33, 0.0  ;;  %v3162_v13 = vsel %vm3097_vm3, %v3026_v23, %v3130_v63  ;;  %v3039_v59 = vadd.f32 %v4367_v30, %v6015_v19 }
 0x749   : > { %v3030_v21 = vpop.f32.mrf.mxu1  ;;  %v3202_v47 = vpack.c.bf16 %v3162_v13, %v3161_v40 }
 0x74a   : > { %v3160_v60 = vsel %vm3095_vm1, %v3018_v33, %v3128_v17  ;;  %v3031_v49 = vadd.f32 %v3030_v21, %v6015_v19  ;;  %v3133_v14 = vmul.f32 %v6018_v46, %v3039_v59  ;;  %vm3100_vm8 = vcmp.gt.f32.partialorder %v3039_v59, 0.0 }
 0x74b   : > { %v4368_v61 = vpop.f32.mrf.mxu1  ;;  %v3201_v39 = vpack.c.bf16 %v3160_v60, %v3159_v8  ;;  %v3210_v60 = vlaneseq }
 0x74c   : > { %v3131_v10 = vmul.f32 %v6018_v46, %v3031_v49  ;;  %vm3098_vm6 = vcmp.gt.f32.partialorder %v3031_v49, 0.0  ;;  %v3042_v56 = vadd.f32 %v4368_v61, %v6015_v19  ;;  %v3165_v20 = vsel %vm3100_vm8, %v3039_v59, %v3133_v14 }
 0x74d   : > { %3403 = vmatmul.mubr.bf16.gmra.mxu0 %v3200_v0  ;;  %v3033_v1 = vpop.f32.mrf.mxu1  ;;  %v3211_v61 = vshrl.u32 %v3210_v60, 7 }
 0x74e   : > { %3412 = vmatprep.mubr.bf16.mxu0 %v4962_v26  ;;  %v3034_v45 = vadd.f32 %v3033_v1, %v6015_v19  ;;  %v3163_v11 = vsel %vm3098_vm6, %v3031_v49, %v3131_v10  ;;  %v3134_v55 = vmul.f32 %v6018_v46, %v3042_v56  ;;  %vm3101_vm7 = vcmp.gt.f32.partialorder %v3042_v56, 0.0 }
 0x74f   : > { %v4371_v3 = vpop.f32.mrf.mxu1  ;;  %v3212_v51 = vsub.s32 0, %v3211_v61  ;;  %v3216_v8 = vsub.s32 1, %v3211_v61 }
 0x750   : > { %v3132_v44 = vmul.f32 %v6018_v46, %v3034_v45  ;;  %vm3099_vm5 = vcmp.gt.f32.partialorder %v3034_v45, 0.0  ;;  %v3166_v15 = vsel %vm3101_vm7, %v3042_v56, %v3134_v55  ;;  %v3055_v50 = vadd.f32 %v4371_v3, %v6015_v19 }
 0x751   : > { %v3046_v57 = vpop.f32.mrf.mxu1  ;;  %v3204_v24 = vpack.c.bf16 %v3166_v15, %v3165_v20 }
 0x752   : > { %v3164_v6 = vsel %vm3099_vm5, %v3034_v45, %v3132_v44  ;;  %v3047_v37 = vadd.f32 %v3046_v57, %v6015_v19  ;;  %v3137_v62 = vmul.f32 %v6018_v46, %v3055_v50  ;;  %vm3104_vm12 = vcmp.gt.f32.partialorder %v3055_v50, 0.0 }
 0x753   : > { %v4372_v7 = vpop.f32.mrf.mxu1  ;;  %v3203_v42 = vpack.c.bf16 %v3164_v6, %v3163_v11 }
 0x754   : > { %v3135_v32 = vmul.f32 %v6018_v46, %v3047_v37  ;;  %vm3102_vm10 = vcmp.gt.f32.partialorder %v3047_v37, 0.0  ;;  %v3058_v29 = vadd.f32 %v4372_v7, %v6015_v19  ;;  %v3169_v36 = vsel %vm3104_vm12, %v3055_v50, %v3137_v62 }
 0x755   : > { %3413 = vmatmul.mubr.bf16.gmra.mxu0 %v3201_v39  ;;  %v3049_v5 = vpop.f32.mrf.mxu1 }
 0x756   : > { %3422 = vmatprep.mubr.bf16.mxu0 %v4962_v26  ;;  %v3050_v16 = vadd.f32 %v3049_v5, %v6015_v19  ;;  %v3167_v9 = vsel %vm3102_vm10, %v3047_v37, %v3135_v32  ;;  %v3138_v41 = vmul.f32 %v6018_v46, %v3058_v29  ;;  %vm3105_vm11 = vcmp.gt.f32.partialorder %v3058_v29, 0.0 }
 0x757   : > { %v4375_v22 = vpop.f32.mrf.mxu1 }
 0x758   : > { %v3136_v25 = vmul.f32 %v6018_v46, %v3050_v16  ;;  %vm3103_vm9 = vcmp.gt.f32.partialorder %v3050_v16, 0.0  ;;  %v3170_v28 = vsel %vm3105_vm11, %v3058_v29, %v3138_v41  ;;  %v3071_v30 = vadd.f32 %v4375_v22, %v6015_v19 }
 0x759   : > { %v3062_v18 = vpop.f32.mrf.mxu1  ;;  %v3206_v53 = vpack.c.bf16 %v3170_v28, %v3169_v36 }
 0x75a   : > { %v3168_v31 = vsel %vm3103_vm9, %v3050_v16, %v3136_v25  ;;  %v3063_v48 = vadd.f32 %v3062_v18, %v6015_v19  ;;  %v3141_v17 = vmul.f32 %v6018_v46, %v3071_v30  ;;  %vm3108_vm0 = vcmp.gt.f32.partialorder %v3071_v30, 0.0 }
 0x75b   : > { %v4376_v38 = vpop.f32.mrf.mxu1  ;;  %v3205_v52 = vpack.c.bf16 %v3168_v31, %v3167_v9 }
 0x75c   : > { %v3139_v27 = vmul.f32 %v6018_v46, %v3063_v48  ;;  %vm3106_vm14 = vcmp.gt.f32.partialorder %v3063_v48, 0.0  ;;  %v3074_v2 = vadd.f32 %v4376_v38, %v6015_v19  ;;  %v3173_v43 = vsel %vm3108_vm0, %v3071_v30, %v3141_v17 }
 0x75d   : > { %3423 = vmatmul.mubr.bf16.gmra.mxu0 %v3202_v47  ;;  %v3065_v4 = vpop.f32.mrf.mxu1 }
 0x75e   : > { %3432 = vmatprep.mubr.bf16.mxu0 %v4962_v26  ;;  %v3066_v12 = vadd.f32 %v3065_v4, %v6015_v19  ;;  %v3171_v35 = vsel %vm3106_vm14, %v3063_v48, %v3139_v27  ;;  %v3142_v0 = vmul.f32 %v6018_v46, %v3074_v2  ;;  %vm3109_vm15 = vcmp.gt.f32.partialorder %v3074_v2, 0.0  ;;  %v3176_v19 = vld [vmem:[#allocation7 + $0x7] ss:$8 sm:$0x3] }
 0x75f   : > { %v6098_v39 = vrot.slane %v3176_v19, %v3212_v51  ;;  %v6100_v63 = vrot.slane %v3176_v19, %v3216_v8 }
 0x760   : > { %v3140_v58 = vmul.f32 %v6018_v46, %v3066_v12  ;;  %vm3107_vm13 = vcmp.gt.f32.partialorder %v3066_v12, 0.0  ;;  %v3174_v21 = vsel %vm3109_vm15, %v3074_v2, %v3142_v0 }
 0x761   : > { %v3208_v23 = vpack.c.bf16 %v3174_v21, %v3173_v43 }
 0x762   : > { %v3172_v33 = vsel %vm3107_vm13, %v3066_v12, %v3140_v58 }
 0x763   : > { %v3207_v54 = vpack.c.bf16 %v3172_v33, %v3171_v35 }
 0x765   : > { %3433 = vmatmul.mubr.bf16.gmra.mxu0 %v3203_v42 }
 0x766   : > { %3442 = vmatprep.mubr.bf16.mxu0 %v4962_v26 }
 0x76d   : > { %3443 = vmatmul.mubr.bf16.gmra.mxu0 %v3204_v24 }
 0x76e   : > { %3452 = vmatprep.mubr.bf16.mxu0 %v4962_v26 }
 0x775   : > { %3453 = vmatmul.mubr.bf16.gmra.mxu0 %v3205_v52 }
 0x776   : > { %3462 = vmatprep.mubr.bf16.mxu0 %v4962_v26 }
 0x77d   : > { %3463 = vmatmul.mubr.bf16.gmra.mxu0 %v3206_v53 }
 0x77e   : > { %3472 = vmatprep.mubr.bf16.mxu0 %v4962_v26 }
 0x785   : > { %3473 = vmatmul.mubr.bf16.gmra.mxu0 %v3207_v54 }
 0x786   : > { %3482 = vmatprep.mubr.bf16.mxu0 %v4962_v26 }
 0x78d   : > { %3483 = vmatmul.mubr.bf16.gmra.mxu0 %v3208_v23 }
 0x7d2   : > { %v3334_v1 = vpop.f32.mrf.mxu0 }
 0x7d3   : > { %v3335_v46 = vadd.f32 %v3334_v1, %v6098_v39 }
 0x7d4   : > { %v3336_v34 = vpop.f32.mrf.mxu0 }
 0x7d5   : > { %3493 = vst [vmem:[%s6105_s16] sm:$0xff] %v3335_v46  ;;  %v3337_v26 = vadd.f32 %v3336_v34, %v6100_v63 }
 0x7d6   : > { %v3338_v13 = vpop.f32.mrf.mxu0 }
 0x7d7   : > { %3494 = vst [vmem:[%s6105_s16 + $0x8] sm:$0xff] %v3337_v26  ;;  %v3339_v45 = vadd.f32 %v3338_v13, %v6098_v39 }
 0x7d8   : > { %v3340_v3 = vpop.f32.mrf.mxu0 }
 0x7d9   : > { %3495 = vst [vmem:[%s6105_s16 + $0x10] sm:$0xff] %v3339_v45  ;;  %v3341_v40 = vadd.f32 %v3340_v3, %v6100_v63 }
 0x7da   : > { %v3344_v49 = vpop.f32.mrf.mxu0 }
 0x7db   : > { %3496 = vst [vmem:[%s6105_s16 + $0x18] sm:$0xff] %v3341_v40  ;;  %v3345_v47 = vadd.f32 %v3344_v49, %v6098_v39 }
 0x7dc   : > { %v3346_v44 = vpop.f32.mrf.mxu0 }
 0x7dd   : > { %3497 = vst [vmem:[%s6105_s16 + $0x20] sm:$0xff] %v3345_v47  ;;  %v3347_v57 = vadd.f32 %v3346_v44, %v6100_v63 }
 0x7de   : > { %v3348_v10 = vpop.f32.mrf.mxu0 }
 0x7df   : > { %3498 = vst [vmem:[%s6105_s16 + $0x28] sm:$0xff] %v3347_v57  ;;  %v3349_v56 = vadd.f32 %v3348_v10, %v6098_v39 }
 0x7e0   : > { %v3350_v6 = vpop.f32.mrf.mxu0 }
 0x7e1   : > { %3499 = vst [vmem:[%s6105_s16 + $0x30] sm:$0xff] %v3349_v56  ;;  %v3351_v7 = vadd.f32 %v3350_v6, %v6100_v63 }
 0x7e3   : > { %3500 = vst [vmem:[%s6105_s16 + $0x38] sm:$0xff] %v3351_v7 }
 0x7e5   : > { %v3354_v59 = vpop.f32.mrf.mxu0 }
 0x7e6   : > { %v3355_v11 = vadd.f32 %v3354_v59, %v6098_v39 }
 0x7e7   : > { %v3356_v42 = vpop.f32.mrf.mxu0 }
 0x7e8   : > { %3501 = vst [vmem:[%s6105_s16 + $0x40] sm:$0xff] %v3355_v11  ;;  %v3357_v55 = vadd.f32 %v3356_v42, %v6100_v63 }
 0x7e9   : > { %v3358_v5 = vpop.f32.mrf.mxu0 }
 0x7ea   : > { %3502 = vst [vmem:[%s6105_s16 + $0x48] sm:$0xff] %v3357_v55  ;;  %v3359_v14 = vadd.f32 %v3358_v5, %v6098_v39 }
 0x7eb   : > { %v3360_v15 = vpop.f32.mrf.mxu0 }
 0x7ec   : > { %3503 = vst [vmem:[%s6105_s16 + $0x50] sm:$0xff] %v3359_v14  ;;  %v3361_v16 = vadd.f32 %v3360_v15, %v6100_v63 }
 0x7ed   : > { %v3364_v22 = vpop.f32.mrf.mxu0 }
 0x7ee   : > { %3504 = vst [vmem:[%s6105_s16 + $0x58] sm:$0xff] %v3361_v16  ;;  %v3365_v20 = vadd.f32 %v3364_v22, %v6098_v39 }
 0x7ef   : > { %v3366_v37 = vpop.f32.mrf.mxu0 }
 0x7f0   : > { %3505 = vst [vmem:[%s6105_s16 + $0x60] sm:$0xff] %v3365_v20  ;;  %v3367_v24 = vadd.f32 %v3366_v37, %v6100_v63 }
 0x7f1   : > { %v3368_v25 = vpop.f32.mrf.mxu0 }
 0x7f2   : > { %3506 = vst [vmem:[%s6105_s16 + $0x68] sm:$0xff] %v3367_v24  ;;  %v3369_v18 = vadd.f32 %v3368_v25, %v6098_v39 }
 0x7f3   : > { %v3370_v32 = vpop.f32.mrf.mxu0 }
 0x7f4   : > { %3507 = vst [vmem:[%s6105_s16 + $0x70] sm:$0xff] %v3369_v18  ;;  %v3371_v29 = vadd.f32 %v3370_v32, %v6100_v63 }
 0x7f5   : > { %v3374_v31 = vpop.f32.mrf.mxu0 }
 0x7f6   : > { %3508 = vst [vmem:[%s6105_s16 + $0x78] sm:$0xff] %v3371_v29  ;;  %v3375_v38 = vadd.f32 %v3374_v31, %v6098_v39 }
 0x7f7   : > { %v3376_v50 = vpop.f32.mrf.mxu0 }
 0x7f8   : > { %3509 = vst [vmem:[%s6105_s16 + $0x80] sm:$0xff] %v3375_v38  ;;  %v3377_v9 = vadd.f32 %v3376_v50, %v6100_v63 }
 0x7f9   : > { %v3378_v52 = vpop.f32.mrf.mxu0 }
 0x7fa   : > { %3510 = vst [vmem:[%s6105_s16 + $0x88] sm:$0xff] %v3377_v9  ;;  %v3379_v41 = vadd.f32 %v3378_v52, %v6098_v39 }
 0x7fb   : > { %v3380_v4 = vpop.f32.mrf.mxu0 }
 0x7fc   : > { %3511 = vst [vmem:[%s6105_s16 + $0x90] sm:$0xff] %v3379_v41  ;;  %v3381_v62 = vadd.f32 %v3380_v4, %v6100_v63 }
 0x7fd   : > { %v3384_v28 = vpop.f32.mrf.mxu0 }
 0x7fe   : > { %3512 = vst [vmem:[%s6105_s16 + $0x98] sm:$0xff] %v3381_v62  ;;  %v3385_v12 = vadd.f32 %v3384_v28, %v6098_v39 }
 0x7ff   : > { %v3386_v36 = vpop.f32.mrf.mxu0 }
 0x800   : > { %3513 = vst [vmem:[%s6105_s16 + $0xa0] sm:$0xff] %v3385_v12  ;;  %v3387_v48 = vadd.f32 %v3386_v36, %v6100_v63 }
 0x801   : > { %v3388_v53 = vpop.f32.mrf.mxu0 }
 0x802   : > { %3514 = vst [vmem:[%s6105_s16 + $0xa8] sm:$0xff] %v3387_v48  ;;  %v3389_v58 = vadd.f32 %v3388_v53, %v6098_v39 }
 0x803   : > { %v3390_v27 = vpop.f32.mrf.mxu0 }
 0x804   : > { %3515 = vst [vmem:[%s6105_s16 + $0xb0] sm:$0xff] %v3389_v58  ;;  %v3391_v2 = vadd.f32 %v3390_v27, %v6100_v63 }
 0x805   : > { %v3394_v33 = vpop.f32.mrf.mxu0 }
 0x806   : > { %3516 = vst [vmem:[%s6105_s16 + $0xb8] sm:$0xff] %v3391_v2  ;;  %v3395_v30 = vadd.f32 %v3394_v33, %v6098_v39 }
 0x807   : > { %v3396_v35 = vpop.f32.mrf.mxu0 }
 0x808   : > { %3517 = vst [vmem:[%s6105_s16 + $0xc0] sm:$0xff] %v3395_v30  ;;  %v3397_v54 = vadd.f32 %v3396_v35, %v6100_v63 }
 0x809   : > { %v3398_v0 = vpop.f32.mrf.mxu0 }
 0x80a   : > { %3518 = vst [vmem:[%s6105_s16 + $0xc8] sm:$0xff] %v3397_v54  ;;  %v3399_v17 = vadd.f32 %v3398_v0, %v6098_v39 }
 0x80b   : > { %v3400_v21 = vpop.f32.mrf.mxu0 }
 0x80c   : > { %3519 = vst [vmem:[%s6105_s16 + $0xd0] sm:$0xff] %v3399_v17  ;;  %v3401_v43 = vadd.f32 %v3400_v21, %v6100_v63 }
 0x80d   : > { %v3404_v23 = vpop.f32.mrf.mxu0 }
 0x80e   : > { %3520 = vst [vmem:[%s6105_s16 + $0xd8] sm:$0xff] %v3401_v43  ;;  %v3405_v60 = vadd.f32 %v3404_v23, %v6098_v39 }
 0x80f   : > { %v3406_v61 = vpop.f32.mrf.mxu0 }
 0x810   : > { %3521 = vst [vmem:[%s6105_s16 + $0xe0] sm:$0xff] %v3405_v60  ;;  %v3407_v51 = vadd.f32 %v3406_v61, %v6100_v63 }
 0x811   : > { %v3408_v19 = vpop.f32.mrf.mxu0 }
 0x812   : > { %3522 = vst [vmem:[%s6105_s16 + $0xe8] sm:$0xff] %v3407_v51  ;;  %v3409_v8 = vadd.f32 %v3408_v19, %v6098_v39 }
 0x813   : > { %v3410_v1 = vpop.f32.mrf.mxu0 }
 0x814   : > { %3523 = vst [vmem:[%s6105_s16 + $0xf0] sm:$0xff] %v3409_v8  ;;  %v3411_v46 = vadd.f32 %v3410_v1, %v6100_v63 }
 0x815   : > { %v3414_v34 = vpop.f32.mrf.mxu0 }
 0x816   : > { %3524 = vst [vmem:[%s6105_s16 + $0xf8] sm:$0xff] %v3411_v46  ;;  %v3415_v26 = vadd.f32 %v3414_v34, %v6098_v39 }
 0x817   : > { %v3416_v13 = vpop.f32.mrf.mxu0 }
 0x818   : > { %3525 = vst [vmem:[%s6105_s16 + $0x100] sm:$0xff] %v3415_v26  ;;  %v3417_v45 = vadd.f32 %v3416_v13, %v6100_v63 }
 0x819   : > { %v3418_v3 = vpop.f32.mrf.mxu0 }
 0x81a   : > { %3526 = vst [vmem:[%s6105_s16 + $0x108] sm:$0xff] %v3417_v45  ;;  %v3419_v40 = vadd.f32 %v3418_v3, %v6098_v39 }
 0x81b   : > { %v3420_v49 = vpop.f32.mrf.mxu0 }
 0x81c   : > { %3527 = vst [vmem:[%s6105_s16 + $0x110] sm:$0xff] %v3419_v40  ;;  %v3421_v47 = vadd.f32 %v3420_v49, %v6100_v63 }
 0x81d   : > { %v3424_v44 = vpop.f32.mrf.mxu0 }
 0x81e   : > { %3528 = vst [vmem:[%s6105_s16 + $0x118] sm:$0xff] %v3421_v47  ;;  %v3425_v57 = vadd.f32 %v3424_v44, %v6098_v39 }
 0x81f   : > { %v3426_v10 = vpop.f32.mrf.mxu0 }
 0x820   : > { %3529 = vst [vmem:[%s6105_s16 + $0x120] sm:$0xff] %v3425_v57  ;;  %v3427_v56 = vadd.f32 %v3426_v10, %v6100_v63 }
 0x821   : > { %v3428_v6 = vpop.f32.mrf.mxu0 }
 0x822   : > { %3530 = vst [vmem:[%s6105_s16 + $0x128] sm:$0xff] %v3427_v56  ;;  %v3429_v7 = vadd.f32 %v3428_v6, %v6098_v39 }
 0x823   : > { %v3430_v59 = vpop.f32.mrf.mxu0 }
 0x824   : > { %3531 = vst [vmem:[%s6105_s16 + $0x130] sm:$0xff] %v3429_v7  ;;  %v3431_v11 = vadd.f32 %v3430_v59, %v6100_v63 }
 0x825   : > { %v3434_v42 = vpop.f32.mrf.mxu0 }
 0x826   : > { %3532 = vst [vmem:[%s6105_s16 + $0x138] sm:$0xff] %v3431_v11  ;;  %v3435_v55 = vadd.f32 %v3434_v42, %v6098_v39 }
 0x827   : > { %v3436_v5 = vpop.f32.mrf.mxu0 }
 0x828   : > { %3533 = vst [vmem:[%s6105_s16 + $0x140] sm:$0xff] %v3435_v55  ;;  %v3437_v14 = vadd.f32 %v3436_v5, %v6100_v63 }
 0x829   : > { %v3438_v15 = vpop.f32.mrf.mxu0 }
 0x82a   : > { %3534 = vst [vmem:[%s6105_s16 + $0x148] sm:$0xff] %v3437_v14  ;;  %v3439_v16 = vadd.f32 %v3438_v15, %v6098_v39 }
 0x82b   : > { %v3440_v22 = vpop.f32.mrf.mxu0 }
 0x82c   : > { %3535 = vst [vmem:[%s6105_s16 + $0x150] sm:$0xff] %v3439_v16  ;;  %v3441_v20 = vadd.f32 %v3440_v22, %v6100_v63 }
 0x82d   : > { %v3444_v37 = vpop.f32.mrf.mxu0 }
 0x82e   : > { %3536 = vst [vmem:[%s6105_s16 + $0x158] sm:$0xff] %v3441_v20  ;;  %v3445_v24 = vadd.f32 %v3444_v37, %v6098_v39 }
 0x82f   : > { %v3446_v25 = vpop.f32.mrf.mxu0 }
 0x830   : > { %3537 = vst [vmem:[%s6105_s16 + $0x160] sm:$0xff] %v3445_v24  ;;  %v3447_v18 = vadd.f32 %v3446_v25, %v6100_v63 }
 0x831   : > { %v3448_v32 = vpop.f32.mrf.mxu0 }
 0x832   : > { %3538 = vst [vmem:[%s6105_s16 + $0x168] sm:$0xff] %v3447_v18  ;;  %v3449_v29 = vadd.f32 %v3448_v32, %v6098_v39 }
 0x833   : > { %v3450_v31 = vpop.f32.mrf.mxu0 }
 0x834   : > { %3539 = vst [vmem:[%s6105_s16 + $0x170] sm:$0xff] %v3449_v29  ;;  %v3451_v38 = vadd.f32 %v3450_v31, %v6100_v63 }
 0x835   : > { %v3454_v50 = vpop.f32.mrf.mxu0 }
 0x836   : > { %3540 = vst [vmem:[%s6105_s16 + $0x178] sm:$0xff] %v3451_v38  ;;  %v3455_v9 = vadd.f32 %v3454_v50, %v6098_v39 }
 0x837   : > { %v3456_v52 = vpop.f32.mrf.mxu0 }
 0x838   : > { %3541 = vst [vmem:[%s6105_s16 + $0x180] sm:$0xff] %v3455_v9  ;;  %v3457_v41 = vadd.f32 %v3456_v52, %v6100_v63 }
 0x839   : > { %v3458_v4 = vpop.f32.mrf.mxu0 }
 0x83a   : > { %3542 = vst [vmem:[%s6105_s16 + $0x188] sm:$0xff] %v3457_v41  ;;  %v3459_v62 = vadd.f32 %v3458_v4, %v6098_v39 }
 0x83b   : > { %v3460_v28 = vpop.f32.mrf.mxu0 }
 0x83c   : > { %3543 = vst [vmem:[%s6105_s16 + $0x190] sm:$0xff] %v3459_v62  ;;  %v3461_v12 = vadd.f32 %v3460_v28, %v6100_v63 }
 0x83d   : > { %v3464_v36 = vpop.f32.mrf.mxu0 }
 0x83e   : > { %3544 = vst [vmem:[%s6105_s16 + $0x198] sm:$0xff] %v3461_v12  ;;  %v3465_v48 = vadd.f32 %v3464_v36, %v6098_v39 }
 0x83f   : > { %v3466_v53 = vpop.f32.mrf.mxu0 }
 0x840   : > { %3545 = vst [vmem:[%s6105_s16 + $0x1a0] sm:$0xff] %v3465_v48  ;;  %v3467_v58 = vadd.f32 %v3466_v53, %v6100_v63 }
 0x841   : > { %v3468_v27 = vpop.f32.mrf.mxu0 }
 0x842   : > { %3546 = vst [vmem:[%s6105_s16 + $0x1a8] sm:$0xff] %v3467_v58  ;;  %v3469_v2 = vadd.f32 %v3468_v27, %v6098_v39 }
 0x843   : > { %v3470_v33 = vpop.f32.mrf.mxu0 }
 0x844   : > { %3547 = vst [vmem:[%s6105_s16 + $0x1b0] sm:$0xff] %v3469_v2  ;;  %v3471_v30 = vadd.f32 %v3470_v33, %v6100_v63 }
 0x845   : > { %v3474_v35 = vpop.f32.mrf.mxu0 }
 0x846   : > { %3548 = vst [vmem:[%s6105_s16 + $0x1b8] sm:$0xff] %v3471_v30  ;;  %v3475_v54 = vadd.f32 %v3474_v35, %v6098_v39 }
 0x847   : > { %v3476_v0 = vpop.f32.mrf.mxu0 }
 0x848   : > { %3549 = vst [vmem:[%s6105_s16 + $0x1c0] sm:$0xff] %v3475_v54  ;;  %v3477_v17 = vadd.f32 %v3476_v0, %v6100_v63 }
 0x849   : > { %v3478_v21 = vpop.f32.mrf.mxu0 }
 0x84a   : > { %3550 = vst [vmem:[%s6105_s16 + $0x1c8] sm:$0xff] %v3477_v17  ;;  %v3479_v43 = vadd.f32 %v3478_v21, %v6098_v39 }
 0x84b   : > { %v3480_v23 = vpop.f32.mrf.mxu0 }
 0x84c   : > { %3551 = vst [vmem:[%s6105_s16 + $0x1d0] sm:$0xff] %v3479_v43  ;;  %v3481_v60 = vadd.f32 %v3480_v23, %v6100_v63 }
 0x84d   : > { %v3484_v61 = vpop.f32.mrf.mxu0 }
 0x84e   : > { %3552 = vst [vmem:[%s6105_s16 + $0x1d8] sm:$0xff] %v3481_v60  ;;  %v3485_v51 = vadd.f32 %v3484_v61, %v6098_v39 }
 0x84f   : > { %v3486_v19 = vpop.f32.mrf.mxu0 }
 0x850   : > { %3553 = vst [vmem:[%s6105_s16 + $0x1e0] sm:$0xff] %v3485_v51  ;;  %v3487_v8 = vadd.f32 %v3486_v19, %v6100_v63 }
 0x851   : > { %v3488_v1 = vpop.f32.mrf.mxu0 }
 0x852   : > { %3554 = vst [vmem:[%s6105_s16 + $0x1e8] sm:$0xff] %v3487_v8  ;;  %v3489_v46 = vadd.f32 %v3488_v1, %v6098_v39 }
 0x853   : > { %v3490_v34 = vpop.f32.mrf.mxu0 }
 0x854   : > { %3555 = vst [vmem:[%s6105_s16 + $0x1f0] sm:$0xff] %v3489_v46  ;;  %v3491_v26 = vadd.f32 %v3490_v34, %v6100_v63 }
 0x856   : > { %3556 = vst [vmem:[%s6105_s16 + $0x1f8] sm:$0xff] %v3491_v26 }
 0x857   : > { %4879 = shalt.err (!%p4876_p6)
}
 0x858   : > { %s4880_s30 = scalar_lea.hbm %s6236_s13, 8192  ;;  %s4884_s12 = scalar_lea.hbm %s6295_s11, 16384 }
 0x859   : > { %p4881_p8 = scmp.ne.s32.totalorder %s6236_s13, %s4880_s30  ;;  %p4885_p10 = scmp.lt.s32.totalorder %s6236_s13, %s6295_s11 }
 0x85a   : > { %p4886_p0 = scmp.lt.s32.totalorder %s4884_s12, %s4880_s30 }
 0x85b   : > { %p4882_p9 = pnand %p4881_p8, %p6327_p5 }
 0x85c   : > { %p4887_p13 = por %p4886_p0, %p4885_p10 }
 0x85d   : > { %p4883_p11 = pneg %p4882_p9 }
 0x85f   : > { %p4888_p2 = pnand %p4887_p13, %p4883_p11 }
 0x861   : > { %4891 = shalt.err (!%p4888_p2)
}
 0x862   : > { %s4964_s3 = smov 256   ;;  %s4965_s28 = smov 16  }
 0x863   : > { %4423 = dma.vmem_to_hbm [thread:$0]  (%p6327_p5), %s6238_s14, 8192, %s6236_s13, %s3558_s23, %s4964_s3, %s4964_s3, %s4965_s28  }
 0x864 PF: > { %s3587_s1 = sand.u32 1, %s4934_s17   ;;  %p6328_p7 = scmp.ne.s32.totalorder %s6315_s26, 0 }
 0x865   : > { %p6329_p12 = scmp.ge.s32.totalorder %s4946_s20, 2  ;;  %s3588_s2 = scalar_lea.sflag [#allocation4], %s3587_s1 }
 0x867   : > { %p4452_p1 = pnand %p6329_p12, %p6328_p7 }
 0x869   : > { %p4453_p3 = pneg %p4452_p1 }
 0x86b   : > { %4929 = dma.done.wait (%p4453_p3), %s3588_s2, 8192  }
 0x86c   : > { %4931 = vsyncadd (%p4453_p3), %s3588_s2, 4294959104  ;;  %p28_p4 = scmp.ge.s32.totalorder %s5152_s25, 4   ;;  %s6330_s17 = smov %s4938_s18 }
 0x86d   : > { %s6331_s18 = smov %s4942_s19  ;;  %s6332_s19 = smov %s5164_s29 }
 0x86e   : > { %s6333_s20 = smov %s5152_s25  ;;  %30 = sbr.rel (!%p28_p4) target bundleno = 15 (0xf), region = 139 }
 0x873   :  { %3593 = vsyncpa [#allocation3], 1 }
 0x874   :  { %3595 = vsyncpa [#allocation3 + $0x1], 1 }
 0x875   :  { %3596 = vsyncpa [#allocation8], 1 }
 0x876   :  { %3597 = vsyncpa [#allocation11], 1 }
 0x877   :  { %3598 = vsyncpa [#allocation14], 1 }
 0x878   :  { %3599 = vsyncpa [#allocation4], 1 }
 0x879   :  { %3601 = vsyncpa [#allocation4 + $0x1], 1 }
 0x87a   :  { %3602 = vsyncpa [#allocation5], 1 }
 0x87b   :  { %3604 = vsyncpa [#allocation5 + $0x1], 1 }

// kernel: tpu_custom_call.1
= control target key start
LH: loop header
LB: loop body
LE: loop exit
PB: predicated region body
PF: predicated region fallthrough
CT: control target
= control target key end

     0   :  { %s6284_s0 = inlined_call_operand.hbm [shape: f32[512,256], index: 0, kind: input, shape index: {}]   ;;  %s6285_s1 = inlined_call_operand.vmem [shape: f32[6], index: 1, kind: input, shape index: {}]   ;;  %s6286_s2 = inlined_call_operand.hbm [shape: f32[8,256], index: 2, kind: input, shape index: {}]   ;;  %s6287_s3 = inlined_call_operand.hbm [shape: bf16[256,128], index: 3, kind: input, shape index: {}]   ;;  %s6288_s4 = inlined_call_operand.vmem [shape: bf16[128,128], index: 4, kind: input, shape index: {}]   ;;  %s6289_s5 = inlined_call_operand.hbm [shape: bf16[128,128], index: 5, kind: input, shape index: {}]   ;;  %s6290_s6 = inlined_call_operand.vmem [shape: bf16[128,64], index: 6, kind: input, shape index: {}]   ;;  %s6291_s7 = inlined_call_operand.vmem [shape: bf16[64,128], index: 7, kind: input, shape index: {}]   ;;  %s6292_s8 = inlined_call_operand.hbm [shape: bf16[128,128], index: 8, kind: input, shape index: {}]   ;;  %s6293_s9 = inlined_call_operand.hbm [shape: bf16[128,128], index: 9, kind: input, shape index: {}]   ;;  %s6294_s10 = inlined_call_operand.hbm [shape: bf16[128,256], index: 10, kind: input, shape index: {}]   ;;  %s6295_s11 = inlined_call_operand.hbm [shape: f32[512,256], index: 11, kind: output, shape index: {}]  }
   0x1   :  { %6300 = sst [smem:[#allocation23_spill]] %s6285_s1 }
   0x2   :  { %6301 = sst [smem:[#allocation24_spill]] %s6286_s2 }
   0x3   :  { %6302 = sst [smem:[#allocation25_spill]] %s6287_s3 }
   0x4   :  { %6303 = sst [smem:[#allocation26_spill]] %s6289_s5 }
   0x5   :  { %6304 = sst [smem:[#allocation27_spill]] %s6292_s8 }
   0x6   :  { %16 = vsyncpa [#allocation3], 0 }
   0x7   :  { %18 = vsyncpa [#allocation3 + $0x1], 0 }
   0x8   :  { %19 = vsyncpa [#allocation5], 0 }
   0x9   :  { %20 = vsyncpa [#allocation8], 0 }
   0xa   :  { %21 = vsyncpa [#allocation11], 0 }
   0xb   :  { %22 = vsyncpa [#allocation14], 0 }
   0xc   :  { %23 = vsyncpa [#allocation4], 0 }
   0xd   :  { %25 = vsyncpa [#allocation4 + $0x1], 0  ;;  %s5026_s17 = smov 0   ;;  %s5028_s18 = smov 0  }
   0xe   :  { %s5030_s19 = smov 0   ;;  %s5032_s20 = smov 0  }
   0xf LB: > { %s4948_s21 = smov [#allocation7]   ;;  %s5047_s23 = sadd.s32 4294967295, %s4946_s20   ;;  %s4946_s20 = sphi %s5032_s20, %s6333_s20   ;;  %s4942_s19 = sphi %s5030_s19, %s6332_s19   ;;  %s4938_s18 = sphi %s5028_s18, %s6331_s18   ;;  %s4934_s17 = sphi %s5026_s17, %s6330_s17  }
  0x10   : > { %s322_s22 = sshll.u32 %s4948_s21, 4  ;;  %p3715_p0 = scmp.ge.s32.totalorder %s4946_s20, 1  ;;  %s323_s22 = int_to_ptr.vmem [resolvable:$true] %s322_s22 }
  0x11   : > { %p6296_p1 = scmp.eq.s32.totalorder %s5047_s23, 0  ;;  %p298_p2 = scmp.lt.s32.totalorder %s4946_s20, 3 }
  0x12   : > { %s4949_s25 = smov [#allocation10]   ;;  %s4950_s28 = smov [#allocation13]  }
  0x13   : > { %p5052_p3 = pnand %p3715_p0, %p298_p2  ;;  %s348_s26 = sshll.u32 %s4949_s25, 4  ;;  %s5065_s26 = int_to_ptr.vmem [resolvable:$true] %s348_s26 }
  0x14   : > { %s380_s29 = sshll.u32 %s4950_s28, 4  ;;  %s6307_s1 = sld [smem:[#allocation23_spill]]  ;;  %s5070_s29 = int_to_ptr.vmem [resolvable:$true] %s380_s29 }
  0x15   : > { %s6305_s24 = scalar_select %p5052_p3, 1, 0 }
  0x16   : > { %p4425_p5 = pneg %p5052_p3  ;;  %s4678_s15 = scalar_lea.vmem %s323_s22, 256 }
  0x17   : > { %p4679_p8 = scmp.ne.s32.totalorder %s323_s22, %s4678_s15  ;;  %p4686_p11 = scmp.lt.s32.totalorder %s323_s22, %s323_s22 }
  0x18   : > { %p5061_p6 = pnand %p4425_p5, %p6296_p1  ;;  %p4687_p12 = scmp.lt.s32.totalorder %s4678_s15, %s4678_s15 }
  0x1a   : > { %s311_s13 = sshll.u32 %s6307_s1, 4  ;;  %p5074_p7 = pneg %p5061_p6  ;;  %s312_s13 = int_to_ptr.vmem [resolvable:$true] %s311_s13 }
  0x1b   : > { %p4688_p13 = por %p4687_p12, %p4686_p11 }
  0x1c   : > { %p4681_p9 = pnand %p4679_p8, %p5074_p7 }
  0x1e   : > { %p4682_p10 = pneg %p4681_p9 }
  0x20   : > { %p4689_p0 = pnand %p4688_p13, %p4682_p10 }
  0x22   : > { %4692 = shalt.err (!%p4689_p0)
}
  0x23   : > { %s6309_s2 = sld [smem:[#allocation24_spill]]  ;;  %s4704_s25 = scalar_lea.vmem %s5065_s26, 1024 }
  0x24   : > { %p4705_p2 = scmp.ne.s32.totalorder %s5065_s26, %s4704_s25  ;;  %p4712_p9 = scmp.lt.s32.totalorder %s5065_s26, %s5065_s26 }
  0x25   : > { %p4713_p11 = scmp.lt.s32.totalorder %s4704_s25, %s4704_s25 }
  0x26   : > { %p4707_p5 = pnand %p4705_p2, %p5074_p7 }
  0x27   : > { %p4714_p10 = por %p4713_p11, %p4712_p9 }
  0x28   : > { %p4708_p8 = pneg %p4707_p5 }
  0x29   : > { %4431 = dma.hbm_to_vmem [thread:$0]  (!%p5061_p6), %s6309_s2, 256, %s323_s22, [#allocation8]  }
  0x2a   : > { %p4715_p12 = pnand %p4714_p10, %p4708_p8 }
  0x2c   : > { %4718 = shalt.err (!%p4715_p12)
}
  0x2d   : > { %s4951_s28 = smov 64   ;;  %s4952_s30 = smov 4  }
  0x2e   : > { %s6310_s5 = sld [smem:[#allocation26_spill]]  ;;  %s4730_s15 = scalar_lea.vmem %s5070_s29, 1024 }
  0x2f   : > { %p4731_p13 = scmp.ne.s32.totalorder %s5070_s29, %s4730_s15  ;;  %p4738_p5 = scmp.lt.s32.totalorder %s5070_s29, %s5070_s29 }
  0x30   : > { %p4739_p8 = scmp.lt.s32.totalorder %s4730_s15, %s4730_s15 }
  0x31   : > { %p4733_p0 = pnand %p4731_p13, %p5074_p7 }
  0x32   : > { %p4740_p9 = por %p4739_p8, %p4738_p5 }
  0x33   : > { %p4734_p2 = pneg %p4733_p0 }
  0x34   : > { %4437 = dma.hbm_to_vmem [thread:$0]  (!%p5061_p6), %s6310_s5, 1024, %s5065_s26, [#allocation11], %s4951_s28, %s4951_s28, %s4952_s30  }
  0x35   : > { %p4741_p11 = pnand %p4740_p9, %p4734_p2 }
  0x37   : > { %4744 = shalt.err (!%p4741_p11)
}
  0x38   : > { %4443 = dma.hbm_to_vmem [thread:$0]  (!%p5061_p6), %s6293_s9, 1024, %s5070_s29, [#allocation14], %s4951_s28, %s4951_s28, %s4952_s30  }
  0x39   : > { %s4745_s22 = scalar_lea.vmem %s312_s13, 16  ;;  %p4753_p0 = scmp.lt.s32.totalorder %s312_s13, %s312_s13 }
  0x3a   : > { %p4746_p10 = scmp.ne.s32.totalorder %s312_s13, %s4745_s22  ;;  %p4754_p2 = scmp.lt.s32.totalorder %s4745_s22, %s4745_s22 }
  0x3c   : > { %p4748_p12 = pnand %p4746_p10, %p5074_p7  ;;  %p4755_p5 = por %p4754_p2, %p4753_p0 }
  0x3e   : > { %p4749_p13 = pneg %p4748_p12 }
  0x40   : > { %p4756_p8 = pnand %p4755_p5, %p4749_p13 }
  0x42   : > { %4759 = shalt.err (!%p4756_p8)
}
  0x43   : > { %s4953_s12 = smov [#allocation6]   ;;  %s4954_s29 = smov [#allocation9]  }
  0x44   : > { %4428 = dma.vmem_to_smem (!%p5061_p6), %s312_s13, 16, %s4953_s12, [#allocation5]  }
  0x45   : > { %s332_s15 = sshll.u32 %s4954_s29, 4  ;;  %s4955_s16 = smov [#allocation12]   ;;  %s333_s15 = int_to_ptr.vmem [resolvable:$true] %s332_s15 }
  0x46   : > { %s367_s21 = sshll.u32 %s4955_s16, 4  ;;  %s4771_s26 = scalar_lea.vmem %s333_s15, 2048  ;;  %s368_s21 = int_to_ptr.vmem [resolvable:$true] %s367_s21 }
  0x47   : > { %p4772_p9 = scmp.ne.s32.totalorder %s333_s15, %s4771_s26  ;;  %p4779_p12 = scmp.lt.s32.totalorder %s333_s15, %s333_s15 }
  0x48   : > { %p4780_p0 = scmp.lt.s32.totalorder %s4771_s26, %s4771_s26 }
  0x49   : > { %p4774_p11 = pnand %p4772_p9, %p5074_p7 }
  0x4a   : > { %p4781_p13 = por %p4780_p0, %p4779_p12 }
  0x4b   : > { %p4775_p10 = pneg %p4774_p11 }
  0x4d   : > { %p4782_p2 = pnand %p4781_p13, %p4775_p10 }
  0x4f   : > { %4785 = shalt.err (!%p4782_p2)
}
  0x50   : > { %s6311_s3 = sld [smem:[#allocation25_spill]]  ;;  %s4797_s22 = scalar_lea.vmem %s368_s21, 1024 }
  0x51   : > { %p4798_p5 = scmp.ne.s32.totalorder %s368_s21, %s4797_s22  ;;  %p4805_p11 = scmp.lt.s32.totalorder %s368_s21, %s368_s21 }
  0x52   : > { %p4806_p4 = scmp.lt.s32.totalorder %s4797_s22, %s4797_s22 }
  0x53   : > { %p4800_p8 = pnand %p4798_p5, %p5074_p7 }
  0x54   : > { %p4807_p12 = por %p4806_p4, %p4805_p11 }
  0x55   : > { %p4801_p9 = pneg %p4800_p8 }
  0x56   : > { %4434 = dma.hbm_to_vmem [thread:$0]  (!%p5061_p6), %s6311_s3, 2048, %s333_s15, [#allocation8], %s4951_s28, %s4951_s28, %s4952_s30  }
  0x57   : > { %p4808_p10 = pnand %p4807_p12, %p4801_p9 }
  0x59   : > { %4811 = shalt.err (!%p4808_p10)
}
  0x5a   : > { %s6312_s8 = sld [smem:[#allocation27_spill]]  ;;  %s4956_s15 = smov [#allocation15]  }
  0x5b   : > { %s393_s16 = sshll.u32 %s4956_s15, 4  ;;  %s394_s16 = int_to_ptr.vmem [resolvable:$true] %s393_s16 }
  0x5c   : > { %s4823_s26 = scalar_lea.vmem %s394_s16, 2048  ;;  %p4831_p2 = scmp.lt.s32.totalorder %s394_s16, %s394_s16 }
  0x5d   : > { %p4824_p0 = scmp.ne.s32.totalorder %s394_s16, %s4823_s26  ;;  %p4832_p5 = scmp.lt.s32.totalorder %s4823_s26, %s4823_s26 }
  0x5f   : > { %p4826_p13 = pnand %p4824_p0, %p5074_p7  ;;  %p4833_p8 = por %p4832_p5, %p4831_p2 }
  0x60   : > { %4440 = dma.hbm_to_vmem [thread:$0]  (!%p5061_p6), %s6312_s8, 1024, %s368_s21, [#allocation11], %s4951_s28, %s4951_s28, %s4952_s30  }
  0x61   : > { %p4827_p4 = pneg %p4826_p13 }
  0x63   : > { %p4834_p9 = pnand %p4833_p8, %p4827_p4 }
  0x65   : > { %4837 = shalt.err (!%p4834_p9)
}
  0x66   : > { %s4957_s13 = smov 128   ;;  %s4958_s14 = smov 8  }
  0x67   : > { %4446 = dma.hbm_to_vmem [thread:$0]  (!%p5061_p6), %s6294_s10, 2048, %s394_s16, [#allocation14], %s4957_s13, %s4957_s13, %s4958_s14  }
  0x68   : > { %s3714_s21 = sadd.s32 4294967294, %s4946_s20   ;;  %s5152_s25 = sadd.s32 1, %s4946_s20  }
  0x69   : > { %s38_s22 = sadd.s32 1, %s4942_s19  ;;  %s35_s12 = ssub.s32 %s4946_s20, %s5152_s25 }
  0x6a   : > { %p45_p7 = scmp.ne.s32.totalorder %s4942_s19, %s4938_s18  ;;  %p36_p11 = scmp.eq.s32.totalorder %s35_s12, 0 }
  0x6b   : > { %p46_p12 = scmp.eq.s32.totalorder %s4946_s20, 0  ;;  %p51_p10 = scmp.ne.s32.totalorder %s4938_s18, %s4934_s17 }
  0x6c   : > { %p285_p0 = scmp.eq.s32.totalorder %s5047_s23, 1  ;;  %p291_p2 = scmp.eq.s32.totalorder %s3714_s21, 1 }
  0x6d   : > { %s5164_s29 = scalar_select %p36_p11, %s4942_s19, %s38_s22  }
  0x6e   : > { %p47_p13 = por %p46_p12, %p45_p7  ;;  %p5168_p4 = por %p6296_p1, %p51_p10 }
  0x6f   : > { %p5172_p6 = por %p285_p0, %p45_p7  ;;  %p4462_p5 = scmp.lt.s32.totalorder %s4946_s20, 2 }
  0x70   : > { %s6313_s27 = scalar_select %p5168_p4, 1, 0 }
  0x71   : > { %s6314_s15 = scalar_select %p5172_p6, 1, 0 }
  0x72   : > { %s407_s16 = sand.u32 1, %s4942_s19   ;;  %p5178_p8 = por %p291_p2, %p51_p10 }
  0x73   : > { %s3724_s13 = sshll.u32 %s407_s16, 9  ;;  %s3842_s14 = sshll.u32 %s4946_s20, 13 }
  0x74   : > { %s6315_s26 = scalar_select %p5178_p8, 1, 0 }
  0x75   : > { %s5186_s22 = scalar_lea.hbm %s6284_s0, %s3842_s14  ;;  %s411_s12 = scalar_lea.vmem [#allocation2], %s3724_s13 }
  0x76   : > { %s419_s1 = sshll.u32 %s411_s12, 4  ;;  %p5188_p9 = pnand %p4462_p5, %p47_p13  ;;  %s5192_s1 = int_to_ptr.vmem [resolvable:$true] %s419_s1 }
  0x77   : > { %s5194_s2 = scalar_lea.sflag [#allocation3], %s407_s16  ;;  %s4838_s3 = scalar_lea.hbm %s5186_s22, 8192 }
  0x78   : > { %p4839_p7 = scmp.ne.s32.totalorder %s5186_s22, %s4838_s3  ;;  %p4840_p11 = pneg %p5188_p9 }
  0x79   : > { %s4843_s13 = scalar_lea.hbm %s6284_s0, 16384  ;;  %p4844_p0 = scmp.lt.s32.totalorder %s5186_s22, %s6284_s0 }
  0x7a   : > { %p4841_p12 = pnand %p4840_p11, %p4839_p7  ;;  %p4845_p13 = scmp.lt.s32.totalorder %s4843_s13, %s4838_s3 }
  0x7c   : > { %p4842_p10 = pneg %p4841_p12  ;;  %p4846_p2 = por %p4845_p13, %p4844_p0 }
  0x7e   : > { %p4847_p5 = pnand %p4846_p2, %p4842_p10 }
  0x80   : > { %4850 = shalt.err (!%p4847_p5)
}
  0x81   : > { %s4851_s16 = scalar_lea.vmem %s5192_s1, 8192  ;;  %s4959_s5 = smov [#allocation2]  }
  0x82   : > { %p4852_p1 = scmp.ne.s32.totalorder %s5192_s1, %s4851_s16  ;;  %s4856_s8 = sshll.u32 %s4959_s5, 4  ;;  %s4857_s8 = int_to_ptr.vmem [resolvable:$false] %s4856_s8 }
  0x83   : > { %s4858_s14 = scalar_lea.vmem %s4857_s8, 16384  ;;  %p4859_p12 = scmp.lt.s32.totalorder %s5192_s1, %s4857_s8 }
  0x84   : > { %p4854_p8 = pnand %p4852_p1, %p4840_p11  ;;  %p4860_p6 = scmp.lt.s32.totalorder %s4858_s14, %s4851_s16 }
  0x86   : > { %p4855_p7 = pneg %p4854_p8  ;;  %p4861_p4 = por %p4860_p6, %p4859_p12 }
  0x88   : > { %p4862_p3 = pnand %p4861_p4, %p4855_p7 }
  0x8a   : > { %4865 = shalt.err (!%p4862_p3)
}
  0x8b   : > { %s4960_s3 = smov 256   ;;  %s4961_s28 = smov 16  }
  0x8c   : > { %4450 = dma.hbm_to_vmem [thread:$0]  (!%p5188_p9), %s5186_s22, 8192, %s5192_s1, %s5194_s2, %s4960_s3, %s4960_s3, %s4961_s28  }
  0x8d   : > { %p6317_p1 = scmp.ne.s32.totalorder %s6305_s24, 0 }
  0x8e   : > { %s5218_s5 = sand.u32 (!%p6317_p1), 1, %s4938_s18   ;;  %p6318_p3 = scmp.ne.s32.totalorder (!%p6317_p1), %s6313_s27, 0 }
  0x8f   : > { %431 = sbr.rel (%p6317_p1) target bundleno = 2148 (0x864), region = 64  ;;  %s3729_s8 = sshll.u32 (!%p6317_p1), %s5218_s5, 9 }
  0x90   : > { %s434_s13 = scalar_lea.sflag (!%p6317_p1), [#allocation3], %s5218_s5  ;;  %s5224_s30 = scalar_lea.vmem (!%p6317_p1), [#allocation2], %s3729_s8 }
  0x94   : > { %4909 = dma.done.wait (%p6318_p3), %s434_s13, 8192  }
  0x95   : > { %4911 = vsyncadd (%p6318_p3), %s434_s13, 4294959104  ;;  %p6319_p4 = scmp.eq.s32.totalorder %s5047_s23, 0 }
  0x97   : > { %4913 = dma.done.wait (%p6319_p4), [#allocation5], 16   ;;  %p6320_p6 = pmov %p6319_p4 }
  0x98   : > { %p6321_p8 = pmov %p6319_p4 }
  0x99   : > { %4915 = vsyncadd (%p6320_p6), [#allocation5], 4294967280 }
  0x9a   : > { %4917 = dma.done.wait (%p6321_p8), [#allocation8], 2304   ;;  %p6322_p9 = pmov %p6319_p4 }
  0x9b   : > { %p6323_p11 = pmov %p6319_p4 }
  0x9c   : > { %4919 = vsyncadd (%p6322_p9), [#allocation8], 4294964992 }
  0x9d   : > { %4921 = dma.done.wait (%p6323_p11), [#allocation11], 2048   ;;  %p6324_p10 = pmov %p6319_p4 }
  0x9e   : > { %p6325_p0 = pmov %p6319_p4 }
  0x9f   : > { %4923 = vsyncadd (%p6324_p10), [#allocation11], 4294965248 }
  0xa0   : > { %4925 = dma.done.wait (%p6325_p0), [#allocation14], 3072   ;;  %p6326_p13 = pmov %p6325_p0 }
  0xa2   : > { %4927 = vsyncadd (%p6326_p13), [#allocation14], 4294964224 }
  0xa3   : > { %470 = sfence }
  0xa4   : > { %v4519_v0 = vld [vmem:[#allocation9 + $0x78] sm:$0xff]   ;;  %v4521_v2 = vld [vmem:[#allocation9 + $0x70] sm:$0xff]   ;;  %v4523_v4 = vld [vmem:[#allocation9 + $0x68] sm:$0xff]   ;;  %s3771_s14 = sld [smem:[#allocation6 + $0x2]]  ;;  %s6105_s16 = scalar_lea.vmem [#allocation16], %s3729_s8 }
  0xa5   : > { %v4520_v1 = vld [vmem:[#allocation9 + $0x38] sm:$0xff]   ;;  %3845 = vmatprep.subr.bf16.mxu0 %v4519_v0  ;;  %4377 = vmatprep.subr.bf16.mxu1 %v4519_v0  ;;  %v4522_v3 = vld [vmem:[#allocation9 + $0x30] sm:$0xff]   ;;  %v4524_v5 = vld [vmem:[#allocation9 + $0x28] sm:$0xff]   ;;  %s3800_s22 = sld [smem:[#allocation6 + $0x3]]  ;;  %s3844_s8 = sshll.u32 %s5047_s23, 13 }
  0xa6   : > { %3846 = vmatpush3.bf16.msra.mxu0 %v4520_v1  ;;  %4385 = vmatpush3.bf16.msra.mxu1 %v4520_v1  ;;  %v4525_v6 = vld [vmem:[#allocation9 + $0x60] sm:$0xff]   ;;  %v4527_v8 = vld [vmem:[#allocation9 + $0x58] sm:$0xff]   ;;  %v4529_v10 = vld [vmem:[#allocation9 + $0x50] sm:$0xff]   ;;  %s3809_s21 = sld [smem:[#allocation6 + $0x4]]  ;;  %s6236_s13 = scalar_lea.hbm %s6295_s11, %s3844_s8 }
  0xa7   : > { %3847 = vmatprep.subr.bf16.mxu0 %v4521_v2  ;;  %4378 = vmatprep.subr.bf16.mxu1 %v4521_v2  ;;  %v4526_v7 = vld [vmem:[#allocation9 + $0x20] sm:$0xff]   ;;  %v4528_v9 = vld [vmem:[#allocation9 + $0x18] sm:$0xff]   ;;  %v511_v12 = vld [vmem:[%s5224_s30 + $0x18] sm:$0xff]  ;;  %s3818_s12 = sld [smem:[#allocation6 + $0x5]]  ;;  %s3558_s23 = scalar_lea.sflag [#allocation4], %s5218_s5 }
  0xa8   : > { %v509_v11 = vld [vmem:[%s5224_s30 + $0x8] sm:$0xff]  ;;  %v4530_v14 = vld [vmem:[#allocation9 + $0x10] sm:$0xff]   ;;  %v4531_v15 = vld [vmem:[#allocation9 + $0x48] sm:$0xff]   ;;  %p6327_p5 = scmp.ne.s32.totalorder %s6314_s15, 0  ;;  %s4963_s2 = smov [#allocation16]  }
  0xa9   : > { %v606_v13 = vpack.c.bf16 %v511_v12, %v509_v11  ;;  %v541_v16 = vld [vmem:[%s5224_s30 + $0x108] sm:$0xff]  ;;  %v543_v17 = vld [vmem:[%s5224_s30 + $0x118] sm:$0xff]  ;;  %v4533_v20 = vld [vmem:[#allocation9 + $0x40] sm:$0xff]   ;;  %s4870_s24 = sshll.u32 %s4963_s2, 4  ;;  %s4871_s24 = int_to_ptr.vmem [resolvable:$false] %s4870_s24 }
  0xaa   : > { %3848 = vmatpush3.bf16.msra.mxu0 %v4522_v3  ;;  %4386 = vmatpush3.bf16.msra.mxu1 %v4522_v3  ;;  %v4532_v18 = vld [vmem:[#allocation9 + $0x8] sm:$0xff]   ;;  %v622_v19 = vpack.c.bf16 %v543_v17, %v541_v16  ;;  %v4534_v21 = vld [vmem:[#allocation9] sm:$0xff]   ;;  %v508_v22 = vld [vmem:[%s5224_s30] sm:$0xff]  ;;  %s4872_s27 = scalar_lea.vmem %s4871_s24, 16384 }
  0xab   : > { %3849 = vmatprep.subr.bf16.mxu0 %v4523_v4  ;;  %4379 = vmatprep.subr.bf16.mxu1 %v4523_v4  ;;  %v510_v23 = vld [vmem:[%s5224_s30 + $0x10] sm:$0xff]  ;;  %v513_v24 = vld [vmem:[%s5224_s30 + $0x28] sm:$0xff]  ;;  %v515_v25 = vld [vmem:[%s5224_s30 + $0x38] sm:$0xff] }
  0xac   : > { %765 = vmatprep.mubr.bf16.mxu0 %v606_v13  ;;  %829 = vmatprep.mubr.bf16.mxu1 %v622_v19  ;;  %v540_v26 = vld [vmem:[%s5224_s30 + $0x100] sm:$0xff]  ;;  %v542_v27 = vld [vmem:[%s5224_s30 + $0x110] sm:$0xff]  ;;  %v545_v28 = vld [vmem:[%s5224_s30 + $0x128] sm:$0xff]  ;;  %v605_v30 = vpack.c.bf16 %v510_v23, %v508_v22  ;;  %v608_v31 = vpack.c.bf16 %v515_v25, %v513_v24 }
  0xad   : > { %v547_v29 = vld [vmem:[%s5224_s30 + $0x138] sm:$0xff]  ;;  %v621_v32 = vpack.c.bf16 %v542_v27, %v540_v26  ;;  %v512_v34 = vld [vmem:[%s5224_s30 + $0x20] sm:$0xff]  ;;  %v514_v35 = vld [vmem:[%s5224_s30 + $0x30] sm:$0xff] }
  0xae   : > { %3850 = vmatpush3.bf16.msra.mxu0 %v4524_v5  ;;  %4387 = vmatpush3.bf16.msra.mxu1 %v4524_v5  ;;  %v624_v33 = vpack.c.bf16 %v547_v29, %v545_v28  ;;  %v517_v36 = vld [vmem:[%s5224_s30 + $0x48] sm:$0xff]  ;;  %v519_v37 = vld [vmem:[%s5224_s30 + $0x58] sm:$0xff]  ;;  %v544_v38 = vld [vmem:[%s5224_s30 + $0x120] sm:$0xff]  ;;  %v607_v42 = vpack.c.bf16 %v514_v35, %v512_v34 }
  0xaf   : > { %3851 = vmatprep.subr.bf16.mxu0 %v4525_v6  ;;  %4380 = vmatprep.subr.bf16.mxu1 %v4525_v6  ;;  %v546_v39 = vld [vmem:[%s5224_s30 + $0x130] sm:$0xff]  ;;  %v549_v40 = vld [vmem:[%s5224_s30 + $0x148] sm:$0xff]  ;;  %v551_v41 = vld [vmem:[%s5224_s30 + $0x158] sm:$0xff]  ;;  %v610_v44 = vpack.c.bf16 %v519_v37, %v517_v36 }
  0xb0   : > { %v4535_v43 = vld [vmem:[%s6288_s4 + $0x38] sm:$0xff]   ;;  %v623_v45 = vpack.c.bf16 %v546_v39, %v544_v38  ;;  %v4536_v46 = vld [vmem:[%s6288_s4 + $0x30] sm:$0xff]   ;;  %v626_v47 = vpack.c.bf16 %v551_v41, %v549_v40  ;;  %v516_v48 = vld [vmem:[%s5224_s30 + $0x40] sm:$0xff] }
  0xb1   : > { %v518_v49 = vld [vmem:[%s5224_s30 + $0x50] sm:$0xff]  ;;  %v521_v50 = vld [vmem:[%s5224_s30 + $0x68] sm:$0xff]  ;;  %v523_v51 = vld [vmem:[%s5224_s30 + $0x78] sm:$0xff] }
  0xb2   : > { %3852 = vmatpush3.bf16.msra.mxu0 %v4526_v7  ;;  %4388 = vmatpush3.bf16.msra.mxu1 %v4526_v7  ;;  %v548_v52 = vld [vmem:[%s5224_s30 + $0x140] sm:$0xff]  ;;  %v550_v53 = vld [vmem:[%s5224_s30 + $0x150] sm:$0xff]  ;;  %v4537_v54 = vld [vmem:[%s6288_s4 + $0x28] sm:$0xff]   ;;  %v609_v58 = vpack.c.bf16 %v518_v49, %v516_v48  ;;  %v612_v59 = vpack.c.bf16 %v523_v51, %v521_v50 }
  0xb3   : > { %3853 = vmatprep.subr.bf16.mxu0 %v4527_v8  ;;  %4381 = vmatprep.subr.bf16.mxu1 %v4527_v8  ;;  %v553_v55 = vld [vmem:[%s5224_s30 + $0x168] sm:$0xff]  ;;  %v555_v56 = vld [vmem:[%s5224_s30 + $0x178] sm:$0xff]  ;;  %v4538_v57 = vld [vmem:[%s6288_s4 + $0x20] sm:$0xff]   ;;  %v625_v60 = vpack.c.bf16 %v550_v53, %v548_v52 }
  0xb4   : > { %v628_v61 = vpack.c.bf16 %v555_v56, %v553_v55  ;;  %v4539_v62 = vld [vmem:[%s6288_s4 + $0x18] sm:$0xff]   ;;  %v520_v63 = vld [vmem:[%s5224_s30 + $0x60] sm:$0xff]  ;;  %v522_v0 = vld [vmem:[%s5224_s30 + $0x70] sm:$0xff] }
  0xb5   : > { %v525_v1 = vld [vmem:[%s5224_s30 + $0x88] sm:$0xff]  ;;  %v527_v2 = vld [vmem:[%s5224_s30 + $0x98] sm:$0xff]  ;;  %v552_v3 = vld [vmem:[%s5224_s30 + $0x160] sm:$0xff]  ;;  %v611_v7 = vpack.c.bf16 %v522_v0, %v520_v63 }
  0xb6   : > { %3854 = vmatpush3.bf16.msra.mxu0 %v4528_v9  ;;  %4389 = vmatpush3.bf16.msra.mxu1 %v4528_v9  ;;  %v554_v4 = vld [vmem:[%s5224_s30 + $0x170] sm:$0xff]  ;;  %v557_v5 = vld [vmem:[%s5224_s30 + $0x188] sm:$0xff]  ;;  %v559_v6 = vld [vmem:[%s5224_s30 + $0x198] sm:$0xff]  ;;  %v614_v8 = vpack.c.bf16 %v527_v2, %v525_v1 }
  0xb7   : > { %3855 = vmatprep.subr.bf16.mxu0 %v4529_v10  ;;  %4382 = vmatprep.subr.bf16.mxu1 %v4529_v10  ;;  %v627_v9 = vpack.c.bf16 %v554_v4, %v552_v3  ;;  %v630_v10 = vpack.c.bf16 %v559_v6, %v557_v5  ;;  %v524_v11 = vld [vmem:[%s5224_s30 + $0x80] sm:$0xff]  ;;  %v526_v12 = vld [vmem:[%s5224_s30 + $0x90] sm:$0xff]  ;;  %v529_v13 = vld [vmem:[%s5224_s30 + $0xa8] sm:$0xff] }
  0xb8   : > { %v558_v16 = vld [vmem:[%s5224_s30 + $0x190] sm:$0xff]  ;;  %v561_v17 = vld [vmem:[%s5224_s30 + $0x1a8] sm:$0xff]  ;;  %v613_v19 = vpack.c.bf16 %v526_v12, %v524_v11  ;;  %v528_v23 = vld [vmem:[%s5224_s30 + $0xa0] sm:$0xff] }
  0xb9   : > { %v530_v24 = vld [vmem:[%s5224_s30 + $0xb0] sm:$0xff]  ;;  %v533_v25 = vld [vmem:[%s5224_s30 + $0xc8] sm:$0xff]  ;;  %v535_v26 = vld [vmem:[%s5224_s30 + $0xd8] sm:$0xff] }
  0xba   : > { %3856 = vmatpush3.bf16.msra.mxu0 %v4530_v14  ;;  %4390 = vmatpush3.bf16.msra.mxu1 %v4530_v14  ;;  %v531_v14 = vld [vmem:[%s5224_s30 + $0xb8] sm:$0xff]  ;;  %v560_v27 = vld [vmem:[%s5224_s30 + $0x1a0] sm:$0xff]  ;;  %v562_v28 = vld [vmem:[%s5224_s30 + $0x1b0] sm:$0xff] }
  0xbb   : > { %3857 = vmatprep.subr.bf16.mxu0 %v4531_v15  ;;  %4383 = vmatprep.subr.bf16.mxu1 %v4531_v15  ;;  %v556_v15 = vld [vmem:[%s5224_s30 + $0x180] sm:$0xff]  ;;  %v565_v29 = vld [vmem:[%s5224_s30 + $0x1c8] sm:$0xff]  ;;  %v534_v36 = vld [vmem:[%s5224_s30 + $0xd0] sm:$0xff] }
  0xbc   : > { %v532_v35 = vld [vmem:[%s5224_s30 + $0xc0] sm:$0xff]  ;;  %v537_v37 = vld [vmem:[%s5224_s30 + $0xe8] sm:$0xff]  ;;  %v539_v38 = vld [vmem:[%s5224_s30 + $0xf8] sm:$0xff] }
  0xbd   : > { %v564_v39 = vld [vmem:[%s5224_s30 + $0x1c0] sm:$0xff]  ;;  %v566_v40 = vld [vmem:[%s5224_s30 + $0x1d0] sm:$0xff]  ;;  %v569_v41 = vld [vmem:[%s5224_s30 + $0x1e8] sm:$0xff] }
  0xbe   : > { %3858 = vmatpush3.bf16.msra.mxu0 %v4532_v18  ;;  %4391 = vmatpush3.bf16.msra.mxu1 %v4532_v18  ;;  %v563_v18 = vld [vmem:[%s5224_s30 + $0x1b8] sm:$0xff]  ;;  %v538_v48 = vld [vmem:[%s5224_s30 + $0xf0] sm:$0xff]  ;;  %v568_v49 = vld [vmem:[%s5224_s30 + $0x1e0] sm:$0xff] }
  0xbf   : > { %3859 = vmatprep.subr.bf16.mxu0 %v4533_v20  ;;  %4384 = vmatprep.subr.bf16.mxu1 %v4533_v20  ;;  %v616_v20 = vpack.c.bf16 %v531_v14, %v529_v13  ;;  %v632_v22 = vpack.c.bf16 %v563_v18, %v561_v17  ;;  %v570_v50 = vld [vmem:[%s5224_s30 + $0x1f0] sm:$0xff]  ;;  %v4542_v55 = vld [vmem:[%s6288_s4] sm:$0xff]   ;;  %v5334_v56 = vld [vmem:[#allocation10 + $0x38] sm:$0xff]  }
  0xc0   : > { %v635_v52 = vpack.c.bf16 %v570_v50, %v568_v49  ;;  %v4540_v53 = vld [vmem:[%s6288_s4 + $0x10] sm:$0xff]  }
  0xc2   : > { %3860 = vmatpush3.bf16.msra.mxu0 %v4534_v21  ;;  %4392 = vmatpush3.bf16.msra.mxu1 %v4534_v21  ;;  %v629_v21 = vpack.c.bf16 %v558_v16, %v556_v15 }
  0xc3   : > { %4097 = vmatprep.subr.bf16.mxu1 %v4535_v43 }
  0xc5   : > { %766 = vmatmul.mubr.bf16.vlgmr.msra.gmra.mxu0 %v605_v30  ;;  %830 = vmatmul.mubr.bf16.vlgmr.msra.gmra.mxu1 %v621_v32  ;;  %v567_v30 = vld [vmem:[%s5224_s30 + $0x1d8] sm:$0xff]  ;;  %v618_v32 = vpack.c.bf16 %v535_v26, %v533_v25 }
  0xc6   : > { %773 = vmatprep.mubr.bf16.mxu0 %v608_v31  ;;  %837 = vmatprep.mubr.bf16.mxu1 %v624_v33  ;;  %v615_v31 = vpack.c.bf16 %v530_v24, %v528_v23  ;;  %v631_v33 = vpack.c.bf16 %v562_v28, %v560_v27  ;;  %v634_v34 = vpack.c.bf16 %v567_v30, %v565_v29 }
  0xc7   : > { %4098 = vmatpush3.bf16.msra.mxu1 %v4535_v43  ;;  %v617_v43 = vpack.c.bf16 %v534_v36, %v532_v35 }
  0xc8   : > { %4099 = vmatprep.subr.bf16.mxu1 %v4536_v46 }
  0xcb   : > { %4100 = vmatpush3.bf16.msra.mxu1 %v4536_v46 }
  0xcc   : > { %4101 = vmatprep.subr.bf16.mxu1 %v4537_v54 }
  0xcd   : > { %774 = vmatmul.mubr.bf16.gmra.mxu0 %v607_v42  ;;  %838 = vmatmul.mubr.bf16.gmra.mxu1 %v623_v45  ;;  %v571_v42 = vld [vmem:[%s5224_s30 + $0x1f8] sm:$0xff]  ;;  %v633_v45 = vpack.c.bf16 %v566_v40, %v564_v39 }
  0xce   : > { %781 = vmatprep.mubr.bf16.mxu0 %v610_v44  ;;  %845 = vmatprep.mubr.bf16.mxu1 %v626_v47  ;;  %v620_v44 = vpack.c.bf16 %v539_v38, %v537_v37  ;;  %v636_v46 = vpack.c.bf16 %v571_v42, %v569_v41  ;;  %v536_v47 = vld [vmem:[%s5224_s30 + $0xe0] sm:$0xff]  ;;  %s894_s30 = sld [smem:[#allocation6]] }
  0xcf   : > { %4102 = vmatpush3.bf16.msra.mxu1 %v4537_v54  ;;  %v619_v51 = vpack.c.bf16 %v538_v48, %v536_v47  ;;  %v4541_v54 = vld [vmem:[%s6288_s4 + $0x8] sm:$0xff]   ;;  %v4544_v48 = vld [vmem:[#allocation10 + $0x30] sm:$0xff]  }
  0xd0   : > { %4103 = vmatprep.subr.bf16.mxu1 %v4538_v57 }
  0xd3   : > { %4104 = vmatpush3.bf16.msra.mxu1 %v4538_v57 }
  0xd4   : > { %4105 = vmatprep.subr.bf16.mxu1 %v4539_v62  ;;  %v5346_v2 = vstv %s894_s30  ;;  %s3762_s30 = sld [smem:[#allocation6 + $0x1]] }
  0xd5   : > { %782 = vmatmul.mubr.bf16.gmra.mxu0 %v609_v58  ;;  %846 = vmatmul.mubr.bf16.gmra.mxu1 %v625_v60 }
  0xd6   : > { %789 = vmatprep.mubr.bf16.mxu0 %v612_v59  ;;  %853 = vmatprep.mubr.bf16.mxu1 %v628_v61  ;;  %v5339_v59 = vld [vmem:[#allocation7] ss:$0 sm:$0xff] }
  0xd7   : > { %4106 = vmatpush3.bf16.msra.mxu1 %v4539_v62 }
  0xd8   : > { %4107 = vmatprep.subr.bf16.mxu1 %v4540_v53 }
  0xdb   : > { %4108 = vmatpush3.bf16.msra.mxu1 %v4540_v53 }
  0xdc   : > { %4109 = vmatprep.subr.bf16.mxu1 %v4541_v54 }
  0xdd   : > { %790 = vmatmul.mubr.bf16.gmra.mxu0 %v611_v7  ;;  %854 = vmatmul.mubr.bf16.gmra.mxu1 %v627_v9 }
  0xde   : > { %797 = vmatprep.mubr.bf16.mxu0 %v614_v8  ;;  %861 = vmatprep.mubr.bf16.mxu1 %v630_v10 }
  0xdf   : > { %4110 = vmatpush3.bf16.msra.mxu1 %v4541_v54 }
  0xe0   : > { %4111 = vmatprep.subr.bf16.mxu1 %v4542_v55 }
  0xe3   : > { %4112 = vmatpush3.bf16.msra.mxu1 %v4542_v55 }
  0xe4   : > { %4145 = vmatprep.subr.bf16.mxu1 %v5334_v56 }
  0xe5   : > { %798 = vmatmul.mubr.bf16.gmra.mxu0 %v613_v19  ;;  %862 = vmatmul.mubr.bf16.gmra.mxu1 %v629_v21 }
  0xe6   : > { %805 = vmatprep.mubr.bf16.mxu0 %v616_v20  ;;  %869 = vmatprep.mubr.bf16.mxu1 %v632_v22 }
  0xed   : > { %806 = vmatmul.mubr.bf16.gmra.mxu0 %v615_v31  ;;  %870 = vmatmul.mubr.bf16.gmra.mxu1 %v631_v33 }
  0xee   : > { %813 = vmatprep.mubr.bf16.mxu0 %v618_v32  ;;  %877 = vmatprep.mubr.bf16.mxu1 %v634_v34 }
  0xf5   : > { %814 = vmatmul.mubr.bf16.gmra.mxu0 %v617_v43  ;;  %878 = vmatmul.mubr.bf16.gmra.mxu1 %v633_v45 }
  0xf6   : > { %821 = vmatprep.mubr.bf16.mxu0 %v620_v44  ;;  %885 = vmatprep.mubr.bf16.mxu1 %v636_v46 }
  0xfd   : > { %822 = vmatmul.mubr.bf16.gmra.mxu0 %v619_v51  ;;  %886 = vmatmul.mubr.bf16.gmra.mxu1 %v635_v52 }
 0x185   : > { %v3861_v57 = vpop.f32.mrf.mxu0  ;;  %v5337_v58 = vpop.f32.mrf.mxu1 }
 0x187   : > { %v3862_v60 = vpop.f32.mrf.mxu0  ;;  %v5341_v62 = vpop.f32.mrf.mxu1 }
 0x188   : > { %v3863_v61 = vadd.f32 %v3862_v60, %v3861_v57 }
 0x189   : > { %v3864_v63 = vpop.f32.mrf.mxu0  ;;  %v5344_v1 = vpop.f32.mrf.mxu1 }
 0x18a   : > { %v768_v0 = vadd.f32 %v3863_v61, %v5339_v59 }
 0x18b   : > { %v3865_v3 = vpop.f32.mrf.mxu0  ;;  %v5348_v5 = vpop.f32.mrf.mxu1 }
 0x18c   : > { %v3866_v4 = vadd.f32 %v3865_v3, %v3864_v63  ;;  %v928_v7 = vmul.f32 %v5346_v2, %v768_v0  ;;  %vm895_vm0 = vcmp.gt.f32.partialorder %v768_v0, 0.0  ;;  %v4545_v3 = vld [vmem:[#allocation10 + $0x28] sm:$0xff]  }
 0x18d   : > { %v3867_v6 = vpop.f32.mrf.mxu0  ;;  %v3915_v9 = vpop.f32.mrf.mxu1 }
 0x18e   : > { %v771_v8 = vadd.f32 %v3866_v4, %v5339_v59  ;;  %v960_v17 = vsel %vm895_vm0, %v768_v0, %v928_v7 }
 0x18f   : > { %v3868_v10 = vpop.f32.mrf.mxu0  ;;  %v3916_v13 = vpop.f32.mrf.mxu1 }
 0x190   : > { %v929_v11 = vmul.f32 %v5346_v2, %v771_v8  ;;  %v3869_v12 = vadd.f32 %v3868_v10, %v3867_v6  ;;  %vm896_vm1 = vcmp.gt.f32.partialorder %v771_v8, 0.0  ;;  %v3917_v15 = vadd.f32 %v3916_v13, %v3915_v9 }
 0x191   : > { %v3870_v14 = vpop.f32.mrf.mxu0  ;;  %v3918_v19 = vpop.f32.mrf.mxu1 }
 0x192   : > { %v776_v16 = vadd.f32 %v3869_v12, %v5339_v59  ;;  %v961_v18 = vsel %vm896_vm1, %v771_v8, %v929_v11  ;;  %v840_v22 = vadd.f32 %v3917_v15, %v5339_v59 }
 0x193   : > { %v3871_v20 = vpop.f32.mrf.mxu0  ;;  %v1009_v21 = vpack.c.bf16 %v961_v18, %v960_v17  ;;  %v3919_v24 = vpop.f32.mrf.mxu1  ;;  %v4546_v18 = vld [vmem:[#allocation10 + $0x20] sm:$0xff]  }
 0x194   : > { %v3872_v23 = vadd.f32 %v3871_v20, %v3870_v14  ;;  %vm913_vm2 = vcmp.gt.f32.partialorder %v840_v22, 0.0  ;;  %v946_v26 = vmul.f32 %v5346_v2, %v840_v22  ;;  %v3920_v27 = vadd.f32 %v3919_v24, %v3918_v19 }
 0x195   : > { %v3873_v25 = vpop.f32.mrf.mxu0  ;;  %4113 = vmatprep.mubr.bf16.mxu1 %v1009_v21  ;;  %v930_v28 = vmul.f32 %v5346_v2, %v776_v16  ;;  %v3921_v30 = vpop.f32.mrf.mxu1  ;;  %vm897_vm3 = vcmp.gt.f32.partialorder %v776_v16, 0.0 }
 0x196   : > { %v779_v29 = vadd.f32 %v3872_v23, %v5339_v59  ;;  %v843_v32 = vadd.f32 %v3920_v27, %v5339_v59  ;;  %v5359_v33 = vsel %vm913_vm2, %v840_v22, %v946_v26 }
 0x197   : > { %v3874_v31 = vpop.f32.mrf.mxu0  ;;  %v3922_v36 = vpop.f32.mrf.mxu1  ;;  %v962_v40 = vsel %vm897_vm3, %v776_v16, %v930_v28 }
 0x198   : > { %vm898_vm4 = vcmp.gt.f32.partialorder %v779_v29, 0.0  ;;  %v931_v34 = vmul.f32 %v5346_v2, %v779_v29  ;;  %v3875_v35 = vadd.f32 %v3874_v31, %v3873_v25  ;;  %v947_v38 = vmul.f32 %v5346_v2, %v843_v32  ;;  %v4547_v31 = vld [vmem:[#allocation10 + $0x18] sm:$0xff]  }
 0x199   : > { %v3876_v37 = vpop.f32.mrf.mxu0  ;;  %v3923_v39 = vadd.f32 %v3922_v36, %v3921_v30  ;;  %vm914_vm5 = vcmp.gt.f32.partialorder %v843_v32, 0.0  ;;  %v3924_v43 = vpop.f32.mrf.mxu1 }
 0x19a   : > { %v963_v41 = vsel %vm898_vm4, %v779_v29, %v931_v34  ;;  %v784_v42 = vadd.f32 %v3875_v35, %v5339_v59  ;;  %v5365_v47 = vsel %vm914_vm5, %v843_v32, %v947_v38 }
 0x19b   : > { %v1010_v44 = vpack.c.bf16 %v963_v41, %v962_v40  ;;  %v3877_v45 = vpop.f32.mrf.mxu0  ;;  %v848_v46 = vadd.f32 %v3923_v39, %v5339_v59  ;;  %v3925_v50 = vpop.f32.mrf.mxu1  ;;  %v1018_v51 = vpack.c.bf16 %v5365_v47, %v5359_v33  ;;  %v4551_v33 = vld [vmem:[%s6290_s6 + $0x38] sm:$0xff]   ;;  %v4552_v47 = vld [vmem:[%s6290_s6 + $0x30] sm:$0xff]  }
 0x19c   : > { %v3878_v49 = vadd.f32 %v3877_v45, %v3876_v37  ;;  %v3926_v54 = vadd.f32 %v3925_v50, %v3924_v43  ;;  %v932_v55 = vmul.f32 %v5346_v2, %v784_v42  ;;  %vm899_vm7 = vcmp.gt.f32.partialorder %v784_v42, 0.0  ;;  %4193 = vmatprep.subr.bf16.mxu0 %v4551_v33 }
 0x19d   : > { %v3879_v52 = vpop.f32.mrf.mxu0  ;;  %4114 = vmatmul.mubr.bf16.vlgmr.msra.gmra.mxu1 %v1010_v44  ;;  %vm915_vm6 = vcmp.gt.f32.partialorder %v848_v46, 0.0  ;;  %v948_v53 = vmul.f32 %v5346_v2, %v848_v46  ;;  %v3927_v60 = vpop.f32.mrf.mxu1  ;;  %4194 = vmatpush3.bf16.msra.mxu0 %v4551_v33 }
 0x19e   : > { %v787_v57 = vadd.f32 %v3878_v49, %v5339_v59  ;;  %4146 = vmatpush3.bf16.msra.mxu1 %v5334_v56  ;;  %v851_v63 = vadd.f32 %v3926_v54, %v5339_v59  ;;  %v964_v11 = vsel %vm899_vm7, %v784_v42, %v932_v55  ;;  %4195 = vmatprep.subr.bf16.mxu0 %v4552_v47 }
 0x19f   : > { %v3880_v61 = vpop.f32.mrf.mxu0  ;;  %v5374_v0 = vsel %vm915_vm6, %v848_v46, %v948_v53  ;;  %4147 = vmatprep.subr.bf16.mxu1 %v4544_v48  ;;  %v3928_v7 = vpop.f32.mrf.mxu1 }
 0x1a0   : > { %v933_v4 = vmul.f32 %v5346_v2, %v787_v57  ;;  %v3881_v6 = vadd.f32 %v3880_v61, %v3879_v52  ;;  %vm900_vm8 = vcmp.gt.f32.partialorder %v787_v57, 0.0  ;;  %v949_v9 = vmul.f32 %v5346_v2, %v851_v63 }
 0x1a1   : > { %v3882_v8 = vpop.f32.mrf.mxu0  ;;  %v3929_v10 = vadd.f32 %v3928_v7, %v3927_v60  ;;  %vm916_vm9 = vcmp.gt.f32.partialorder %v851_v63, 0.0  ;;  %v3930_v13 = vpop.f32.mrf.mxu1  ;;  %4196 = vmatpush3.bf16.msra.mxu0 %v4552_v47 }
 0x1a2   : > { %v792_v56 = vadd.f32 %v3881_v6, %v5339_v59  ;;  %v965_v12 = vsel %vm900_vm8, %v787_v57, %v933_v4  ;;  %4148 = vmatpush3.bf16.msra.mxu1 %v4544_v48  ;;  %v5380_v17 = vsel %vm916_vm9, %v851_v63, %v949_v9  ;;  %v4548_v48 = vld [vmem:[#allocation10 + $0x10] sm:$0xff]  }
 0x1a3   : > { %v3883_v14 = vpop.f32.mrf.mxu0  ;;  %v1011_v15 = vpack.c.bf16 %v965_v12, %v964_v11  ;;  %v856_v16 = vadd.f32 %v3929_v10, %v5339_v59  ;;  %4149 = vmatprep.subr.bf16.mxu1 %v4545_v3  ;;  %v3931_v20 = vpop.f32.mrf.mxu1  ;;  %v1019_v21 = vpack.c.bf16 %v5380_v17, %v5374_v0  ;;  %v4554_v0 = vld [vmem:[%s6290_s6 + $0x20] sm:$0xff]   ;;  %v4555_v17 = vld [vmem:[%s6290_s6 + $0x18] sm:$0xff]  }
 0x1a4   : > { %v3884_v19 = vadd.f32 %v3883_v14, %v3882_v8  ;;  %v3932_v24 = vadd.f32 %v3931_v20, %v3930_v13  ;;  %v934_v25 = vmul.f32 %v5346_v2, %v792_v56  ;;  %vm901_vm11 = vcmp.gt.f32.partialorder %v792_v56, 0.0 }
 0x1a5   : > { %v3885_v22 = vpop.f32.mrf.mxu0  ;;  %4117 = vmatprep.mubr.bf16.mxu1 %v1011_v15  ;;  %vm917_vm10 = vcmp.gt.f32.partialorder %v856_v16, 0.0  ;;  %v950_v23 = vmul.f32 %v5346_v2, %v856_v16  ;;  %v3933_v27 = vpop.f32.mrf.mxu1 }
 0x1a6   : > { %v795_v26 = vadd.f32 %v3884_v19, %v5339_v59  ;;  %4150 = vmatpush3.bf16.msra.mxu1 %v4545_v3  ;;  %v859_v29 = vadd.f32 %v3932_v24, %v5339_v59  ;;  %v966_v40 = vsel %vm901_vm11, %v792_v56, %v934_v25 }
 0x1a7   : > { %v3886_v28 = vpop.f32.mrf.mxu0  ;;  %v5388_v30 = vsel %vm917_vm10, %v856_v16, %v950_v23  ;;  %4151 = vmatprep.subr.bf16.mxu1 %v4546_v18  ;;  %v3934_v35 = vpop.f32.mrf.mxu1 }
 0x1a8   : > { %v935_v32 = vmul.f32 %v5346_v2, %v795_v26  ;;  %v3887_v34 = vadd.f32 %v3886_v28, %v3885_v22  ;;  %vm902_vm12 = vcmp.gt.f32.partialorder %v795_v26, 0.0  ;;  %v951_v37 = vmul.f32 %v5346_v2, %v859_v29 }
 0x1a9   : > { %v3888_v36 = vpop.f32.mrf.mxu0  ;;  %v3935_v38 = vadd.f32 %v3934_v35, %v3933_v27  ;;  %vm918_vm13 = vcmp.gt.f32.partialorder %v859_v29, 0.0  ;;  %v3936_v42 = vpop.f32.mrf.mxu1 }
 0x1aa   : > { %v800_v39 = vadd.f32 %v3887_v34, %v5339_v59  ;;  %v967_v41 = vsel %vm902_vm12, %v795_v26, %v935_v32  ;;  %4152 = vmatpush3.bf16.msra.mxu1 %v4546_v18  ;;  %v5394_v46 = vsel %vm918_vm13, %v859_v29, %v951_v37 }
 0x1ab   : > { %v3889_v43 = vpop.f32.mrf.mxu0  ;;  %v1012_v44 = vpack.c.bf16 %v967_v41, %v966_v40  ;;  %v864_v45 = vadd.f32 %v3935_v38, %v5339_v59  ;;  %4153 = vmatprep.subr.bf16.mxu1 %v4547_v31  ;;  %v3937_v50 = vpop.f32.mrf.mxu1  ;;  %v1020_v52 = vpack.c.bf16 %v5394_v46, %v5388_v30  ;;  %v3911_v38 = vadd.f32 %v5341_v62, %v5337_v58  ;;  %v5482_v46 = vld [vmem:[#allocation7 + $0x1] ss:$0 sm:$0xff] }
 0x1ac   : > { %v3890_v49 = vadd.f32 %v3889_v43, %v3888_v36  ;;  %v3938_v55 = vadd.f32 %v3937_v50, %v3936_v42  ;;  %v936_v57 = vmul.f32 %v5346_v2, %v800_v39  ;;  %vm903_vm15 = vcmp.gt.f32.partialorder %v800_v39, 0.0 }
 0x1ad   : > { %v3891_v53 = vpop.f32.mrf.mxu0  ;;  %4118 = vmatmul.mubr.bf16.gmra.mxu1 %v1012_v44  ;;  %vm919_vm14 = vcmp.gt.f32.partialorder %v864_v45, 0.0  ;;  %v952_v54 = vmul.f32 %v5346_v2, %v864_v45  ;;  %v3939_v61 = vpop.f32.mrf.mxu1 }
 0x1ae   : > { %v803_v60 = vadd.f32 %v3890_v49, %v5339_v59  ;;  %4154 = vmatpush3.bf16.msra.mxu1 %v4547_v31  ;;  %v867_v3 = vadd.f32 %v3938_v55, %v5339_v59  ;;  %v968_v12 = vsel %vm903_vm15, %v800_v39, %v936_v57  ;;  %v832_v57 = vadd.f32 %v3911_v38, %v5339_v59 }
 0x1af   : > { %v3892_v63 = vpop.f32.mrf.mxu0  ;;  %v5402_v4 = vsel %vm919_vm14, %v864_v45, %v952_v54  ;;  %4155 = vmatprep.subr.bf16.mxu1 %v4548_v48  ;;  %v3940_v8 = vpop.f32.mrf.mxu1 }
 0x1b0   : > { %v937_v6 = vmul.f32 %v5346_v2, %v803_v60  ;;  %v3893_v7 = vadd.f32 %v3892_v63, %v3891_v53  ;;  %vm904_vm0 = vcmp.gt.f32.partialorder %v803_v60, 0.0  ;;  %v953_v10 = vmul.f32 %v5346_v2, %v867_v3 }
 0x1b1   : > { %v3894_v9 = vpop.f32.mrf.mxu0  ;;  %v3941_v56 = vadd.f32 %v3940_v8, %v3939_v61  ;;  %vm920_vm1 = vcmp.gt.f32.partialorder %v867_v3, 0.0  ;;  %v3942_v14 = vpop.f32.mrf.mxu1  ;;  %vm911_vm9 = vcmp.gt.f32.partialorder %v832_v57, 0.0 }
 0x1b2   : > { %v808_v11 = vadd.f32 %v3893_v7, %v5339_v59  ;;  %v969_v13 = vsel %vm904_vm0, %v803_v60, %v937_v6  ;;  %4156 = vmatpush3.bf16.msra.mxu1 %v4548_v48  ;;  %v5408_v19 = vsel %vm920_vm1, %v867_v3, %v953_v10  ;;  %v3914_v48 = vadd.f32 %v5348_v5, %v5344_v1 }
 0x1b3   : > { %v3895_v15 = vpop.f32.mrf.mxu0  ;;  %v1013_v16 = vpack.c.bf16 %v969_v13, %v968_v12  ;;  %v872_v18 = vadd.f32 %v3941_v56, %v5339_v59  ;;  %v3943_v22 = vpop.f32.mrf.mxu1  ;;  %v1021_v23 = vpack.c.bf16 %v5408_v19, %v5402_v4 }
 0x1b4   : > { %v3896_v20 = vadd.f32 %v3895_v15, %v3894_v9  ;;  %v3944_v26 = vadd.f32 %v3943_v22, %v3942_v14  ;;  %v938_v27 = vmul.f32 %v5346_v2, %v808_v11  ;;  %vm905_vm3 = vcmp.gt.f32.partialorder %v808_v11, 0.0 }
 0x1b5   : > { %v3897_v24 = vpop.f32.mrf.mxu0  ;;  %4121 = vmatprep.mubr.bf16.mxu1 %v1013_v16  ;;  %vm921_vm2 = vcmp.gt.f32.partialorder %v872_v18, 0.0  ;;  %v954_v25 = vmul.f32 %v5346_v2, %v872_v18  ;;  %v3945_v29 = vpop.f32.mrf.mxu1  ;;  %v835_v6 = vadd.f32 %v3914_v48, %v5339_v59  ;;  %v944_v15 = vmul.f32 %v5346_v2, %v832_v57 }
 0x1b6   : > { %v811_v28 = vadd.f32 %v3896_v20, %v5339_v59  ;;  %v875_v32 = vadd.f32 %v3944_v26, %v5339_v59  ;;  %v970_v43 = vsel %vm905_vm3, %v808_v11, %v938_v27 }
 0x1b7   : > { %v3898_v31 = vpop.f32.mrf.mxu0  ;;  %v5416_v34 = vsel %vm921_vm2, %v872_v18, %v954_v25  ;;  %v3946_v37 = vpop.f32.mrf.mxu1  ;;  %vm912_vm11 = vcmp.gt.f32.partialorder %v835_v6, 0.0 }
 0x1b8   : > { %v939_v35 = vmul.f32 %v5346_v2, %v811_v28  ;;  %v3899_v36 = vadd.f32 %v3898_v31, %v3897_v24  ;;  %vm906_vm4 = vcmp.gt.f32.partialorder %v811_v28, 0.0  ;;  %v955_v40 = vmul.f32 %v5346_v2, %v875_v32 }
 0x1b9   : > { %v3900_v39 = vpop.f32.mrf.mxu0  ;;  %v3947_v41 = vadd.f32 %v3946_v37, %v3945_v29  ;;  %vm922_vm5 = vcmp.gt.f32.partialorder %v875_v32, 0.0  ;;  %v3948_v45 = vpop.f32.mrf.mxu1  ;;  %v945_v24 = vmul.f32 %v5346_v2, %v835_v6 }
 0x1ba   : > { %v816_v42 = vadd.f32 %v3899_v36, %v5339_v59  ;;  %v971_v44 = vsel %vm906_vm4, %v811_v28, %v939_v35  ;;  %v5426_v54 = vsel %vm922_vm5, %v875_v32, %v955_v40 }
 0x1bb   : > { %v3901_v49 = vpop.f32.mrf.mxu0  ;;  %v1014_v50 = vpack.c.bf16 %v971_v44, %v970_v43  ;;  %v880_v53 = vadd.f32 %v3947_v41, %v5339_v59  ;;  %v3949_v62 = vpop.f32.mrf.mxu1  ;;  %v1022_v55 = vpack.c.bf16 %v5426_v54, %v5416_v34  ;;  %v977_v40 = vsel %vm912_vm11, %v835_v6, %v945_v24 }
 0x1bc   : > { %v3902_v58 = vadd.f32 %v3901_v49, %v3900_v39  ;;  %v3950_v63 = vadd.f32 %v3949_v62, %v3948_v45  ;;  %v940_v1 = vmul.f32 %v5346_v2, %v816_v42  ;;  %vm907_vm7 = vcmp.gt.f32.partialorder %v816_v42, 0.0 }
 0x1bd   : > { %v3903_v60 = vpop.f32.mrf.mxu0  ;;  %4122 = vmatmul.mubr.bf16.gmra.mxu1 %v1014_v50  ;;  %vm923_vm6 = vcmp.gt.f32.partialorder %v880_v53, 0.0  ;;  %v956_v61 = vmul.f32 %v5346_v2, %v880_v53  ;;  %v3951_v3 = vpop.f32.mrf.mxu1  ;;  %v976_v39 = vsel %vm911_vm9, %v832_v57, %v944_v15  ;;  %v5486_v34 = vstv %s3762_s30 }
 0x1be   : > { %v819_v5 = vadd.f32 %v3902_v58, %v5339_v59  ;;  %v883_v8 = vadd.f32 %v3950_v63, %v5339_v59  ;;  %v972_v18 = vsel %vm907_vm7, %v816_v42, %v940_v1  ;;  %v1017_v49 = vpack.c.bf16 %v977_v40, %v976_v39 }
 0x1bf   : > { %v3904_v7 = vpop.f32.mrf.mxu0  ;;  %v988_v9 = vsel %vm923_vm6, %v880_v53, %v956_v61  ;;  %v3952_v11 = vpop.f32.mrf.mxu1 }
 0x1c0   : > { %v941_v10 = vmul.f32 %v5346_v2, %v819_v5  ;;  %v3905_v56 = vadd.f32 %v3904_v7, %v3903_v60  ;;  %vm908_vm8 = vcmp.gt.f32.partialorder %v819_v5, 0.0  ;;  %v957_v13 = vmul.f32 %v5346_v2, %v883_v8 }
 0x1c1   : > { %v3906_v12 = vpop.f32.mrf.mxu0  ;;  %v3953_v14 = vadd.f32 %v3952_v11, %v3951_v3  ;;  %vm924_vm10 = vcmp.gt.f32.partialorder %v883_v8, 0.0  ;;  %v3954_v22 = vpop.f32.mrf.mxu1 }
 0x1c2   : > { %v824_v16 = vadd.f32 %v3905_v56, %v5339_v59  ;;  %v973_v20 = vsel %vm908_vm8, %v819_v5, %v941_v10  ;;  %v989_v28 = vsel %vm924_vm10, %v883_v8, %v957_v13 }
 0x1c3   : > { %v3907_v25 = vpop.f32.mrf.mxu0  ;;  %v1015_v26 = vpack.c.bf16 %v973_v20, %v972_v18  ;;  %v888_v27 = vadd.f32 %v3953_v14, %v5339_v59  ;;  %v3955_v31 = vpop.f32.mrf.mxu1  ;;  %v1023_v32 = vpack.c.bf16 %v989_v28, %v988_v9 }
 0x1c4   : > { %v3908_v29 = vadd.f32 %v3907_v25, %v3906_v12  ;;  %v3956_v36 = vadd.f32 %v3955_v31, %v3954_v22  ;;  %v942_v37 = vmul.f32 %v5346_v2, %v824_v16  ;;  %vm909_vm13 = vcmp.gt.f32.partialorder %v824_v16, 0.0 }
 0x1c5   : > { %4125 = vmatprep.mubr.bf16.mxu1 %v1015_v26  ;;  %vm925_vm12 = vcmp.gt.f32.partialorder %v888_v27, 0.0  ;;  %v958_v35 = vmul.f32 %v5346_v2, %v888_v27 }
 0x1c6   : > { %v827_v38 = vadd.f32 %v3908_v29, %v5339_v59  ;;  %v891_v41 = vadd.f32 %v3956_v36, %v5339_v59  ;;  %v974_v45 = vsel %vm909_vm13, %v824_v16, %v942_v37  ;;  %v4549_v59 = vld [vmem:[#allocation10 + $0x8] sm:$0xff]  }
 0x1c7   : > { %v990_v42 = vsel %vm925_vm12, %v888_v27, %v958_v35  ;;  %4157 = vmatprep.subr.bf16.mxu1 %v4549_v59 }
 0x1c8   : > { %v943_v43 = vmul.f32 %v5346_v2, %v827_v38  ;;  %vm910_vm14 = vcmp.gt.f32.partialorder %v827_v38, 0.0  ;;  %v959_v44 = vmul.f32 %v5346_v2, %v891_v41  ;;  %vm926_vm15 = vcmp.gt.f32.partialorder %v891_v41, 0.0  ;;  %4158 = vmatpush3.bf16.msra.mxu1 %v4549_v59  ;;  %v4550_v2 = vld [vmem:[#allocation10] sm:$0xff]  }
 0x1c9   : > { %4159 = vmatprep.subr.bf16.mxu1 %v4550_v2 }
 0x1ca   : > { %v975_v48 = vsel %vm910_vm14, %v827_v38, %v943_v43  ;;  %v991_v53 = vsel %vm926_vm15, %v891_v41, %v959_v44 }
 0x1cb   : > { %v1016_v50 = vpack.c.bf16 %v975_v48, %v974_v45  ;;  %v1024_v58 = vpack.c.bf16 %v991_v53, %v990_v42 }
 0x1cc   : > { %4160 = vmatpush3.bf16.msra.mxu1 %v4550_v2 }
 0x1cd   : > { %4126 = vmatmul.mubr.bf16.gmra.mxu1 %v1016_v50 }
 0x1ce   : > { %4129 = vmatprep.mubr.bf16.mxu1 %v1017_v49 }
 0x1d5   : > { %4130 = vmatmul.mubr.bf16.gmra.mxu1 %v1018_v51  ;;  %v4553_v51 = vld [vmem:[%s6290_s6 + $0x28] sm:$0xff]  }
 0x1d6   : > { %4133 = vmatprep.mubr.bf16.mxu1 %v1019_v21  ;;  %4197 = vmatprep.subr.bf16.mxu0 %v4553_v51  ;;  %v4556_v21 = vld [vmem:[%s6290_s6 + $0x10] sm:$0xff]  }
 0x1d7   : > { %4198 = vmatpush3.bf16.msra.mxu0 %v4553_v51 }
 0x1d8   : > { %4199 = vmatprep.subr.bf16.mxu0 %v4554_v0 }
 0x1db   : > { %4200 = vmatpush3.bf16.msra.mxu0 %v4554_v0 }
 0x1dc   : > { %4201 = vmatprep.subr.bf16.mxu0 %v4555_v17 }
 0x1dd   : > { %4134 = vmatmul.mubr.bf16.gmra.mxu1 %v1020_v52 }
 0x1de   : > { %4137 = vmatprep.mubr.bf16.mxu1 %v1021_v23 }
 0x1df   : > { %4202 = vmatpush3.bf16.msra.mxu0 %v4555_v17 }
 0x1e0   : > { %4203 = vmatprep.subr.bf16.mxu0 %v4556_v21 }
 0x1e3   : > { %4204 = vmatpush3.bf16.msra.mxu0 %v4556_v21 }
 0x1e5   : > { %4138 = vmatmul.mubr.bf16.gmra.mxu1 %v1022_v55 }
 0x1e6   : > { %4141 = vmatprep.mubr.bf16.mxu1 %v1023_v32 }
 0x1ed   : > { %4142 = vmatmul.mubr.bf16.gmra.mxu1 %v1024_v58 }
 0x25d   : > { %v4115_v30 = vpop.f32.mrf.mxu1 }
 0x25e   : > { %v1116_v19 = vadd.f32 %v4115_v30, %v5482_v46 }
 0x25f   : > { %v1107_v52 = vpop.f32.mrf.mxu1 }
 0x260   : > { %v1108_v4 = vadd.f32 %v1107_v52, %v5482_v46  ;;  %v1270_v61 = vmul.f32 %v5486_v34, %v1116_v19  ;;  %vm1237_vm2 = vcmp.gt.f32.partialorder %v1116_v19, 0.0 }
 0x261   : > { %v4116_v23 = vpop.f32.mrf.mxu1 }
 0x262   : > { %v1119_v54 = vadd.f32 %v4116_v23, %v5482_v46  ;;  %v1268_v55 = vmul.f32 %v5486_v34, %v1108_v4  ;;  %vm1235_vm1 = vcmp.gt.f32.partialorder %v1108_v4, 0.0  ;;  %v1302_v6 = vsel %vm1237_vm2, %v1116_v19, %v1270_v61 }
 0x263   : > { %v1110_v62 = vpop.f32.mrf.mxu1 }
 0x264   : > { %vm1238_vm0 = vcmp.gt.f32.partialorder %v1119_v54, 0.0  ;;  %v1271_v57 = vmul.f32 %v5486_v34, %v1119_v54  ;;  %v1111_v60 = vadd.f32 %v1110_v62, %v5482_v46  ;;  %v1300_v5 = vsel %vm1235_vm1, %v1108_v4, %v1268_v55 }
 0x266   : > { %vm1236_vm3 = vcmp.gt.f32.partialorder %v1111_v60, 0.0  ;;  %v1269_v63 = vmul.f32 %v5486_v34, %v1111_v60  ;;  %v1303_v1 = vsel %vm1238_vm0, %v1119_v54, %v1271_v57 }
 0x267   : > { %v1350_v8 = vpack.c.bf16 %v1303_v1, %v1302_v6 }
 0x268   : > { %v1301_v3 = vsel %vm1236_vm3, %v1111_v60, %v1269_v63 }
 0x269   : > { %v1349_v7 = vpack.c.bf16 %v1301_v3, %v1300_v5 }
 0x26b   : > { %4161 = vmatprep.mubr.bf16.mxu1 %v1349_v7 }
 0x26c   : > { %4162 = vmatmul.mubr.bf16.vlgmr.msra.gmra.mxu1 %v1350_v8 }
 0x26d   : > { %v4119_v9 = vpop.f32.mrf.mxu1 }
 0x26e   : > { %v1132_v11 = vadd.f32 %v4119_v9, %v5482_v46 }
 0x26f   : > { %v1123_v10 = vpop.f32.mrf.mxu1 }
 0x270   : > { %v1124_v56 = vadd.f32 %v1123_v10, %v5482_v46  ;;  %v1274_v20 = vmul.f32 %v5486_v34, %v1132_v11  ;;  %vm1241_vm6 = vcmp.gt.f32.partialorder %v1132_v11, 0.0 }
 0x271   : > { %v4120_v12 = vpop.f32.mrf.mxu1 }
 0x272   : > { %v1135_v13 = vadd.f32 %v4120_v12, %v5482_v46  ;;  %v1272_v15 = vmul.f32 %v5486_v34, %v1124_v56  ;;  %vm1239_vm5 = vcmp.gt.f32.partialorder %v1124_v56, 0.0  ;;  %v1306_v28 = vsel %vm1241_vm6, %v1132_v11, %v1274_v20 }
 0x273   : > { %v1126_v14 = vpop.f32.mrf.mxu1 }
 0x274   : > { %vm1242_vm4 = vcmp.gt.f32.partialorder %v1135_v13, 0.0  ;;  %v1275_v16 = vmul.f32 %v5486_v34, %v1135_v13  ;;  %v1127_v18 = vadd.f32 %v1126_v14, %v5482_v46  ;;  %v1304_v25 = vsel %vm1239_vm5, %v1124_v56, %v1272_v15 }
 0x276   : > { %vm1240_vm7 = vcmp.gt.f32.partialorder %v1127_v18, 0.0  ;;  %v1273_v22 = vmul.f32 %v5486_v34, %v1127_v18  ;;  %v1307_v24 = vsel %vm1242_vm4, %v1135_v13, %v1275_v16 }
 0x277   : > { %v1352_v29 = vpack.c.bf16 %v1307_v24, %v1306_v28 }
 0x278   : > { %v1305_v26 = vsel %vm1240_vm7, %v1127_v18, %v1273_v22 }
 0x279   : > { %v1351_v27 = vpack.c.bf16 %v1305_v26, %v1304_v25 }
 0x27b   : > { %4165 = vmatprep.mubr.bf16.mxu1 %v1351_v27 }
 0x27c   : > { %4166 = vmatmul.mubr.bf16.gmra.mxu1 %v1352_v29 }
 0x27d   : > { %v4123_v31 = vpop.f32.mrf.mxu1 }
 0x27e   : > { %v1148_v36 = vadd.f32 %v4123_v31, %v5482_v46 }
 0x27f   : > { %v1139_v32 = vpop.f32.mrf.mxu1 }
 0x280   : > { %v1140_v35 = vadd.f32 %v1139_v32, %v5482_v46  ;;  %v1278_v43 = vmul.f32 %v5486_v34, %v1148_v36  ;;  %vm1245_vm10 = vcmp.gt.f32.partialorder %v1148_v36, 0.0 }
 0x281   : > { %v4124_v37 = vpop.f32.mrf.mxu1 }
 0x282   : > { %v1151_v38 = vadd.f32 %v4124_v37, %v5482_v46  ;;  %v1276_v40 = vmul.f32 %v5486_v34, %v1140_v35  ;;  %vm1243_vm9 = vcmp.gt.f32.partialorder %v1140_v35, 0.0  ;;  %v1310_v53 = vsel %vm1245_vm10, %v1148_v36, %v1278_v43 }
 0x283   : > { %v1142_v39 = vpop.f32.mrf.mxu1 }
 0x284   : > { %vm1246_vm8 = vcmp.gt.f32.partialorder %v1151_v38, 0.0  ;;  %v1279_v41 = vmul.f32 %v5486_v34, %v1151_v38  ;;  %v1143_v42 = vadd.f32 %v1142_v39, %v5482_v46  ;;  %v1308_v48 = vsel %vm1243_vm9, %v1140_v35, %v1276_v40 }
 0x286   : > { %vm1244_vm11 = vcmp.gt.f32.partialorder %v1143_v42, 0.0  ;;  %v1277_v44 = vmul.f32 %v5486_v34, %v1143_v42  ;;  %v1311_v45 = vsel %vm1246_vm8, %v1151_v38, %v1279_v41 }
 0x287   : > { %v1354_v58 = vpack.c.bf16 %v1311_v45, %v1310_v53 }
 0x288   : > { %v1309_v49 = vsel %vm1244_vm11, %v1143_v42, %v1277_v44 }
 0x289   : > { %v1353_v50 = vpack.c.bf16 %v1309_v49, %v1308_v48 }
 0x28b   : > { %4169 = vmatprep.mubr.bf16.mxu1 %v1353_v50 }
 0x28c   : > { %4170 = vmatmul.mubr.bf16.gmra.mxu1 %v1354_v58 }
 0x28d   : > { %v4127_v59 = vpop.f32.mrf.mxu1 }
 0x28e   : > { %v1164_v47 = vadd.f32 %v4127_v59, %v5482_v46 }
 0x28f   : > { %v1155_v2 = vpop.f32.mrf.mxu1 }
 0x290   : > { %v1156_v33 = vadd.f32 %v1155_v2, %v5482_v46  ;;  %v1282_v4 = vmul.f32 %v5486_v34, %v1164_v47  ;;  %vm1249_vm14 = vcmp.gt.f32.partialorder %v1164_v47, 0.0 }
 0x291   : > { %v4128_v51 = vpop.f32.mrf.mxu1 }
 0x292   : > { %v1167_v0 = vadd.f32 %v4128_v51, %v5482_v46  ;;  %v1280_v21 = vmul.f32 %v5486_v34, %v1156_v33  ;;  %vm1247_vm13 = vcmp.gt.f32.partialorder %v1156_v33, 0.0  ;;  %v1314_v5 = vsel %vm1249_vm14, %v1164_v47, %v1282_v4 }
 0x293   : > { %v1158_v17 = vpop.f32.mrf.mxu1 }
 0x294   : > { %vm1250_vm12 = vcmp.gt.f32.partialorder %v1167_v0, 0.0  ;;  %v1283_v30 = vmul.f32 %v5486_v34, %v1167_v0  ;;  %v1159_v52 = vadd.f32 %v1158_v17, %v5482_v46  ;;  %v1312_v60 = vsel %vm1247_vm13, %v1156_v33, %v1280_v21 }
 0x295   : > { %v4131_v19 = vpop.f32.mrf.mxu1 }
 0x296   : > { %vm1248_vm15 = vcmp.gt.f32.partialorder %v1159_v52, 0.0  ;;  %v1281_v23 = vmul.f32 %v5486_v34, %v1159_v52  ;;  %v1180_v54 = vadd.f32 %v4131_v19, %v5482_v46  ;;  %v1315_v55 = vsel %vm1250_vm12, %v1167_v0, %v1283_v30 }
 0x297   : > { %v1171_v62 = vpop.f32.mrf.mxu1  ;;  %v1356_v6 = vpack.c.bf16 %v1315_v55, %v1314_v5 }
 0x298   : > { %v1172_v57 = vadd.f32 %v1171_v62, %v5482_v46  ;;  %v1313_v61 = vsel %vm1248_vm15, %v1159_v52, %v1281_v23  ;;  %v1286_v7 = vmul.f32 %v5486_v34, %v1180_v54  ;;  %vm1253_vm1 = vcmp.gt.f32.partialorder %v1180_v54, 0.0 }
 0x299   : > { %v4132_v63 = vpop.f32.mrf.mxu1  ;;  %v1355_v1 = vpack.c.bf16 %v1313_v61, %v1312_v60 }
 0x29a   : > { %v1183_v3 = vadd.f32 %v4132_v63, %v5482_v46  ;;  %v1284_v9 = vmul.f32 %v5486_v34, %v1172_v57  ;;  %vm1251_vm2 = vcmp.gt.f32.partialorder %v1172_v57, 0.0  ;;  %v1318_v22 = vsel %vm1253_vm1, %v1180_v54, %v1286_v7 }
 0x29b   : > { %v1174_v8 = vpop.f32.mrf.mxu1  ;;  %4173 = vmatprep.mubr.bf16.mxu1 %v1355_v1 }
 0x29c   : > { %vm1254_vm0 = vcmp.gt.f32.partialorder %v1183_v3, 0.0  ;;  %v1287_v10 = vmul.f32 %v5486_v34, %v1183_v3  ;;  %v1175_v56 = vadd.f32 %v1174_v8, %v5482_v46  ;;  %4174 = vmatmul.mubr.bf16.gmra.mxu1 %v1356_v6  ;;  %v1316_v18 = vsel %vm1251_vm2, %v1172_v57, %v1284_v9  ;;  %v4557_v57 = vld [vmem:[%s6290_s6 + $0x8] sm:$0xff]   ;;  %v4558_v6 = vld [vmem:[%s6290_s6] sm:$0xff]  }
 0x29d   : > { %v4135_v11 = vpop.f32.mrf.mxu1  ;;  %4205 = vmatprep.subr.bf16.mxu0 %v4557_v57 }
 0x29e   : > { %vm1252_vm3 = vcmp.gt.f32.partialorder %v1175_v56, 0.0  ;;  %v1285_v12 = vmul.f32 %v5486_v34, %v1175_v56  ;;  %v1196_v13 = vadd.f32 %v4135_v11, %v5482_v46  ;;  %v1319_v14 = vsel %vm1254_vm0, %v1183_v3, %v1287_v10  ;;  %4206 = vmatpush3.bf16.msra.mxu0 %v4557_v57 }
 0x29f   : > { %v1187_v15 = vpop.f32.mrf.mxu1  ;;  %v1358_v27 = vpack.c.bf16 %v1319_v14, %v1318_v22  ;;  %4207 = vmatprep.subr.bf16.mxu0 %v4558_v6 }
 0x2a0   : > { %v1188_v16 = vadd.f32 %v1187_v15, %v5482_v46  ;;  %v1317_v20 = vsel %vm1252_vm3, %v1175_v56, %v1285_v12  ;;  %v1290_v24 = vmul.f32 %v5486_v34, %v1196_v13  ;;  %vm1257_vm4 = vcmp.gt.f32.partialorder %v1196_v13, 0.0  ;;  %v5556_v12 = vld [vmem:[#allocation7 + $0x2] ss:$0 sm:$0xff] }
 0x2a1   : > { %v4136_v25 = vpop.f32.mrf.mxu1  ;;  %v1357_v26 = vpack.c.bf16 %v1317_v20, %v1316_v18 }
 0x2a2   : > { %vm1255_vm5 = vcmp.gt.f32.partialorder %v1188_v16, 0.0  ;;  %v1288_v28 = vmul.f32 %v5486_v34, %v1188_v16  ;;  %v1199_v29 = vadd.f32 %v4136_v25, %v5482_v46  ;;  %v1322_v38 = vsel %vm1257_vm4, %v1196_v13, %v1290_v24  ;;  %4208 = vmatpush3.bf16.msra.mxu0 %v4558_v6 }
 0x2a3   : > { %v1190_v31 = vpop.f32.mrf.mxu1  ;;  %4177 = vmatprep.mubr.bf16.mxu1 %v1357_v26 }
 0x2a4   : > { %vm1258_vm6 = vcmp.gt.f32.partialorder %v1199_v29, 0.0  ;;  %v1291_v32 = vmul.f32 %v5486_v34, %v1199_v29  ;;  %v1191_v35 = vadd.f32 %v1190_v31, %v5482_v46  ;;  %4178 = vmatmul.mubr.bf16.gmra.mxu1 %v1358_v27  ;;  %v1320_v37 = vsel %vm1255_vm5, %v1188_v16, %v1288_v28 }
 0x2a5   : > { %v4139_v36 = vpop.f32.mrf.mxu1 }
 0x2a6   : > { %vm1256_vm7 = vcmp.gt.f32.partialorder %v1191_v35, 0.0  ;;  %v1289_v39 = vmul.f32 %v5486_v34, %v1191_v35  ;;  %v1212_v40 = vadd.f32 %v4139_v36, %v5482_v46  ;;  %v1323_v41 = vsel %vm1258_vm6, %v1199_v29, %v1291_v32 }
 0x2a7   : > { %v1203_v42 = vpop.f32.mrf.mxu1  ;;  %v1360_v45 = vpack.c.bf16 %v1323_v41, %v1322_v38 }
 0x2a8   : > { %v1204_v43 = vadd.f32 %v1203_v42, %v5482_v46  ;;  %v1321_v44 = vsel %vm1256_vm7, %v1191_v35, %v1289_v39  ;;  %v1294_v48 = vmul.f32 %v5486_v34, %v1212_v40  ;;  %vm1261_vm8 = vcmp.gt.f32.partialorder %v1212_v40, 0.0 }
 0x2a9   : > { %v4140_v49 = vpop.f32.mrf.mxu1  ;;  %v1359_v50 = vpack.c.bf16 %v1321_v44, %v1320_v37 }
 0x2aa   : > { %vm1259_vm9 = vcmp.gt.f32.partialorder %v1204_v43, 0.0  ;;  %v1292_v53 = vmul.f32 %v5486_v34, %v1204_v43  ;;  %v1215_v58 = vadd.f32 %v4140_v49, %v5482_v46  ;;  %v1326_v0 = vsel %vm1261_vm8, %v1212_v40, %v1294_v48 }
 0x2ab   : > { %v1206_v59 = vpop.f32.mrf.mxu1  ;;  %4181 = vmatprep.mubr.bf16.mxu1 %v1359_v50 }
 0x2ac   : > { %vm1262_vm10 = vcmp.gt.f32.partialorder %v1215_v58, 0.0  ;;  %v1295_v2 = vmul.f32 %v5486_v34, %v1215_v58  ;;  %v1207_v33 = vadd.f32 %v1206_v59, %v5482_v46  ;;  %4182 = vmatmul.mubr.bf16.gmra.mxu1 %v1360_v45  ;;  %v1324_v51 = vsel %vm1259_vm9, %v1204_v43, %v1292_v53 }
 0x2ad   : > { %v4143_v47 = vpop.f32.mrf.mxu1 }
 0x2ae   : > { %vm1260_vm11 = vcmp.gt.f32.partialorder %v1207_v33, 0.0  ;;  %v1293_v17 = vmul.f32 %v5486_v34, %v1207_v33  ;;  %v1228_v21 = vadd.f32 %v4143_v47, %v5482_v46  ;;  %v1327_v30 = vsel %vm1262_vm10, %v1215_v58, %v1295_v2 }
 0x2af   : > { %v1219_v52 = vpop.f32.mrf.mxu1  ;;  %v1362_v23 = vpack.c.bf16 %v1327_v30, %v1326_v0 }
 0x2b0   : > { %v1220_v4 = vadd.f32 %v1219_v52, %v5482_v46  ;;  %v1325_v19 = vsel %vm1260_vm11, %v1207_v33, %v1293_v17  ;;  %v1298_v54 = vmul.f32 %v5486_v34, %v1228_v21  ;;  %vm1265_vm12 = vcmp.gt.f32.partialorder %v1228_v21, 0.0 }
 0x2b1   : > { %v4144_v62 = vpop.f32.mrf.mxu1  ;;  %v1361_v55 = vpack.c.bf16 %v1325_v19, %v1324_v51 }
 0x2b2   : > { %v1296_v60 = vmul.f32 %v5486_v34, %v1220_v4  ;;  %v1231_v61 = vadd.f32 %v4144_v62, %v5482_v46  ;;  %vm1263_vm13 = vcmp.gt.f32.partialorder %v1220_v4, 0.0  ;;  %v1330_v3 = vsel %vm1265_vm12, %v1228_v21, %v1298_v54 }
 0x2b3   : > { %v1222_v63 = vpop.f32.mrf.mxu1  ;;  %4185 = vmatprep.mubr.bf16.mxu1 %v1361_v55 }
 0x2b4   : > { %vm1266_vm14 = vcmp.gt.f32.partialorder %v1231_v61, 0.0  ;;  %v1299_v1 = vmul.f32 %v5486_v34, %v1231_v61  ;;  %v1223_v5 = vadd.f32 %v1222_v63, %v5482_v46  ;;  %4186 = vmatmul.mubr.bf16.gmra.mxu1 %v1362_v23  ;;  %v1328_v8 = vsel %vm1263_vm13, %v1220_v4, %v1296_v60 }
 0x2b6   : > { %vm1264_vm15 = vcmp.gt.f32.partialorder %v1223_v5, 0.0  ;;  %v1297_v7 = vmul.f32 %v5486_v34, %v1223_v5  ;;  %v1331_v9 = vsel %vm1266_vm14, %v1231_v61, %v1299_v1  ;;  %v5560_v34 = vstv %s3771_s14  ;;  %s3572_s14 = sshll.u32 %s6105_s16, 4  ;;  %s6238_s14 = int_to_ptr.vmem [resolvable:$true] %s3572_s14 }
 0x2b7   : > { %v1364_v56 = vpack.c.bf16 %v1331_v9, %v1330_v3  ;;  %s4866_s1 = scalar_lea.vmem %s6238_s14, 8192  ;;  %p4873_p1 = scmp.lt.s32.totalorder %s6238_s14, %s4871_s24 }
 0x2b8   : > { %v1329_v10 = vsel %vm1264_vm15, %v1223_v5, %v1297_v7  ;;  %p4867_p2 = scmp.ne.s32.totalorder %s6238_s14, %s4866_s1  ;;  %p4874_p3 = scmp.lt.s32.totalorder %s4872_s27, %s4866_s1 }
 0x2b9   : > { %v1363_v11 = vpack.c.bf16 %v1329_v10, %v1328_v8 }
 0x2ba   : > { %p4868_p7 = pnand %p4867_p2, %p6327_p5  ;;  %p4875_p4 = por %p4874_p3, %p4873_p1 }
 0x2bb   : > { %4189 = vmatprep.mubr.bf16.mxu1 %v1363_v11 }
 0x2bc   : > { %4190 = vmatmul.mubr.bf16.gmra.mxu1 %v1364_v56  ;;  %p4869_p12 = pneg %p4868_p7 }
 0x2be   : > { %p4876_p6 = pnand %p4875_p4, %p4869_p12 }
 0x32c   : > { %v4163_v46 = vpop.f32.mrf.mxu1 }
 0x32d   : > { %v1456_v15 = vadd.f32 %v4163_v46, %v5556_v12 }
 0x32e   : > { %v1447_v13 = vpop.f32.mrf.mxu1 }
 0x32f   : > { %v1448_v14 = vadd.f32 %v1447_v13, %v5556_v12  ;;  %v1610_v26 = vmul.f32 %v5560_v34, %v1456_v15  ;;  %vm1577_vm2 = vcmp.gt.f32.partialorder %v1456_v15, 0.0 }
 0x330   : > { %v4164_v16 = vpop.f32.mrf.mxu1 }
 0x331   : > { %v1459_v18 = vadd.f32 %v4164_v16, %v5556_v12  ;;  %v1608_v22 = vmul.f32 %v5560_v34, %v1448_v14  ;;  %vm1575_vm1 = vcmp.gt.f32.partialorder %v1448_v14, 0.0  ;;  %v1642_v32 = vsel %vm1577_vm2, %v1456_v15, %v1610_v26 }
 0x332   : > { %v1450_v20 = vpop.f32.mrf.mxu1 }
 0x333   : > { %vm1578_vm0 = vcmp.gt.f32.partialorder %v1459_v18, 0.0  ;;  %v1611_v24 = vmul.f32 %v5560_v34, %v1459_v18  ;;  %v1451_v25 = vadd.f32 %v1450_v20, %v5556_v12  ;;  %v1640_v29 = vsel %vm1575_vm1, %v1448_v14, %v1608_v22 }
 0x335   : > { %vm1576_vm3 = vcmp.gt.f32.partialorder %v1451_v25, 0.0  ;;  %v1609_v27 = vmul.f32 %v5560_v34, %v1451_v25  ;;  %v1643_v28 = vsel %vm1578_vm0, %v1459_v18, %v1611_v24 }
 0x336   : > { %v1690_v36 = vpack.c.bf16 %v1643_v28, %v1642_v32 }
 0x337   : > { %v1641_v31 = vsel %vm1576_vm3, %v1451_v25, %v1609_v27 }
 0x338   : > { %v1689_v35 = vpack.c.bf16 %v1641_v31, %v1640_v29 }
 0x33a   : > { %4209 = vmatprep.mubr.bf16.mxu0 %v1689_v35 }
 0x33b   : > { %4210 = vmatmul.mubr.bf16.vlgmr.msra.gmra.mxu0 %v1690_v36 }
 0x33c   : > { %v4167_v37 = vpop.f32.mrf.mxu1 }
 0x33d   : > { %v1472_v40 = vadd.f32 %v4167_v37, %v5556_v12 }
 0x33e   : > { %v1463_v38 = vpop.f32.mrf.mxu1 }
 0x33f   : > { %v1464_v39 = vadd.f32 %v1463_v38, %v5556_v12  ;;  %v1614_v49 = vmul.f32 %v5560_v34, %v1472_v40  ;;  %vm1581_vm6 = vcmp.gt.f32.partialorder %v1472_v40, 0.0 }
 0x340   : > { %v4168_v41 = vpop.f32.mrf.mxu1 }
 0x341   : > { %v1475_v42 = vadd.f32 %v4168_v41, %v5556_v12  ;;  %v1612_v44 = vmul.f32 %v5560_v34, %v1464_v39  ;;  %vm1579_vm5 = vcmp.gt.f32.partialorder %v1464_v39, 0.0  ;;  %v1646_v33 = vsel %vm1581_vm6, %v1472_v40, %v1614_v49 }
 0x342   : > { %v1466_v43 = vpop.f32.mrf.mxu1 }
 0x343   : > { %vm1582_vm4 = vcmp.gt.f32.partialorder %v1475_v42, 0.0  ;;  %v1615_v45 = vmul.f32 %v5560_v34, %v1475_v42  ;;  %v1467_v48 = vadd.f32 %v1466_v43, %v5556_v12  ;;  %v1644_v58 = vsel %vm1579_vm5, %v1464_v39, %v1612_v44 }
 0x345   : > { %vm1580_vm7 = vcmp.gt.f32.partialorder %v1467_v48, 0.0  ;;  %v1613_v50 = vmul.f32 %v5560_v34, %v1467_v48  ;;  %v1647_v53 = vsel %vm1582_vm4, %v1475_v42, %v1615_v45 }
 0x346   : > { %v1692_v47 = vpack.c.bf16 %v1647_v53, %v1646_v33 }
 0x347   : > { %v1645_v59 = vsel %vm1580_vm7, %v1467_v48, %v1613_v50 }
 0x348   : > { %v1691_v2 = vpack.c.bf16 %v1645_v59, %v1644_v58 }
 0x34a   : > { %4213 = vmatprep.mubr.bf16.mxu0 %v1691_v2 }
 0x34b   : > { %4214 = vmatmul.mubr.bf16.gmra.mxu0 %v1692_v47 }
 0x34c   : > { %v4171_v51 = vpop.f32.mrf.mxu1 }
 0x34d   : > { %v1488_v21 = vadd.f32 %v4171_v51, %v5556_v12 }
 0x34e   : > { %v1479_v0 = vpop.f32.mrf.mxu1 }
 0x34f   : > { %v1480_v17 = vadd.f32 %v1479_v0, %v5556_v12  ;;  %v1618_v62 = vmul.f32 %v5560_v34, %v1488_v21  ;;  %vm1585_vm10 = vcmp.gt.f32.partialorder %v1488_v21, 0.0 }
 0x350   : > { %v4172_v30 = vpop.f32.mrf.mxu1 }
 0x351   : > { %v1491_v52 = vadd.f32 %v4172_v30, %v5556_v12  ;;  %v1616_v19 = vmul.f32 %v5560_v34, %v1480_v17  ;;  %vm1583_vm9 = vcmp.gt.f32.partialorder %v1480_v17, 0.0  ;;  %v1650_v1 = vsel %vm1585_vm10, %v1488_v21, %v1618_v62 }
 0x352   : > { %v1482_v4 = vpop.f32.mrf.mxu1 }
 0x353   : > { %vm1586_vm8 = vcmp.gt.f32.partialorder %v1491_v52, 0.0  ;;  %v1619_v23 = vmul.f32 %v5560_v34, %v1491_v52  ;;  %v1483_v54 = vadd.f32 %v1482_v4, %v5556_v12  ;;  %v1648_v60 = vsel %vm1583_vm9, %v1480_v17, %v1616_v19 }
 0x355   : > { %vm1584_vm11 = vcmp.gt.f32.partialorder %v1483_v54, 0.0  ;;  %v1617_v55 = vmul.f32 %v5560_v34, %v1483_v54  ;;  %v1651_v57 = vsel %vm1586_vm8, %v1491_v52, %v1619_v23 }
 0x356   : > { %v1694_v5 = vpack.c.bf16 %v1651_v57, %v1650_v1 }
 0x357   : > { %v1649_v61 = vsel %vm1584_vm11, %v1483_v54, %v1617_v55 }
 0x358   : > { %v1693_v63 = vpack.c.bf16 %v1649_v61, %v1648_v60 }
 0x35a   : > { %4217 = vmatprep.mubr.bf16.mxu0 %v1693_v63 }
 0x35b   : > { %4218 = vmatmul.mubr.bf16.gmra.mxu0 %v1694_v5 }
 0x35c   : > { %v4175_v3 = vpop.f32.mrf.mxu1 }
 0x35d   : > { %v1504_v8 = vadd.f32 %v4175_v3, %v5556_v12 }
 0x35e   : > { %v1495_v6 = vpop.f32.mrf.mxu1 }
 0x35f   : > { %v1496_v7 = vadd.f32 %v1495_v6, %v5556_v12  ;;  %v1622_v14 = vmul.f32 %v5560_v34, %v1504_v8  ;;  %vm1589_vm14 = vcmp.gt.f32.partialorder %v1504_v8, 0.0 }
 0x360   : > { %v4176_v9 = vpop.f32.mrf.mxu1 }
 0x361   : > { %v1507_v10 = vadd.f32 %v4176_v9, %v5556_v12  ;;  %v1620_v11 = vmul.f32 %v5560_v34, %v1496_v7  ;;  %vm1587_vm13 = vcmp.gt.f32.partialorder %v1496_v7, 0.0  ;;  %v1654_v29 = vsel %vm1589_vm14, %v1504_v8, %v1622_v14 }
 0x362   : > { %v1498_v56 = vpop.f32.mrf.mxu1 }
 0x363   : > { %vm1590_vm12 = vcmp.gt.f32.partialorder %v1507_v10, 0.0  ;;  %v1623_v46 = vmul.f32 %v5560_v34, %v1507_v10  ;;  %v1499_v13 = vadd.f32 %v1498_v56, %v5556_v12  ;;  %v1652_v24 = vsel %vm1587_vm13, %v1496_v7, %v1620_v11 }
 0x364   : > { %v4179_v15 = vpop.f32.mrf.mxu1 }
 0x365   : > { %vm1588_vm15 = vcmp.gt.f32.partialorder %v1499_v13, 0.0  ;;  %v1621_v16 = vmul.f32 %v5560_v34, %v1499_v13  ;;  %v1655_v20 = vsel %vm1590_vm12, %v1507_v10, %v1623_v46  ;;  %v1520_v26 = vadd.f32 %v4179_v15, %v5556_v12 }
 0x366   : > { %v1511_v18 = vpop.f32.mrf.mxu1  ;;  %v1696_v32 = vpack.c.bf16 %v1655_v20, %v1654_v29 }
 0x367   : > { %v1512_v22 = vadd.f32 %v1511_v18, %v5556_v12  ;;  %v1653_v25 = vsel %vm1588_vm15, %v1499_v13, %v1621_v16  ;;  %v1626_v39 = vmul.f32 %v5560_v34, %v1520_v26  ;;  %vm1593_vm2 = vcmp.gt.f32.partialorder %v1520_v26, 0.0 }
 0x368   : > { %v4180_v27 = vpop.f32.mrf.mxu1  ;;  %v1695_v28 = vpack.c.bf16 %v1653_v25, %v1652_v24 }
 0x369   : > { %v1523_v31 = vadd.f32 %v4180_v27, %v5556_v12  ;;  %v1624_v36 = vmul.f32 %v5560_v34, %v1512_v22  ;;  %vm1591_vm1 = vcmp.gt.f32.partialorder %v1512_v22, 0.0  ;;  %v1658_v58 = vsel %vm1593_vm2, %v1520_v26, %v1626_v39  ;;  %v4559_v39 = vld [vmem:[%s6291_s7 + $0x18] sm:$0xff]  }
 0x36a   : > { %v1514_v35 = vpop.f32.mrf.mxu1  ;;  %4221 = vmatprep.mubr.bf16.mxu0 %v1695_v28  ;;  %4241 = vmatprep.subr.bf16.mxu1 %v4559_v39 }
 0x36b   : > { %vm1594_vm0 = vcmp.gt.f32.partialorder %v1523_v31, 0.0  ;;  %v1627_v37 = vmul.f32 %v5560_v34, %v1523_v31  ;;  %v1515_v38 = vadd.f32 %v1514_v35, %v5556_v12  ;;  %4222 = vmatmul.mubr.bf16.gmra.mxu0 %v1696_v32  ;;  %v1656_v45 = vsel %vm1591_vm1, %v1512_v22, %v1624_v36  ;;  %4242 = vmatpush3.bf16.msra.mxu1 %v4559_v39 }
 0x36c   : > { %v4183_v40 = vpop.f32.mrf.mxu1 }
 0x36d   : > { %vm1592_vm3 = vcmp.gt.f32.partialorder %v1515_v38, 0.0  ;;  %v1625_v41 = vmul.f32 %v5560_v34, %v1515_v38  ;;  %v1659_v43 = vsel %vm1594_vm0, %v1523_v31, %v1627_v37  ;;  %v1536_v49 = vadd.f32 %v4183_v40, %v5556_v12  ;;  %v5633_v40 = vld [vmem:[#allocation7 + $0x3] ss:$0 sm:$0xff] }
 0x36e   : > { %v1527_v42 = vpop.f32.mrf.mxu1  ;;  %v1698_v2 = vpack.c.bf16 %v1659_v43, %v1658_v58  ;;  %vm1946_vm0 = vcmask 523264  }
 0x36f   : > { %v1528_v44 = vadd.f32 %v1527_v42, %v5556_v12  ;;  %v1657_v48 = vsel %vm1592_vm3, %v1515_v38, %v1625_v41  ;;  %v1630_v17 = vmul.f32 %v5560_v34, %v1536_v49  ;;  %vm1597_vm6 = vcmp.gt.f32.partialorder %v1536_v49, 0.0 }
 0x370   : > { %v4184_v50 = vpop.f32.mrf.mxu1  ;;  %v1697_v53 = vpack.c.bf16 %v1657_v48, %v1656_v45 }
 0x371   : > { %v1539_v59 = vadd.f32 %v4184_v50, %v5556_v12  ;;  %v1628_v47 = vmul.f32 %v5560_v34, %v1528_v44  ;;  %vm1595_vm5 = vcmp.gt.f32.partialorder %v1528_v44, 0.0  ;;  %v1662_v60 = vsel %vm1597_vm6, %v1536_v49, %v1630_v17 }
 0x372   : > { %v1530_v33 = vpop.f32.mrf.mxu1  ;;  %4225 = vmatprep.mubr.bf16.mxu0 %v1697_v53 }
 0x373   : > { %vm1598_vm4 = vcmp.gt.f32.partialorder %v1539_v59, 0.0  ;;  %v1631_v51 = vmul.f32 %v5560_v34, %v1539_v59  ;;  %v1531_v0 = vadd.f32 %v1530_v33, %v5556_v12  ;;  %4226 = vmatmul.mubr.bf16.gmra.mxu0 %v1698_v2  ;;  %v1660_v54 = vsel %vm1595_vm5, %v1528_v44, %v1628_v47 }
 0x374   : > { %v4187_v21 = vpop.f32.mrf.mxu1 }
 0x375   : > { %vm1596_vm7 = vcmp.gt.f32.partialorder %v1531_v0, 0.0  ;;  %v1629_v30 = vmul.f32 %v5560_v34, %v1531_v0  ;;  %v1552_v52 = vadd.f32 %v4187_v21, %v5556_v12  ;;  %v1663_v19 = vsel %vm1598_vm4, %v1539_v59, %v1631_v51 }
 0x376   : > { %v1543_v4 = vpop.f32.mrf.mxu1  ;;  %v1700_v1 = vpack.c.bf16 %v1663_v19, %v1662_v60 }
 0x377   : > { %v1544_v23 = vadd.f32 %v1543_v4, %v5556_v12  ;;  %v1661_v62 = vsel %vm1596_vm7, %v1531_v0, %v1629_v30  ;;  %v1634_v5 = vmul.f32 %v5560_v34, %v1552_v52  ;;  %vm1601_vm9 = vcmp.gt.f32.partialorder %v1552_v52, 0.0 }
 0x378   : > { %v4188_v55 = vpop.f32.mrf.mxu1  ;;  %v1699_v57 = vpack.c.bf16 %v1661_v62, %v1660_v54 }
 0x379   : > { %v1632_v61 = vmul.f32 %v5560_v34, %v1544_v23  ;;  %v1555_v63 = vadd.f32 %v4188_v55, %v5556_v12  ;;  %vm1599_vm8 = vcmp.gt.f32.partialorder %v1544_v23, 0.0  ;;  %v1666_v46 = vsel %vm1601_vm9, %v1552_v52, %v1634_v5 }
 0x37a   : > { %v1546_v3 = vpop.f32.mrf.mxu1  ;;  %4229 = vmatprep.mubr.bf16.mxu0 %v1699_v57 }
 0x37b   : > { %vm1602_vm10 = vcmp.gt.f32.partialorder %v1555_v63, 0.0  ;;  %v1635_v6 = vmul.f32 %v5560_v34, %v1555_v63  ;;  %v1547_v7 = vadd.f32 %v1546_v3, %v5556_v12  ;;  %4230 = vmatmul.mubr.bf16.gmra.mxu0 %v1700_v1  ;;  %v1664_v56 = vsel %vm1599_vm8, %v1544_v23, %v1632_v61 }
 0x37c   : > { %v4191_v8 = vpop.f32.mrf.mxu1 }
 0x37d   : > { %vm1600_vm11 = vcmp.gt.f32.partialorder %v1547_v7, 0.0  ;;  %v1633_v9 = vmul.f32 %v5560_v34, %v1547_v7  ;;  %v1568_v10 = vadd.f32 %v4191_v8, %v5556_v12  ;;  %v1667_v13 = vsel %vm1602_vm10, %v1555_v63, %v1635_v6 }
 0x37e   : > { %v1559_v11 = vpop.f32.mrf.mxu1  ;;  %v1702_v25 = vpack.c.bf16 %v1667_v13, %v1666_v46 }
 0x37f   : > { %v1560_v14 = vadd.f32 %v1559_v11, %v5556_v12  ;;  %v1665_v15 = vsel %vm1600_vm11, %v1547_v7, %v1633_v9  ;;  %v1638_v16 = vmul.f32 %v5560_v34, %v1568_v10  ;;  %vm1605_vm12 = vcmp.gt.f32.partialorder %v1568_v10, 0.0 }
 0x380   : > { %v4192_v18 = vpop.f32.mrf.mxu1  ;;  %v1701_v20 = vpack.c.bf16 %v1665_v15, %v1664_v56  ;;  %v4562_v56 = vld [vmem:[%s6291_s7] sm:$0xff]  }
 0x381   : > { %v1636_v22 = vmul.f32 %v5560_v34, %v1560_v14  ;;  %v1571_v24 = vadd.f32 %v4192_v18, %v5556_v12  ;;  %vm1603_vm13 = vcmp.gt.f32.partialorder %v1560_v14, 0.0  ;;  %v1670_v29 = vsel %vm1605_vm12, %v1568_v10, %v1638_v16 }
 0x382   : > { %v1562_v26 = vpop.f32.mrf.mxu1  ;;  %4233 = vmatprep.mubr.bf16.mxu0 %v1701_v20 }
 0x383   : > { %vm1606_vm14 = vcmp.gt.f32.partialorder %v1571_v24, 0.0  ;;  %v1639_v27 = vmul.f32 %v5560_v34, %v1571_v24  ;;  %v1563_v28 = vadd.f32 %v1562_v26, %v5556_v12  ;;  %4234 = vmatmul.mubr.bf16.gmra.mxu0 %v1702_v25  ;;  %v1668_v32 = vsel %vm1603_vm13, %v1560_v14, %v1636_v22  ;;  %v4560_v12 = vld [vmem:[%s6291_s7 + $0x10] sm:$0xff]  }
 0x384   : > { %4243 = vmatprep.subr.bf16.mxu1 %v4560_v12 }
 0x385   : > { %vm1604_vm15 = vcmp.gt.f32.partialorder %v1563_v28, 0.0  ;;  %v1637_v31 = vmul.f32 %v5560_v34, %v1563_v28  ;;  %v1671_v35 = vsel %vm1606_vm14, %v1571_v24, %v1639_v27  ;;  %v4561_v34 = vld [vmem:[%s6291_s7 + $0x8] sm:$0xff]   ;;  %4244 = vmatpush3.bf16.msra.mxu1 %v4560_v12 }
 0x386   : > { %v1704_v37 = vpack.c.bf16 %v1671_v35, %v1670_v29  ;;  %4245 = vmatprep.subr.bf16.mxu1 %v4561_v34 }
 0x387   : > { %v1669_v36 = vsel %vm1604_vm15, %v1563_v28, %v1637_v31 }
 0x388   : > { %v1703_v38 = vpack.c.bf16 %v1669_v36, %v1668_v32 }
 0x389   : > { %4246 = vmatpush3.bf16.msra.mxu1 %v4561_v34 }
 0x38a   : > { %4237 = vmatprep.mubr.bf16.mxu0 %v1703_v38  ;;  %4247 = vmatprep.subr.bf16.mxu1 %v4562_v56 }
 0x38b   : > { %4238 = vmatmul.mubr.bf16.gmra.mxu0 %v1704_v37 }
 0x38d   : > { %4248 = vmatpush3.bf16.msra.mxu1 %v4562_v56 }
 0x3fb   : > { %v4211_v41 = vpop.f32.mrf.mxu0 }
 0x3fc   : > { %v5636_v42 = vadd.f32 %v4211_v41, %v5633_v40 }
 0x3fd   : > { %v1787_v43 = vpop.f32.mrf.mxu0 }
 0x3fe   : > { %v5639_v44 = vadd.f32 %v1787_v43, %v5633_v40  ;;  %v1916_v45 = vmul.f32 %v5636_v42, %v5636_v42 }
 0x3ff   : > { %v4212_v48 = vpop.f32.mrf.mxu0 }
 0x400   : > { %v5644_v49 = vadd.f32 %v4212_v48, %v5633_v40  ;;  %v1953_v50 = vsel %vm1946_vm0, %v1916_v45, 0.0  ;;  %v1914_v53 = vmul.f32 %v5639_v44, %v5639_v44 }
 0x401   : > { %1954 = vadd.xlane.f32.xlu1 %v1953_v50  ;;  %v1790_v58 = vpop.f32.mrf.mxu0 }
 0x402   : > { %v5650_v59 = vadd.f32 %v1790_v58, %v5633_v40  ;;  %v1947_v2 = vsel %vm1946_vm0, %v1914_v53, 0.0  ;;  %v1917_v33 = vmul.f32 %v5644_v49, %v5644_v49 }
 0x403   : > { %1948 = vadd.xlane.f32.xlu0 %v1947_v2 }
 0x404   : > { %v1956_v47 = vsel %vm1946_vm0, %v1917_v33, 0.0  ;;  %v1915_v51 = vmul.f32 %v5650_v59, %v5650_v59 }
 0x405   : > { %1957 = vadd.xlane.f32.xlu1 %v1956_v47 }
 0x406   : > { %v1950_v0 = vsel %vm1946_vm0, %v1915_v51, 0.0 }
 0x407   : > { %1951 = vadd.xlane.f32.xlu0 %v1950_v0 }
 0x40b   : > { %v4215_v17 = vpop.f32.mrf.mxu0 }
 0x40c   : > { %v5660_v30 = vadd.f32 %v4215_v17, %v5633_v40 }
 0x40d   : > { %v1803_v21 = vpop.f32.mrf.mxu0 }
 0x40e   : > { %v5663_v52 = vadd.f32 %v1803_v21, %v5633_v40  ;;  %v1920_v57 = vmul.f32 %v5660_v30, %v5660_v30 }
 0x40f   : > { %v4216_v4 = vpop.f32.mrf.mxu0 }
 0x410   : > { %v1918_v19 = vmul.f32 %v5663_v52, %v5663_v52  ;;  %v5668_v54 = vadd.f32 %v4216_v4, %v5633_v40  ;;  %v1965_v63 = vsel %vm1946_vm0, %v1920_v57, 0.0 }
 0x411   : > { %v1806_v23 = vpop.f32.mrf.mxu0 }
 0x412   : > { %v5671_v62 = vadd.f32 %v1806_v23, %v5633_v40  ;;  %v1959_v55 = vsel %vm1946_vm0, %v1918_v19, 0.0  ;;  %v1921_v1 = vmul.f32 %v5668_v54, %v5668_v54 }
 0x413   : > { %1960 = vadd.xlane.f32.xlu0 %v1959_v55 }
 0x414   : > { %v1919_v60 = vmul.f32 %v5671_v62, %v5671_v62  ;;  %v1968_v5 = vsel %vm1946_vm0, %v1921_v1, 0.0 }
 0x416   : > { %v1962_v61 = vsel %vm1946_vm0, %v1919_v60, 0.0 }
 0x417   : > { %1963 = vadd.xlane.f32.xlu1 %v1962_v61  ;;  %1966 = vadd.xlane.f32.xlu0 %v1965_v63 }
 0x41b   : > { %v4219_v3 = vpop.f32.mrf.mxu0  ;;  %1969 = vadd.xlane.f32.xlu1 %v1968_v5 }
 0x41c   : > { %v5684_v7 = vadd.f32 %v4219_v3, %v5633_v40 }
 0x41d   : > { %v1819_v6 = vpop.f32.mrf.mxu0 }
 0x41e   : > { %v5687_v8 = vadd.f32 %v1819_v6, %v5633_v40  ;;  %v1924_v15 = vmul.f32 %v5684_v7, %v5684_v7 }
 0x41f   : > { %v4220_v9 = vpop.f32.mrf.mxu0 }
 0x420   : > { %v1922_v10 = vmul.f32 %v5687_v8, %v5687_v8  ;;  %v5695_v46 = vadd.f32 %v4220_v9, %v5633_v40  ;;  %v1977_v20 = vsel %vm1946_vm0, %v1924_v15, 0.0 }
 0x421   : > { %v1822_v11 = vpop.f32.mrf.mxu0 }
 0x422   : > { %v5698_v13 = vadd.f32 %v1822_v11, %v5633_v40  ;;  %v1971_v14 = vsel %vm1946_vm0, %v1922_v10, 0.0  ;;  %v1925_v22 = vmul.f32 %v5695_v46, %v5695_v46 }
 0x423   : > { %1972 = vadd.xlane.f32.xlu0 %v1971_v14 }
 0x424   : > { %v1923_v16 = vmul.f32 %v5698_v13, %v5698_v13  ;;  %v1980_v24 = vsel %vm1946_vm0, %v1925_v22, 0.0 }
 0x426   : > { %v1974_v18 = vsel %vm1946_vm0, %v1923_v16, 0.0 }
 0x427   : > { %1975 = vadd.xlane.f32.xlu1 %v1974_v18  ;;  %1978 = vadd.xlane.f32.xlu0 %v1977_v20 }
 0x42b   : > { %v4223_v25 = vpop.f32.mrf.mxu0  ;;  %1981 = vadd.xlane.f32.xlu1 %v1980_v24 }
 0x42c   : > { %v5711_v27 = vadd.f32 %v4223_v25, %v5633_v40 }
 0x42d   : > { %v1835_v26 = vpop.f32.mrf.mxu0 }
 0x42e   : > { %v5714_v28 = vadd.f32 %v1835_v26, %v5633_v40  ;;  %v1928_v38 = vmul.f32 %v5711_v27, %v5711_v27 }
 0x42f   : > { %v4224_v29 = vpop.f32.mrf.mxu0 }
 0x430   : > { %v1926_v31 = vmul.f32 %v5714_v28, %v5714_v28  ;;  %v5719_v35 = vadd.f32 %v4224_v29, %v5633_v40  ;;  %v1989_v48 = vsel %vm1946_vm0, %v1928_v38, 0.0 }
 0x431   : > { %v1838_v32 = vpop.f32.mrf.mxu0 }
 0x432   : > { %v5722_v36 = vadd.f32 %v1838_v32, %v5633_v40  ;;  %v1983_v37 = vsel %vm1946_vm0, %v1926_v31, 0.0  ;;  %v1929_v50 = vmul.f32 %v5719_v35, %v5719_v35 }
 0x433   : > { %v4227_v39 = vpop.f32.mrf.mxu0  ;;  %1984 = vadd.xlane.f32.xlu0 %v1983_v37 }
 0x434   : > { %v1927_v12 = vmul.f32 %v5722_v36, %v5722_v36  ;;  %v5730_v34 = vadd.f32 %v4227_v39, %v5633_v40  ;;  %v1992_v0 = vsel %vm1946_vm0, %v1929_v50, 0.0 }
 0x435   : > { %v1851_v41 = vpop.f32.mrf.mxu0 }
 0x436   : > { %v5733_v43 = vadd.f32 %v1851_v41, %v5633_v40  ;;  %v1986_v45 = vsel %vm1946_vm0, %v1927_v12, 0.0  ;;  %v1932_v33 = vmul.f32 %v5730_v34, %v5730_v34 }
 0x437   : > { %v4228_v53 = vpop.f32.mrf.mxu0  ;;  %1987 = vadd.xlane.f32.xlu1 %v1986_v45  ;;  %1990 = vadd.xlane.f32.xlu0 %v1989_v48 }
 0x438   : > { %v1930_v58 = vmul.f32 %v5733_v43, %v5733_v43  ;;  %v5744_v47 = vadd.f32 %v4228_v53, %v5633_v40  ;;  %v2001_v23 = vsel %vm1946_vm0, %v1932_v33, 0.0 }
 0x439   : > { %v1854_v2 = vpop.f32.mrf.mxu0 }
 0x43a   : > { %v5747_v51 = vadd.f32 %v1854_v2, %v5633_v40  ;;  %v1995_v17 = vsel %vm1946_vm0, %v1930_v58, 0.0  ;;  %v1933_v61 = vmul.f32 %v5744_v47, %v5744_v47 }
 0x43b   : > { %v4231_v21 = vpop.f32.mrf.mxu0  ;;  %1993 = vadd.xlane.f32.xlu1 %v1992_v0  ;;  %1996 = vadd.xlane.f32.xlu0 %v1995_v17 }
 0x43c   : > { %v1931_v4 = vmul.f32 %v5747_v51, %v5747_v51  ;;  %v5755_v55 = vadd.f32 %v4231_v21, %v5633_v40  ;;  %v2004_v9 = vsel %vm1946_vm0, %v1933_v61, 0.0 }
 0x43d   : > { %v1867_v19 = vpop.f32.mrf.mxu0 }
 0x43e   : > { %v5758_v57 = vadd.f32 %v1867_v19, %v5633_v40  ;;  %v1998_v60 = vsel %vm1946_vm0, %v1931_v4, 0.0  ;;  %v1936_v56 = vmul.f32 %v5755_v55, %v5755_v55 }
 0x43f   : > { %v4232_v63 = vpop.f32.mrf.mxu0  ;;  %1999 = vadd.xlane.f32.xlu1 %v1998_v60  ;;  %2002 = vadd.xlane.f32.xlu0 %v2001_v23 }
 0x440   : > { %v1934_v1 = vmul.f32 %v5758_v57, %v5758_v57  ;;  %v5766_v5 = vadd.f32 %v4232_v63, %v5633_v40  ;;  %v2013_v24 = vsel %vm1946_vm0, %v1936_v56, 0.0  ;;  %v4565_v56 = vld [vmem:[#allocation12 + $0x28] sm:$0xff]  }
 0x441   : > { %v1870_v3 = vpop.f32.mrf.mxu0 }
 0x442   : > { %v5769_v6 = vadd.f32 %v1870_v3, %v5633_v40  ;;  %v2007_v10 = vsel %vm1946_vm0, %v1934_v1, 0.0  ;;  %v1937_v16 = vmul.f32 %v5766_v5, %v5766_v5 }
 0x443   : > { %v4235_v11 = vpop.f32.mrf.mxu0  ;;  %2005 = vadd.xlane.f32.xlu1 %v2004_v9  ;;  %2008 = vadd.xlane.f32.xlu0 %v2007_v10  ;;  %v4563_v9 = vld [vmem:[#allocation12 + $0x38] sm:$0xff]   ;;  %v4564_v10 = vld [vmem:[#allocation12 + $0x30] sm:$0xff]  }
 0x444   : > { %v1935_v14 = vmul.f32 %v5769_v6, %v5769_v6  ;;  %v5780_v18 = vadd.f32 %v4235_v11, %v5633_v40  ;;  %v2016_v31 = vsel %vm1946_vm0, %v1937_v16, 0.0  ;;  %4281 = vmatprep.subr.bf16.mxu0 %v4563_v9  ;;  %v4566_v11 = vld [vmem:[#allocation12 + $0x20] sm:$0xff]  }
 0x445   : > { %v1883_v15 = vpop.f32.mrf.mxu0  ;;  %4282 = vmatpush3.bf16.msra.mxu0 %v4563_v9 }
 0x446   : > { %v5783_v20 = vadd.f32 %v1883_v15, %v5633_v40  ;;  %v2010_v22 = vsel %vm1946_vm0, %v1935_v14, 0.0  ;;  %v1940_v39 = vmul.f32 %v5780_v18, %v5780_v18  ;;  %4283 = vmatprep.subr.bf16.mxu0 %v4564_v10  ;;  %v4567_v14 = vld [vmem:[#allocation12 + $0x18] sm:$0xff]   ;;  %v4568_v15 = vld [vmem:[#allocation12 + $0x10] sm:$0xff]  }
 0x447   : > { %v4236_v25 = vpop.f32.mrf.mxu0  ;;  %2011 = vadd.xlane.f32.xlu1 %v2010_v22  ;;  %2014 = vadd.xlane.f32.xlu0 %v2013_v24 }
 0x448   : > { %v1938_v26 = vmul.f32 %v5783_v20, %v5783_v20  ;;  %v5791_v32 = vadd.f32 %v4236_v25, %v5633_v40  ;;  %v2025_v58 = vsel %vm1946_vm0, %v1940_v39, 0.0 }
 0x449   : > { %v1886_v29 = vpop.f32.mrf.mxu0  ;;  %4284 = vmatpush3.bf16.msra.mxu0 %v4564_v10 }
 0x44a   : > { %v5794_v37 = vadd.f32 %v1886_v29, %v5633_v40  ;;  %v2019_v38 = vsel %vm1946_vm0, %v1938_v26, 0.0  ;;  %v1941_v2 = vmul.f32 %v5791_v32, %v5791_v32  ;;  %4285 = vmatprep.subr.bf16.mxu0 %v4565_v56 }
 0x44b   : > { %v4239_v12 = vpop.f32.mrf.mxu0  ;;  %2017 = vadd.xlane.f32.xlu1 %v2016_v31  ;;  %2020 = vadd.xlane.f32.xlu0 %v2019_v38 }
 0x44c   : > { %v5800_v41 = vadd.f32 %v4239_v12, %v5633_v40  ;;  %v1939_v45 = vmul.f32 %v5794_v37, %v5794_v37  ;;  %v2028_v23 = vsel %vm1946_vm0, %v1941_v2, 0.0 }
 0x44d   : > { %v1899_v48 = vpop.f32.mrf.mxu0  ;;  %4286 = vmatpush3.bf16.msra.mxu0 %v4565_v56 }
 0x44e   : > { %v5805_v50 = vadd.f32 %v1899_v48, %v5633_v40  ;;  %v2022_v53 = vsel %vm1946_vm0, %v1939_v45, 0.0  ;;  %v1944_v17 = vmul.f32 %v5800_v41, %v5800_v41  ;;  %4287 = vmatprep.subr.bf16.mxu0 %v4566_v11 }
 0x44f   : > { %v4240_v33 = vpop.f32.mrf.mxu0  ;;  %2023 = vadd.xlane.f32.xlu1 %v2022_v53  ;;  %2026 = vadd.xlane.f32.xlu0 %v2025_v58 }
 0x450   : > { %v1942_v0 = vmul.f32 %v5805_v50, %v5805_v50  ;;  %v5816_v4 = vadd.f32 %v4240_v33, %v5633_v40  ;;  %v2037_v63 = vsel %vm1946_vm0, %v1944_v17, 0.0 }
 0x451   : > { %v1902_v21 = vpop.f32.mrf.mxu0  ;;  %4288 = vmatpush3.bf16.msra.mxu0 %v4566_v11 }
 0x452   : > { %v5819_v19 = vadd.f32 %v1902_v21, %v5633_v40  ;;  %v2031_v60 = vsel %vm1946_vm0, %v1942_v0, 0.0  ;;  %v1945_v3 = vmul.f32 %v5816_v4, %v5816_v4  ;;  %4289 = vmatprep.subr.bf16.mxu0 %v4567_v14 }
 0x453   : > { %2029 = vadd.xlane.f32.xlu1 %v2028_v23  ;;  %2032 = vadd.xlane.f32.xlu0 %v2031_v60 }
 0x454   : > { %v1943_v61 = vmul.f32 %v5819_v19, %v5819_v19  ;;  %v2040_v40 = vsel %vm1946_vm0, %v1945_v3, 0.0 }
 0x455   : > { %4290 = vmatpush3.bf16.msra.mxu0 %v4567_v14 }
 0x456   : > { %v2034_v1 = vsel %vm1946_vm0, %v1943_v61, 0.0  ;;  %4291 = vmatprep.subr.bf16.mxu0 %v4568_v15 }
 0x457   : > { %2035 = vadd.xlane.f32.xlu1 %v2034_v1  ;;  %2038 = vadd.xlane.f32.xlu0 %v2037_v63 }
 0x459   : > { %4292 = vmatpush3.bf16.msra.mxu0 %v4568_v15 }
 0x45b   : > { %2041 = vadd.xlane.f32.xlu1 %v2040_v40 }
 0x48a   : > { %v1955_v16 = vpop.xlane.xlu1 %1954 }
 0x48b   : > { %v2045_v25 = vmax.f32 %v1955_v16, 1e-24 }
 0x48c   : > { %v1949_v22 = vpop.xlane.xlu0 %1948 }
 0x48d   : > { %v2043_v24 = vmax.f32 %v1949_v22, 1e-24 }
 0x48e   : > { %v1958_v26 = vpop.xlane.xlu1 %1957 }
 0x48f   : > { %v2046_v29 = vmax.f32 %v1958_v26, 1e-24  ;;  %4603 = vrsqrt.f32 %v2043_v24 }
 0x490   : > { %v1952_v31 = vpop.xlane.xlu0 %1951 }
 0x491   : > { %4605 = vrsqrt.f32 %v2046_v29  ;;  %v2044_v38 = vmax.f32 %v1952_v31, 1e-24 }
 0x492   : > { %4607 = vrsqrt.f32 %v2045_v25 }
 0x493   : > { %4609 = vrsqrt.f32 %v2044_v38 }
 0x49c   : > { %v1961_v39 = vpop.xlane.xlu0 %1960  ;;  %v4604_v12 = vpop.eup %4603 }
 0x49d   : > { %v2047_v45 = vmax.f32 %v1961_v39, 1e-24  ;;  %v2107_v17 = vmul.f32 %v4604_v12, %v5639_v44 }
 0x49e   : > { %v4606_v48 = vpop.eup %4605 }
 0x49f   : > { %v4608_v53 = vpop.eup %4607  ;;  %v2110_v2 = vmul.f32 %v4606_v48, %v5644_v49  ;;  %4611 = vrsqrt.f32 %v2047_v45 }
 0x4a0   : > { %v4610_v58 = vpop.eup %4609  ;;  %v1964_v33 = vpop.xlane.xlu1 %1963  ;;  %v2109_v61 = vmul.f32 %v4608_v53, %v5636_v42 }
 0x4a1   : > { %v1967_v0 = vpop.xlane.xlu0 %1966  ;;  %v2048_v21 = vmax.f32 %v1964_v33, 1e-24  ;;  %v2108_v60 = vmul.f32 %v4610_v58, %v5650_v59 }
 0x4a2   : > { %v2049_v23 = vmax.f32 %v1967_v0, 1e-24  ;;  %v2149_v1 = vpack.c.bf16 %v2110_v2, %v2109_v61 }
 0x4a3   : > { %4613 = vrsqrt.f32 %v2048_v21  ;;  %v2148_v63 = vpack.c.bf16 %v2108_v60, %v2107_v17 }
 0x4a4   : > { %v1970_v3 = vpop.xlane.xlu1 %1969  ;;  %4615 = vrsqrt.f32 %v2049_v23 }
 0x4a5   : > { %v2050_v40 = vmax.f32 %v1970_v3, 1e-24  ;;  %4249 = vmatprep.mubr.msk.bf16.mxu1 %vm1946_vm0, %v2148_v63 }
 0x4a6   : > { %4250 = vmatmul.mubr.msk.bf16.vlgmr.msra.gmra.mxu1 %vm1946_vm0, %v2149_v1 }
 0x4a7   : > { %4617 = vrsqrt.f32 %v2050_v40 }
 0x4ac   : > { %v1973_v49 = vpop.xlane.xlu0 %1972  ;;  %v4612_v9 = vpop.eup %4611 }
 0x4ad   : > { %v2051_v44 = vmax.f32 %v1973_v49, 1e-24  ;;  %v2111_v14 = vmul.f32 %v4612_v9, %v5663_v52 }
 0x4af   : > { %4619 = vrsqrt.f32 %v2051_v44 }
 0x4b0   : > { %v4614_v10 = vpop.eup %4613  ;;  %v1976_v56 = vpop.xlane.xlu1 %1975 }
 0x4b1   : > { %v1979_v59 = vpop.xlane.xlu0 %1978  ;;  %v2052_v11 = vmax.f32 %v1976_v56, 1e-24  ;;  %v2112_v15 = vmul.f32 %v4614_v10, %v5671_v62  ;;  %v4616_v16 = vpop.eup %4615 }
 0x4b2   : > { %v2053_v42 = vmax.f32 %v1979_v59, 1e-24  ;;  %v2113_v29 = vmul.f32 %v4616_v16, %v5660_v30 }
 0x4b3   : > { %4621 = vrsqrt.f32 %v2052_v11  ;;  %v2150_v22 = vpack.c.bf16 %v2112_v15, %v2111_v14 }
 0x4b4   : > { %v4618_v24 = vpop.eup %4617  ;;  %v1982_v25 = vpop.xlane.xlu1 %1981  ;;  %4623 = vrsqrt.f32 %v2053_v42 }
 0x4b5   : > { %v2054_v26 = vmax.f32 %v1982_v25, 1e-24  ;;  %4253 = vmatprep.mubr.msk.bf16.mxu1 %vm1946_vm0, %v2150_v22  ;;  %v2114_v31 = vmul.f32 %v4618_v24, %v5668_v54 }
 0x4b7   : > { %4625 = vrsqrt.f32 %v2054_v26  ;;  %v2151_v38 = vpack.c.bf16 %v2114_v31, %v2113_v29 }
 0x4b9   : > { %4254 = vmatmul.mubr.msk.bf16.gmra.mxu1 %vm1946_vm0, %v2151_v38 }
 0x4bc   : > { %v1985_v52 = vpop.xlane.xlu0 %1984  ;;  %v4620_v39 = vpop.eup %4619 }
 0x4bd   : > { %v2055_v62 = vmax.f32 %v1985_v52, 1e-24  ;;  %v2115_v53 = vmul.f32 %v4620_v39, %v5687_v8 }
 0x4bf   : > { %4627 = vrsqrt.f32 %v2055_v62 }
 0x4c0   : > { %v4622_v12 = vpop.eup %4621  ;;  %v1988_v45 = vpop.xlane.xlu1 %1987 }
 0x4c1   : > { %v1991_v48 = vpop.xlane.xlu0 %1990  ;;  %v2056_v58 = vmax.f32 %v1988_v45, 1e-24  ;;  %v2116_v33 = vmul.f32 %v4622_v12, %v5698_v13  ;;  %v4624_v30 = vpop.eup %4623 }
 0x4c2   : > { %v2057_v2 = vmax.f32 %v1991_v48, 1e-24  ;;  %v2117_v61 = vmul.f32 %v4624_v30, %v5684_v7 }
 0x4c3   : > { %4629 = vrsqrt.f32 %v2056_v58  ;;  %v2152_v54 = vpack.c.bf16 %v2116_v33, %v2115_v53 }
 0x4c4   : > { %v4626_v0 = vpop.eup %4625  ;;  %4631 = vrsqrt.f32 %v2057_v2  ;;  %v1994_v17 = vpop.xlane.xlu1 %1993 }
 0x4c5   : > { %v1997_v21 = vpop.xlane.xlu0 %1996  ;;  %v2058_v23 = vmax.f32 %v1994_v17, 1e-24  ;;  %4257 = vmatprep.mubr.msk.bf16.mxu1 %vm1946_vm0, %v2152_v54  ;;  %v2118_v8 = vmul.f32 %v4626_v0, %v5695_v46 }
 0x4c6   : > { %v2059_v60 = vmax.f32 %v1997_v21, 1e-24 }
 0x4c7   : > { %4633 = vrsqrt.f32 %v2058_v23  ;;  %v2153_v63 = vpack.c.bf16 %v2118_v8, %v2117_v61 }
 0x4c8   : > { %4635 = vrsqrt.f32 %v2059_v60  ;;  %v2000_v1 = vpop.xlane.xlu1 %1999 }
 0x4c9   : > { %v2003_v13 = vpop.xlane.xlu0 %2002  ;;  %v2060_v3 = vmax.f32 %v2000_v1, 1e-24  ;;  %4258 = vmatmul.mubr.msk.bf16.gmra.mxu1 %vm1946_vm0, %v2153_v63 }
 0x4ca   : > { %v2061_v40 = vmax.f32 %v2003_v13, 1e-24 }
 0x4cb   : > { %4637 = vrsqrt.f32 %v2060_v3 }
 0x4cc   : > { %4639 = vrsqrt.f32 %v2061_v40  ;;  %v2006_v49 = vpop.xlane.xlu1 %2005  ;;  %v4628_v56 = vpop.eup %4627 }
 0x4cd   : > { %v2009_v44 = vpop.xlane.xlu0 %2008  ;;  %v2062_v9 = vmax.f32 %v2006_v49, 1e-24  ;;  %v2119_v15 = vmul.f32 %v4628_v56, %v5714_v28 }
 0x4ce   : > { %v2063_v10 = vmax.f32 %v2009_v44, 1e-24 }
 0x4cf   : > { %4641 = vrsqrt.f32 %v2062_v9 }
 0x4d0   : > { %v4630_v7 = vpop.eup %4629  ;;  %4643 = vrsqrt.f32 %v2063_v10  ;;  %v2012_v46 = vpop.xlane.xlu1 %2011 }
 0x4d1   : > { %v2015_v59 = vpop.xlane.xlu0 %2014  ;;  %v4632_v11 = vpop.eup %4631  ;;  %v2064_v42 = vmax.f32 %v2012_v46, 1e-24  ;;  %v2120_v16 = vmul.f32 %v4630_v7, %v5722_v36 }
 0x4d2   : > { %v2065_v14 = vmax.f32 %v2015_v59, 1e-24  ;;  %v2121_v29 = vmul.f32 %v4632_v11, %v5711_v27  ;;  %v4569_v11 = vld [vmem:[#allocation12 + $0x8] sm:$0xff]  }
 0x4d3   : > { %4645 = vrsqrt.f32 %v2064_v42  ;;  %v2154_v22 = vpack.c.bf16 %v2120_v16, %v2119_v15  ;;  %4293 = vmatprep.subr.bf16.mxu0 %v4569_v11 }
 0x4d4   : > { %v4634_v24 = vpop.eup %4633  ;;  %v2018_v25 = vpop.xlane.xlu1 %2017  ;;  %4647 = vrsqrt.f32 %v2065_v14  ;;  %4294 = vmatpush3.bf16.msra.mxu0 %v4569_v11 }
 0x4d5   : > { %v2021_v26 = vpop.xlane.xlu0 %2020  ;;  %v4636_v31 = vpop.eup %4635  ;;  %v2066_v38 = vmax.f32 %v2018_v25, 1e-24  ;;  %4261 = vmatprep.mubr.msk.bf16.mxu1 %vm1946_vm0, %v2154_v22  ;;  %v2122_v39 = vmul.f32 %v4634_v24, %v5719_v35  ;;  %v4570_v22 = vld [vmem:[#allocation12] sm:$0xff]  }
 0x4d6   : > { %v2067_v52 = vmax.f32 %v2021_v26, 1e-24  ;;  %v2123_v45 = vmul.f32 %v4636_v31, %v5733_v43  ;;  %4295 = vmatprep.subr.bf16.mxu0 %v4570_v22  ;;  %v4571_v31 = vld [vmem:[#allocation13 + $0x38] sm:$0xff]  }
 0x4d7   : > { %4649 = vrsqrt.f32 %v2066_v38  ;;  %v2155_v62 = vpack.c.bf16 %v2122_v39, %v2121_v29  ;;  %v4572_v38 = vld [vmem:[#allocation13 + $0x30] sm:$0xff]   ;;  %4329 = vmatprep.subr.bf16.mxu1 %v4571_v31 }
 0x4d8   : > { %v4638_v28 = vpop.eup %4637  ;;  %v2024_v12 = vpop.xlane.xlu1 %2023  ;;  %4651 = vrsqrt.f32 %v2067_v52  ;;  %4296 = vmatpush3.bf16.msra.mxu0 %v4570_v22  ;;  %4330 = vmatpush3.bf16.msra.mxu1 %v4571_v31  ;;  %v4575_v52 = vld [vmem:[#allocation13 + $0x18] sm:$0xff]   ;;  %v5878_v39 = vld [vmem:[#allocation7 + $0x4] ss:$0 sm:$0xff] }
 0x4d9   : > { %v2027_v36 = vpop.xlane.xlu0 %2026  ;;  %v4640_v48 = vpop.eup %4639  ;;  %v2068_v53 = vmax.f32 %v2024_v12, 1e-24  ;;  %4262 = vmatmul.mubr.msk.bf16.gmra.mxu1 %vm1946_vm0, %v2155_v62  ;;  %v2124_v27 = vmul.f32 %v4638_v28, %v5747_v51  ;;  %4331 = vmatprep.subr.bf16.mxu1 %v4572_v38 }
 0x4da   : > { %v2069_v58 = vmax.f32 %v2027_v36, 1e-24  ;;  %v2125_v54 = vmul.f32 %v4640_v48, %v5730_v34 }
 0x4db   : > { %4653 = vrsqrt.f32 %v2068_v53  ;;  %v2156_v2 = vpack.c.bf16 %v2124_v27, %v2123_v45  ;;  %v5882_v45 = vstv %s3800_s22 }
 0x4dc   : > { %v4642_v33 = vpop.eup %4641  ;;  %v2030_v30 = vpop.xlane.xlu1 %2029  ;;  %4655 = vrsqrt.f32 %v2069_v58  ;;  %4332 = vmatpush3.bf16.msra.mxu1 %v4572_v38 }
 0x4dd   : > { %v2033_v35 = vpop.xlane.xlu0 %2032  ;;  %v4644_v0 = vpop.eup %4643  ;;  %v2070_v17 = vmax.f32 %v2030_v30, 1e-24  ;;  %4265 = vmatprep.mubr.msk.bf16.mxu1 %vm1946_vm0, %v2156_v2  ;;  %v2126_v43 = vmul.f32 %v4642_v33, %v5744_v47 }
 0x4de   : > { %v2071_v21 = vmax.f32 %v2033_v35, 1e-24  ;;  %v2127_v8 = vmul.f32 %v4644_v0, %v5758_v57 }
 0x4df   : > { %4657 = vrsqrt.f32 %v2070_v17  ;;  %v2157_v23 = vpack.c.bf16 %v2126_v43, %v2125_v54 }
 0x4e0   : > { %v4646_v60 = vpop.eup %4645  ;;  %v2036_v61 = vpop.xlane.xlu1 %2035  ;;  %4659 = vrsqrt.f32 %v2071_v21 }
 0x4e1   : > { %v2039_v51 = vpop.xlane.xlu0 %2038  ;;  %v2072_v63 = vmax.f32 %v2036_v61, 1e-24  ;;  %4266 = vmatmul.mubr.msk.bf16.gmra.mxu1 %vm1946_vm0, %v2157_v23  ;;  %v2128_v34 = vmul.f32 %v4646_v60, %v5769_v6  ;;  %v4648_v13 = vpop.eup %4647 }
 0x4e2   : > { %v2073_v1 = vmax.f32 %v2039_v51, 1e-24  ;;  %v2129_v44 = vmul.f32 %v4648_v13, %v5755_v55 }
 0x4e3   : > { %4661 = vrsqrt.f32 %v2072_v63  ;;  %v2158_v3 = vpack.c.bf16 %v2128_v34, %v2127_v8 }
 0x4e4   : > { %v4650_v40 = vpop.eup %4649  ;;  %v2042_v49 = vpop.xlane.xlu1 %2041  ;;  %4663 = vrsqrt.f32 %v2073_v1 }
 0x4e5   : > { %v2074_v47 = vmax.f32 %v2042_v49, 1e-24  ;;  %4269 = vmatprep.mubr.msk.bf16.mxu1 %vm1946_vm0, %v2158_v3  ;;  %v2130_v57 = vmul.f32 %v4650_v40, %v5766_v5  ;;  %v4652_v9 = vpop.eup %4651 }
 0x4e6   : > { %v2131_v6 = vmul.f32 %v4652_v9, %v5783_v20 }
 0x4e7   : > { %4665 = vrsqrt.f32 %v2074_v47  ;;  %v2159_v10 = vpack.c.bf16 %v2130_v57, %v2129_v44 }
 0x4e8   : > { %v4654_v56 = vpop.eup %4653 }
 0x4e9   : > { %4270 = vmatmul.mubr.msk.bf16.gmra.mxu1 %vm1946_vm0, %v2159_v10  ;;  %v2132_v7 = vmul.f32 %v4654_v56, %v5794_v37  ;;  %v4656_v46 = vpop.eup %4655 }
 0x4ea   : > { %v2133_v55 = vmul.f32 %v4656_v46, %v5780_v18 }
 0x4eb   : > { %v2160_v59 = vpack.c.bf16 %v2132_v7, %v2131_v6 }
 0x4ec   : > { %v4658_v42 = vpop.eup %4657 }
 0x4ed   : > { %4273 = vmatprep.mubr.msk.bf16.mxu1 %vm1946_vm0, %v2160_v59  ;;  %v2134_v5 = vmul.f32 %v4658_v42, %v5791_v32  ;;  %v4660_v14 = vpop.eup %4659 }
 0x4ee   : > { %v2135_v20 = vmul.f32 %v4660_v14, %v5805_v50  ;;  %v4573_v50 = vld [vmem:[#allocation13 + $0x28] sm:$0xff]  }
 0x4ef   : > { %v2161_v15 = vpack.c.bf16 %v2134_v5, %v2133_v55  ;;  %4333 = vmatprep.subr.bf16.mxu1 %v4573_v50 }
 0x4f0   : > { %v4662_v16 = vpop.eup %4661  ;;  %4334 = vmatpush3.bf16.msra.mxu1 %v4573_v50 }
 0x4f1   : > { %4274 = vmatmul.mubr.msk.bf16.gmra.mxu1 %vm1946_vm0, %v2161_v15  ;;  %v2136_v37 = vmul.f32 %v4662_v16, %v5819_v19  ;;  %v4664_v24 = vpop.eup %4663  ;;  %v4574_v19 = vld [vmem:[#allocation13 + $0x20] sm:$0xff]  }
 0x4f2   : > { %v2137_v18 = vmul.f32 %v4664_v24, %v5800_v41  ;;  %4335 = vmatprep.subr.bf16.mxu1 %v4574_v19  ;;  %v4576_v41 = vld [vmem:[#allocation13 + $0x10] sm:$0xff]  }
 0x4f3   : > { %v2162_v25 = vpack.c.bf16 %v2136_v37, %v2135_v20 }
 0x4f4   : > { %v4666_v26 = vpop.eup %4665  ;;  %4336 = vmatpush3.bf16.msra.mxu1 %v4574_v19 }
 0x4f5   : > { %4277 = vmatprep.mubr.msk.bf16.mxu1 %vm1946_vm0, %v2162_v25  ;;  %v2138_v32 = vmul.f32 %v4666_v26, %v5816_v4  ;;  %4337 = vmatprep.subr.bf16.mxu1 %v4575_v52 }
 0x4f7   : > { %v2163_v29 = vpack.c.bf16 %v2138_v32, %v2137_v18 }
 0x4f8   : > { %4338 = vmatpush3.bf16.msra.mxu1 %v4575_v52 }
 0x4f9   : > { %4278 = vmatmul.mubr.msk.bf16.gmra.mxu1 %vm1946_vm0, %v2163_v29  ;;  %4339 = vmatprep.subr.bf16.mxu1 %v4576_v41 }
 0x4fc   : > { %4340 = vmatpush3.bf16.msra.mxu1 %v4576_v41 }
 0x566   : > { %v4251_v4 = vpop.f32.mrf.mxu1 }
 0x567   : > { %v2279_v12 = vadd.f32 %v4251_v4, %v5878_v39 }
 0x568   : > { %v2270_v62 = vpop.f32.mrf.mxu1 }
 0x569   : > { %v2271_v28 = vadd.f32 %v2270_v62, %v5878_v39  ;;  %v2433_v33 = vmul.f32 %v5882_v45, %v2279_v12  ;;  %vm2400_vm3 = vcmp.gt.f32.partialorder %v2279_v12, 0.0 }
 0x56a   : > { %v4252_v36 = vpop.f32.mrf.mxu1 }
 0x56b   : > { %v2282_v48 = vadd.f32 %v4252_v36, %v5878_v39  ;;  %v2431_v58 = vmul.f32 %v5882_v45, %v2271_v28  ;;  %vm2398_vm2 = vcmp.gt.f32.partialorder %v2271_v28, 0.0  ;;  %v2465_v17 = vsel %vm2400_vm3, %v2279_v12, %v2433_v33 }
 0x56c   : > { %v2273_v53 = vpop.f32.mrf.mxu1 }
 0x56d   : > { %vm2401_vm1 = vcmp.gt.f32.partialorder %v2282_v48, 0.0  ;;  %v2434_v27 = vmul.f32 %v5882_v45, %v2282_v48  ;;  %v2274_v2 = vadd.f32 %v2273_v53, %v5878_v39  ;;  %v2463_v54 = vsel %vm2398_vm2, %v2271_v28, %v2431_v58 }
 0x56f   : > { %vm2399_vm4 = vcmp.gt.f32.partialorder %v2274_v2, 0.0  ;;  %v2432_v30 = vmul.f32 %v5882_v45, %v2274_v2  ;;  %v2466_v35 = vsel %vm2401_vm1, %v2282_v48, %v2434_v27 }
 0x570   : > { %v2513_v43 = vpack.c.bf16 %v2466_v35, %v2465_v17 }
 0x571   : > { %v2464_v0 = vsel %vm2399_vm4, %v2274_v2, %v2432_v30 }
 0x572   : > { %v2512_v21 = vpack.c.bf16 %v2464_v0, %v2463_v54 }
 0x574   : > { %4297 = vmatprep.mubr.bf16.mxu0 %v2512_v21 }
 0x575   : > { %4298 = vmatmul.mubr.bf16.vlgmr.msra.gmra.mxu0 %v2513_v43 }
 0x579   : > { %v4255_v23 = vpop.f32.mrf.mxu1 }
 0x57a   : > { %v2295_v51 = vadd.f32 %v4255_v23, %v5878_v39 }
 0x57b   : > { %v2286_v60 = vpop.f32.mrf.mxu1 }
 0x57c   : > { %v2287_v61 = vadd.f32 %v2286_v60, %v5878_v39  ;;  %v2437_v40 = vmul.f32 %v5882_v45, %v2295_v51  ;;  %vm2404_vm7 = vcmp.gt.f32.partialorder %v2295_v51, 0.0 }
 0x57d   : > { %v4256_v8 = vpop.f32.mrf.mxu1 }
 0x57e   : > { %v2298_v63 = vadd.f32 %v4256_v8, %v5878_v39  ;;  %v2435_v34 = vmul.f32 %v5882_v45, %v2287_v61  ;;  %vm2402_vm6 = vcmp.gt.f32.partialorder %v2287_v61, 0.0  ;;  %v2469_v10 = vsel %vm2404_vm7, %v2295_v51, %v2437_v40 }
 0x57f   : > { %v2289_v1 = vpop.f32.mrf.mxu1 }
 0x580   : > { %vm2405_vm5 = vcmp.gt.f32.partialorder %v2298_v63, 0.0  ;;  %v2438_v13 = vmul.f32 %v5882_v45, %v2298_v63  ;;  %v2290_v3 = vadd.f32 %v2289_v1, %v5878_v39  ;;  %v2467_v44 = vsel %vm2402_vm6, %v2287_v61, %v2435_v34 }
 0x582   : > { %vm2403_vm8 = vcmp.gt.f32.partialorder %v2290_v3, 0.0  ;;  %v2436_v49 = vmul.f32 %v5882_v45, %v2290_v3  ;;  %v2470_v47 = vsel %vm2405_vm5, %v2298_v63, %v2438_v13 }
 0x583   : > { %v2515_v56 = vpack.c.bf16 %v2470_v47, %v2469_v10 }
 0x584   : > { %v2468_v57 = vsel %vm2403_vm8, %v2290_v3, %v2436_v49 }
 0x585   : > { %v2514_v9 = vpack.c.bf16 %v2468_v57, %v2467_v44 }
 0x587   : > { %4301 = vmatprep.mubr.bf16.mxu0 %v2514_v9 }
 0x588   : > { %4302 = vmatmul.mubr.bf16.gmra.mxu0 %v2515_v56 }
 0x589   : > { %v4259_v6 = vpop.f32.mrf.mxu1 }
 0x58a   : > { %v2311_v59 = vadd.f32 %v4259_v6, %v5878_v39 }
 0x58b   : > { %v2302_v7 = vpop.f32.mrf.mxu1 }
 0x58c   : > { %v2303_v46 = vadd.f32 %v2302_v7, %v5878_v39  ;;  %v2441_v16 = vmul.f32 %v5882_v45, %v2311_v59  ;;  %vm2408_vm11 = vcmp.gt.f32.partialorder %v2311_v59, 0.0 }
 0x58d   : > { %v4260_v11 = vpop.f32.mrf.mxu1 }
 0x58e   : > { %v2314_v42 = vadd.f32 %v4260_v11, %v5878_v39  ;;  %v2439_v5 = vmul.f32 %v5882_v45, %v2303_v46  ;;  %vm2406_vm10 = vcmp.gt.f32.partialorder %v2303_v46, 0.0  ;;  %v2473_v26 = vsel %vm2408_vm11, %v2311_v59, %v2441_v16 }
 0x58f   : > { %v2305_v55 = vpop.f32.mrf.mxu1 }
 0x590   : > { %vm2409_vm9 = vcmp.gt.f32.partialorder %v2314_v42, 0.0  ;;  %v2442_v14 = vmul.f32 %v5882_v45, %v2314_v42  ;;  %v2306_v15 = vadd.f32 %v2305_v55, %v5878_v39  ;;  %v2471_v37 = vsel %vm2406_vm10, %v2303_v46, %v2439_v5 }
 0x592   : > { %vm2407_vm12 = vcmp.gt.f32.partialorder %v2306_v15, 0.0  ;;  %v2440_v22 = vmul.f32 %v5882_v45, %v2306_v15  ;;  %v2474_v20 = vsel %vm2409_vm9, %v2314_v42, %v2442_v14 }
 0x593   : > { %v2517_v18 = vpack.c.bf16 %v2474_v20, %v2473_v26 }
 0x594   : > { %v2472_v24 = vsel %vm2407_vm12, %v2306_v15, %v2440_v22 }
 0x595   : > { %v2516_v25 = vpack.c.bf16 %v2472_v24, %v2471_v37 }
 0x597   : > { %4305 = vmatprep.mubr.bf16.mxu0 %v2516_v25 }
 0x598   : > { %4306 = vmatmul.mubr.bf16.gmra.mxu0 %v2517_v18 }
 0x599   : > { %v4263_v32 = vpop.f32.mrf.mxu1 }
 0x59a   : > { %v2327_v38 = vadd.f32 %v4263_v32, %v5878_v39 }
 0x59b   : > { %v2318_v29 = vpop.f32.mrf.mxu1 }
 0x59c   : > { %v2319_v31 = vadd.f32 %v2318_v29, %v5878_v39  ;;  %v2445_v28 = vmul.f32 %v5882_v45, %v2327_v38  ;;  %vm2412_vm15 = vcmp.gt.f32.partialorder %v2327_v38, 0.0 }
 0x59d   : > { %v4264_v50 = vpop.f32.mrf.mxu1 }
 0x59e   : > { %v2330_v19 = vadd.f32 %v4264_v50, %v5878_v39  ;;  %v2443_v41 = vmul.f32 %v5882_v45, %v2319_v31  ;;  %vm2410_vm14 = vcmp.gt.f32.partialorder %v2319_v31, 0.0  ;;  %v2477_v54 = vsel %vm2412_vm15, %v2327_v38, %v2445_v28 }
 0x59f   : > { %v2321_v52 = vpop.f32.mrf.mxu1 }
 0x5a0   : > { %vm2413_vm13 = vcmp.gt.f32.partialorder %v2330_v19, 0.0  ;;  %v2446_v4 = vmul.f32 %v5882_v45, %v2330_v19  ;;  %v2322_v62 = vadd.f32 %v2321_v52, %v5878_v39  ;;  %v2475_v27 = vsel %vm2410_vm14, %v2319_v31, %v2443_v41 }
 0x5a1   : > { %v4267_v12 = vpop.f32.mrf.mxu1 }
 0x5a2   : > { %vm2411_vm0 = vcmp.gt.f32.partialorder %v2322_v62, 0.0  ;;  %v2444_v36 = vmul.f32 %v5882_v45, %v2322_v62  ;;  %v2478_v53 = vsel %vm2413_vm13, %v2330_v19, %v2446_v4  ;;  %v2343_v33 = vadd.f32 %v4267_v12, %v5878_v39  ;;  %v4577_v19 = vld [vmem:[#allocation13 + $0x8] sm:$0xff]  }
 0x5a3   : > { %v2334_v48 = vpop.f32.mrf.mxu1  ;;  %v2519_v17 = vpack.c.bf16 %v2478_v53, %v2477_v54  ;;  %4341 = vmatprep.subr.bf16.mxu1 %v4577_v19 }
 0x5a4   : > { %v2335_v58 = vadd.f32 %v2334_v48, %v5878_v39  ;;  %v2476_v2 = vsel %vm2411_vm0, %v2322_v62, %v2444_v36  ;;  %v2449_v61 = vmul.f32 %v5882_v45, %v2343_v33  ;;  %vm2416_vm3 = vcmp.gt.f32.partialorder %v2343_v33, 0.0  ;;  %4342 = vmatpush3.bf16.msra.mxu1 %v4577_v19 }
 0x5a5   : > { %v4268_v30 = vpop.f32.mrf.mxu1  ;;  %v2518_v35 = vpack.c.bf16 %v2476_v2, %v2475_v27 }
 0x5a6   : > { %v2346_v0 = vadd.f32 %v4268_v30, %v5878_v39  ;;  %v2447_v43 = vmul.f32 %v5882_v45, %v2335_v58  ;;  %vm2414_vm2 = vcmp.gt.f32.partialorder %v2335_v58, 0.0  ;;  %v2481_v44 = vsel %vm2416_vm3, %v2343_v33, %v2449_v61  ;;  %v4578_v33 = vld [vmem:[#allocation13] sm:$0xff]  }
 0x5a7   : > { %v2337_v21 = vpop.f32.mrf.mxu1  ;;  %4309 = vmatprep.mubr.bf16.mxu0 %v2518_v35  ;;  %4343 = vmatprep.subr.bf16.mxu1 %v4578_v33 }
 0x5a8   : > { %vm2417_vm1 = vcmp.gt.f32.partialorder %v2346_v0, 0.0  ;;  %v2450_v23 = vmul.f32 %v5882_v45, %v2346_v0  ;;  %v2338_v60 = vadd.f32 %v2337_v21, %v5878_v39  ;;  %4310 = vmatmul.mubr.bf16.gmra.mxu0 %v2519_v17  ;;  %v2479_v13 = vsel %vm2414_vm2, %v2335_v58, %v2447_v43  ;;  %4344 = vmatpush3.bf16.msra.mxu1 %v4578_v33 }
 0x5a9   : > { %v4271_v51 = vpop.f32.mrf.mxu1 }
 0x5aa   : > { %vm2415_vm4 = vcmp.gt.f32.partialorder %v2338_v60, 0.0  ;;  %v2448_v8 = vmul.f32 %v5882_v45, %v2338_v60  ;;  %v2482_v1 = vsel %vm2417_vm1, %v2346_v0, %v2450_v23  ;;  %v2359_v40 = vadd.f32 %v4271_v51, %v5878_v39 }
 0x5ab   : > { %v2350_v63 = vpop.f32.mrf.mxu1  ;;  %v2521_v9 = vpack.c.bf16 %v2482_v1, %v2481_v44  ;;  %v4582_v1 = vld [vmem:[#allocation15 + $0x60] ss:$8 sps:$4 sm:$0xff]  }
 0x5ac   : > { %v2351_v34 = vadd.f32 %v2350_v63, %v5878_v39  ;;  %v2480_v3 = vsel %vm2415_vm4, %v2338_v60, %v2448_v8  ;;  %v2453_v46 = vmul.f32 %v5882_v45, %v2359_v40  ;;  %vm2420_vm7 = vcmp.gt.f32.partialorder %v2359_v40, 0.0  ;;  %v4579_v8 = vld [vmem:[#allocation15 + $0x70] ss:$8 sps:$4 sm:$0xff]   ;;  %v4584_v63 = vld [vmem:[#allocation15 + $0x64] ss:$8 sps:$4 sm:$0xff]  }
 0x5ad   : > { %v4272_v49 = vpop.f32.mrf.mxu1  ;;  %v2520_v47 = vpack.c.bf16 %v2480_v3, %v2479_v13  ;;  %v4585_v13 = vld [vmem:[#allocation15 + $0x50] ss:$8 sps:$4 sm:$0xff]   ;;  %v4588_v3 = vld [vmem:[#allocation15 + $0x40] ss:$8 sps:$4 sm:$0xff]  }
 0x5ae   : > { %v2362_v57 = vadd.f32 %v4272_v49, %v5878_v39  ;;  %v2451_v56 = vmul.f32 %v5882_v45, %v2351_v34  ;;  %vm2418_vm6 = vcmp.gt.f32.partialorder %v2351_v34, 0.0  ;;  %v2485_v37 = vsel %vm2420_vm7, %v2359_v40, %v2453_v46  ;;  %v4593_v40 = vld [vmem:[#allocation15 + $0x34] ss:$8 sps:$4 sm:$0xff]   ;;  %v4591_v49 = vld [vmem:[#allocation15 + $0x30] ss:$8 sps:$4 sm:$0xff]  }
 0x5af   : > { %v2353_v10 = vpop.f32.mrf.mxu1  ;;  %4313 = vmatprep.mubr.bf16.mxu0 %v2520_v47  ;;  %v4596_v47 = vld [vmem:[#allocation15 + $0x24] ss:$8 sps:$4 sm:$0xff]   ;;  %v4594_v44 = vld [vmem:[#allocation15 + $0x20] ss:$8 sps:$4 sm:$0xff]   ;;  %v5950_v46 = vstv %s3809_s21 }
 0x5b0   : > { %vm2421_vm5 = vcmp.gt.f32.partialorder %v2362_v57, 0.0  ;;  %v2454_v6 = vmul.f32 %v5882_v45, %v2362_v57  ;;  %v2354_v7 = vadd.f32 %v2353_v10, %v5878_v39  ;;  %4314 = vmatmul.mubr.bf16.gmra.mxu0 %v2521_v9  ;;  %v2483_v14 = vsel %vm2418_vm6, %v2351_v34, %v2451_v56  ;;  %v4587_v34 = vld [vmem:[#allocation15 + $0x54] ss:$8 sps:$4 sm:$0xff]  }
 0x5b1   : > { %v4275_v59 = vpop.f32.mrf.mxu1  ;;  %v5946_v9 = vld [vmem:[#allocation7 + $0x5] ss:$0 sm:$0xff] }
 0x5b2   : > { %vm2419_vm8 = vcmp.gt.f32.partialorder %v2354_v7, 0.0  ;;  %v2452_v11 = vmul.f32 %v5882_v45, %v2354_v7  ;;  %v2486_v55 = vsel %vm2421_vm5, %v2362_v57, %v2454_v6  ;;  %v2375_v16 = vadd.f32 %v4275_v59, %v5878_v39 }
 0x5b3   : > { %v2366_v42 = vpop.f32.mrf.mxu1  ;;  %v2523_v25 = vpack.c.bf16 %v2486_v55, %v2485_v37 }
 0x5b4   : > { %v2367_v5 = vadd.f32 %v2366_v42, %v5878_v39  ;;  %v2484_v15 = vsel %vm2419_vm8, %v2354_v7, %v2452_v11  ;;  %v2457_v31 = vmul.f32 %v5882_v45, %v2375_v16  ;;  %vm2424_vm11 = vcmp.gt.f32.partialorder %v2375_v16, 0.0 }
 0x5b5   : > { %v4276_v22 = vpop.f32.mrf.mxu1  ;;  %v2522_v20 = vpack.c.bf16 %v2484_v15, %v2483_v14 }
 0x5b6   : > { %v2378_v24 = vadd.f32 %v4276_v22, %v5878_v39  ;;  %v2455_v18 = vmul.f32 %v5882_v45, %v2367_v5  ;;  %vm2422_vm10 = vcmp.gt.f32.partialorder %v2367_v5, 0.0  ;;  %v2489_v53 = vsel %vm2424_vm11, %v2375_v16, %v2457_v31 }
 0x5b7   : > { %v2369_v26 = vpop.f32.mrf.mxu1  ;;  %4317 = vmatprep.mubr.bf16.mxu0 %v2522_v20 }
 0x5b8   : > { %vm2425_vm9 = vcmp.gt.f32.partialorder %v2378_v24, 0.0  ;;  %v2458_v32 = vmul.f32 %v5882_v45, %v2378_v24  ;;  %v2370_v29 = vadd.f32 %v2369_v26, %v5878_v39  ;;  %4318 = vmatmul.mubr.bf16.gmra.mxu0 %v2523_v25  ;;  %v2487_v62 = vsel %vm2422_vm10, %v2367_v5, %v2455_v18 }
 0x5b9   : > { %v4279_v38 = vpop.f32.mrf.mxu1 }
 0x5ba   : > { %vm2423_vm12 = vcmp.gt.f32.partialorder %v2370_v29, 0.0  ;;  %v2456_v50 = vmul.f32 %v5882_v45, %v2370_v29  ;;  %v2490_v41 = vsel %vm2425_vm9, %v2378_v24, %v2458_v32  ;;  %v2391_v12 = vadd.f32 %v4279_v38, %v5878_v39 }
 0x5bb   : > { %v2382_v52 = vpop.f32.mrf.mxu1  ;;  %v2525_v27 = vpack.c.bf16 %v2490_v41, %v2489_v53 }
 0x5bc   : > { %v2383_v4 = vadd.f32 %v2382_v52, %v5878_v39  ;;  %v2488_v28 = vsel %vm2423_vm12, %v2370_v29, %v2456_v50  ;;  %v2461_v0 = vmul.f32 %v5882_v45, %v2391_v12  ;;  %vm2428_vm15 = vcmp.gt.f32.partialorder %v2391_v12, 0.0 }
 0x5bd   : > { %v4280_v36 = vpop.f32.mrf.mxu1  ;;  %v2524_v48 = vpack.c.bf16 %v2488_v28, %v2487_v62 }
 0x5be   : > { %v2394_v58 = vadd.f32 %v4280_v36, %v5878_v39  ;;  %v2459_v30 = vmul.f32 %v5882_v45, %v2383_v4  ;;  %vm2426_vm14 = vcmp.gt.f32.partialorder %v2383_v4, 0.0  ;;  %v2493_v61 = vsel %vm2428_vm15, %v2391_v12, %v2461_v0 }
 0x5bf   : > { %v2385_v2 = vpop.f32.mrf.mxu1  ;;  %4321 = vmatprep.mubr.bf16.mxu0 %v2524_v48 }
 0x5c0   : > { %vm2429_vm13 = vcmp.gt.f32.partialorder %v2394_v58, 0.0  ;;  %v2462_v35 = vmul.f32 %v5882_v45, %v2394_v58  ;;  %v2386_v54 = vadd.f32 %v2385_v2, %v5878_v39  ;;  %4322 = vmatmul.mubr.bf16.gmra.mxu0 %v2525_v27  ;;  %v2491_v43 = vsel %vm2426_vm14, %v2383_v4, %v2459_v30  ;;  %v4581_v39 = vld [vmem:[#allocation15 + $0x74] ss:$8 sps:$4 sm:$0xff]  }
 0x5c1   : > { %3300 = vmatprep.subr.bf16.mxu0 %v4581_v39 }
 0x5c2   : > { %vm2427_vm0 = vcmp.gt.f32.partialorder %v2386_v54, 0.0  ;;  %v2460_v17 = vmul.f32 %v5882_v45, %v2386_v54  ;;  %v2494_v21 = vsel %vm2429_vm13, %v2394_v58, %v2462_v35  ;;  %3301 = vmatpush1.bf16.msra.mxu0 %v4579_v8  ;;  %v4590_v45 = vld [vmem:[#allocation15 + $0x44] ss:$8 sps:$4 sm:$0xff]  }
 0x5c3   : > { %v2527_v51 = vpack.c.bf16 %v2494_v21, %v2493_v61  ;;  %3302 = vmatprep.subr.bf16.mxu0 %v4584_v63 }
 0x5c4   : > { %v2492_v23 = vsel %vm2427_vm0, %v2386_v54, %v2460_v17 }
 0x5c5   : > { %v2526_v60 = vpack.c.bf16 %v2492_v23, %v2491_v43 }
 0x5c6   : > { %3303 = vmatpush1.bf16.msra.mxu0 %v4582_v1 }
 0x5c7   : > { %4325 = vmatprep.mubr.bf16.mxu0 %v2526_v60  ;;  %3304 = vmatprep.subr.bf16.mxu0 %v4587_v34 }
 0x5c8   : > { %4326 = vmatmul.mubr.bf16.gmra.mxu0 %v2527_v51 }
 0x5ca   : > { %3305 = vmatpush1.bf16.msra.mxu0 %v4585_v13 }
 0x5cb   : > { %3306 = vmatprep.subr.bf16.mxu0 %v4590_v45 }
 0x5ce   : > { %3307 = vmatpush1.bf16.msra.mxu0 %v4588_v3 }
 0x5cf   : > { %3308 = vmatprep.subr.bf16.mxu0 %v4593_v40 }
 0x5d2   : > { %3309 = vmatpush1.bf16.msra.mxu0 %v4591_v49 }
 0x5d3   : > { %3310 = vmatprep.subr.bf16.mxu0 %v4596_v47 }
 0x5d6   : > { %3311 = vmatpush1.bf16.msra.mxu0 %v4594_v44 }
 0x635   : > { %v4299_v57 = vpop.f32.mrf.mxu0 }
 0x636   : > { %v2619_v6 = vadd.f32 %v4299_v57, %v5946_v9 }
 0x637   : > { %v2610_v10 = vpop.f32.mrf.mxu0 }
 0x638   : > { %v2611_v56 = vadd.f32 %v2610_v10, %v5946_v9  ;;  %v2773_v14 = vmul.f32 %v5950_v46, %v2619_v6  ;;  %vm2740_vm3 = vcmp.gt.f32.partialorder %v2619_v6, 0.0 }
 0x639   : > { %v4300_v7 = vpop.f32.mrf.mxu0 }
 0x63a   : > { %v2622_v59 = vadd.f32 %v4300_v7, %v5946_v9  ;;  %v2771_v42 = vmul.f32 %v5950_v46, %v2611_v56  ;;  %vm2738_vm2 = vcmp.gt.f32.partialorder %v2611_v56, 0.0  ;;  %v2805_v37 = vsel %vm2740_vm3, %v2619_v6, %v2773_v14 }
 0x63b   : > { %v2613_v11 = vpop.f32.mrf.mxu0 }
 0x63c   : > { %vm2741_vm1 = vcmp.gt.f32.partialorder %v2622_v59, 0.0  ;;  %v2774_v55 = vmul.f32 %v5950_v46, %v2622_v59  ;;  %v2614_v5 = vadd.f32 %v2613_v11, %v5946_v9  ;;  %v2803_v22 = vsel %vm2738_vm2, %v2611_v56, %v2771_v42 }
 0x63e   : > { %vm2739_vm4 = vcmp.gt.f32.partialorder %v2614_v5, 0.0  ;;  %v2772_v15 = vmul.f32 %v5950_v46, %v2614_v5  ;;  %v2806_v16 = vsel %vm2741_vm1, %v2622_v59, %v2774_v55 }
 0x63f   : > { %v2853_v25 = vpack.c.bf16 %v2806_v16, %v2805_v37 }
 0x640   : > { %v2804_v20 = vsel %vm2739_vm4, %v2614_v5, %v2772_v15 }
 0x641   : > { %v2852_v24 = vpack.c.bf16 %v2804_v20, %v2803_v22 }
 0x643   : > { %4345 = vmatprep.mubr.bf16.mxu1 %v2852_v24 }
 0x644   : > { %4346 = vmatmul.mubr.bf16.vlgmr.msra.gmra.mxu1 %v2853_v25 }
 0x648   : > { %v4303_v26 = vpop.f32.mrf.mxu0 }
 0x649   : > { %v2635_v29 = vadd.f32 %v4303_v26, %v5946_v9 }
 0x64a   : > { %v2626_v18 = vpop.f32.mrf.mxu0 }
 0x64b   : > { %v2627_v32 = vadd.f32 %v2626_v18, %v5946_v9  ;;  %v2777_v4 = vmul.f32 %v5950_v46, %v2635_v29  ;;  %vm2744_vm7 = vcmp.gt.f32.partialorder %v2635_v29, 0.0 }
 0x64c   : > { %v4304_v31 = vpop.f32.mrf.mxu0 }
 0x64d   : > { %v2638_v38 = vadd.f32 %v4304_v31, %v5946_v9  ;;  %v2775_v19 = vmul.f32 %v5950_v46, %v2627_v32  ;;  %vm2742_vm6 = vcmp.gt.f32.partialorder %v2627_v32, 0.0  ;;  %v2809_v48 = vsel %vm2744_vm7, %v2635_v29, %v2777_v4 }
 0x64e   : > { %v2629_v50 = vpop.f32.mrf.mxu0 }
 0x64f   : > { %vm2745_vm5 = vcmp.gt.f32.partialorder %v2638_v38, 0.0  ;;  %v2778_v52 = vmul.f32 %v5950_v46, %v2638_v38  ;;  %v2630_v41 = vadd.f32 %v2629_v50, %v5946_v9  ;;  %v2807_v12 = vsel %vm2742_vm6, %v2627_v32, %v2775_v19 }
 0x651   : > { %vm2743_vm8 = vcmp.gt.f32.partialorder %v2630_v41, 0.0  ;;  %v2776_v62 = vmul.f32 %v5950_v46, %v2630_v41  ;;  %v2810_v28 = vsel %vm2745_vm5, %v2638_v38, %v2778_v52 }
 0x652   : > { %v2855_v58 = vpack.c.bf16 %v2810_v28, %v2809_v48 }
 0x653   : > { %v2808_v36 = vsel %vm2743_vm8, %v2630_v41, %v2776_v62 }
 0x654   : > { %v2854_v53 = vpack.c.bf16 %v2808_v36, %v2807_v12 }
 0x656   : > { %4349 = vmatprep.mubr.bf16.mxu1 %v2854_v53 }
 0x657   : > { %4350 = vmatmul.mubr.bf16.gmra.mxu1 %v2855_v58 }
 0x658   : > { %v4307_v27 = vpop.f32.mrf.mxu0 }
 0x659   : > { %v2651_v30 = vadd.f32 %v4307_v27, %v5946_v9 }
 0x65a   : > { %v2642_v2 = vpop.f32.mrf.mxu0 }
 0x65b   : > { %v2643_v33 = vadd.f32 %v2642_v2, %v5946_v9  ;;  %v2781_v23 = vmul.f32 %v5950_v46, %v2651_v30  ;;  %vm2748_vm11 = vcmp.gt.f32.partialorder %v2651_v30, 0.0 }
 0x65c   : > { %v4308_v35 = vpop.f32.mrf.mxu0 }
 0x65d   : > { %v2654_v54 = vadd.f32 %v4308_v35, %v5946_v9  ;;  %v2779_v17 = vmul.f32 %v5950_v46, %v2643_v33  ;;  %vm2746_vm10 = vcmp.gt.f32.partialorder %v2643_v33, 0.0  ;;  %v2813_v39 = vsel %vm2748_vm11, %v2651_v30, %v2781_v23 }
 0x65e   : > { %v2645_v0 = vpop.f32.mrf.mxu0 }
 0x65f   : > { %vm2749_vm9 = vcmp.gt.f32.partialorder %v2654_v54, 0.0  ;;  %v2782_v21 = vmul.f32 %v5950_v46, %v2654_v54  ;;  %v2646_v43 = vadd.f32 %v2645_v0, %v5946_v9  ;;  %v2811_v51 = vsel %vm2746_vm10, %v2643_v33, %v2779_v17 }
 0x661   : > { %vm2747_vm12 = vcmp.gt.f32.partialorder %v2646_v43, 0.0  ;;  %v2780_v60 = vmul.f32 %v5950_v46, %v2646_v43  ;;  %v2814_v61 = vsel %vm2749_vm9, %v2654_v54, %v2782_v21 }
 0x662   : > { %v2857_v1 = vpack.c.bf16 %v2814_v61, %v2813_v39 }
 0x663   : > { %v2812_v8 = vsel %vm2747_vm12, %v2646_v43, %v2780_v60 }
 0x664   : > { %v2856_v63 = vpack.c.bf16 %v2812_v8, %v2811_v51 }
 0x666   : > { %4353 = vmatprep.mubr.bf16.mxu1 %v2856_v63 }
 0x667   : > { %4354 = vmatmul.mubr.bf16.gmra.mxu1 %v2857_v1 }
 0x668   : > { %v4311_v34 = vpop.f32.mrf.mxu0 }
 0x669   : > { %v2667_v3 = vadd.f32 %v4311_v34, %v5946_v9 }
 0x66a   : > { %v2658_v13 = vpop.f32.mrf.mxu0 }
 0x66b   : > { %v2659_v45 = vadd.f32 %v2658_v13, %v5946_v9  ;;  %v2785_v56 = vmul.f32 %v5950_v46, %v2667_v3  ;;  %vm2752_vm15 = vcmp.gt.f32.partialorder %v2667_v3, 0.0 }
 0x66c   : > { %v4312_v40 = vpop.f32.mrf.mxu0 }
 0x66d   : > { %v2670_v49 = vadd.f32 %v4312_v40, %v5946_v9  ;;  %v2783_v44 = vmul.f32 %v5950_v46, %v2659_v45  ;;  %vm2750_vm14 = vcmp.gt.f32.partialorder %v2659_v45, 0.0  ;;  %v2817_v14 = vsel %vm2752_vm15, %v2667_v3, %v2785_v56  ;;  %v4599_v3 = vld [vmem:[#allocation15 + $0x14] ss:$8 sps:$4 sm:$0xff]  }
 0x66e   : > { %v2661_v47 = vpop.f32.mrf.mxu0  ;;  %3312 = vmatprep.subr.bf16.mxu0 %v4599_v3 }
 0x66f   : > { %vm2753_vm13 = vcmp.gt.f32.partialorder %v2670_v49, 0.0  ;;  %v2786_v57 = vmul.f32 %v5950_v46, %v2670_v49  ;;  %v2662_v10 = vadd.f32 %v2661_v47, %v5946_v9  ;;  %v2815_v55 = vsel %vm2750_vm14, %v2659_v45, %v2783_v44  ;;  %v4597_v45 = vld [vmem:[#allocation15 + $0x10] ss:$8 sps:$4 sm:$0xff]  }
 0x670   : > { %v4315_v6 = vpop.f32.mrf.mxu0  ;;  %3313 = vmatpush1.bf16.msra.mxu0 %v4597_v45 }
 0x671   : > { %vm2751_vm0 = vcmp.gt.f32.partialorder %v2662_v10, 0.0  ;;  %v2784_v7 = vmul.f32 %v5950_v46, %v2662_v10  ;;  %v2818_v59 = vsel %vm2753_vm13, %v2670_v49, %v2786_v57  ;;  %v2683_v15 = vadd.f32 %v4315_v6, %v5946_v9 }
 0x672   : > { %v2674_v11 = vpop.f32.mrf.mxu0  ;;  %v2859_v20 = vpack.c.bf16 %v2818_v59, %v2817_v14  ;;  %v4602_v14 = vld [vmem:[#allocation15 + $0x4] ss:$8 sps:$4 sm:$0xff]  }
 0x673   : > { %v2675_v42 = vadd.f32 %v2674_v11, %v5946_v9  ;;  %v2816_v5 = vsel %vm2751_vm0, %v2662_v10, %v2784_v7  ;;  %v2789_v32 = vmul.f32 %v5950_v46, %v2683_v15  ;;  %vm2756_vm3 = vcmp.gt.f32.partialorder %v2683_v15, 0.0  ;;  %3314 = vmatprep.subr.bf16.mxu0 %v4602_v14 }
 0x674   : > { %v4316_v16 = vpop.f32.mrf.mxu0  ;;  %v2858_v22 = vpack.c.bf16 %v2816_v5, %v2815_v55 }
 0x675   : > { %v2686_v37 = vadd.f32 %v4316_v16, %v5946_v9  ;;  %v2787_v25 = vmul.f32 %v5950_v46, %v2675_v42  ;;  %vm2754_vm2 = vcmp.gt.f32.partialorder %v2675_v42, 0.0  ;;  %v2821_v4 = vsel %vm2756_vm3, %v2683_v15, %v2789_v32  ;;  %v4600_v16 = vld [vmem:[#allocation15] ss:$8 sps:$4 sm:$0xff]  }
 0x676   : > { %v2677_v24 = vpop.f32.mrf.mxu0  ;;  %4357 = vmatprep.mubr.bf16.mxu1 %v2858_v22  ;;  %3315 = vmatpush1.bf16.msra.mxu0 %v4600_v16 }
 0x677   : > { %vm2757_vm1 = vcmp.gt.f32.partialorder %v2686_v37, 0.0  ;;  %v2790_v26 = vmul.f32 %v5950_v46, %v2686_v37  ;;  %v2678_v18 = vadd.f32 %v2677_v24, %v5946_v9  ;;  %4358 = vmatmul.mubr.bf16.gmra.mxu1 %v2859_v20  ;;  %v2819_v52 = vsel %vm2754_vm2, %v2675_v42, %v2787_v25 }
 0x678   : > { %v4319_v29 = vpop.f32.mrf.mxu0 }
 0x679   : > { %vm2755_vm4 = vcmp.gt.f32.partialorder %v2678_v18, 0.0  ;;  %v2788_v31 = vmul.f32 %v5950_v46, %v2678_v18  ;;  %v2822_v38 = vsel %vm2757_vm1, %v2686_v37, %v2790_v26  ;;  %v2699_v62 = vadd.f32 %v4319_v29, %v5946_v9 }
 0x67a   : > { %v2690_v50 = vpop.f32.mrf.mxu0  ;;  %v2861_v36 = vpack.c.bf16 %v2822_v38, %v2821_v4  ;;  %v4962_v26 = vmov 0  }
 0x67b   : > { %v2691_v19 = vadd.f32 %v2690_v50, %v5946_v9  ;;  %v2820_v41 = vsel %vm2755_vm4, %v2678_v18, %v2788_v31  ;;  %v2793_v33 = vmul.f32 %v5950_v46, %v2699_v62  ;;  %vm2760_vm7 = vcmp.gt.f32.partialorder %v2699_v62, 0.0  ;;  %3332 = vmatprep.mubr.bf16.mxu0 %v4962_v26 }
 0x67c   : > { %v4320_v28 = vpop.f32.mrf.mxu0  ;;  %v2860_v12 = vpack.c.bf16 %v2820_v41, %v2819_v52 }
 0x67d   : > { %v2702_v48 = vadd.f32 %v4320_v28, %v5946_v9  ;;  %v2791_v58 = vmul.f32 %v5950_v46, %v2691_v19  ;;  %vm2758_vm6 = vcmp.gt.f32.partialorder %v2691_v19, 0.0  ;;  %v2825_v23 = vsel %vm2760_vm7, %v2699_v62, %v2793_v33 }
 0x67e   : > { %v2693_v53 = vpop.f32.mrf.mxu0  ;;  %4361 = vmatprep.mubr.bf16.mxu1 %v2860_v12 }
 0x67f   : > { %vm2761_vm5 = vcmp.gt.f32.partialorder %v2702_v48, 0.0  ;;  %v2794_v27 = vmul.f32 %v5950_v46, %v2702_v48  ;;  %v2694_v2 = vadd.f32 %v2693_v53, %v5946_v9  ;;  %4362 = vmatmul.mubr.bf16.gmra.mxu1 %v2861_v36  ;;  %v2823_v21 = vsel %vm2758_vm6, %v2691_v19, %v2791_v58  ;;  %v6015_v19 = vld [vmem:[#allocation7 + $0x6] ss:$0 sm:$0xff] }
 0x680   : > { %v4323_v30 = vpop.f32.mrf.mxu0 }
 0x681   : > { %vm2759_vm8 = vcmp.gt.f32.partialorder %v2694_v2, 0.0  ;;  %v2792_v35 = vmul.f32 %v5950_v46, %v2694_v2  ;;  %v2826_v54 = vsel %vm2761_vm5, %v2702_v48, %v2794_v27  ;;  %v2715_v60 = vadd.f32 %v4323_v30, %v5946_v9 }
 0x682   : > { %v2706_v0 = vpop.f32.mrf.mxu0  ;;  %v2863_v8 = vpack.c.bf16 %v2826_v54, %v2825_v23 }
 0x683   : > { %v2707_v17 = vadd.f32 %v2706_v0, %v5946_v9  ;;  %v2824_v43 = vsel %vm2759_vm8, %v2694_v2, %v2792_v35  ;;  %v2797_v40 = vmul.f32 %v5950_v46, %v2715_v60  ;;  %vm2764_vm11 = vcmp.gt.f32.partialorder %v2715_v60, 0.0 }
 0x684   : > { %v4324_v61 = vpop.f32.mrf.mxu0  ;;  %v2862_v51 = vpack.c.bf16 %v2824_v43, %v2823_v21 }
 0x685   : > { %v2718_v39 = vadd.f32 %v4324_v61, %v5946_v9  ;;  %v2795_v1 = vmul.f32 %v5950_v46, %v2707_v17  ;;  %vm2762_vm10 = vcmp.gt.f32.partialorder %v2707_v17, 0.0  ;;  %v2829_v7 = vsel %vm2764_vm11, %v2715_v60, %v2797_v40 }
 0x686   : > { %v2709_v63 = vpop.f32.mrf.mxu0  ;;  %4365 = vmatprep.mubr.bf16.mxu1 %v2862_v51 }
 0x687   : > { %vm2765_vm9 = vcmp.gt.f32.partialorder %v2718_v39, 0.0  ;;  %v2798_v34 = vmul.f32 %v5950_v46, %v2718_v39  ;;  %v2710_v13 = vadd.f32 %v2709_v63, %v5946_v9  ;;  %4366 = vmatmul.mubr.bf16.gmra.mxu1 %v2863_v8  ;;  %v2827_v56 = vsel %vm2762_vm10, %v2707_v17, %v2795_v1 }
 0x688   : > { %v4327_v49 = vpop.f32.mrf.mxu0 }
 0x689   : > { %vm2763_vm12 = vcmp.gt.f32.partialorder %v2710_v13, 0.0  ;;  %v2796_v47 = vmul.f32 %v5950_v46, %v2710_v13  ;;  %v2830_v44 = vsel %vm2765_vm9, %v2718_v39, %v2798_v34  ;;  %v2731_v59 = vadd.f32 %v4327_v49, %v5946_v9 }
 0x68a   : > { %v2722_v57 = vpop.f32.mrf.mxu0  ;;  %v2865_v55 = vpack.c.bf16 %v2830_v44, %v2829_v7 }
 0x68b   : > { %v2723_v10 = vadd.f32 %v2722_v57, %v5946_v9  ;;  %v2828_v6 = vsel %vm2763_vm12, %v2710_v13, %v2796_v47  ;;  %v2801_v24 = vmul.f32 %v5950_v46, %v2731_v59  ;;  %vm2768_vm15 = vcmp.gt.f32.partialorder %v2731_v59, 0.0 }
 0x68c   : > { %v4328_v11 = vpop.f32.mrf.mxu0  ;;  %v2864_v42 = vpack.c.bf16 %v2828_v6, %v2827_v56 }
 0x68d   : > { %v2734_v5 = vadd.f32 %v4328_v11, %v5946_v9  ;;  %v2799_v22 = vmul.f32 %v5950_v46, %v2723_v10  ;;  %vm2766_vm14 = vcmp.gt.f32.partialorder %v2723_v10, 0.0  ;;  %v2833_v31 = vsel %vm2768_vm15, %v2731_v59, %v2801_v24 }
 0x68e   : > { %v2725_v15 = vpop.f32.mrf.mxu0  ;;  %4369 = vmatprep.mubr.bf16.mxu1 %v2864_v42 }
 0x68f   : > { %vm2769_vm13 = vcmp.gt.f32.partialorder %v2734_v5, 0.0  ;;  %v2802_v20 = vmul.f32 %v5950_v46, %v2734_v5  ;;  %v2726_v37 = vadd.f32 %v2725_v15, %v5946_v9  ;;  %4370 = vmatmul.mubr.bf16.gmra.mxu1 %v2865_v55  ;;  %v2831_v32 = vsel %vm2766_vm14, %v2723_v10, %v2799_v22 }
 0x691   : > { %vm2767_vm0 = vcmp.gt.f32.partialorder %v2726_v37, 0.0  ;;  %v2800_v25 = vmul.f32 %v5950_v46, %v2726_v37  ;;  %v2834_v18 = vsel %vm2769_vm13, %v2734_v5, %v2802_v20  ;;  %v6018_v46 = vstv %s3818_s12 }
 0x692   : > { %v2867_v50 = vpack.c.bf16 %v2834_v18, %v2833_v31 }
 0x693   : > { %v2832_v29 = vsel %vm2767_vm0, %v2726_v37, %v2800_v25 }
 0x694   : > { %v2866_v38 = vpack.c.bf16 %v2832_v29, %v2831_v32 }
 0x696   : > { %4373 = vmatprep.mubr.bf16.mxu1 %v2866_v38 }
 0x697   : > { %4374 = vmatmul.mubr.bf16.gmra.mxu1 %v2867_v50 }
 0x704   : > { %v4347_v9 = vpop.f32.mrf.mxu1 }
 0x705   : > { %v2959_v53 = vadd.f32 %v4347_v9, %v6015_v19 }
 0x706   : > { %v2950_v52 = vpop.f32.mrf.mxu1 }
 0x707   : > { %v2951_v41 = vadd.f32 %v2950_v52, %v6015_v19  ;;  %v3113_v30 = vmul.f32 %v6018_v46, %v2959_v53  ;;  %vm3080_vm4 = vcmp.gt.f32.partialorder %v2959_v53, 0.0 }
 0x708   : > { %v4348_v4 = vpop.f32.mrf.mxu1 }
 0x709   : > { %v3111_v28 = vmul.f32 %v6018_v46, %v2951_v41  ;;  %vm3078_vm1 = vcmp.gt.f32.partialorder %v2951_v41, 0.0  ;;  %v2962_v36 = vadd.f32 %v4348_v4, %v6015_v19  ;;  %v3145_v0 = vsel %vm3080_vm4, %v2959_v53, %v3113_v30 }
 0x70a   : > { %v2953_v62 = vpop.f32.mrf.mxu1 }
 0x70b   : > { %v2954_v12 = vadd.f32 %v2953_v62, %v6015_v19  ;;  %v3143_v58 = vsel %vm3078_vm1, %v2951_v41, %v3111_v28  ;;  %v3114_v33 = vmul.f32 %v6018_v46, %v2962_v36  ;;  %vm3081_vm3 = vcmp.gt.f32.partialorder %v2962_v36, 0.0 }
 0x70d   : > { %vm3079_vm2 = vcmp.gt.f32.partialorder %v2954_v12, 0.0  ;;  %v3112_v48 = vmul.f32 %v6018_v46, %v2954_v12  ;;  %v3146_v35 = vsel %vm3081_vm3, %v2962_v36, %v3114_v33 }
 0x70e   : > { %v3194_v17 = vpack.c.bf16 %v3146_v35, %v3145_v0 }
 0x70f   : > { %v3144_v27 = vsel %vm3079_vm2, %v2954_v12, %v3112_v48 }
 0x710   : > { %v3193_v2 = vpack.c.bf16 %v3144_v27, %v3143_v58 }
 0x712   : > { %3333 = vmatmul.mubr.bf16.vlgmr.msra.gmra.mxu0 %v3193_v2 }
 0x713   : > { %3342 = vmatprep.mubr.bf16.mxu0 %v4962_v26 }
 0x717   : > { %v4351_v54 = vpop.f32.mrf.mxu1 }
 0x718   : > { %v2975_v63 = vadd.f32 %v4351_v54, %v6015_v19 }
 0x719   : > { %v2966_v21 = vpop.f32.mrf.mxu1 }
 0x71a   : > { %v2967_v43 = vadd.f32 %v2966_v21, %v6015_v19  ;;  %3343 = vmatmul.mubr.bf16.gmra.mxu0 %v3194_v17  ;;  %v3117_v3 = vmul.f32 %v6018_v46, %v2975_v63  ;;  %vm3084_vm8 = vcmp.gt.f32.partialorder %v2975_v63, 0.0 }
 0x71b   : > { %v4352_v23 = vpop.f32.mrf.mxu1  ;;  %3352 = vmatprep.mubr.bf16.mxu0 %v4962_v26 }
 0x71c   : > { %v3115_v61 = vmul.f32 %v6018_v46, %v2967_v43  ;;  %vm3082_vm5 = vcmp.gt.f32.partialorder %v2967_v43, 0.0  ;;  %v2978_v8 = vadd.f32 %v4352_v23, %v6015_v19  ;;  %v3149_v57 = vsel %vm3084_vm8, %v2975_v63, %v3117_v3 }
 0x71d   : > { %v2969_v60 = vpop.f32.mrf.mxu1 }
 0x71e   : > { %v2970_v51 = vadd.f32 %v2969_v60, %v6015_v19  ;;  %v3147_v1 = vsel %vm3082_vm5, %v2967_v43, %v3115_v61  ;;  %v3118_v45 = vmul.f32 %v6018_v46, %v2978_v8  ;;  %vm3085_vm7 = vcmp.gt.f32.partialorder %v2978_v8, 0.0 }
 0x720   : > { %vm3083_vm6 = vcmp.gt.f32.partialorder %v2970_v51, 0.0  ;;  %v3116_v39 = vmul.f32 %v6018_v46, %v2970_v51  ;;  %v3150_v49 = vsel %vm3085_vm7, %v2978_v8, %v3118_v45 }
 0x721   : > { %v3196_v56 = vpack.c.bf16 %v3150_v49, %v3149_v57 }
 0x722   : > { %v3148_v34 = vsel %vm3083_vm6, %v2970_v51, %v3116_v39 }
 0x723   : > { %v3195_v13 = vpack.c.bf16 %v3148_v34, %v3147_v1 }
 0x725   : > { %3353 = vmatmul.mubr.bf16.gmra.mxu0 %v3195_v13 }
 0x726   : > { %3362 = vmatprep.mubr.bf16.mxu0 %v4962_v26 }
 0x727   : > { %v4355_v40 = vpop.f32.mrf.mxu1 }
 0x728   : > { %v2991_v55 = vadd.f32 %v4355_v40, %v6015_v19 }
 0x729   : > { %v2982_v47 = vpop.f32.mrf.mxu1 }
 0x72a   : > { %v2983_v44 = vadd.f32 %v2982_v47, %v6015_v19  ;;  %v3121_v22 = vmul.f32 %v6018_v46, %v2991_v55  ;;  %vm3088_vm12 = vcmp.gt.f32.partialorder %v2991_v55, 0.0 }
 0x72b   : > { %v4356_v10 = vpop.f32.mrf.mxu1 }
 0x72c   : > { %v3119_v7 = vmul.f32 %v6018_v46, %v2983_v44  ;;  %vm3086_vm9 = vcmp.gt.f32.partialorder %v2983_v44, 0.0  ;;  %v2994_v11 = vadd.f32 %v4356_v10, %v6015_v19  ;;  %v3153_v25 = vsel %vm3088_vm12, %v2991_v55, %v3121_v22 }
 0x72d   : > { %v2985_v6 = vpop.f32.mrf.mxu1  ;;  %3363 = vmatmul.mubr.bf16.gmra.mxu0 %v3196_v56 }
 0x72e   : > { %v2986_v59 = vadd.f32 %v2985_v6, %v6015_v19  ;;  %3372 = vmatprep.mubr.bf16.mxu0 %v4962_v26  ;;  %v3151_v5 = vsel %vm3086_vm9, %v2983_v44, %v3119_v7  ;;  %v3122_v16 = vmul.f32 %v6018_v46, %v2994_v11  ;;  %vm3089_vm11 = vcmp.gt.f32.partialorder %v2994_v11, 0.0 }
 0x730   : > { %vm3087_vm10 = vcmp.gt.f32.partialorder %v2986_v59, 0.0  ;;  %v3120_v42 = vmul.f32 %v6018_v46, %v2986_v59  ;;  %v3154_v37 = vsel %vm3089_vm11, %v2994_v11, %v3122_v16 }
 0x731   : > { %v3198_v32 = vpack.c.bf16 %v3154_v37, %v3153_v25 }
 0x732   : > { %v3152_v14 = vsel %vm3087_vm10, %v2986_v59, %v3120_v42 }
 0x733   : > { %v3197_v15 = vpack.c.bf16 %v3152_v14, %v3151_v5 }
 0x735   : > { %3373 = vmatmul.mubr.bf16.gmra.mxu0 %v3197_v15 }
 0x736   : > { %3382 = vmatprep.mubr.bf16.mxu0 %v4962_v26 }
 0x737   : > { %v4359_v20 = vpop.f32.mrf.mxu1 }
 0x738   : > { %v3007_v62 = vadd.f32 %v4359_v20, %v6015_v19 }
 0x739   : > { %v2998_v24 = vpop.f32.mrf.mxu1 }
 0x73a   : > { %v2999_v18 = vadd.f32 %v2998_v24, %v6015_v19  ;;  %v3125_v27 = vmul.f32 %v6018_v46, %v3007_v62  ;;  %vm3092_vm0 = vcmp.gt.f32.partialorder %v3007_v62, 0.0 }
 0x73b   : > { %v4360_v29 = vpop.f32.mrf.mxu1 }
 0x73c   : > { %v3123_v38 = vmul.f32 %v6018_v46, %v2999_v18  ;;  %vm3090_vm13 = vcmp.gt.f32.partialorder %v2999_v18, 0.0  ;;  %v3010_v52 = vadd.f32 %v4360_v29, %v6015_v19  ;;  %v3157_v35 = vsel %vm3092_vm0, %v3007_v62, %v3125_v27 }
 0x73d   : > { %v3001_v31 = vpop.f32.mrf.mxu1  ;;  %3383 = vmatmul.mubr.bf16.gmra.mxu0 %v3198_v32 }
 0x73e   : > { %v3002_v50 = vadd.f32 %v3001_v31, %v6015_v19  ;;  %3392 = vmatprep.mubr.bf16.mxu0 %v4962_v26  ;;  %v3155_v28 = vsel %vm3090_vm13, %v2999_v18, %v3123_v38  ;;  %v3126_v53 = vmul.f32 %v6018_v46, %v3010_v52  ;;  %vm3093_vm15 = vcmp.gt.f32.partialorder %v3010_v52, 0.0 }
 0x73f   : > { %v4363_v9 = vpop.f32.mrf.mxu1 }
 0x740   : > { %vm3091_vm14 = vcmp.gt.f32.partialorder %v3002_v50, 0.0  ;;  %v3124_v41 = vmul.f32 %v6018_v46, %v3002_v50  ;;  %v3158_v2 = vsel %vm3093_vm15, %v3010_v52, %v3126_v53  ;;  %v3023_v51 = vadd.f32 %v4363_v9, %v6015_v19 }
 0x741   : > { %v3014_v4 = vpop.f32.mrf.mxu1  ;;  %v3200_v0 = vpack.c.bf16 %v3158_v2, %v3157_v35 }
 0x742   : > { %v3156_v12 = vsel %vm3091_vm14, %v3002_v50, %v3124_v41  ;;  %v3015_v54 = vadd.f32 %v3014_v4, %v6015_v19  ;;  %v3129_v34 = vmul.f32 %v6018_v46, %v3023_v51  ;;  %vm3096_vm4 = vcmp.gt.f32.partialorder %v3023_v51, 0.0 }
 0x743   : > { %v3199_v36 = vpack.c.bf16 %v3156_v12, %v3155_v28  ;;  %v4364_v48 = vpop.f32.mrf.mxu1 }
 0x744   : > { %v3127_v43 = vmul.f32 %v6018_v46, %v3015_v54  ;;  %vm3094_vm2 = vcmp.gt.f32.partialorder %v3015_v54, 0.0  ;;  %v3026_v23 = vadd.f32 %v4364_v48, %v6015_v19  ;;  %v3161_v40 = vsel %vm3096_vm4, %v3023_v51, %v3129_v34 }
 0x745   : > { %v3017_v58 = vpop.f32.mrf.mxu1  ;;  %3393 = vmatmul.mubr.bf16.gmra.mxu0 %v3199_v36 }
 0x746   : > { %3402 = vmatprep.mubr.bf16.mxu0 %v4962_v26  ;;  %v3018_v33 = vadd.f32 %v3017_v58, %v6015_v19  ;;  %v3159_v8 = vsel %vm3094_vm2, %v3015_v54, %v3127_v43  ;;  %v3130_v63 = vmul.f32 %v6018_v46, %v3026_v23  ;;  %vm3097_vm3 = vcmp.gt.f32.partialorder %v3026_v23, 0.0 }
 0x747   : > { %v4367_v30 = vpop.f32.mrf.mxu1 }
 0x748   : > { %v3128_v17 = vmul.f32 %v6018_v46, %v3018_v33  ;;  %vm3095_vm1 = vcmp.gt.f32.partialorder %v3018_v33, 0.0  ;;  %v3162_v13 = vsel %vm3097_vm3, %v3026_v23, %v3130_v63  ;;  %v3039_v59 = vadd.f32 %v4367_v30, %v6015_v19 }
 0x749   : > { %v3030_v21 = vpop.f32.mrf.mxu1  ;;  %v3202_v47 = vpack.c.bf16 %v3162_v13, %v3161_v40 }
 0x74a   : > { %v3160_v60 = vsel %vm3095_vm1, %v3018_v33, %v3128_v17  ;;  %v3031_v49 = vadd.f32 %v3030_v21, %v6015_v19  ;;  %v3133_v14 = vmul.f32 %v6018_v46, %v3039_v59  ;;  %vm3100_vm8 = vcmp.gt.f32.partialorder %v3039_v59, 0.0 }
 0x74b   : > { %v4368_v61 = vpop.f32.mrf.mxu1  ;;  %v3201_v39 = vpack.c.bf16 %v3160_v60, %v3159_v8  ;;  %v3210_v60 = vlaneseq }
 0x74c   : > { %v3131_v10 = vmul.f32 %v6018_v46, %v3031_v49  ;;  %vm3098_vm6 = vcmp.gt.f32.partialorder %v3031_v49, 0.0  ;;  %v3042_v56 = vadd.f32 %v4368_v61, %v6015_v19  ;;  %v3165_v20 = vsel %vm3100_vm8, %v3039_v59, %v3133_v14 }
 0x74d   : > { %3403 = vmatmul.mubr.bf16.gmra.mxu0 %v3200_v0  ;;  %v3033_v1 = vpop.f32.mrf.mxu1  ;;  %v3211_v61 = vshrl.u32 %v3210_v60, 7 }
 0x74e   : > { %3412 = vmatprep.mubr.bf16.mxu0 %v4962_v26  ;;  %v3034_v45 = vadd.f32 %v3033_v1, %v6015_v19  ;;  %v3163_v11 = vsel %vm3098_vm6, %v3031_v49, %v3131_v10  ;;  %v3134_v55 = vmul.f32 %v6018_v46, %v3042_v56  ;;  %vm3101_vm7 = vcmp.gt.f32.partialorder %v3042_v56, 0.0 }
 0x74f   : > { %v4371_v3 = vpop.f32.mrf.mxu1  ;;  %v3212_v51 = vsub.s32 0, %v3211_v61  ;;  %v3216_v8 = vsub.s32 1, %v3211_v61 }
 0x750   : > { %v3132_v44 = vmul.f32 %v6018_v46, %v3034_v45  ;;  %vm3099_vm5 = vcmp.gt.f32.partialorder %v3034_v45, 0.0  ;;  %v3166_v15 = vsel %vm3101_vm7, %v3042_v56, %v3134_v55  ;;  %v3055_v50 = vadd.f32 %v4371_v3, %v6015_v19 }
 0x751   : > { %v3046_v57 = vpop.f32.mrf.mxu1  ;;  %v3204_v24 = vpack.c.bf16 %v3166_v15, %v3165_v20 }
 0x752   : > { %v3164_v6 = vsel %vm3099_vm5, %v3034_v45, %v3132_v44  ;;  %v3047_v37 = vadd.f32 %v3046_v57, %v6015_v19  ;;  %v3137_v62 = vmul.f32 %v6018_v46, %v3055_v50  ;;  %vm3104_vm12 = vcmp.gt.f32.partialorder %v3055_v50, 0.0 }
 0x753   : > { %v4372_v7 = vpop.f32.mrf.mxu1  ;;  %v3203_v42 = vpack.c.bf16 %v3164_v6, %v3163_v11 }
 0x754   : > { %v3135_v32 = vmul.f32 %v6018_v46, %v3047_v37  ;;  %vm3102_vm10 = vcmp.gt.f32.partialorder %v3047_v37, 0.0  ;;  %v3058_v29 = vadd.f32 %v4372_v7, %v6015_v19  ;;  %v3169_v36 = vsel %vm3104_vm12, %v3055_v50, %v3137_v62 }
 0x755   : > { %3413 = vmatmul.mubr.bf16.gmra.mxu0 %v3201_v39  ;;  %v3049_v5 = vpop.f32.mrf.mxu1 }
 0x756   : > { %3422 = vmatprep.mubr.bf16.mxu0 %v4962_v26  ;;  %v3050_v16 = vadd.f32 %v3049_v5, %v6015_v19  ;;  %v3167_v9 = vsel %vm3102_vm10, %v3047_v37, %v3135_v32  ;;  %v3138_v41 = vmul.f32 %v6018_v46, %v3058_v29  ;;  %vm3105_vm11 = vcmp.gt.f32.partialorder %v3058_v29, 0.0 }
 0x757   : > { %v4375_v22 = vpop.f32.mrf.mxu1 }
 0x758   : > { %v3136_v25 = vmul.f32 %v6018_v46, %v3050_v16  ;;  %vm3103_vm9 = vcmp.gt.f32.partialorder %v3050_v16, 0.0  ;;  %v3170_v28 = vsel %vm3105_vm11, %v3058_v29, %v3138_v41  ;;  %v3071_v30 = vadd.f32 %v4375_v22, %v6015_v19 }
 0x759   : > { %v3062_v18 = vpop.f32.mrf.mxu1  ;;  %v3206_v53 = vpack.c.bf16 %v3170_v28, %v3169_v36 }
 0x75a   : > { %v3168_v31 = vsel %vm3103_vm9, %v3050_v16, %v3136_v25  ;;  %v3063_v48 = vadd.f32 %v3062_v18, %v6015_v19  ;;  %v3141_v17 = vmul.f32 %v6018_v46, %v3071_v30  ;;  %vm3108_vm0 = vcmp.gt.f32.partialorder %v3071_v30, 0.0 }
 0x75b   : > { %v4376_v38 = vpop.f32.mrf.mxu1  ;;  %v3205_v52 = vpack.c.bf16 %v3168_v31, %v3167_v9 }
 0x75c   : > { %v3139_v27 = vmul.f32 %v6018_v46, %v3063_v48  ;;  %vm3106_vm14 = vcmp.gt.f32.partialorder %v3063_v48, 0.0  ;;  %v3074_v2 = vadd.f32 %v4376_v38, %v6015_v19  ;;  %v3173_v43 = vsel %vm3108_vm0, %v3071_v30, %v3141_v17 }
 0x75d   : > { %3423 = vmatmul.mubr.bf16.gmra.mxu0 %v3202_v47  ;;  %v3065_v4 = vpop.f32.mrf.mxu1 }
 0x75e   : > { %3432 = vmatprep.mubr.bf16.mxu0 %v4962_v26  ;;  %v3066_v12 = vadd.f32 %v3065_v4, %v6015_v19  ;;  %v3171_v35 = vsel %vm3106_vm14, %v3063_v48, %v3139_v27  ;;  %v3142_v0 = vmul.f32 %v6018_v46, %v3074_v2  ;;  %vm3109_vm15 = vcmp.gt.f32.partialorder %v3074_v2, 0.0  ;;  %v3176_v19 = vld [vmem:[#allocation7 + $0x7] ss:$8 sm:$0x3] }
 0x75f   : > { %v6098_v39 = vrot.slane %v3176_v19, %v3212_v51  ;;  %v6100_v63 = vrot.slane %v3176_v19, %v3216_v8 }
 0x760   : > { %v3140_v58 = vmul.f32 %v6018_v46, %v3066_v12  ;;  %vm3107_vm13 = vcmp.gt.f32.partialorder %v3066_v12, 0.0  ;;  %v3174_v21 = vsel %vm3109_vm15, %v3074_v2, %v3142_v0 }
 0x761   : > { %v3208_v23 = vpack.c.bf16 %v3174_v21, %v3173_v43 }
 0x762   : > { %v3172_v33 = vsel %vm3107_vm13, %v3066_v12, %v3140_v58 }
 0x763   : > { %v3207_v54 = vpack.c.bf16 %v3172_v33, %v3171_v35 }
 0x765   : > { %3433 = vmatmul.mubr.bf16.gmra.mxu0 %v3203_v42 }
 0x766   : > { %3442 = vmatprep.mubr.bf16.mxu0 %v4962_v26 }
 0x76d   : > { %3443 = vmatmul.mubr.bf16.gmra.mxu0 %v3204_v24 }
 0x76e   : > { %3452 = vmatprep.mubr.bf16.mxu0 %v4962_v26 }
 0x775   : > { %3453 = vmatmul.mubr.bf16.gmra.mxu0 %v3205_v52 }
 0x776   : > { %3462 = vmatprep.mubr.bf16.mxu0 %v4962_v26 }
 0x77d   : > { %3463 = vmatmul.mubr.bf16.gmra.mxu0 %v3206_v53 }
 0x77e   : > { %3472 = vmatprep.mubr.bf16.mxu0 %v4962_v26 }
 0x785   : > { %3473 = vmatmul.mubr.bf16.gmra.mxu0 %v3207_v54 }
 0x786   : > { %3482 = vmatprep.mubr.bf16.mxu0 %v4962_v26 }
 0x78d   : > { %3483 = vmatmul.mubr.bf16.gmra.mxu0 %v3208_v23 }
 0x7d2   : > { %v3334_v1 = vpop.f32.mrf.mxu0 }
 0x7d3   : > { %v3335_v46 = vadd.f32 %v3334_v1, %v6098_v39 }
 0x7d4   : > { %v3336_v34 = vpop.f32.mrf.mxu0 }
 0x7d5   : > { %3493 = vst [vmem:[%s6105_s16] sm:$0xff] %v3335_v46  ;;  %v3337_v26 = vadd.f32 %v3336_v34, %v6100_v63 }
 0x7d6   : > { %v3338_v13 = vpop.f32.mrf.mxu0 }
 0x7d7   : > { %3494 = vst [vmem:[%s6105_s16 + $0x8] sm:$0xff] %v3337_v26  ;;  %v3339_v45 = vadd.f32 %v3338_v13, %v6098_v39 }
 0x7d8   : > { %v3340_v3 = vpop.f32.mrf.mxu0 }
 0x7d9   : > { %3495 = vst [vmem:[%s6105_s16 + $0x10] sm:$0xff] %v3339_v45  ;;  %v3341_v40 = vadd.f32 %v3340_v3, %v6100_v63 }
 0x7da   : > { %v3344_v49 = vpop.f32.mrf.mxu0 }
 0x7db   : > { %3496 = vst [vmem:[%s6105_s16 + $0x18] sm:$0xff] %v3341_v40  ;;  %v3345_v47 = vadd.f32 %v3344_v49, %v6098_v39 }
 0x7dc   : > { %v3346_v44 = vpop.f32.mrf.mxu0 }
 0x7dd   : > { %3497 = vst [vmem:[%s6105_s16 + $0x20] sm:$0xff] %v3345_v47  ;;  %v3347_v57 = vadd.f32 %v3346_v44, %v6100_v63 }
 0x7de   : > { %v3348_v10 = vpop.f32.mrf.mxu0 }
 0x7df   : > { %3498 = vst [vmem:[%s6105_s16 + $0x28] sm:$0xff] %v3347_v57  ;;  %v3349_v56 = vadd.f32 %v3348_v10, %v6098_v39 }
 0x7e0   : > { %v3350_v6 = vpop.f32.mrf.mxu0 }
 0x7e1   : > { %3499 = vst [vmem:[%s6105_s16 + $0x30] sm:$0xff] %v3349_v56  ;;  %v3351_v7 = vadd.f32 %v3350_v6, %v6100_v63 }
 0x7e3   : > { %3500 = vst [vmem:[%s6105_s16 + $0x38] sm:$0xff] %v3351_v7 }
 0x7e5   : > { %v3354_v59 = vpop.f32.mrf.mxu0 }
 0x7e6   : > { %v3355_v11 = vadd.f32 %v3354_v59, %v6098_v39 }
 0x7e7   : > { %v3356_v42 = vpop.f32.mrf.mxu0 }
 0x7e8   : > { %3501 = vst [vmem:[%s6105_s16 + $0x40] sm:$0xff] %v3355_v11  ;;  %v3357_v55 = vadd.f32 %v3356_v42, %v6100_v63 }
 0x7e9   : > { %v3358_v5 = vpop.f32.mrf.mxu0 }
 0x7ea   : > { %3502 = vst [vmem:[%s6105_s16 + $0x48] sm:$0xff] %v3357_v55  ;;  %v3359_v14 = vadd.f32 %v3358_v5, %v6098_v39 }
 0x7eb   : > { %v3360_v15 = vpop.f32.mrf.mxu0 }
 0x7ec   : > { %3503 = vst [vmem:[%s6105_s16 + $0x50] sm:$0xff] %v3359_v14  ;;  %v3361_v16 = vadd.f32 %v3360_v15, %v6100_v63 }
 0x7ed   : > { %v3364_v22 = vpop.f32.mrf.mxu0 }
 0x7ee   : > { %3504 = vst [vmem:[%s6105_s16 + $0x58] sm:$0xff] %v3361_v16  ;;  %v3365_v20 = vadd.f32 %v3364_v22, %v6098_v39 }
 0x7ef   : > { %v3366_v37 = vpop.f32.mrf.mxu0 }
 0x7f0   : > { %3505 = vst [vmem:[%s6105_s16 + $0x60] sm:$0xff] %v3365_v20  ;;  %v3367_v24 = vadd.f32 %v3366_v37, %v6100_v63 }
 0x7f1   : > { %v3368_v25 = vpop.f32.mrf.mxu0 }
 0x7f2   : > { %3506 = vst [vmem:[%s6105_s16 + $0x68] sm:$0xff] %v3367_v24  ;;  %v3369_v18 = vadd.f32 %v3368_v25, %v6098_v39 }
 0x7f3   : > { %v3370_v32 = vpop.f32.mrf.mxu0 }
 0x7f4   : > { %3507 = vst [vmem:[%s6105_s16 + $0x70] sm:$0xff] %v3369_v18  ;;  %v3371_v29 = vadd.f32 %v3370_v32, %v6100_v63 }
 0x7f5   : > { %v3374_v31 = vpop.f32.mrf.mxu0 }
 0x7f6   : > { %3508 = vst [vmem:[%s6105_s16 + $0x78] sm:$0xff] %v3371_v29  ;;  %v3375_v38 = vadd.f32 %v3374_v31, %v6098_v39 }
 0x7f7   : > { %v3376_v50 = vpop.f32.mrf.mxu0 }
 0x7f8   : > { %3509 = vst [vmem:[%s6105_s16 + $0x80] sm:$0xff] %v3375_v38  ;;  %v3377_v9 = vadd.f32 %v3376_v50, %v6100_v63 }
 0x7f9   : > { %v3378_v52 = vpop.f32.mrf.mxu0 }
 0x7fa   : > { %3510 = vst [vmem:[%s6105_s16 + $0x88] sm:$0xff] %v3377_v9  ;;  %v3379_v41 = vadd.f32 %v3378_v52, %v6098_v39 }
 0x7fb   : > { %v3380_v4 = vpop.f32.mrf.mxu0 }
 0x7fc   : > { %3511 = vst [vmem:[%s6105_s16 + $0x90] sm:$0xff] %v3379_v41  ;;  %v3381_v62 = vadd.f32 %v3380_v4, %v6100_v63 }
 0x7fd   : > { %v3384_v28 = vpop.f32.mrf.mxu0 }
 0x7fe   : > { %3512 = vst [vmem:[%s6105_s16 + $0x98] sm:$0xff] %v3381_v62  ;;  %v3385_v12 = vadd.f32 %v3384_v28, %v6098_v39 }
 0x7ff   : > { %v3386_v36 = vpop.f32.mrf.mxu0 }
 0x800   : > { %3513 = vst [vmem:[%s6105_s16 + $0xa0] sm:$0xff] %v3385_v12  ;;  %v3387_v48 = vadd.f32 %v3386_v36, %v6100_v63 }
 0x801   : > { %v3388_v53 = vpop.f32.mrf.mxu0 }
 0x802   : > { %3514 = vst [vmem:[%s6105_s16 + $0xa8] sm:$0xff] %v3387_v48  ;;  %v3389_v58 = vadd.f32 %v3388_v53, %v6098_v39 }
 0x803   : > { %v3390_v27 = vpop.f32.mrf.mxu0 }
 0x804   : > { %3515 = vst [vmem:[%s6105_s16 + $0xb0] sm:$0xff] %v3389_v58  ;;  %v3391_v2 = vadd.f32 %v3390_v27, %v6100_v63 }
 0x805   : > { %v3394_v33 = vpop.f32.mrf.mxu0 }
 0x806   : > { %3516 = vst [vmem:[%s6105_s16 + $0xb8] sm:$0xff] %v3391_v2  ;;  %v3395_v30 = vadd.f32 %v3394_v33, %v6098_v39 }
 0x807   : > { %v3396_v35 = vpop.f32.mrf.mxu0 }
 0x808   : > { %3517 = vst [vmem:[%s6105_s16 + $0xc0] sm:$0xff] %v3395_v30  ;;  %v3397_v54 = vadd.f32 %v3396_v35, %v6100_v63 }
 0x809   : > { %v3398_v0 = vpop.f32.mrf.mxu0 }
 0x80a   : > { %3518 = vst [vmem:[%s6105_s16 + $0xc8] sm:$0xff] %v3397_v54  ;;  %v3399_v17 = vadd.f32 %v3398_v0, %v6098_v39 }
 0x80b   : > { %v3400_v21 = vpop.f32.mrf.mxu0 }
 0x80c   : > { %3519 = vst [vmem:[%s6105_s16 + $0xd0] sm:$0xff] %v3399_v17  ;;  %v3401_v43 = vadd.f32 %v3400_v21, %v6100_v63 }
 0x80d   : > { %v3404_v23 = vpop.f32.mrf.mxu0 }
 0x80e   : > { %3520 = vst [vmem:[%s6105_s16 + $0xd8] sm:$0xff] %v3401_v43  ;;  %v3405_v60 = vadd.f32 %v3404_v23, %v6098_v39 }
 0x80f   : > { %v3406_v61 = vpop.f32.mrf.mxu0 }
 0x810   : > { %3521 = vst [vmem:[%s6105_s16 + $0xe0] sm:$0xff] %v3405_v60  ;;  %v3407_v51 = vadd.f32 %v3406_v61, %v6100_v63 }
 0x811   : > { %v3408_v19 = vpop.f32.mrf.mxu0 }
 0x812   : > { %3522 = vst [vmem:[%s6105_s16 + $0xe8] sm:$0xff] %v3407_v51  ;;  %v3409_v8 = vadd.f32 %v3408_v19, %v6098_v39 }
 0x813   : > { %v3410_v1 = vpop.f32.mrf.mxu0 }
 0x814   : > { %3523 = vst [vmem:[%s6105_s16 + $0xf0] sm:$0xff] %v3409_v8  ;;  %v3411_v46 = vadd.f32 %v3410_v1, %v6100_v63 }
 0x815   : > { %v3414_v34 = vpop.f32.mrf.mxu0 }
 0x816   : > { %3524 = vst [vmem:[%s6105_s16 + $0xf8] sm:$0xff] %v3411_v46  ;;  %v3415_v26 = vadd.f32 %v3414_v34, %v6098_v39 }
 0x817   : > { %v3416_v13 = vpop.f32.mrf.mxu0 }
 0x818   : > { %3525 = vst [vmem:[%s6105_s16 + $0x100] sm:$0xff] %v3415_v26  ;;  %v3417_v45 = vadd.f32 %v3416_v13, %v6100_v63 }
 0x819   : > { %v3418_v3 = vpop.f32.mrf.mxu0 }
 0x81a   : > { %3526 = vst [vmem:[%s6105_s16 + $0x108] sm:$0xff] %v3417_v45  ;;  %v3419_v40 = vadd.f32 %v3418_v3, %v6098_v39 }
 0x81b   : > { %v3420_v49 = vpop.f32.mrf.mxu0 }
 0x81c   : > { %3527 = vst [vmem:[%s6105_s16 + $0x110] sm:$0xff] %v3419_v40  ;;  %v3421_v47 = vadd.f32 %v3420_v49, %v6100_v63 }
 0x81d   : > { %v3424_v44 = vpop.f32.mrf.mxu0 }
 0x81e   : > { %3528 = vst [vmem:[%s6105_s16 + $0x118] sm:$0xff] %v3421_v47  ;;  %v3425_v57 = vadd.f32 %v3424_v44, %v6098_v39 }
 0x81f   : > { %v3426_v10 = vpop.f32.mrf.mxu0 }
 0x820   : > { %3529 = vst [vmem:[%s6105_s16 + $0x120] sm:$0xff] %v3425_v57  ;;  %v3427_v56 = vadd.f32 %v3426_v10, %v6100_v63 }
 0x821   : > { %v3428_v6 = vpop.f32.mrf.mxu0 }
 0x822   : > { %3530 = vst [vmem:[%s6105_s16 + $0x128] sm:$0xff] %v3427_v56  ;;  %v3429_v7 = vadd.f32 %v3428_v6, %v6098_v39 }
 0x823   : > { %v3430_v59 = vpop.f32.mrf.mxu0 }
 0x824   : > { %3531 = vst [vmem:[%s6105_s16 + $0x130] sm:$0xff] %v3429_v7  ;;  %v3431_v11 = vadd.f32 %v3430_v59, %v6100_v63 }
 0x825   : > { %v3434_v42 = vpop.f32.mrf.mxu0 }
 0x826   : > { %3532 = vst [vmem:[%s6105_s16 + $0x138] sm:$0xff] %v3431_v11  ;;  %v3435_v55 = vadd.f32 %v3434_v42, %v6098_v39 }
 0x827   : > { %v3436_v5 = vpop.f32.mrf.mxu0 }
 0x828   : > { %3533 = vst [vmem:[%s6105_s16 + $0x140] sm:$0xff] %v3435_v55  ;;  %v3437_v14 = vadd.f32 %v3436_v5, %v6100_v63 }
 0x829   : > { %v3438_v15 = vpop.f32.mrf.mxu0 }
 0x82a   : > { %3534 = vst [vmem:[%s6105_s16 + $0x148] sm:$0xff] %v3437_v14  ;;  %v3439_v16 = vadd.f32 %v3438_v15, %v6098_v39 }
 0x82b   : > { %v3440_v22 = vpop.f32.mrf.mxu0 }
 0x82c   : > { %3535 = vst [vmem:[%s6105_s16 + $0x150] sm:$0xff] %v3439_v16  ;;  %v3441_v20 = vadd.f32 %v3440_v22, %v6100_v63 }
 0x82d   : > { %v3444_v37 = vpop.f32.mrf.mxu0 }
 0x82e   : > { %3536 = vst [vmem:[%s6105_s16 + $0x158] sm:$0xff] %v3441_v20  ;;  %v3445_v24 = vadd.f32 %v3444_v37, %v6098_v39 }
 0x82f   : > { %v3446_v25 = vpop.f32.mrf.mxu0 }
 0x830   : > { %3537 = vst [vmem:[%s6105_s16 + $0x160] sm:$0xff] %v3445_v24  ;;  %v3447_v18 = vadd.f32 %v3446_v25, %v6100_v63 }
 0x831   : > { %v3448_v32 = vpop.f32.mrf.mxu0 }
 0x832   : > { %3538 = vst [vmem:[%s6105_s16 + $0x168] sm:$0xff] %v3447_v18  ;;  %v3449_v29 = vadd.f32 %v3448_v32, %v6098_v39 }
 0x833   : > { %v3450_v31 = vpop.f32.mrf.mxu0 }
 0x834   : > { %3539 = vst [vmem:[%s6105_s16 + $0x170] sm:$0xff] %v3449_v29  ;;  %v3451_v38 = vadd.f32 %v3450_v31, %v6100_v63 }
 0x835   : > { %v3454_v50 = vpop.f32.mrf.mxu0 }
 0x836   : > { %3540 = vst [vmem:[%s6105_s16 + $0x178] sm:$0xff] %v3451_v38  ;;  %v3455_v9 = vadd.f32 %v3454_v50, %v6098_v39 }
 0x837   : > { %v3456_v52 = vpop.f32.mrf.mxu0 }
 0x838   : > { %3541 = vst [vmem:[%s6105_s16 + $0x180] sm:$0xff] %v3455_v9  ;;  %v3457_v41 = vadd.f32 %v3456_v52, %v6100_v63 }
 0x839   : > { %v3458_v4 = vpop.f32.mrf.mxu0 }
 0x83a   : > { %3542 = vst [vmem:[%s6105_s16 + $0x188] sm:$0xff] %v3457_v41  ;;  %v3459_v62 = vadd.f32 %v3458_v4, %v6098_v39 }
 0x83b   : > { %v3460_v28 = vpop.f32.mrf.mxu0 }
 0x83c   : > { %3543 = vst [vmem:[%s6105_s16 + $0x190] sm:$0xff] %v3459_v62  ;;  %v3461_v12 = vadd.f32 %v3460_v28, %v6100_v63 }
 0x83d   : > { %v3464_v36 = vpop.f32.mrf.mxu0 }
 0x83e   : > { %3544 = vst [vmem:[%s6105_s16 + $0x198] sm:$0xff] %v3461_v12  ;;  %v3465_v48 = vadd.f32 %v3464_v36, %v6098_v39 }
 0x83f   : > { %v3466_v53 = vpop.f32.mrf.mxu0 }
 0x840   : > { %3545 = vst [vmem:[%s6105_s16 + $0x1a0] sm:$0xff] %v3465_v48  ;;  %v3467_v58 = vadd.f32 %v3466_v53, %v6100_v63 }
 0x841   : > { %v3468_v27 = vpop.f32.mrf.mxu0 }
 0x842   : > { %3546 = vst [vmem:[%s6105_s16 + $0x1a8] sm:$0xff] %v3467_v58  ;;  %v3469_v2 = vadd.f32 %v3468_v27, %v6098_v39 }
 0x843   : > { %v3470_v33 = vpop.f32.mrf.mxu0 }
 0x844   : > { %3547 = vst [vmem:[%s6105_s16 + $0x1b0] sm:$0xff] %v3469_v2  ;;  %v3471_v30 = vadd.f32 %v3470_v33, %v6100_v63 }
 0x845   : > { %v3474_v35 = vpop.f32.mrf.mxu0 }
 0x846   : > { %3548 = vst [vmem:[%s6105_s16 + $0x1b8] sm:$0xff] %v3471_v30  ;;  %v3475_v54 = vadd.f32 %v3474_v35, %v6098_v39 }
 0x847   : > { %v3476_v0 = vpop.f32.mrf.mxu0 }
 0x848   : > { %3549 = vst [vmem:[%s6105_s16 + $0x1c0] sm:$0xff] %v3475_v54  ;;  %v3477_v17 = vadd.f32 %v3476_v0, %v6100_v63 }
 0x849   : > { %v3478_v21 = vpop.f32.mrf.mxu0 }
 0x84a   : > { %3550 = vst [vmem:[%s6105_s16 + $0x1c8] sm:$0xff] %v3477_v17  ;;  %v3479_v43 = vadd.f32 %v3478_v21, %v6098_v39 }
 0x84b   : > { %v3480_v23 = vpop.f32.mrf.mxu0 }
 0x84c   : > { %3551 = vst [vmem:[%s6105_s16 + $0x1d0] sm:$0xff] %v3479_v43  ;;  %v3481_v60 = vadd.f32 %v3480_v23, %v6100_v63 }
 0x84d   : > { %v3484_v61 = vpop.f32.mrf.mxu0 }
 0x84e   : > { %3552 = vst [vmem:[%s6105_s16 + $0x1d8] sm:$0xff] %v3481_v60  ;;  %v3485_v51 = vadd.f32 %v3484_v61, %v6098_v39 }
 0x84f   : > { %v3486_v19 = vpop.f32.mrf.mxu0 }
 0x850   : > { %3553 = vst [vmem:[%s6105_s16 + $0x1e0] sm:$0xff] %v3485_v51  ;;  %v3487_v8 = vadd.f32 %v3486_v19, %v6100_v63 }
 0x851   : > { %v3488_v1 = vpop.f32.mrf.mxu0 }
 0x852   : > { %3554 = vst [vmem:[%s6105_s16 + $0x1e8] sm:$0xff] %v3487_v8  ;;  %v3489_v46 = vadd.f32 %v3488_v1, %v6098_v39 }
 0x853   : > { %v3490_v34 = vpop.f32.mrf.mxu0 }
 0x854   : > { %3555 = vst [vmem:[%s6105_s16 + $0x1f0] sm:$0xff] %v3489_v46  ;;  %v3491_v26 = vadd.f32 %v3490_v34, %v6100_v63 }
 0x856   : > { %3556 = vst [vmem:[%s6105_s16 + $0x1f8] sm:$0xff] %v3491_v26 }
 0x857   : > { %4879 = shalt.err (!%p4876_p6)
}
 0x858   : > { %s4880_s30 = scalar_lea.hbm %s6236_s13, 8192  ;;  %s4884_s12 = scalar_lea.hbm %s6295_s11, 16384 }
 0x859   : > { %p4881_p8 = scmp.ne.s32.totalorder %s6236_s13, %s4880_s30  ;;  %p4885_p10 = scmp.lt.s32.totalorder %s6236_s13, %s6295_s11 }
 0x85a   : > { %p4886_p0 = scmp.lt.s32.totalorder %s4884_s12, %s4880_s30 }
 0x85b   : > { %p4882_p9 = pnand %p4881_p8, %p6327_p5 }
 0x85c   : > { %p4887_p13 = por %p4886_p0, %p4885_p10 }
 0x85d   : > { %p4883_p11 = pneg %p4882_p9 }
 0x85f   : > { %p4888_p2 = pnand %p4887_p13, %p4883_p11 }
 0x861   : > { %4891 = shalt.err (!%p4888_p2)
}
 0x862   : > { %s4964_s3 = smov 256   ;;  %s4965_s28 = smov 16  }
 0x863   : > { %4423 = dma.vmem_to_hbm [thread:$0]  (%p6327_p5), %s6238_s14, 8192, %s6236_s13, %s3558_s23, %s4964_s3, %s4964_s3, %s4965_s28  }
 0x864 PF: > { %s3587_s1 = sand.u32 1, %s4934_s17   ;;  %p6328_p7 = scmp.ne.s32.totalorder %s6315_s26, 0 }
 0x865   : > { %p6329_p12 = scmp.ge.s32.totalorder %s4946_s20, 2  ;;  %s3588_s2 = scalar_lea.sflag [#allocation4], %s3587_s1 }
 0x867   : > { %p4452_p1 = pnand %p6329_p12, %p6328_p7 }
 0x869   : > { %p4453_p3 = pneg %p4452_p1 }
 0x86b   : > { %4929 = dma.done.wait (%p4453_p3), %s3588_s2, 8192  }
 0x86c   : > { %4931 = vsyncadd (%p4453_p3), %s3588_s2, 4294959104  ;;  %p28_p4 = scmp.ge.s32.totalorder %s5152_s25, 4   ;;  %s6330_s17 = smov %s4938_s18 }
 0x86d   : > { %s6331_s18 = smov %s4942_s19  ;;  %s6332_s19 = smov %s5164_s29 }
 0x86e   : > { %s6333_s20 = smov %s5152_s25  ;;  %30 = sbr.rel (!%p28_p4) target bundleno = 15 (0xf), region = 139 }
 0x873   :  { %3593 = vsyncpa [#allocation3], 1 }
 0x874   :  { %3595 = vsyncpa [#allocation3 + $0x1], 1 }
 0x875   :  { %3596 = vsyncpa [#allocation8], 1 }
 0x876   :  { %3597 = vsyncpa [#allocation11], 1 }
 0x877   :  { %3598 = vsyncpa [#allocation14], 1 }
 0x878   :  { %3599 = vsyncpa [#allocation4], 1 }
 0x879   :  { %3601 = vsyncpa [#allocation4 + $0x1], 1 }
 0x87a   :  { %3602 = vsyncpa [#allocation5], 1 }
 0x87b   :  { %3604 = vsyncpa [#allocation5 + $0x1], 1 }

</bundles_post_ra>
